<compile_context>
chip_gen: v7x
topology: tpu7x:2x2x1
jax: 0.10.0
libtpu: 0.0.40
codegen_flags: <defaults>
</compile_context>

<pallas_src>
import functools

import jax
import jax.numpy as jnp
from jax.experimental import pallas as pl
from jax.experimental.pallas import tpu as pltpu

LEAKY_SLOPE = 0.01            # torch nn.LeakyReLU default
BN_EPS = 1e-5                 # torch BatchNorm default
MATMUL_DTYPE = jnp.bfloat16   # MXU operand dtype; accumulation stays f32


def _leaky(y, slope):
    return jnp.maximum(y, y * slope)


# ----------------------------- Pallas kernels ------------------------------- #

def _matmul_shift_leaky_kernel(x_ref, w_ref, shift_ref, o_ref, *, slope):
    """out = leaky_relu(x @ w + shift); bf16 operands, f32 accumulate/epilogue."""
    acc = jnp.dot(x_ref[...], w_ref[...], preferred_element_type=jnp.float32)
    y = acc + shift_ref[...]
    o_ref[...] = _leaky(y, slope).astype(o_ref.dtype)


def fused_matmul_shift_leaky(x, w, shift, slope, out_dtype, tm=512):
    """x:(M,K) @ w:(K,N) + shift, leaky relu.  M is tiled (parallel grid)."""
    M, K = x.shape
    N = w.shape[1]
    shift2 = shift.reshape(1, N).astype(jnp.float32)

    bm = M if M <= tm else tm           # full-extent block for small M
    grid = (pl.cdiv(M, bm),)

    return pl.pallas_call(
        functools.partial(_matmul_shift_leaky_kernel, slope=slope),
        out_shape=jax.ShapeDtypeStruct((M, N), out_dtype),
        grid=grid,
        in_specs=[
            pl.BlockSpec((bm, K), lambda i: (i, 0)),
            pl.BlockSpec((K, N), lambda i: (0, 0)),
            pl.BlockSpec((1, N), lambda i: (0, 0)),
        ],
        out_specs=pl.BlockSpec((bm, N), lambda i: (i, 0)),
        compiler_params=pltpu.CompilerParams(
            dimension_semantics=("parallel",)),
    )(x, w, shift2)


def _mlp_kernel(x_ref, w1_ref, s1_ref, w2_ref, s2_ref, w3_ref, s3_ref,
                w4_ref, b4_ref, o_ref, *, slope):
    """Whole regressor fused: 3x (matmul + shift + leaky) + final matmul + bias."""
    h = jnp.dot(x_ref[...], w1_ref[...], preferred_element_type=jnp.float32)
    h = _leaky(h + s1_ref[...], slope)
    h = jnp.dot(h.astype(w2_ref.dtype), w2_ref[...],
                preferred_element_type=jnp.float32)
    h = _leaky(h + s2_ref[...], slope)
    h = jnp.dot(h.astype(w3_ref.dtype), w3_ref[...],
                preferred_element_type=jnp.float32)
    h = _leaky(h + s3_ref[...], slope)
    o_ref[...] = (jnp.dot(h.astype(w4_ref.dtype), w4_ref[...],
                          preferred_element_type=jnp.float32) + b4_ref[...])


def fused_mlp(x, mats, shifts, out_dtype=jnp.float32):
    """Single pallas_call for the 4-layer regressor; all weights VMEM-resident."""
    M = x.shape[0]
    args = [x]
    in_specs = [pl.BlockSpec(x.shape, lambda i: (0, 0))]
    for w_mat, sh in zip(mats, shifts):
        sh2 = sh.reshape(1, -1).astype(jnp.float32)
        args += [w_mat, sh2]
        in_specs += [pl.BlockSpec(w_mat.shape, lambda i: (0, 0)),
                     pl.BlockSpec(sh2.shape, lambda i: (0, 0))]
    n_out = mats[-1].shape[1]

    return pl.pallas_call(
        functools.partial(_mlp_kernel, slope=LEAKY_SLOPE),
        out_shape=jax.ShapeDtypeStruct((M, n_out), out_dtype),
        grid=(1,),
        in_specs=in_specs,
        out_specs=pl.BlockSpec((M, n_out), lambda i: (0, 0)),
        compiler_params=pltpu.CompilerParams(
            dimension_semantics=("arbitrary",)),
    )(*args)


# --------------------------- layer-level glue ------------------------------- #

def im2col(x, kh, kw, stride):
    """x: (N, H, W, C) -> (N*OH*OW, KH*KW*C); patch order is (kh, kw, cin)."""
    n, h, w, c = x.shape
    oh = (h - kh) // stride + 1
    ow = (w - kw) // stride + 1
    cols = []
    for i in range(kh):
        for j in range(kw):
            cols.append(
                x[:, i:i + stride * (oh - 1) + 1:stride,
                     j:j + stride * (ow - 1) + 1:stride, :])
    cols = jnp.stack(cols, axis=3)                 # (N, OH, OW, KH*KW, C)
    return cols.reshape(n * oh * ow, kh * kw * c), oh, ow


def _fold_bn_into_weights(w_mat, p, with_bn):
    """Fold bias + eval-mode BatchNorm into (W*scale, shift).  Trace-time only."""
    if with_bn:
        inv_std = 1.0 / jnp.sqrt(p["bn_var"] + BN_EPS)
        scale = p["bn_gamma"] * inv_std
        shift = p["bn_beta"] + (p["b"] - p["bn_mean"]) * scale
        w_mat = w_mat * scale[None, :]
    else:
        shift = p["b"]
    return w_mat, shift


def conv_bn_lrelu(x, p, stride):
    """Conv2d + BatchNorm2d(eval) + LeakyReLU, NHWC in / NHWC out (bf16)."""
    w = p["w"]                                     # (KH, KW, Cin, Cout)
    kh, kw, cin, cout = w.shape
    cols, oh, ow = im2col(x, kh, kw, stride)
    wmat, shift = _fold_bn_into_weights(w.reshape(kh * kw * cin, cout), p, True)
    out = fused_matmul_shift_leaky(
        cols, wmat.astype(MATMUL_DTYPE), shift, LEAKY_SLOPE,
        out_dtype=MATMUL_DTYPE)
    return out.reshape(x.shape[0], oh, ow, cout)


# ------------------------------ parameters ---------------------------------- #

def _conv_params(key, kh, kw, cin, cout):
    ks = jax.random.split(key, 6)
    bound = 1.0 / jnp.sqrt(float(kh * kw * cin))
    return {
        "w": jax.random.uniform(ks[0], (kh, kw, cin, cout), jnp.float32, -bound, bound),
        "b": jax.random.uniform(ks[1], (cout,), jnp.float32, -bound, bound),
        "bn_gamma": 1.0 + 0.1 * jax.random.normal(ks[2], (cout,), jnp.float32),
        "bn_beta": 0.1 * jax.random.normal(ks[3], (cout,), jnp.float32),
        "bn_mean": 0.1 * jax.random.normal(ks[4], (cout,), jnp.float32),
        "bn_var": 1.0 + 0.1 * jnp.abs(jax.random.normal(ks[5], (cout,), jnp.float32)),
    }


def _linear_params(key, fin, fout, with_bn):
    ks = jax.random.split(key, 6)
    bound = 1.0 / jnp.sqrt(float(fin))
    p = {
        "w": jax.random.uniform(ks[0], (fin, fout), jnp.float32, -bound, bound),
        "b": jax.random.uniform(ks[1], (fout,), jnp.float32, -bound, bound),
    }
    if with_bn:
        p.update({
            "bn_gamma": 1.0 + 0.1 * jax.random.normal(ks[2], (fout,), jnp.float32),
            "bn_beta": 0.1 * jax.random.normal(ks[3], (fout,), jnp.float32),
            "bn_mean": 0.1 * jax.random.normal(ks[4], (fout,), jnp.float32),
            "bn_var": 1.0 + 0.1 * jnp.abs(jax.random.normal(ks[5], (fout,), jnp.float32)),
        })
    return p


def init_params(key):
    ks = jax.random.split(key, 9)
    return {
        "c1": _conv_params(ks[0], 5, 5, 3, 24),
        "c2": _conv_params(ks[1], 5, 5, 24, 36),
        "c3": _conv_params(ks[2], 5, 5, 36, 48),
        "c4": _conv_params(ks[3], 3, 3, 48, 64),
        "c5": _conv_params(ks[4], 3, 3, 64, 64),
        "l1": _linear_params(ks[5], 1664, 100, True),
        "l2": _linear_params(ks[6], 100, 50, True),
        "l3": _linear_params(ks[7], 50, 10, False),
        "l4": _linear_params(ks[8], 10, 1, False),
    }


# ------------------------------- forward ------------------------------------ #

def pilotnet_forward(x_nchw, params):
    # NCHW (torch) -> NHWC (kernel layout), bf16 matmul operands.
    x = jnp.transpose(x_nchw, (0, 2, 3, 1)).astype(MATMUL_DTYPE)

    x = conv_bn_lrelu(x, params["c1"], stride=2)   # -> (N, 33, 77, 24)
    x = conv_bn_lrelu(x, params["c2"], stride=2)   # -> (N, 15, 37, 36)
    x = conv_bn_lrelu(x, params["c3"], stride=2)   # -> (N,  6, 17, 48)
    x = conv_bn_lrelu(x, params["c4"], stride=1)   # -> (N,  4, 15, 64)
    x = conv_bn_lrelu(x, params["c5"], stride=1)   # -> (N,  2, 13, 64)

    # torch nn.Flatten operates on NCHW ordering.
    n = x.shape[0]
    x = jnp.transpose(x, (0, 3, 1, 2)).reshape(n, -1)   # (N, 1664)

    # Whole regressor in one fused kernel.  Large weights (l1, l2) in bf16;
    # tiny ones (l3, l4) kept f32 (negligible cost, less drift).
    mats, shifts = [], []
    for name, with_bn, dt in (("l1", True, MATMUL_DTYPE),
                              ("l2", True, MATMUL_DTYPE),
                              ("l3", False, jnp.float32),
                              ("l4", False, jnp.float32)):
        p = params[name]
        wm, sh = _fold_bn_into_weights(p["w"], p, with_bn)
        mats.append(wm.astype(dt))
        shifts.append(sh)
    return fused_mlp(x, mats, shifts, out_dtype=jnp.float32)   # (N, 1)


if __name__ == "__main__":
    key = jax.random.PRNGKey(0)
    k_param, k_input = jax.random.split(key)

    params = init_params(k_param)
    # Smallest input whose conv-stack output flattens to 1664 features (64 x 2 x 13).
    x = jax.random.normal(k_input, (2, 3, 69, 157), jnp.float32)

    fwd = jax.jit(pilotnet_forward)
    out = fwd(x, params)
    out = jax.block_until_ready(out)

    assert out.shape == (2, 1), out.shape
    assert out.dtype == jnp.float32
    assert bool(jnp.all(jnp.isfinite(out)))
    print("KERNEL_OK")
</pallas_src>

<mosaic_0001>
module attributes {stable_mosaic.version = 11 : i64} {
  func.func @_matmul_shift_leaky_kernel(%arg0: i32, %arg1: memref<512x75xbf16, #tpu.memory_space<vmem>>, %arg2: memref<75x24xbf16, #tpu.memory_space<vmem>>, %arg3: memref<1x24xf32, #tpu.memory_space<vmem>>, %arg4: memref<512x24xbf16, #tpu.memory_space<vmem>>) attributes {dimension_semantics = [#tpu.dimension_semantics<parallel>], iteration_bounds = array<i64: 10>, scalar_prefetch = 0 : i64, scratch_operands = 0 : i64, tpu.core_type = #tpu.core_type<tc>, window_params = [{transform_indices = @transform_0, window_bounds = array<i64: 512, 75>}, {pipeline_mode = #tpu.pipeline_mode<synchronous>, transform_indices = @transform_1, window_bounds = array<i64: 75, 24>}, {pipeline_mode = #tpu.pipeline_mode<synchronous>, transform_indices = @transform_2, window_bounds = array<i64: 1, 24>}, {transform_indices = @transform_3, window_bounds = array<i64: 512, 24>}]} {
    %c0 = arith.constant 0 : index
    %c0_0 = arith.constant 0 : index
    %0 = vector.load %arg1[%c0, %c0_0] : memref<512x75xbf16, #tpu.memory_space<vmem>>, vector<512x75xbf16>
    %c0_1 = arith.constant 0 : index
    %c0_2 = arith.constant 0 : index
    %1 = vector.load %arg2[%c0_1, %c0_2] : memref<75x24xbf16, #tpu.memory_space<vmem>>, vector<75x24xbf16>
    %cst = arith.constant dense<0.000000e+00> : vector<512x24xf32>
    %2 = tpu.matmul %0, %1, %cst {dimension_numbers = #tpu.dot_dimension_numbers<[1], [0], [0], [1], [0, 0, 1, 1], [], []>} : vector<512x75xbf16>, vector<75x24xbf16>, vector<512x24xf32> -> vector<512x24xf32>
    %c0_3 = arith.constant 0 : index
    %c0_4 = arith.constant 0 : index
    %3 = vector.load %arg3[%c0_3, %c0_4] : memref<1x24xf32, #tpu.memory_space<vmem>>, vector<1x24xf32>
    %4 = vector.broadcast %3 : vector<1x24xf32> to vector<512x24xf32>
    %5 = arith.addf %2, %4 : vector<512x24xf32>
    %cst_5 = arith.constant 0.00999999977 : f32
    %6 = vector.broadcast %cst_5 : f32 to vector<512x24xf32>
    %7 = arith.mulf %5, %6 : vector<512x24xf32>
    %8 = arith.maximumf %5, %7 : vector<512x24xf32>
    %9 = arith.truncf %8 : vector<512x24xf32> to vector<512x24xbf16>
    %c0_6 = arith.constant 0 : index
    %c0_7 = arith.constant 0 : index
    %10 = vector.load %arg4[%c0_6, %c0_7] : memref<512x24xbf16, #tpu.memory_space<vmem>>, vector<512x24xbf16>
    tpu.vector_store %arg4[%c0_6, %c0_7], %9 {strides = array<i32>} : memref<512x24xbf16, #tpu.memory_space<vmem>>, vector<512x24xbf16>,
    return
  }
  func.func @transform_0(%arg0: i32) -> (i32, i32) {
    %c0_i32 = arith.constant 0 : i32
    %c0_i32_0 = arith.constant 0 : i32
    return %arg0, %c0_i32 : i32, i32
  }
  func.func @transform_1(%arg0: i32) -> (i32, i32) {
    %c0_i32 = arith.constant 0 : i32
    %c0_i32_0 = arith.constant 0 : i32
    %c0_i32_1 = arith.constant 0 : i32
    return %c0_i32, %c0_i32_0 : i32, i32
  }
  func.func @transform_2(%arg0: i32) -> (i32, i32) {
    %c0_i32 = arith.constant 0 : i32
    %c0_i32_0 = arith.constant 0 : i32
    %c0_i32_1 = arith.constant 0 : i32
    return %c0_i32, %c0_i32_0 : i32, i32
  }
  func.func @transform_3(%arg0: i32) -> (i32, i32) {
    %c0_i32 = arith.constant 0 : i32
    %c0_i32_0 = arith.constant 0 : i32
    return %arg0, %c0_i32 : i32, i32
  }
}

module attributes {stable_mosaic.version = 11 : i64} {
  func.func @_matmul_shift_leaky_kernel(%arg0: i32, %arg1: memref<512x600xbf16, #tpu.memory_space<vmem>>, %arg2: memref<600x36xbf16, #tpu.memory_space<vmem>>, %arg3: memref<1x36xf32, #tpu.memory_space<vmem>>, %arg4: memref<512x36xbf16, #tpu.memory_space<vmem>>) attributes {dimension_semantics = [#tpu.dimension_semantics<parallel>], iteration_bounds = array<i64: 3>, scalar_prefetch = 0 : i64, scratch_operands = 0 : i64, tpu.core_type = #tpu.core_type<tc>, window_params = [{transform_indices = @transform_0, window_bounds = array<i64: 512, 600>}, {pipeline_mode = #tpu.pipeline_mode<synchronous>, transform_indices = @transform_1, window_bounds = array<i64: 600, 36>}, {pipeline_mode = #tpu.pipeline_mode<synchronous>, transform_indices = @transform_2, window_bounds = array<i64: 1, 36>}, {transform_indices = @transform_3, window_bounds = array<i64: 512, 36>}]} {
    %c0 = arith.constant 0 : index
    %c0_0 = arith.constant 0 : index
    %0 = vector.load %arg1[%c0, %c0_0] : memref<512x600xbf16, #tpu.memory_space<vmem>>, vector<512x600xbf16>
    %c0_1 = arith.constant 0 : index
    %c0_2 = arith.constant 0 : index
    %1 = vector.load %arg2[%c0_1, %c0_2] : memref<600x36xbf16, #tpu.memory_space<vmem>>, vector<600x36xbf16>
    %cst = arith.constant dense<0.000000e+00> : vector<512x36xf32>
    %2 = tpu.matmul %0, %1, %cst {dimension_numbers = #tpu.dot_dimension_numbers<[1], [0], [0], [1], [0, 0, 1, 1], [], []>} : vector<512x600xbf16>, vector<600x36xbf16>, vector<512x36xf32> -> vector<512x36xf32>
    %c0_3 = arith.constant 0 : index
    %c0_4 = arith.constant 0 : index
    %3 = vector.load %arg3[%c0_3, %c0_4] : memref<1x36xf32, #tpu.memory_space<vmem>>, vector<1x36xf32>
    %4 = vector.broadcast %3 : vector<1x36xf32> to vector<512x36xf32>
    %5 = arith.addf %2, %4 : vector<512x36xf32>
    %cst_5 = arith.constant 0.00999999977 : f32
    %6 = vector.broadcast %cst_5 : f32 to vector<512x36xf32>
    %7 = arith.mulf %5, %6 : vector<512x36xf32>
    %8 = arith.maximumf %5, %7 : vector<512x36xf32>
    %9 = arith.truncf %8 : vector<512x36xf32> to vector<512x36xbf16>
    %c0_6 = arith.constant 0 : index
    %c0_7 = arith.constant 0 : index
    %10 = vector.load %arg4[%c0_6, %c0_7] : memref<512x36xbf16, #tpu.memory_space<vmem>>, vector<512x36xbf16>
    tpu.vector_store %arg4[%c0_6, %c0_7], %9 {strides = array<i32>} : memref<512x36xbf16, #tpu.memory_space<vmem>>, vector<512x36xbf16>,
    return
  }
  func.func @transform_0(%arg0: i32) -> (i32, i32) {
    %c0_i32 = arith.constant 0 : i32
    %c0_i32_0 = arith.constant 0 : i32
    return %arg0, %c0_i32 : i32, i32
  }
  func.func @transform_1(%arg0: i32) -> (i32, i32) {
    %c0_i32 = arith.constant 0 : i32
    %c0_i32_0 = arith.constant 0 : i32
    %c0_i32_1 = arith.constant 0 : i32
    return %c0_i32, %c0_i32_0 : i32, i32
  }
  func.func @transform_2(%arg0: i32) -> (i32, i32) {
    %c0_i32 = arith.constant 0 : i32
    %c0_i32_0 = arith.constant 0 : i32
    %c0_i32_1 = arith.constant 0 : i32
    return %c0_i32, %c0_i32_0 : i32, i32
  }
  func.func @transform_3(%arg0: i32) -> (i32, i32) {
    %c0_i32 = arith.constant 0 : i32
    %c0_i32_0 = arith.constant 0 : i32
    return %arg0, %c0_i32 : i32, i32
  }
}

module attributes {stable_mosaic.version = 11 : i64} {
  func.func @_matmul_shift_leaky_kernel(%arg0: i32, %arg1: memref<204x900xbf16, #tpu.memory_space<vmem>>, %arg2: memref<900x48xbf16, #tpu.memory_space<vmem>>, %arg3: memref<1x48xf32, #tpu.memory_space<vmem>>, %arg4: memref<204x48xbf16, #tpu.memory_space<vmem>>) attributes {dimension_semantics = [#tpu.dimension_semantics<parallel>], iteration_bounds = array<i64: 1>, scalar_prefetch = 0 : i64, scratch_operands = 0 : i64, tpu.core_type = #tpu.core_type<tc>, window_params = [{transform_indices = @transform_0, window_bounds = array<i64: 204, 900>}, {pipeline_mode = #tpu.pipeline_mode<synchronous>, transform_indices = @transform_1, window_bounds = array<i64: 900, 48>}, {pipeline_mode = #tpu.pipeline_mode<synchronous>, transform_indices = @transform_2, window_bounds = array<i64: 1, 48>}, {transform_indices = @transform_3, window_bounds = array<i64: 204, 48>}]} {
    %c0 = arith.constant 0 : index
    %c0_0 = arith.constant 0 : index
    %0 = vector.load %arg1[%c0, %c0_0] : memref<204x900xbf16, #tpu.memory_space<vmem>>, vector<204x900xbf16>
    %c0_1 = arith.constant 0 : index
    %c0_2 = arith.constant 0 : index
    %1 = vector.load %arg2[%c0_1, %c0_2] : memref<900x48xbf16, #tpu.memory_space<vmem>>, vector<900x48xbf16>
    %cst = arith.constant dense<0.000000e+00> : vector<204x48xf32>
    %2 = tpu.matmul %0, %1, %cst {dimension_numbers = #tpu.dot_dimension_numbers<[1], [0], [0], [1], [0, 0, 1, 1], [], []>} : vector<204x900xbf16>, vector<900x48xbf16>, vector<204x48xf32> -> vector<204x48xf32>
    %c0_3 = arith.constant 0 : index
    %c0_4 = arith.constant 0 : index
    %3 = vector.load %arg3[%c0_3, %c0_4] : memref<1x48xf32, #tpu.memory_space<vmem>>, vector<1x48xf32>
    %4 = vector.broadcast %3 : vector<1x48xf32> to vector<204x48xf32>
    %5 = arith.addf %2, %4 : vector<204x48xf32>
    %cst_5 = arith.constant 0.00999999977 : f32
    %6 = vector.broadcast %cst_5 : f32 to vector<204x48xf32>
    %7 = arith.mulf %5, %6 : vector<204x48xf32>
    %8 = arith.maximumf %5, %7 : vector<204x48xf32>
    %9 = arith.truncf %8 : vector<204x48xf32> to vector<204x48xbf16>
    %c0_6 = arith.constant 0 : index
    %c0_7 = arith.constant 0 : index
    %10 = vector.load %arg4[%c0_6, %c0_7] : memref<204x48xbf16, #tpu.memory_space<vmem>>, vector<204x48xbf16>
    tpu.vector_store %arg4[%c0_6, %c0_7], %9 {strides = array<i32>} : memref<204x48xbf16, #tpu.memory_space<vmem>>, vector<204x48xbf16>,
    return
  }
  func.func @transform_0(%arg0: i32) -> (i32, i32) {
    %c0_i32 = arith.constant 0 : i32
    %c0_i32_0 = arith.constant 0 : i32
    return %arg0, %c0_i32 : i32, i32
  }
  func.func @transform_1(%arg0: i32) -> (i32, i32) {
    %c0_i32 = arith.constant 0 : i32
    %c0_i32_0 = arith.constant 0 : i32
    %c0_i32_1 = arith.constant 0 : i32
    return %c0_i32, %c0_i32_0 : i32, i32
  }
  func.func @transform_2(%arg0: i32) -> (i32, i32) {
    %c0_i32 = arith.constant 0 : i32
    %c0_i32_0 = arith.constant 0 : i32
    %c0_i32_1 = arith.constant 0 : i32
    return %c0_i32, %c0_i32_0 : i32, i32
  }
  func.func @transform_3(%arg0: i32) -> (i32, i32) {
    %c0_i32 = arith.constant 0 : i32
    %c0_i32_0 = arith.constant 0 : i32
    return %arg0, %c0_i32 : i32, i32
  }
}

module attributes {stable_mosaic.version = 11 : i64} {
  func.func @_matmul_shift_leaky_kernel(%arg0: i32, %arg1: memref<120x432xbf16, #tpu.memory_space<vmem>>, %arg2: memref<432x64xbf16, #tpu.memory_space<vmem>>, %arg3: memref<1x64xf32, #tpu.memory_space<vmem>>, %arg4: memref<120x64xbf16, #tpu.memory_space<vmem>>) attributes {dimension_semantics = [#tpu.dimension_semantics<parallel>], iteration_bounds = array<i64: 1>, scalar_prefetch = 0 : i64, scratch_operands = 0 : i64, tpu.core_type = #tpu.core_type<tc>, window_params = [{transform_indices = @transform_0, window_bounds = array<i64: 120, 432>}, {pipeline_mode = #tpu.pipeline_mode<synchronous>, transform_indices = @transform_1, window_bounds = array<i64: 432, 64>}, {pipeline_mode = #tpu.pipeline_mode<synchronous>, transform_indices = @transform_2, window_bounds = array<i64: 1, 64>}, {transform_indices = @transform_3, window_bounds = array<i64: 120, 64>}]} {
    %c0 = arith.constant 0 : index
    %c0_0 = arith.constant 0 : index
    %0 = vector.load %arg1[%c0, %c0_0] : memref<120x432xbf16, #tpu.memory_space<vmem>>, vector<120x432xbf16>
    %c0_1 = arith.constant 0 : index
    %c0_2 = arith.constant 0 : index
    %1 = vector.load %arg2[%c0_1, %c0_2] : memref<432x64xbf16, #tpu.memory_space<vmem>>, vector<432x64xbf16>
    %cst = arith.constant dense<0.000000e+00> : vector<120x64xf32>
    %2 = tpu.matmul %0, %1, %cst {dimension_numbers = #tpu.dot_dimension_numbers<[1], [0], [0], [1], [0, 0, 1, 1], [], []>} : vector<120x432xbf16>, vector<432x64xbf16>, vector<120x64xf32> -> vector<120x64xf32>
    %c0_3 = arith.constant 0 : index
    %c0_4 = arith.constant 0 : index
    %3 = vector.load %arg3[%c0_3, %c0_4] : memref<1x64xf32, #tpu.memory_space<vmem>>, vector<1x64xf32>
    %4 = vector.broadcast %3 : vector<1x64xf32> to vector<120x64xf32>
    %5 = arith.addf %2, %4 : vector<120x64xf32>
    %cst_5 = arith.constant 0.00999999977 : f32
    %6 = vector.broadcast %cst_5 : f32 to vector<120x64xf32>
    %7 = arith.mulf %5, %6 : vector<120x64xf32>
    %8 = arith.maximumf %5, %7 : vector<120x64xf32>
    %9 = arith.truncf %8 : vector<120x64xf32> to vector<120x64xbf16>
    %c0_6 = arith.constant 0 : index
    %c0_7 = arith.constant 0 : index
    %10 = vector.load %arg4[%c0_6, %c0_7] : memref<120x64xbf16, #tpu.memory_space<vmem>>, vector<120x64xbf16>
    tpu.vector_store %arg4[%c0_6, %c0_7], %9 {strides = array<i32>} : memref<120x64xbf16, #tpu.memory_space<vmem>>, vector<120x64xbf16>,
    return
  }
  func.func @transform_0(%arg0: i32) -> (i32, i32) {
    %c0_i32 = arith.constant 0 : i32
    %c0_i32_0 = arith.constant 0 : i32
    return %arg0, %c0_i32 : i32, i32
  }
  func.func @transform_1(%arg0: i32) -> (i32, i32) {
    %c0_i32 = arith.constant 0 : i32
    %c0_i32_0 = arith.constant 0 : i32
    %c0_i32_1 = arith.constant 0 : i32
    return %c0_i32, %c0_i32_0 : i32, i32
  }
  func.func @transform_2(%arg0: i32) -> (i32, i32) {
    %c0_i32 = arith.constant 0 : i32
    %c0_i32_0 = arith.constant 0 : i32
    %c0_i32_1 = arith.constant 0 : i32
    return %c0_i32, %c0_i32_0 : i32, i32
  }
  func.func @transform_3(%arg0: i32) -> (i32, i32) {
    %c0_i32 = arith.constant 0 : i32
    %c0_i32_0 = arith.constant 0 : i32
    return %arg0, %c0_i32 : i32, i32
  }
}

module attributes {stable_mosaic.version = 11 : i64} {
  func.func @_matmul_shift_leaky_kernel(%arg0: i32, %arg1: memref<52x576xbf16, #tpu.memory_space<vmem>>, %arg2: memref<576x64xbf16, #tpu.memory_space<vmem>>, %arg3: memref<1x64xf32, #tpu.memory_space<vmem>>, %arg4: memref<52x64xbf16, #tpu.memory_space<vmem>>) attributes {dimension_semantics = [#tpu.dimension_semantics<parallel>], iteration_bounds = array<i64: 1>, scalar_prefetch = 0 : i64, scratch_operands = 0 : i64, tpu.core_type = #tpu.core_type<tc>, window_params = [{transform_indices = @transform_0, window_bounds = array<i64: 52, 576>}, {pipeline_mode = #tpu.pipeline_mode<synchronous>, transform_indices = @transform_1, window_bounds = array<i64: 576, 64>}, {pipeline_mode = #tpu.pipeline_mode<synchronous>, transform_indices = @transform_2, window_bounds = array<i64: 1, 64>}, {transform_indices = @transform_3, window_bounds = array<i64: 52, 64>}]} {
    %c0 = arith.constant 0 : index
    %c0_0 = arith.constant 0 : index
    %0 = vector.load %arg1[%c0, %c0_0] : memref<52x576xbf16, #tpu.memory_space<vmem>>, vector<52x576xbf16>
    %c0_1 = arith.constant 0 : index
    %c0_2 = arith.constant 0 : index
    %1 = vector.load %arg2[%c0_1, %c0_2] : memref<576x64xbf16, #tpu.memory_space<vmem>>, vector<576x64xbf16>
    %cst = arith.constant dense<0.000000e+00> : vector<52x64xf32>
    %2 = tpu.matmul %0, %1, %cst {dimension_numbers = #tpu.dot_dimension_numbers<[1], [0], [0], [1], [0, 0, 1, 1], [], []>} : vector<52x576xbf16>, vector<576x64xbf16>, vector<52x64xf32> -> vector<52x64xf32>
    %c0_3 = arith.constant 0 : index
    %c0_4 = arith.constant 0 : index
    %3 = vector.load %arg3[%c0_3, %c0_4] : memref<1x64xf32, #tpu.memory_space<vmem>>, vector<1x64xf32>
    %4 = vector.broadcast %3 : vector<1x64xf32> to vector<52x64xf32>
    %5 = arith.addf %2, %4 : vector<52x64xf32>
    %cst_5 = arith.constant 0.00999999977 : f32
    %6 = vector.broadcast %cst_5 : f32 to vector<52x64xf32>
    %7 = arith.mulf %5, %6 : vector<52x64xf32>
    %8 = arith.maximumf %5, %7 : vector<52x64xf32>
    %9 = arith.truncf %8 : vector<52x64xf32> to vector<52x64xbf16>
    %c0_6 = arith.constant 0 : index
    %c0_7 = arith.constant 0 : index
    %10 = vector.load %arg4[%c0_6, %c0_7] : memref<52x64xbf16, #tpu.memory_space<vmem>>, vector<52x64xbf16>
    tpu.vector_store %arg4[%c0_6, %c0_7], %9 {strides = array<i32>} : memref<52x64xbf16, #tpu.memory_space<vmem>>, vector<52x64xbf16>,
    return
  }
  func.func @transform_0(%arg0: i32) -> (i32, i32) {
    %c0_i32 = arith.constant 0 : i32
    %c0_i32_0 = arith.constant 0 : i32
    return %arg0, %c0_i32 : i32, i32
  }
  func.func @transform_1(%arg0: i32) -> (i32, i32) {
    %c0_i32 = arith.constant 0 : i32
    %c0_i32_0 = arith.constant 0 : i32
    %c0_i32_1 = arith.constant 0 : i32
    return %c0_i32, %c0_i32_0 : i32, i32
  }
  func.func @transform_2(%arg0: i32) -> (i32, i32) {
    %c0_i32 = arith.constant 0 : i32
    %c0_i32_0 = arith.constant 0 : i32
    %c0_i32_1 = arith.constant 0 : i32
    return %c0_i32, %c0_i32_0 : i32, i32
  }
  func.func @transform_3(%arg0: i32) -> (i32, i32) {
    %c0_i32 = arith.constant 0 : i32
    %c0_i32_0 = arith.constant 0 : i32
    return %arg0, %c0_i32 : i32, i32
  }
}

module attributes {stable_mosaic.version = 11 : i64} {
  func.func @_mlp_kernel(%arg0: i32, %arg1: memref<2x1664xbf16, #tpu.memory_space<vmem>>, %arg2: memref<1664x100xbf16, #tpu.memory_space<vmem>>, %arg3: memref<1x100xf32, #tpu.memory_space<vmem>>, %arg4: memref<100x50xbf16, #tpu.memory_space<vmem>>, %arg5: memref<1x50xf32, #tpu.memory_space<vmem>>, %arg6: memref<50x10xf32, #tpu.memory_space<vmem>>, %arg7: memref<1x10xf32, #tpu.memory_space<vmem>>, %arg8: memref<10x1xf32, #tpu.memory_space<vmem>>, %arg9: memref<1x1xf32, #tpu.memory_space<vmem>>, %arg10: memref<2x1xf32, #tpu.memory_space<vmem>>) attributes {dimension_semantics = [#tpu.dimension_semantics<arbitrary>], iteration_bounds = array<i64: 1>, scalar_prefetch = 0 : i64, scratch_operands = 0 : i64, tpu.core_type = #tpu.core_type<tc>, window_params = [{pipeline_mode = #tpu.pipeline_mode<synchronous>, transform_indices = @transform_0, window_bounds = array<i64: 2, 1664>}, {pipeline_mode = #tpu.pipeline_mode<synchronous>, transform_indices = @transform_1, window_bounds = array<i64: 1664, 100>}, {pipeline_mode = #tpu.pipeline_mode<synchronous>, transform_indices = @transform_2, window_bounds = array<i64: 1, 100>}, {pipeline_mode = #tpu.pipeline_mode<synchronous>, transform_indices = @transform_3, window_bounds = array<i64: 100, 50>}, {pipeline_mode = #tpu.pipeline_mode<synchronous>, transform_indices = @transform_4, window_bounds = array<i64: 1, 50>}, {pipeline_mode = #tpu.pipeline_mode<synchronous>, transform_indices = @transform_5, window_bounds = array<i64: 50, 10>}, {pipeline_mode = #tpu.pipeline_mode<synchronous>, transform_indices = @transform_6, window_bounds = array<i64: 1, 10>}, {pipeline_mode = #tpu.pipeline_mode<synchronous>, transform_indices = @transform_7, window_bounds = array<i64: 10, 1>}, {pipeline_mode = #tpu.pipeline_mode<synchronous>, transform_indices = @transform_8, window_bounds = array<i64: 1, 1>}, {pipeline_mode = #tpu.pipeline_mode<synchronous>, transform_indices = @transform_9, window_bounds = array<i64: 2, 1>}]} {
    %c0 = arith.constant 0 : index
    %c0_0 = arith.constant 0 : index
    %0 = vector.load %arg1[%c0, %c0_0] : memref<2x1664xbf16, #tpu.memory_space<vmem>>, vector<2x1664xbf16>
    %c0_1 = arith.constant 0 : index
    %c0_2 = arith.constant 0 : index
    %1 = vector.load %arg2[%c0_1, %c0_2] : memref<1664x100xbf16, #tpu.memory_space<vmem>>, vector<1664x100xbf16>
    %cst = arith.constant dense<0.000000e+00> : vector<2x100xf32>
    %2 = tpu.matmul %0, %1, %cst {dimension_numbers = #tpu.dot_dimension_numbers<[1], [0], [0], [1], [0, 0, 1, 1], [], []>} : vector<2x1664xbf16>, vector<1664x100xbf16>, vector<2x100xf32> -> vector<2x100xf32>
    %c0_3 = arith.constant 0 : index
    %c0_4 = arith.constant 0 : index
    %3 = vector.load %arg3[%c0_3, %c0_4] : memref<1x100xf32, #tpu.memory_space<vmem>>, vector<1x100xf32>
    %4 = vector.broadcast %3 : vector<1x100xf32> to vector<2x100xf32>
    %5 = arith.addf %2, %4 : vector<2x100xf32>
    %cst_5 = arith.constant 0.00999999977 : f32
    %6 = vector.broadcast %cst_5 : f32 to vector<2x100xf32>
    %7 = arith.mulf %5, %6 : vector<2x100xf32>
    %8 = arith.maximumf %5, %7 : vector<2x100xf32>
    %9 = arith.truncf %8 : vector<2x100xf32> to vector<2x100xbf16>
    %c0_6 = arith.constant 0 : index
    %c0_7 = arith.constant 0 : index
    %10 = vector.load %arg4[%c0_6, %c0_7] : memref<100x50xbf16, #tpu.memory_space<vmem>>, vector<100x50xbf16>
    %cst_8 = arith.constant dense<0.000000e+00> : vector<2x50xf32>
    %11 = tpu.matmul %9, %10, %cst_8 {dimension_numbers = #tpu.dot_dimension_numbers<[1], [0], [0], [1], [0, 0, 1, 1], [], []>} : vector<2x100xbf16>, vector<100x50xbf16>, vector<2x50xf32> -> vector<2x50xf32>
    %c0_9 = arith.constant 0 : index
    %c0_10 = arith.constant 0 : index
    %12 = vector.load %arg5[%c0_9, %c0_10] : memref<1x50xf32, #tpu.memory_space<vmem>>, vector<1x50xf32>
    %13 = vector.broadcast %12 : vector<1x50xf32> to vector<2x50xf32>
    %14 = arith.addf %11, %13 : vector<2x50xf32>
    %cst_11 = arith.constant 0.00999999977 : f32
    %15 = vector.broadcast %cst_11 : f32 to vector<2x50xf32>
    %16 = arith.mulf %14, %15 : vector<2x50xf32>
    %17 = arith.maximumf %14, %16 : vector<2x50xf32>
    %c0_12 = arith.constant 0 : index
    %c0_13 = arith.constant 0 : index
    %18 = vector.load %arg6[%c0_12, %c0_13] : memref<50x10xf32, #tpu.memory_space<vmem>>, vector<50x10xf32>
    %cst_14 = arith.constant dense<0.000000e+00> : vector<2x10xf32>
    %19 = tpu.matmul %17, %18, %cst_14 {dimension_numbers = #tpu.dot_dimension_numbers<[1], [0], [0], [1], [0, 0, 1, 1], [], []>} : vector<2x50xf32>, vector<50x10xf32>, vector<2x10xf32> -> vector<2x10xf32>
    %c0_15 = arith.constant 0 : index
    %c0_16 = arith.constant 0 : index
    %20 = vector.load %arg7[%c0_15, %c0_16] : memref<1x10xf32, #tpu.memory_space<vmem>>, vector<1x10xf32>
    %21 = vector.broadcast %20 : vector<1x10xf32> to vector<2x10xf32>
    %22 = arith.addf %19, %21 : vector<2x10xf32>
    %cst_17 = arith.constant 0.00999999977 : f32
    %23 = vector.broadcast %cst_17 : f32 to vector<2x10xf32>
    %24 = arith.mulf %22, %23 : vector<2x10xf32>
    %25 = arith.maximumf %22, %24 : vector<2x10xf32>
    %c0_18 = arith.constant 0 : index
    %c0_19 = arith.constant 0 : index
    %26 = vector.load %arg8[%c0_18, %c0_19] : memref<10x1xf32, #tpu.memory_space<vmem>>, vector<10x1xf32>
    %cst_20 = arith.constant dense<0.000000e+00> : vector<2x1xf32>
    %27 = tpu.matmul %25, %26, %cst_20 {dimension_numbers = #tpu.dot_dimension_numbers<[1], [0], [0], [1], [0, 0, 1, 1], [], []>} : vector<2x10xf32>, vector<10x1xf32>, vector<2x1xf32> -> vector<2x1xf32>
    %c0_21 = arith.constant 0 : index
    %c0_22 = arith.constant 0 : index
    %28 = vector.load %arg9[%c0_21, %c0_22] : memref<1x1xf32, #tpu.memory_space<vmem>>, vector<1x1xf32>
    %29 = vector.broadcast %28 : vector<1x1xf32> to vector<2x1xf32>
    %30 = arith.addf %27, %29 : vector<2x1xf32>
    %c0_23 = arith.constant 0 : index
    %c0_24 = arith.constant 0 : index
    %31 = vector.load %arg10[%c0_23, %c0_24] : memref<2x1xf32, #tpu.memory_space<vmem>>, vector<2x1xf32>
    tpu.vector_store %arg10[%c0_23, %c0_24], %30 {strides = array<i32>} : memref<2x1xf32, #tpu.memory_space<vmem>>, vector<2x1xf32>,
    return
  }
  func.func @transform_0(%arg0: i32) -> (i32, i32) {
    %c0_i32 = arith.constant 0 : i32
    %c0_i32_0 = arith.constant 0 : i32
    %c0_i32_1 = arith.constant 0 : i32
    return %c0_i32, %c0_i32_0 : i32, i32
  }
  func.func @transform_1(%arg0: i32) -> (i32, i32) {
    %c0_i32 = arith.constant 0 : i32
    %c0_i32_0 = arith.constant 0 : i32
    %c0_i32_1 = arith.constant 0 : i32
    return %c0_i32, %c0_i32_0 : i32, i32
  }
  func.func @transform_2(%arg0: i32) -> (i32, i32) {
    %c0_i32 = arith.constant 0 : i32
    %c0_i32_0 = arith.constant 0 : i32
    %c0_i32_1 = arith.constant 0 : i32
    return %c0_i32, %c0_i32_0 : i32, i32
  }
  func.func @transform_3(%arg0: i32) -> (i32, i32) {
    %c0_i32 = arith.constant 0 : i32
    %c0_i32_0 = arith.constant 0 : i32
    %c0_i32_1 = arith.constant 0 : i32
    return %c0_i32, %c0_i32_0 : i32, i32
  }
  func.func @transform_4(%arg0: i32) -> (i32, i32) {
    %c0_i32 = arith.constant 0 : i32
    %c0_i32_0 = arith.constant 0 : i32
    %c0_i32_1 = arith.constant 0 : i32
    return %c0_i32, %c0_i32_0 : i32, i32
  }
  func.func @transform_5(%arg0: i32) -> (i32, i32) {
    %c0_i32 = arith.constant 0 : i32
    %c0_i32_0 = arith.constant 0 : i32
    %c0_i32_1 = arith.constant 0 : i32
    return %c0_i32, %c0_i32_0 : i32, i32
  }
  func.func @transform_6(%arg0: i32) -> (i32, i32) {
    %c0_i32 = arith.constant 0 : i32
    %c0_i32_0 = arith.constant 0 : i32
    %c0_i32_1 = arith.constant 0 : i32
    return %c0_i32, %c0_i32_0 : i32, i32
  }
  func.func @transform_7(%arg0: i32) -> (i32, i32) {
    %c0_i32 = arith.constant 0 : i32
    %c0_i32_0 = arith.constant 0 : i32
    %c0_i32_1 = arith.constant 0 : i32
    return %c0_i32, %c0_i32_0 : i32, i32
  }
  func.func @transform_8(%arg0: i32) -> (i32, i32) {
    %c0_i32 = arith.constant 0 : i32
    %c0_i32_0 = arith.constant 0 : i32
    %c0_i32_1 = arith.constant 0 : i32
    return %c0_i32, %c0_i32_0 : i32, i32
  }
  func.func @transform_9(%arg0: i32) -> (i32, i32) {
    %c0_i32 = arith.constant 0 : i32
    %c0_i32_0 = arith.constant 0 : i32
    %c0_i32_1 = arith.constant 0 : i32
    return %c0_i32, %c0_i32_0 : i32, i32
  }
}

</mosaic_0001>

<bundles_post_ra>
// kernel: pilotnet_forward.6
= control target key start
LH: loop header
LB: loop body
LE: loop exit
PB: predicated region body
PF: predicated region fallthrough
CT: control target
= control target key end

     0   :  { %s2352_s12 = smov 0   ;;  %s2354_s13 = smov 0   ;;  %s2872_s0 = inlined_call_operand.vmem [shape: bf16[5082,75], index: 0, kind: input, shape index: {}]   ;;  %s2873_s1 = inlined_call_operand.vmem [shape: bf16[75,24], index: 1, kind: input, shape index: {}]   ;;  %s2874_s2 = inlined_call_operand.vmem [shape: f32[1,24], index: 2, kind: input, shape index: {}]   ;;  %s2875_s3 = inlined_call_operand.vmem [shape: bf16[5082,24], index: 3, kind: output, shape index: {}]  }
   0x1   :  { %s2356_s14 = smov 0  }
   0x2 LB: > { %s2365_s15 = sadd.s32 4294967295, %s2297_s14   ;;  %s2367_s16 = sadd.s32 1, %s2297_s14   ;;  %s2297_s14 = sphi %s2356_s14, %s2882_s14   ;;  %s2293_s13 = sphi %s2354_s13, %s2881_s13   ;;  %s2289_s12 = sphi %s2352_s12, %s2880_s12  }
   0x3   : > { %s85_s17 = ssub.s32 %s2297_s14, %s2367_s16  ;;  %s88_s18 = sadd.s32 1, %s2293_s13 }
   0x4   : > { %p86_p0 = scmp.eq.s32.totalorder %s85_s17, 0  ;;  %p98_p1 = scmp.ne.s32.totalorder %s2293_s13, %s2289_s12 }
   0x5   : > { %p99_p2 = scmp.eq.s32.totalorder %s2365_s15, 9  ;;  %p1774_p3 = scmp.ge.s32.totalorder %s2297_s14, 1 }
   0x6   : > { %s2375_s19 = scalar_select %p86_p0, %s2293_s13, %s88_s18  }
   0x7   : > { %p2377_p4 = por %p99_p2, %p98_p1  ;;  %p146_p5 = scmp.lt.s32.totalorder %s2297_s14, 11 }
   0x9   : > { %p147_p6 = pnand %p1774_p3, %p146_p5 }
   0xa   : > { %v2206_v0 = vld [vmem:[%s2873_s1] sm:$0xff] (!%p147_p6)   ;;  %v2207_v1 = vld [vmem:[%s2873_s1 + $0x8] sm:$0xff] (!%p147_p6)   ;;  %vm560_vm0 = vcmask (!%p147_p6), 1044480   ;;  %v2208_v2 = vld [vmem:[%s2873_s1 + $0x10] sm:$0xff] (!%p147_p6)   ;;  %s2391_s27 = sshll.u32 (!%p147_p6), %s2365_s15, 6  ;;  %vm561_vm1 = vcmask (!%p147_p6), 1045504  }
   0xb   : > { %150 = sbr.rel (%p147_p6) target bundleno = 407 (0x197), region = 32  ;;  %2033 = vmatprep.subr.bf16.mxu0 (!%p147_p6), %v2206_v0  ;;  %2107 = vmatprep.subr.bf16.mxu1 (!%p147_p6), %v2206_v0  ;;  %v2331_v3 = vmov (!%p147_p6), 65535   ;;  %p178_p7 = scmp.lt.s32.totalorder (!%p147_p6), %s2391_s27, 635  ;;  %v2209_v5 = vld [vmem:[%s2873_s1 + $0x18] sm:$0xff] (!%p147_p6)   ;;  %v2210_v6 = vld [vmem:[%s2873_s1 + $0x20] sm:$0x3f] (!%p147_p6)  }
   0xc   : > { %2034 = vmatpush3.bf16.msra.mxu0 (!%p147_p6), %v2206_v0  ;;  %2112 = vmatpush3.bf16.msra.mxu1 (!%p147_p6), %v2206_v0  ;;  %v562_v4 = vsel (!%p147_p6), %vm560_vm0, 4294967295, %v2331_v3  ;;  %vm463_vm2 = vcmask (!%p147_p6), 613376   ;;  %v2473_v41 = vld [vmem:[%s2874_s2] ss:$0 sm:$0xff] (!%p147_p6)  ;;  %s170_s14 = sand.u32 (!%p147_p6), 1, %s2289_s12   ;;  %vm1240_vm3 = vcmask (!%p147_p6), 191488  }
   0xd   : > { %2035 = vmatprep.subr.bf16.mxu0 (!%p147_p6), %v2207_v1  ;;  %2108 = vmatprep.subr.bf16.mxu1 (!%p147_p6), %v2207_v1  ;;  %v563_v7 = vsel (!%p147_p6), %vm561_vm1, %v562_v4, 0  ;;  %s2478_s17 = sshll.u32 (!%p147_p6), %s170_s14, 8 }
   0xe   : > { %v565_v8 = vand.u32 (!%p147_p6), %v2210_v6, %v563_v7  ;;  %s2487_s12 = scalar_lea.vmem (!%p147_p6), [#allocation2], %s2478_s17  }
  0x10   : > { %2036 = vmatpush3.bf16.msra.mxu0 (!%p147_p6), %v2207_v1  ;;  %2113 = vmatpush3.bf16.msra.mxu1 (!%p147_p6), %v2207_v1 }
  0x11   : > { %2037 = vmatprep.subr.bf16.mxu0 (!%p147_p6), %v2208_v2  ;;  %2109 = vmatprep.subr.bf16.mxu1 (!%p147_p6), %v2208_v2 }
  0x12   : > { %s179_s5 = scalar_select %p178_p7, %s2391_s27, 635 }
  0x13   : > { %s1313_s18 = ssub.s32 (%p2377_p4), 636, %s2391_s27  ;;  %s1993_s21 = sshll.u32 (%p2377_p4), %s2365_s15, 8 }
  0x14   : > { %s1777_s6 = sshll.u32 %s179_s5, 2  ;;  %2038 = vmatpush3.bf16.msra.mxu0 %v2208_v2  ;;  %2114 = vmatpush3.bf16.msra.mxu1 %v2208_v2  ;;  %p1314_p8 = scmp.lt.s32.totalorder (%p2377_p4), %s1313_s18, 64 }
  0x15   : > { %s2404_s9 = scalar_lea.vmem %s2872_s0, %s1777_s6  ;;  %2039 = vmatprep.subr.bf16.mxu0 %v2209_v5  ;;  %2110 = vmatprep.subr.bf16.mxu1 %v2209_v5  ;;  %s2680_s24 = scalar_lea.vmem (%p2377_p4), %s2875_s3, %s1993_s21  }
  0x16   : > { %v2211_v9 = vld [vmem:[%s2404_s9] sm:$0xff]   ;;  %v2213_v11 = vld [vmem:[%s2404_s9 + $0x8] sm:$0xff]   ;;  %v2215_v13 = vld [vmem:[%s2404_s9 + $0x10] sm:$0xff]  }
  0x17   : > { %v2212_v10 = vld [vmem:[%s2404_s9 + $0x80] sm:$0xff]   ;;  %2043 = vmatprep.mubr.msk.bf16.mxu0 %vm463_vm2, %v2211_v9  ;;  %v2214_v12 = vld [vmem:[%s2404_s9 + $0x88] sm:$0xff]   ;;  %v2216_v14 = vld [vmem:[%s2404_s9 + $0x90] sm:$0xff]  }
  0x18   : > { %2040 = vmatpush3.bf16.msra.mxu0 %v2209_v5  ;;  %2115 = vmatpush3.bf16.msra.mxu1 %v2209_v5  ;;  %v2217_v15 = vld [vmem:[%s2404_s9 + $0x18] sm:$0xff]   ;;  %v2219_v17 = vld [vmem:[%s2404_s9 + $0x20] sm:$0xff]   ;;  %v2221_v19 = vld [vmem:[%s2404_s9 + $0x28] sm:$0xff]  }
  0x19   : > { %2041 = vmatprep.subr.bf16.mxu0 %v565_v8  ;;  %2111 = vmatprep.subr.bf16.mxu1 %v565_v8  ;;  %v2218_v16 = vld [vmem:[%s2404_s9 + $0x98] sm:$0xff]   ;;  %v2220_v18 = vld [vmem:[%s2404_s9 + $0xa0] sm:$0xff]   ;;  %v2222_v20 = vld [vmem:[%s2404_s9 + $0xa8] sm:$0xff]  }
  0x1a   : > { %2075 = vmatprep.mubr.msk.bf16.mxu1 %vm463_vm2, %v2212_v10  ;;  %v2223_v21 = vld [vmem:[%s2404_s9 + $0x30] sm:$0xff]   ;;  %v2225_v23 = vld [vmem:[%s2404_s9 + $0x38] sm:$0xff]   ;;  %v2227_v25 = vld [vmem:[%s2404_s9 + $0x40] sm:$0xff]  }
  0x1b   : > { %v2224_v22 = vld [vmem:[%s2404_s9 + $0xb0] sm:$0xff]   ;;  %v2226_v24 = vld [vmem:[%s2404_s9 + $0xb8] sm:$0xff]   ;;  %v2228_v26 = vld [vmem:[%s2404_s9 + $0xc0] sm:$0xff]  }
  0x1c   : > { %2042 = vmatpush3.bf16.msra.mxu0 %v565_v8  ;;  %2116 = vmatpush3.bf16.msra.mxu1 %v565_v8  ;;  %v2229_v27 = vld [vmem:[%s2404_s9 + $0x48] sm:$0xff]   ;;  %v2231_v29 = vld [vmem:[%s2404_s9 + $0x50] sm:$0xff]   ;;  %v2233_v31 = vld [vmem:[%s2404_s9 + $0x58] sm:$0xff]  }
  0x1d   : > { %v2230_v28 = vld [vmem:[%s2404_s9 + $0xc8] sm:$0xff]   ;;  %v2232_v30 = vld [vmem:[%s2404_s9 + $0xd0] sm:$0xff]   ;;  %v2234_v32 = vld [vmem:[%s2404_s9 + $0xd8] sm:$0xff]  }
  0x1e   : > { %v2235_v33 = vld [vmem:[%s2404_s9 + $0x60] sm:$0xff]   ;;  %v2237_v35 = vld [vmem:[%s2404_s9 + $0x68] sm:$0xff]   ;;  %v2239_v37 = vld [vmem:[%s2404_s9 + $0x70] sm:$0xff]  }
  0x1f   : > { %2044 = vmatmul.mubr.msk.bf16.vlgmr.msra.gmra.mrb[0].mxu0 %vm463_vm2, %v2213_v11  ;;  %2076 = vmatmul.mubr.msk.bf16.vlgmr.msra.gmra.mrb[0].mxu1 %vm463_vm2, %v2214_v12  ;;  %v2236_v34 = vld [vmem:[%s2404_s9 + $0xe0] sm:$0xff]   ;;  %v2238_v36 = vld [vmem:[%s2404_s9 + $0xe8] sm:$0xff]   ;;  %v2240_v38 = vld [vmem:[%s2404_s9 + $0xf0] sm:$0xff]  }
  0x20   : > { %2047 = vmatprep.mubr.msk.bf16.mxu0 %vm463_vm2, %v2215_v13  ;;  %2079 = vmatprep.mubr.msk.bf16.mxu1 %vm463_vm2, %v2216_v14  ;;  %v2241_v39 = vld [vmem:[%s2404_s9 + $0x78] sm:$0xff]  }
  0x21   : > { %v2242_v40 = vld [vmem:[%s2404_s9 + $0xf8] sm:$0xff]  }
  0x27   : > { %2048 = vmatmul.mubr.msk.bf16.gmra.mrb[4].mxu0 %vm463_vm2, %v2217_v15  ;;  %2080 = vmatmul.mubr.msk.bf16.gmra.mrb[4].mxu1 %vm463_vm2, %v2218_v16 }
  0x28   : > { %2051 = vmatprep.mubr.msk.bf16.mxu0 %vm463_vm2, %v2219_v17  ;;  %2083 = vmatprep.mubr.msk.bf16.mxu1 %vm463_vm2, %v2220_v18 }
  0x2f   : > { %2052 = vmatmul.mubr.msk.bf16.gmra.mrb[8].mxu0 %vm463_vm2, %v2221_v19  ;;  %2084 = vmatmul.mubr.msk.bf16.gmra.mrb[8].mxu1 %vm463_vm2, %v2222_v20 }
  0x30   : > { %2055 = vmatprep.mubr.msk.bf16.mxu0 %vm463_vm2, %v2223_v21  ;;  %2087 = vmatprep.mubr.msk.bf16.mxu1 %vm463_vm2, %v2224_v22 }
  0x37   : > { %2056 = vmatmul.mubr.msk.bf16.gmra.mrb[12].mxu0 %vm463_vm2, %v2225_v23  ;;  %2088 = vmatmul.mubr.msk.bf16.gmra.mrb[12].mxu1 %vm463_vm2, %v2226_v24 }
  0x38   : > { %2059 = vmatprep.mubr.msk.bf16.mxu0 %vm463_vm2, %v2227_v25  ;;  %2091 = vmatprep.mubr.msk.bf16.mxu1 %vm463_vm2, %v2228_v26 }
  0x3f   : > { %2060 = vmatmul.mubr.msk.bf16.gmra.mrb[16].mxu0 %vm463_vm2, %v2229_v27  ;;  %2092 = vmatmul.mubr.msk.bf16.gmra.mrb[16].mxu1 %vm463_vm2, %v2230_v28 }
  0x40   : > { %2063 = vmatprep.mubr.msk.bf16.mxu0 %vm463_vm2, %v2231_v29  ;;  %2095 = vmatprep.mubr.msk.bf16.mxu1 %vm463_vm2, %v2232_v30 }
  0x47   : > { %2064 = vmatmul.mubr.msk.bf16.gmra.mrb[20].mxu0 %vm463_vm2, %v2233_v31  ;;  %2096 = vmatmul.mubr.msk.bf16.gmra.mrb[20].mxu1 %vm463_vm2, %v2234_v32 }
  0x48   : > { %2067 = vmatprep.mubr.msk.bf16.mxu0 %vm463_vm2, %v2235_v33  ;;  %2099 = vmatprep.mubr.msk.bf16.mxu1 %vm463_vm2, %v2236_v34 }
  0x4f   : > { %2068 = vmatmul.mubr.msk.bf16.gmra.mrb[24].mxu0 %vm463_vm2, %v2237_v35  ;;  %2100 = vmatmul.mubr.msk.bf16.gmra.mrb[24].mxu1 %vm463_vm2, %v2238_v36 }
  0x50   : > { %2071 = vmatprep.mubr.msk.bf16.mxu0 %vm463_vm2, %v2239_v37  ;;  %2103 = vmatprep.mubr.msk.bf16.mxu1 %vm463_vm2, %v2240_v38 }
  0x57   : > { %2072 = vmatmul.mubr.msk.bf16.gmra.mrb[28].mxu0 %vm463_vm2, %v2241_v39  ;;  %2104 = vmatmul.mubr.msk.bf16.gmra.mrb[28].mxu1 %vm463_vm2, %v2242_v40 }
  0xf2   : > { %v2045_v42 = vpop.f32.mrb[0].mxu0  ;;  %v2077_v43 = vpop.f32.mrb[0].mxu1 }
  0xf3   : > { %v610_v44 = vadd.f32 %v2045_v42, %v2473_v41  ;;  %v738_v45 = vadd.f32 %v2077_v43, %v2473_v41  ;;  %v601_v46 = vpop.f32.mrb[1].mxu0  ;;  %v729_v47 = vpop.f32.mrb[1].mxu1 }
  0xf4   : > { %v602_v48 = vadd.f32 %v2473_v41, %v601_v46  ;;  %v730_v49 = vadd.f32 %v2473_v41, %v729_v47  ;;  %v2046_v50 = vpop.f32.mrb[2].mxu0  ;;  %v2078_v51 = vpop.f32.mrb[2].mxu1 }
  0xf5   : > { %v858_v52 = vmul.f32 0.01, %v610_v44  ;;  %v890_v53 = vmul.f32 0.01, %v738_v45  ;;  %v613_v54 = vadd.f32 %v2046_v50, %v2473_v41  ;;  %v741_v55 = vadd.f32 %v2078_v51, %v2473_v41  ;;  %v604_v56 = vpop.f32.mrb[3].mxu0  ;;  %v732_v57 = vpop.f32.mrb[3].mxu1 }
  0xf6   : > { %v856_v58 = vmul.f32 0.01, %v602_v48  ;;  %v888_v59 = vmul.f32 0.01, %v730_v49  ;;  %v605_v60 = vadd.f32 %v2473_v41, %v604_v56  ;;  %v733_v61 = vadd.f32 %v2473_v41, %v732_v57 }
  0xf7   : > { %v922_v62 = vmax.f32 %v610_v44, %v858_v52  ;;  %v954_v63 = vmax.f32 %v738_v45, %v890_v53  ;;  %v859_v0 = vmul.f32 0.01, %v613_v54  ;;  %v891_v1 = vmul.f32 0.01, %v741_v55 }
  0xf8   : > { %v920_v2 = vmax.f32 %v602_v48, %v856_v58  ;;  %v952_v3 = vmax.f32 %v730_v49, %v888_v59  ;;  %v857_v4 = vmul.f32 0.01, %v605_v60  ;;  %v889_v5 = vmul.f32 0.01, %v733_v61 }
  0xf9   : > { %v1931_v6 = vpack.c.bf16 %v922_v62, %v922_v62  ;;  %v1963_v7 = vpack.c.bf16 %v954_v63, %v954_v63  ;;  %v923_v8 = vmax.f32 %v613_v54, %v859_v0  ;;  %v955_v9 = vmax.f32 %v741_v55, %v891_v1 }
  0xfa   : > { %v1929_v10 = vpack.c.bf16 %v920_v2, %v920_v2  ;;  %v1961_v11 = vpack.c.bf16 %v952_v3, %v952_v3  ;;  %v921_v12 = vmax.f32 %v605_v60, %v857_v4  ;;  %v953_v13 = vmax.f32 %v733_v61, %v889_v5  ;;  %v2049_v14 = vpop.f32.mrb[4].mxu0  ;;  %v2081_v15 = vpop.f32.mrb[4].mxu1 }
  0xfb   : > { %1243 = vst.msk [vmem:[%s2487_s12 + $0x8] sm:$0xf] %vm1240_vm3, %v1931_v6  ;;  %1275 = vst.msk [vmem:[%s2487_s12 + $0x88] sm:$0xf] %vm1240_vm3, %v1963_v7  ;;  %v1932_v16 = vpack.c.bf16 %v923_v8, %v923_v8  ;;  %v1964_v17 = vpack.c.bf16 %v955_v9, %v955_v9  ;;  %v626_v18 = vadd.f32 %v2049_v14, %v2473_v41  ;;  %v617_v20 = vpop.f32.mrb[5].mxu0  ;;  %v745_v21 = vpop.f32.mrb[5].mxu1 }
  0xfc   : > { %v754_v19 = vadd.f32 %v2081_v15, %v2473_v41  ;;  %1241 = vst.msk [vmem:[%s2487_s12] sm:$0xf] %vm1240_vm3, %v1929_v10  ;;  %1273 = vst.msk [vmem:[%s2487_s12 + $0x80] sm:$0xf] %vm1240_vm3, %v1961_v11  ;;  %v1930_v22 = vpack.c.bf16 %v921_v12, %v921_v12  ;;  %v1962_v23 = vpack.c.bf16 %v953_v13, %v953_v13  ;;  %v2050_v26 = vpop.f32.mrb[6].mxu0  ;;  %v2082_v27 = vpop.f32.mrb[6].mxu1 }
  0xfd   : > { %v618_v24 = vadd.f32 %v2473_v41, %v617_v20  ;;  %v746_v25 = vadd.f32 %v2473_v41, %v745_v21  ;;  %1244 = vst.msk [vmem:[%s2487_s12 + $0xc] sm:$0xf] %vm1240_vm3, %v1932_v16  ;;  %1276 = vst.msk [vmem:[%s2487_s12 + $0x8c] sm:$0xf] %vm1240_vm3, %v1964_v17  ;;  %v862_v28 = vmul.f32 0.01, %v626_v18  ;;  %v629_v30 = vadd.f32 %v2050_v26, %v2473_v41 }
  0xfe   : > { %v894_v29 = vmul.f32 0.01, %v754_v19  ;;  %v757_v31 = vadd.f32 %v2082_v27, %v2473_v41  ;;  %v620_v32 = vpop.f32.mrb[7].mxu0  ;;  %v748_v33 = vpop.f32.mrb[7].mxu1  ;;  %1242 = vst.msk [vmem:[%s2487_s12 + $0x4] sm:$0xf] %vm1240_vm3, %v1930_v22 }
  0xff   : > { %1274 = vst.msk [vmem:[%s2487_s12 + $0x84] sm:$0xf] %vm1240_vm3, %v1962_v23  ;;  %v860_v34 = vmul.f32 0.01, %v618_v24  ;;  %v892_v35 = vmul.f32 0.01, %v746_v25  ;;  %v621_v36 = vadd.f32 %v2473_v41, %v620_v32  ;;  %v749_v37 = vadd.f32 %v2473_v41, %v748_v33 }
 0x100   : > { %v926_v38 = vmax.f32 %v626_v18, %v862_v28  ;;  %v958_v39 = vmax.f32 %v754_v19, %v894_v29  ;;  %v863_v40 = vmul.f32 0.01, %v629_v30  ;;  %v895_v42 = vmul.f32 0.01, %v757_v31 }
 0x101   : > { %v924_v43 = vmax.f32 %v618_v24, %v860_v34  ;;  %v956_v44 = vmax.f32 %v746_v25, %v892_v35  ;;  %v861_v45 = vmul.f32 0.01, %v621_v36  ;;  %v893_v46 = vmul.f32 0.01, %v749_v37 }
 0x102   : > { %v1935_v47 = vpack.c.bf16 %v926_v38, %v926_v38  ;;  %v1967_v48 = vpack.c.bf16 %v958_v39, %v958_v39  ;;  %v927_v49 = vmax.f32 %v629_v30, %v863_v40  ;;  %v959_v50 = vmax.f32 %v757_v31, %v895_v42  ;;  %v2053_v55 = vpop.f32.mrb[8].mxu0  ;;  %v2085_v56 = vpop.f32.mrb[8].mxu1 }
 0x103   : > { %v1933_v51 = vpack.c.bf16 %v924_v43, %v924_v43  ;;  %v1965_v52 = vpack.c.bf16 %v956_v44, %v956_v44  ;;  %v925_v53 = vmax.f32 %v621_v36, %v861_v45  ;;  %v957_v54 = vmax.f32 %v749_v37, %v893_v46  ;;  %v633_v61 = vpop.f32.mrb[9].mxu0  ;;  %v761_v62 = vpop.f32.mrb[9].mxu1 }
 0x104   : > { %1247 = vst.msk [vmem:[%s2487_s12 + $0x18] sm:$0xf] %vm1240_vm3, %v1935_v47  ;;  %1279 = vst.msk [vmem:[%s2487_s12 + $0x98] sm:$0xf] %vm1240_vm3, %v1967_v48  ;;  %v1936_v57 = vpack.c.bf16 %v927_v49, %v927_v49  ;;  %v1968_v58 = vpack.c.bf16 %v959_v50, %v959_v50  ;;  %v642_v59 = vadd.f32 %v2053_v55, %v2473_v41  ;;  %v2054_v3 = vpop.f32.mrb[10].mxu0  ;;  %v2086_v4 = vpop.f32.mrb[10].mxu1 }
 0x105   : > { %v770_v60 = vadd.f32 %v2085_v56, %v2473_v41  ;;  %1245 = vst.msk [vmem:[%s2487_s12 + $0x10] sm:$0xf] %vm1240_vm3, %v1933_v51  ;;  %1277 = vst.msk [vmem:[%s2487_s12 + $0x90] sm:$0xf] %vm1240_vm3, %v1965_v52  ;;  %v1934_v63 = vpack.c.bf16 %v925_v53, %v925_v53  ;;  %v1966_v0 = vpack.c.bf16 %v957_v54, %v957_v54  ;;  %v636_v9 = vpop.f32.mrb[11].mxu0  ;;  %v764_v10 = vpop.f32.mrb[11].mxu1 }
 0x106   : > { %v634_v1 = vadd.f32 %v2473_v41, %v633_v61  ;;  %v762_v2 = vadd.f32 %v2473_v41, %v761_v62  ;;  %1248 = vst.msk [vmem:[%s2487_s12 + $0x1c] sm:$0xf] %vm1240_vm3, %v1936_v57  ;;  %1280 = vst.msk [vmem:[%s2487_s12 + $0x9c] sm:$0xf] %vm1240_vm3, %v1968_v58  ;;  %v866_v5 = vmul.f32 0.01, %v642_v59  ;;  %v645_v7 = vadd.f32 %v2054_v3, %v2473_v41 }
 0x107   : > { %v898_v6 = vmul.f32 0.01, %v770_v60  ;;  %v773_v8 = vadd.f32 %v2086_v4, %v2473_v41  ;;  %1246 = vst.msk [vmem:[%s2487_s12 + $0x14] sm:$0xf] %vm1240_vm3, %v1934_v63  ;;  %1278 = vst.msk [vmem:[%s2487_s12 + $0x94] sm:$0xf] %vm1240_vm3, %v1966_v0  ;;  %v637_v13 = vadd.f32 %v2473_v41, %v636_v9  ;;  %v765_v14 = vadd.f32 %v2473_v41, %v764_v10 }
 0x108   : > { %v864_v11 = vmul.f32 0.01, %v634_v1  ;;  %v896_v12 = vmul.f32 0.01, %v762_v2  ;;  %v930_v15 = vmax.f32 %v642_v59, %v866_v5  ;;  %v867_v17 = vmul.f32 0.01, %v645_v7 }
 0x109   : > { %v962_v16 = vmax.f32 %v770_v60, %v898_v6  ;;  %v899_v18 = vmul.f32 0.01, %v773_v8  ;;  %v865_v21 = vmul.f32 0.01, %v637_v13  ;;  %v897_v22 = vmul.f32 0.01, %v765_v14 }
 0x10a   : > { %v928_v19 = vmax.f32 %v634_v1, %v864_v11  ;;  %v960_v20 = vmax.f32 %v762_v2, %v896_v12  ;;  %v1939_v23 = vpack.c.bf16 %v930_v15, %v930_v15  ;;  %v931_v25 = vmax.f32 %v645_v7, %v867_v17  ;;  %v2057_v31 = vpop.f32.mrb[12].mxu0  ;;  %v2089_v32 = vpop.f32.mrb[12].mxu1 }
 0x10b   : > { %v1971_v24 = vpack.c.bf16 %v962_v16, %v962_v16  ;;  %v963_v26 = vmax.f32 %v773_v8, %v899_v18  ;;  %v929_v29 = vmax.f32 %v637_v13, %v865_v21  ;;  %v961_v30 = vmax.f32 %v765_v14, %v897_v22  ;;  %v649_v37 = vpop.f32.mrb[13].mxu0  ;;  %v777_v38 = vpop.f32.mrb[13].mxu1 }
 0x10c   : > { %v1937_v27 = vpack.c.bf16 %v928_v19, %v928_v19  ;;  %v1969_v28 = vpack.c.bf16 %v960_v20, %v960_v20  ;;  %1251 = vst.msk [vmem:[%s2487_s12 + $0x28] sm:$0xf] %vm1240_vm3, %v1939_v23  ;;  %v1940_v33 = vpack.c.bf16 %v931_v25, %v931_v25  ;;  %v658_v35 = vadd.f32 %v2057_v31, %v2473_v41  ;;  %v2058_v44 = vpop.f32.mrb[14].mxu0  ;;  %v2090_v45 = vpop.f32.mrb[14].mxu1 }
 0x10d   : > { %1283 = vst.msk [vmem:[%s2487_s12 + $0xa8] sm:$0xf] %vm1240_vm3, %v1971_v24  ;;  %v1972_v34 = vpack.c.bf16 %v963_v26, %v963_v26  ;;  %v786_v36 = vadd.f32 %v2089_v32, %v2473_v41  ;;  %v1938_v39 = vpack.c.bf16 %v929_v29, %v929_v29  ;;  %v1970_v40 = vpack.c.bf16 %v961_v30, %v961_v30  ;;  %v652_v50 = vpop.f32.mrb[15].mxu0  ;;  %v780_v51 = vpop.f32.mrb[15].mxu1 }
 0x10e   : > { %1249 = vst.msk [vmem:[%s2487_s12 + $0x20] sm:$0xf] %vm1240_vm3, %v1937_v27  ;;  %1281 = vst.msk [vmem:[%s2487_s12 + $0xa0] sm:$0xf] %vm1240_vm3, %v1969_v28  ;;  %v650_v42 = vadd.f32 %v2473_v41, %v649_v37  ;;  %v778_v43 = vadd.f32 %v2473_v41, %v777_v38  ;;  %v870_v46 = vmul.f32 0.01, %v658_v35  ;;  %v661_v48 = vadd.f32 %v2058_v44, %v2473_v41 }
 0x10f   : > { %1252 = vst.msk [vmem:[%s2487_s12 + $0x2c] sm:$0xf] %vm1240_vm3, %v1940_v33  ;;  %1284 = vst.msk [vmem:[%s2487_s12 + $0xac] sm:$0xf] %vm1240_vm3, %v1972_v34  ;;  %v902_v47 = vmul.f32 0.01, %v786_v36  ;;  %v789_v49 = vadd.f32 %v2090_v45, %v2473_v41  ;;  %v653_v54 = vadd.f32 %v2473_v41, %v652_v50  ;;  %v781_v55 = vadd.f32 %v2473_v41, %v780_v51 }
 0x110   : > { %1250 = vst.msk [vmem:[%s2487_s12 + $0x24] sm:$0xf] %vm1240_vm3, %v1938_v39  ;;  %1282 = vst.msk [vmem:[%s2487_s12 + $0xa4] sm:$0xf] %vm1240_vm3, %v1970_v40  ;;  %v868_v52 = vmul.f32 0.01, %v650_v42  ;;  %v934_v56 = vmax.f32 %v658_v35, %v870_v46 }
 0x111   : > { %v900_v53 = vmul.f32 0.01, %v778_v43  ;;  %v966_v57 = vmax.f32 %v786_v36, %v902_v47  ;;  %v871_v58 = vmul.f32 0.01, %v661_v48  ;;  %v903_v59 = vmul.f32 0.01, %v789_v49 }
 0x112   : > { %v932_v60 = vmax.f32 %v650_v42, %v868_v52  ;;  %v869_v62 = vmul.f32 0.01, %v653_v54  ;;  %v901_v63 = vmul.f32 0.01, %v781_v55  ;;  %v1943_v0 = vpack.c.bf16 %v934_v56, %v934_v56  ;;  %v2061_v8 = vpop.f32.mrb[16].mxu0  ;;  %v2093_v9 = vpop.f32.mrb[16].mxu1 }
 0x113   : > { %v964_v61 = vmax.f32 %v778_v43, %v900_v53  ;;  %v1975_v1 = vpack.c.bf16 %v966_v57, %v966_v57  ;;  %v935_v2 = vmax.f32 %v661_v48, %v871_v58  ;;  %v967_v3 = vmax.f32 %v789_v49, %v903_v59  ;;  %v665_v14 = vpop.f32.mrb[17].mxu0  ;;  %v793_v15 = vpop.f32.mrb[17].mxu1 }
 0x114   : > { %v1941_v4 = vpack.c.bf16 %v932_v60, %v932_v60  ;;  %v933_v6 = vmax.f32 %v653_v54, %v869_v62  ;;  %v965_v7 = vmax.f32 %v781_v55, %v901_v63  ;;  %1255 = vst.msk [vmem:[%s2487_s12 + $0x38] sm:$0xf] %vm1240_vm3, %v1943_v0  ;;  %v674_v12 = vadd.f32 %v2061_v8, %v2473_v41  ;;  %v2062_v20 = vpop.f32.mrb[18].mxu0  ;;  %v2094_v21 = vpop.f32.mrb[18].mxu1 }
 0x115   : > { %v1973_v5 = vpack.c.bf16 %v964_v61, %v964_v61  ;;  %1287 = vst.msk [vmem:[%s2487_s12 + $0xb8] sm:$0xf] %vm1240_vm3, %v1975_v1  ;;  %v1944_v10 = vpack.c.bf16 %v935_v2, %v935_v2  ;;  %v1976_v11 = vpack.c.bf16 %v967_v3, %v967_v3  ;;  %v802_v13 = vadd.f32 %v2093_v9, %v2473_v41  ;;  %v668_v26 = vpop.f32.mrb[19].mxu0  ;;  %v796_v27 = vpop.f32.mrb[19].mxu1 }
 0x116   : > { %1253 = vst.msk [vmem:[%s2487_s12 + $0x30] sm:$0xf] %vm1240_vm3, %v1941_v4  ;;  %v1942_v16 = vpack.c.bf16 %v933_v6, %v933_v6  ;;  %v1974_v17 = vpack.c.bf16 %v965_v7, %v965_v7  ;;  %v666_v18 = vadd.f32 %v2473_v41, %v665_v14  ;;  %v794_v19 = vadd.f32 %v2473_v41, %v793_v15 }
 0x117   : > { %1285 = vst.msk [vmem:[%s2487_s12 + $0xb0] sm:$0xf] %vm1240_vm3, %v1973_v5  ;;  %1256 = vst.msk [vmem:[%s2487_s12 + $0x3c] sm:$0xf] %vm1240_vm3, %v1944_v10  ;;  %v874_v22 = vmul.f32 0.01, %v674_v12  ;;  %v677_v24 = vadd.f32 %v2062_v20, %v2473_v41  ;;  %v805_v25 = vadd.f32 %v2094_v21, %v2473_v41  ;;  %v669_v30 = vadd.f32 %v2473_v41, %v668_v26 }
 0x118   : > { %1288 = vst.msk [vmem:[%s2487_s12 + $0xbc] sm:$0xf] %vm1240_vm3, %v1976_v11  ;;  %v906_v23 = vmul.f32 0.01, %v802_v13  ;;  %1254 = vst.msk [vmem:[%s2487_s12 + $0x34] sm:$0xf] %vm1240_vm3, %v1942_v16  ;;  %v797_v31 = vadd.f32 %v2473_v41, %v796_v27 }
 0x119   : > { %1286 = vst.msk [vmem:[%s2487_s12 + $0xb4] sm:$0xf] %vm1240_vm3, %v1974_v17  ;;  %v872_v28 = vmul.f32 0.01, %v666_v18  ;;  %v904_v29 = vmul.f32 0.01, %v794_v19  ;;  %v938_v32 = vmax.f32 %v674_v12, %v874_v22 }
 0x11a   : > { %v970_v33 = vmax.f32 %v802_v13, %v906_v23  ;;  %v875_v34 = vmul.f32 0.01, %v677_v24  ;;  %v907_v35 = vmul.f32 0.01, %v805_v25  ;;  %v873_v38 = vmul.f32 0.01, %v669_v30 }
 0x11b   : > { %v936_v36 = vmax.f32 %v666_v18, %v872_v28  ;;  %v968_v37 = vmax.f32 %v794_v19, %v904_v29  ;;  %v905_v39 = vmul.f32 0.01, %v797_v31  ;;  %v1947_v40 = vpack.c.bf16 %v938_v32, %v938_v32  ;;  %v2065_v49 = vpop.f32.mrb[20].mxu0  ;;  %v2097_v50 = vpop.f32.mrb[20].mxu1 }
 0x11c   : > { %v1979_v42 = vpack.c.bf16 %v970_v33, %v970_v33  ;;  %v939_v43 = vmax.f32 %v677_v24, %v875_v34  ;;  %v971_v44 = vmax.f32 %v805_v25, %v907_v35  ;;  %v937_v47 = vmax.f32 %v669_v30, %v873_v38  ;;  %v681_v55 = vpop.f32.mrb[21].mxu0  ;;  %v809_v56 = vpop.f32.mrb[21].mxu1 }
 0x11d   : > { %v1945_v45 = vpack.c.bf16 %v936_v36, %v936_v36  ;;  %v1977_v46 = vpack.c.bf16 %v968_v37, %v968_v37  ;;  %v969_v48 = vmax.f32 %v797_v31, %v905_v39  ;;  %1259 = vst.msk [vmem:[%s2487_s12 + $0x48] sm:$0xf] %vm1240_vm3, %v1947_v40  ;;  %v690_v53 = vadd.f32 %v2065_v49, %v2473_v41  ;;  %v2066_v61 = vpop.f32.mrb[22].mxu0  ;;  %v2098_v62 = vpop.f32.mrb[22].mxu1 }
 0x11e   : > { %1291 = vst.msk [vmem:[%s2487_s12 + $0xc8] sm:$0xf] %vm1240_vm3, %v1979_v42  ;;  %v1948_v51 = vpack.c.bf16 %v939_v43, %v939_v43  ;;  %v1980_v52 = vpack.c.bf16 %v971_v44, %v971_v44  ;;  %v818_v54 = vadd.f32 %v2097_v50, %v2473_v41  ;;  %v1946_v57 = vpack.c.bf16 %v937_v47, %v937_v47  ;;  %v684_v3 = vpop.f32.mrb[23].mxu0  ;;  %v812_v4 = vpop.f32.mrb[23].mxu1 }
 0x11f   : > { %1257 = vst.msk [vmem:[%s2487_s12 + $0x40] sm:$0xf] %vm1240_vm3, %v1945_v45  ;;  %1289 = vst.msk [vmem:[%s2487_s12 + $0xc0] sm:$0xf] %vm1240_vm3, %v1977_v46  ;;  %v1978_v58 = vpack.c.bf16 %v969_v48, %v969_v48  ;;  %v682_v59 = vadd.f32 %v2473_v41, %v681_v55  ;;  %v810_v60 = vadd.f32 %v2473_v41, %v809_v56  ;;  %v878_v63 = vmul.f32 0.01, %v690_v53 }
 0x120   : > { %1260 = vst.msk [vmem:[%s2487_s12 + $0x4c] sm:$0xf] %vm1240_vm3, %v1948_v51  ;;  %1292 = vst.msk [vmem:[%s2487_s12 + $0xcc] sm:$0xf] %vm1240_vm3, %v1980_v52  ;;  %v910_v0 = vmul.f32 0.01, %v818_v54  ;;  %v693_v1 = vadd.f32 %v2066_v61, %v2473_v41  ;;  %v821_v2 = vadd.f32 %v2098_v62, %v2473_v41  ;;  %v685_v7 = vadd.f32 %v2473_v41, %v684_v3 }
 0x121   : > { %1258 = vst.msk [vmem:[%s2487_s12 + $0x44] sm:$0xf] %vm1240_vm3, %v1946_v57  ;;  %1290 = vst.msk [vmem:[%s2487_s12 + $0xc4] sm:$0xf] %vm1240_vm3, %v1978_v58  ;;  %v876_v5 = vmul.f32 0.01, %v682_v59  ;;  %v813_v8 = vadd.f32 %v2473_v41, %v812_v4  ;;  %v942_v9 = vmax.f32 %v690_v53, %v878_v63 }
 0x122   : > { %v908_v6 = vmul.f32 0.01, %v810_v60  ;;  %v974_v10 = vmax.f32 %v818_v54, %v910_v0  ;;  %v879_v11 = vmul.f32 0.01, %v693_v1  ;;  %v911_v12 = vmul.f32 0.01, %v821_v2 }
 0x123   : > { %v940_v13 = vmax.f32 %v682_v59, %v876_v5  ;;  %v877_v15 = vmul.f32 0.01, %v685_v7  ;;  %v909_v16 = vmul.f32 0.01, %v813_v8  ;;  %v1951_v17 = vpack.c.bf16 %v942_v9, %v942_v9  ;;  %v2069_v25 = vpop.f32.mrb[24].mxu0  ;;  %v2101_v26 = vpop.f32.mrb[24].mxu1 }
 0x124   : > { %v972_v14 = vmax.f32 %v810_v60, %v908_v6  ;;  %v1983_v18 = vpack.c.bf16 %v974_v10, %v974_v10  ;;  %v943_v19 = vmax.f32 %v693_v1, %v879_v11  ;;  %v975_v20 = vmax.f32 %v821_v2, %v911_v12  ;;  %v697_v31 = vpop.f32.mrb[25].mxu0  ;;  %v825_v32 = vpop.f32.mrb[25].mxu1 }
 0x125   : > { %v1949_v21 = vpack.c.bf16 %v940_v13, %v940_v13  ;;  %v941_v23 = vmax.f32 %v685_v7, %v877_v15  ;;  %v973_v24 = vmax.f32 %v813_v8, %v909_v16  ;;  %1263 = vst.msk [vmem:[%s2487_s12 + $0x58] sm:$0xf] %vm1240_vm3, %v1951_v17  ;;  %v706_v29 = vadd.f32 %v2069_v25, %v2473_v41  ;;  %v2070_v37 = vpop.f32.mrb[26].mxu0  ;;  %v2102_v38 = vpop.f32.mrb[26].mxu1 }
 0x126   : > { %v1981_v22 = vpack.c.bf16 %v972_v14, %v972_v14  ;;  %1295 = vst.msk [vmem:[%s2487_s12 + $0xd8] sm:$0xf] %vm1240_vm3, %v1983_v18  ;;  %v1952_v27 = vpack.c.bf16 %v943_v19, %v943_v19  ;;  %v1984_v28 = vpack.c.bf16 %v975_v20, %v975_v20  ;;  %v834_v30 = vadd.f32 %v2101_v26, %v2473_v41  ;;  %v700_v44 = vpop.f32.mrb[27].mxu0  ;;  %v828_v45 = vpop.f32.mrb[27].mxu1 }
 0x127   : > { %1261 = vst.msk [vmem:[%s2487_s12 + $0x50] sm:$0xf] %vm1240_vm3, %v1949_v21  ;;  %v1950_v33 = vpack.c.bf16 %v941_v23, %v941_v23  ;;  %v1982_v34 = vpack.c.bf16 %v973_v24, %v973_v24  ;;  %v698_v35 = vadd.f32 %v2473_v41, %v697_v31  ;;  %v826_v36 = vadd.f32 %v2473_v41, %v825_v32 }
 0x128   : > { %1293 = vst.msk [vmem:[%s2487_s12 + $0xd0] sm:$0xf] %vm1240_vm3, %v1981_v22  ;;  %1264 = vst.msk [vmem:[%s2487_s12 + $0x5c] sm:$0xf] %vm1240_vm3, %v1952_v27  ;;  %v882_v39 = vmul.f32 0.01, %v706_v29  ;;  %v709_v42 = vadd.f32 %v2070_v37, %v2473_v41  ;;  %v837_v43 = vadd.f32 %v2102_v38, %v2473_v41  ;;  %v701_v48 = vadd.f32 %v2473_v41, %v700_v44 }
 0x129   : > { %1296 = vst.msk [vmem:[%s2487_s12 + $0xdc] sm:$0xf] %vm1240_vm3, %v1984_v28  ;;  %v914_v40 = vmul.f32 0.01, %v834_v30  ;;  %1262 = vst.msk [vmem:[%s2487_s12 + $0x54] sm:$0xf] %vm1240_vm3, %v1950_v33  ;;  %v829_v49 = vadd.f32 %v2473_v41, %v828_v45 }
 0x12a   : > { %1294 = vst.msk [vmem:[%s2487_s12 + $0xd4] sm:$0xf] %vm1240_vm3, %v1982_v34  ;;  %v880_v46 = vmul.f32 0.01, %v698_v35  ;;  %v912_v47 = vmul.f32 0.01, %v826_v36  ;;  %v946_v50 = vmax.f32 %v706_v29, %v882_v39 }
 0x12b   : > { %v978_v51 = vmax.f32 %v834_v30, %v914_v40  ;;  %v883_v52 = vmul.f32 0.01, %v709_v42  ;;  %v915_v53 = vmul.f32 0.01, %v837_v43  ;;  %v881_v56 = vmul.f32 0.01, %v701_v48 }
 0x12c   : > { %v944_v54 = vmax.f32 %v698_v35, %v880_v46  ;;  %v976_v55 = vmax.f32 %v826_v36, %v912_v47  ;;  %v913_v57 = vmul.f32 0.01, %v829_v49  ;;  %v1955_v58 = vpack.c.bf16 %v946_v50, %v946_v50  ;;  %v2073_v2 = vpop.f32.mrb[28].mxu0  ;;  %v2105_v3 = vpop.f32.mrb[28].mxu1 }
 0x12d   : > { %v1987_v59 = vpack.c.bf16 %v978_v51, %v978_v51  ;;  %v947_v60 = vmax.f32 %v709_v42, %v883_v52  ;;  %v979_v61 = vmax.f32 %v837_v43, %v915_v53  ;;  %v945_v0 = vmax.f32 %v701_v48, %v881_v56  ;;  %v713_v8 = vpop.f32.mrb[29].mxu0  ;;  %v841_v9 = vpop.f32.mrb[29].mxu1 }
 0x12e   : > { %v1953_v62 = vpack.c.bf16 %v944_v54, %v944_v54  ;;  %v1985_v63 = vpack.c.bf16 %v976_v55, %v976_v55  ;;  %v977_v1 = vmax.f32 %v829_v49, %v913_v57  ;;  %1267 = vst.msk [vmem:[%s2487_s12 + $0x68] sm:$0xf] %vm1240_vm3, %v1955_v58  ;;  %v722_v6 = vadd.f32 %v2073_v2, %v2473_v41  ;;  %v2074_v14 = vpop.f32.mrb[30].mxu0  ;;  %v2106_v15 = vpop.f32.mrb[30].mxu1 }
 0x12f   : > { %1299 = vst.msk [vmem:[%s2487_s12 + $0xe8] sm:$0xf] %vm1240_vm3, %v1987_v59  ;;  %v1956_v4 = vpack.c.bf16 %v947_v60, %v947_v60  ;;  %v1988_v5 = vpack.c.bf16 %v979_v61, %v979_v61  ;;  %v850_v7 = vadd.f32 %v2105_v3, %v2473_v41  ;;  %v1954_v10 = vpack.c.bf16 %v945_v0, %v945_v0  ;;  %v716_v20 = vpop.f32.mrb[31].mxu0  ;;  %v844_v21 = vpop.f32.mrb[31].mxu1 }
 0x130   : > { %1265 = vst.msk [vmem:[%s2487_s12 + $0x60] sm:$0xf] %vm1240_vm3, %v1953_v62  ;;  %1297 = vst.msk [vmem:[%s2487_s12 + $0xe0] sm:$0xf] %vm1240_vm3, %v1985_v63  ;;  %v1986_v11 = vpack.c.bf16 %v977_v1, %v977_v1  ;;  %v714_v12 = vadd.f32 %v2473_v41, %v713_v8  ;;  %v842_v13 = vadd.f32 %v2473_v41, %v841_v9  ;;  %v886_v16 = vmul.f32 0.01, %v722_v6 }
 0x131   : > { %1268 = vst.msk [vmem:[%s2487_s12 + $0x6c] sm:$0xf] %vm1240_vm3, %v1956_v4  ;;  %1300 = vst.msk [vmem:[%s2487_s12 + $0xec] sm:$0xf] %vm1240_vm3, %v1988_v5  ;;  %v918_v17 = vmul.f32 0.01, %v850_v7  ;;  %v725_v18 = vadd.f32 %v2074_v14, %v2473_v41  ;;  %v853_v19 = vadd.f32 %v2106_v15, %v2473_v41  ;;  %v717_v24 = vadd.f32 %v2473_v41, %v716_v20 }
 0x132   : > { %1266 = vst.msk [vmem:[%s2487_s12 + $0x64] sm:$0xf] %vm1240_vm3, %v1954_v10  ;;  %1298 = vst.msk [vmem:[%s2487_s12 + $0xe4] sm:$0xf] %vm1240_vm3, %v1986_v11  ;;  %v884_v22 = vmul.f32 0.01, %v714_v12  ;;  %v845_v25 = vadd.f32 %v2473_v41, %v844_v21  ;;  %v950_v26 = vmax.f32 %v722_v6, %v886_v16 }
 0x133   : > { %v916_v23 = vmul.f32 0.01, %v842_v13  ;;  %v982_v27 = vmax.f32 %v850_v7, %v918_v17  ;;  %v887_v28 = vmul.f32 0.01, %v725_v18  ;;  %v919_v29 = vmul.f32 0.01, %v853_v19 }
 0x134   : > { %v948_v30 = vmax.f32 %v714_v12, %v884_v22  ;;  %v885_v32 = vmul.f32 0.01, %v717_v24  ;;  %v917_v33 = vmul.f32 0.01, %v845_v25  ;;  %v1959_v34 = vpack.c.bf16 %v950_v26, %v950_v26 }
 0x135   : > { %v980_v31 = vmax.f32 %v842_v13, %v916_v23  ;;  %v1991_v35 = vpack.c.bf16 %v982_v27, %v982_v27  ;;  %v951_v36 = vmax.f32 %v725_v18, %v887_v28  ;;  %v983_v37 = vmax.f32 %v853_v19, %v919_v29  ;;  %1311 = sbr.rel (!%p2377_p4) target bundleno = 407 (0x197), region = 36 }
 0x136   : > { %v1957_v41 = vpack.c.bf16 %v948_v30, %v948_v30  ;;  %v949_v39 = vmax.f32 %v717_v24, %v885_v32  ;;  %v981_v40 = vmax.f32 %v845_v25, %v917_v33  ;;  %1271 = vst.msk [vmem:[%s2487_s12 + $0x78] sm:$0xf] %vm1240_vm3, %v1959_v34 }
 0x137   : > { %v1989_v38 = vpack.c.bf16 %v980_v31, %v980_v31  ;;  %1303 = vst.msk [vmem:[%s2487_s12 + $0xf8] sm:$0xf] %vm1240_vm3, %v1991_v35  ;;  %v1960_v42 = vpack.c.bf16 %v951_v36, %v951_v36  ;;  %v1992_v43 = vpack.c.bf16 %v983_v37, %v983_v37 }
 0x138   : > { %1269 = vst.msk [vmem:[%s2487_s12 + $0x70] sm:$0xf] %vm1240_vm3, %v1957_v41  ;;  %v1958_v44 = vpack.c.bf16 %v949_v39, %v949_v39  ;;  %v1990_v45 = vpack.c.bf16 %v981_v40, %v981_v40 }
 0x139   : > { %1301 = vst.msk [vmem:[%s2487_s12 + $0xf0] sm:$0xf] %vm1240_vm3, %v1989_v38  ;;  %1272 = vst.msk [vmem:[%s2487_s12 + $0x7c] sm:$0xf] %vm1240_vm3, %v1960_v42 }
 0x13a   : > { %1304 = vst.msk [vmem:[%s2487_s12 + $0xfc] sm:$0xf] %vm1240_vm3, %v1992_v43  ;;  %1270 = vst.msk [vmem:[%s2487_s12 + $0x74] sm:$0xf] %vm1240_vm3, %v1958_v44 }
 0x13b   : > { %1302 = vst.msk [vmem:[%s2487_s12 + $0xf4] sm:$0xf] %vm1240_vm3, %v1990_v45 }
 0x13c   : > { %s2884_s18 = smov (!%p1314_p8, %s1313_s18), 64 }
 0x13d   : > { %s1914_s25 = sshll.u32 %s2884_s18, 6 }
 0x13e   : > { %p1917_p9 = scmp.eq.s32.totalorder %s1914_s25, 0 }
 0x13f   : > { %s2686_s26 = sshrl.u32 (!%p1917_p9), %s2884_s18, 6 }
 0x140   : > { %1322 = sbr.rel (%p1917_p9) target bundleno = 407 (0x197), region = 40  ;;  %p1918_p10 = scmp.le.s32.totalorder (!%p1917_p9), %s2686_s26, 0 }
 0x147   : > { %1727 = sbr.rel (%p1918_p10) target bundleno = 386 (0x182), region = 112  ;;  %s2877_s15 = smov (!%p1918_p10), %s2680_s24 }
 0x148   : > { %s2878_s20 = smov (!%p1918_p10), %s2487_s12  ;;  %s2695_s27 = smov (!%p1918_p10), 0  }
 0x149   : > { %s2697_s28 = smov (!%p1918_p10), 0  }
 0x14e LB: >> { %v1338_v46 = vld [vmem:[%s2305_s20] sm:$0xf]  ;;  %v1340_v47 = vld [vmem:[%s2305_s20 + $0x4] sm:$0xf]  ;;  %v1342_v48 = vld [vmem:[%s2305_s20 + $0x8] sm:$0xf]  ;;  %s2313_s28 = sphi %s2697_s28, %s1332_s28   ;;  %s2309_s27 = sphi %s2695_s27, %s2879_s27   ;;  %s2305_s20 = sphi %s2878_s20, %s1471_s20   ;;  %s2301_s15 = sphi %s2877_s15, %s1472_s15  }
 0x14f   : >> { %1339 = vst [vmem:[%s2301_s15] sm:$0xf] %v1338_v46  ;;  %1341 = vst [vmem:[%s2301_s15 + $0x4] sm:$0xf] %v1340_v47  ;;  %v1344_v49 = vld [vmem:[%s2305_s20 + $0xc] sm:$0xf]  ;;  %s1466_s29 = sadd.s32 1, %s2309_s27 }
 0x150   : >> { %1343 = vst [vmem:[%s2301_s15 + $0x8] sm:$0xf] %v1342_v48  ;;  %v1346_v50 = vld [vmem:[%s2305_s20 + $0x10] sm:$0xf]  ;;  %v1348_v51 = vld [vmem:[%s2305_s20 + $0x14] sm:$0xf]  ;;  %p1467_p11 = scmp.ge.s32.totalorder %s1466_s29, %s2686_s26 }
 0x151   : >> { %1345 = vst [vmem:[%s2301_s15 + $0xc] sm:$0xf] %v1344_v49  ;;  %1347 = vst [vmem:[%s2301_s15 + $0x10] sm:$0xf] %v1346_v50  ;;  %v1350_v52 = vld [vmem:[%s2305_s20 + $0x18] sm:$0xf] }
 0x152   : >> { %1349 = vst [vmem:[%s2301_s15 + $0x14] sm:$0xf] %v1348_v51  ;;  %v1352_v53 = vld [vmem:[%s2305_s20 + $0x1c] sm:$0xf]  ;;  %v1354_v54 = vld [vmem:[%s2305_s20 + $0x20] sm:$0xf] }
 0x153   : >> { %1351 = vst [vmem:[%s2301_s15 + $0x18] sm:$0xf] %v1350_v52  ;;  %1353 = vst [vmem:[%s2301_s15 + $0x1c] sm:$0xf] %v1352_v53  ;;  %v1356_v55 = vld [vmem:[%s2305_s20 + $0x24] sm:$0xf] }
 0x154   : >> { %1355 = vst [vmem:[%s2301_s15 + $0x20] sm:$0xf] %v1354_v54  ;;  %v1358_v56 = vld [vmem:[%s2305_s20 + $0x28] sm:$0xf]  ;;  %v1360_v57 = vld [vmem:[%s2305_s20 + $0x2c] sm:$0xf] }
 0x155   : >> { %1357 = vst [vmem:[%s2301_s15 + $0x24] sm:$0xf] %v1356_v55  ;;  %1359 = vst [vmem:[%s2301_s15 + $0x28] sm:$0xf] %v1358_v56  ;;  %v1362_v58 = vld [vmem:[%s2305_s20 + $0x30] sm:$0xf] }
 0x156   : >> { %1361 = vst [vmem:[%s2301_s15 + $0x2c] sm:$0xf] %v1360_v57  ;;  %v1364_v59 = vld [vmem:[%s2305_s20 + $0x34] sm:$0xf]  ;;  %v1366_v60 = vld [vmem:[%s2305_s20 + $0x38] sm:$0xf] }
 0x157   : >> { %1363 = vst [vmem:[%s2301_s15 + $0x30] sm:$0xf] %v1362_v58  ;;  %1365 = vst [vmem:[%s2301_s15 + $0x34] sm:$0xf] %v1364_v59  ;;  %v1368_v61 = vld [vmem:[%s2305_s20 + $0x3c] sm:$0xf] }
 0x158   : >> { %1367 = vst [vmem:[%s2301_s15 + $0x38] sm:$0xf] %v1366_v60  ;;  %v1370_v62 = vld [vmem:[%s2305_s20 + $0x40] sm:$0xf]  ;;  %v1372_v63 = vld [vmem:[%s2305_s20 + $0x44] sm:$0xf] }
 0x159   : >> { %1369 = vst [vmem:[%s2301_s15 + $0x3c] sm:$0xf] %v1368_v61  ;;  %1371 = vst [vmem:[%s2301_s15 + $0x40] sm:$0xf] %v1370_v62  ;;  %v1374_v0 = vld [vmem:[%s2305_s20 + $0x48] sm:$0xf] }
 0x15a   : >> { %1373 = vst [vmem:[%s2301_s15 + $0x44] sm:$0xf] %v1372_v63  ;;  %v1376_v1 = vld [vmem:[%s2305_s20 + $0x4c] sm:$0xf]  ;;  %v1378_v2 = vld [vmem:[%s2305_s20 + $0x50] sm:$0xf] }
 0x15b   : >> { %1375 = vst [vmem:[%s2301_s15 + $0x48] sm:$0xf] %v1374_v0  ;;  %1377 = vst [vmem:[%s2301_s15 + $0x4c] sm:$0xf] %v1376_v1  ;;  %v1380_v3 = vld [vmem:[%s2305_s20 + $0x54] sm:$0xf] }
 0x15c   : >> { %1379 = vst [vmem:[%s2301_s15 + $0x50] sm:$0xf] %v1378_v2  ;;  %v1382_v4 = vld [vmem:[%s2305_s20 + $0x58] sm:$0xf]  ;;  %v1384_v5 = vld [vmem:[%s2305_s20 + $0x5c] sm:$0xf] }
 0x15d   : >> { %1381 = vst [vmem:[%s2301_s15 + $0x54] sm:$0xf] %v1380_v3  ;;  %1383 = vst [vmem:[%s2301_s15 + $0x58] sm:$0xf] %v1382_v4  ;;  %v1386_v6 = vld [vmem:[%s2305_s20 + $0x60] sm:$0xf] }
 0x15e   : >> { %1385 = vst [vmem:[%s2301_s15 + $0x5c] sm:$0xf] %v1384_v5  ;;  %v1388_v7 = vld [vmem:[%s2305_s20 + $0x64] sm:$0xf]  ;;  %v1390_v8 = vld [vmem:[%s2305_s20 + $0x68] sm:$0xf] }
 0x15f   : >> { %1387 = vst [vmem:[%s2301_s15 + $0x60] sm:$0xf] %v1386_v6  ;;  %1389 = vst [vmem:[%s2301_s15 + $0x64] sm:$0xf] %v1388_v7  ;;  %v1392_v9 = vld [vmem:[%s2305_s20 + $0x6c] sm:$0xf] }
 0x160   : >> { %1391 = vst [vmem:[%s2301_s15 + $0x68] sm:$0xf] %v1390_v8  ;;  %v1394_v10 = vld [vmem:[%s2305_s20 + $0x70] sm:$0xf]  ;;  %v1396_v11 = vld [vmem:[%s2305_s20 + $0x74] sm:$0xf] }
 0x161   : >> { %1393 = vst [vmem:[%s2301_s15 + $0x6c] sm:$0xf] %v1392_v9  ;;  %1395 = vst [vmem:[%s2301_s15 + $0x70] sm:$0xf] %v1394_v10  ;;  %v1398_v12 = vld [vmem:[%s2305_s20 + $0x78] sm:$0xf] }
 0x162   : >> { %1397 = vst [vmem:[%s2301_s15 + $0x74] sm:$0xf] %v1396_v11  ;;  %v1400_v13 = vld [vmem:[%s2305_s20 + $0x7c] sm:$0xf]  ;;  %v1402_v14 = vld [vmem:[%s2305_s20 + $0x80] sm:$0xf] }
 0x163   : >> { %1399 = vst [vmem:[%s2301_s15 + $0x78] sm:$0xf] %v1398_v12  ;;  %1401 = vst [vmem:[%s2301_s15 + $0x7c] sm:$0xf] %v1400_v13  ;;  %v1404_v15 = vld [vmem:[%s2305_s20 + $0x84] sm:$0xf] }
 0x164   : >> { %1403 = vst [vmem:[%s2301_s15 + $0x80] sm:$0xf] %v1402_v14  ;;  %v1406_v16 = vld [vmem:[%s2305_s20 + $0x88] sm:$0xf]  ;;  %v1408_v17 = vld [vmem:[%s2305_s20 + $0x8c] sm:$0xf] }
 0x165   : >> { %1405 = vst [vmem:[%s2301_s15 + $0x84] sm:$0xf] %v1404_v15  ;;  %1407 = vst [vmem:[%s2301_s15 + $0x88] sm:$0xf] %v1406_v16  ;;  %v1410_v18 = vld [vmem:[%s2305_s20 + $0x90] sm:$0xf] }
 0x166   : >> { %1409 = vst [vmem:[%s2301_s15 + $0x8c] sm:$0xf] %v1408_v17  ;;  %v1412_v19 = vld [vmem:[%s2305_s20 + $0x94] sm:$0xf]  ;;  %v1414_v20 = vld [vmem:[%s2305_s20 + $0x98] sm:$0xf] }
 0x167   : >> { %1411 = vst [vmem:[%s2301_s15 + $0x90] sm:$0xf] %v1410_v18  ;;  %1413 = vst [vmem:[%s2301_s15 + $0x94] sm:$0xf] %v1412_v19  ;;  %v1416_v21 = vld [vmem:[%s2305_s20 + $0x9c] sm:$0xf] }
 0x168   : >> { %1415 = vst [vmem:[%s2301_s15 + $0x98] sm:$0xf] %v1414_v20  ;;  %v1418_v22 = vld [vmem:[%s2305_s20 + $0xa0] sm:$0xf]  ;;  %v1420_v23 = vld [vmem:[%s2305_s20 + $0xa4] sm:$0xf] }
 0x169   : >> { %1417 = vst [vmem:[%s2301_s15 + $0x9c] sm:$0xf] %v1416_v21  ;;  %1419 = vst [vmem:[%s2301_s15 + $0xa0] sm:$0xf] %v1418_v22  ;;  %v1422_v24 = vld [vmem:[%s2305_s20 + $0xa8] sm:$0xf] }
 0x16a   : >> { %1421 = vst [vmem:[%s2301_s15 + $0xa4] sm:$0xf] %v1420_v23  ;;  %v1424_v25 = vld [vmem:[%s2305_s20 + $0xac] sm:$0xf]  ;;  %v1426_v26 = vld [vmem:[%s2305_s20 + $0xb0] sm:$0xf] }
 0x16b   : >> { %1423 = vst [vmem:[%s2301_s15 + $0xa8] sm:$0xf] %v1422_v24  ;;  %1425 = vst [vmem:[%s2301_s15 + $0xac] sm:$0xf] %v1424_v25  ;;  %v1428_v27 = vld [vmem:[%s2305_s20 + $0xb4] sm:$0xf] }
 0x16c   : >> { %1427 = vst [vmem:[%s2301_s15 + $0xb0] sm:$0xf] %v1426_v26  ;;  %v1430_v28 = vld [vmem:[%s2305_s20 + $0xb8] sm:$0xf]  ;;  %v1432_v29 = vld [vmem:[%s2305_s20 + $0xbc] sm:$0xf] }
 0x16d   : >> { %1429 = vst [vmem:[%s2301_s15 + $0xb4] sm:$0xf] %v1428_v27  ;;  %1431 = vst [vmem:[%s2301_s15 + $0xb8] sm:$0xf] %v1430_v28  ;;  %v1434_v30 = vld [vmem:[%s2305_s20 + $0xc0] sm:$0xf] }
 0x16e   : >> { %1433 = vst [vmem:[%s2301_s15 + $0xbc] sm:$0xf] %v1432_v29  ;;  %v1436_v31 = vld [vmem:[%s2305_s20 + $0xc4] sm:$0xf]  ;;  %v1438_v32 = vld [vmem:[%s2305_s20 + $0xc8] sm:$0xf] }
 0x16f   : >> { %1435 = vst [vmem:[%s2301_s15 + $0xc0] sm:$0xf] %v1434_v30  ;;  %1437 = vst [vmem:[%s2301_s15 + $0xc4] sm:$0xf] %v1436_v31  ;;  %v1440_v33 = vld [vmem:[%s2305_s20 + $0xcc] sm:$0xf] }
 0x170   : >> { %1439 = vst [vmem:[%s2301_s15 + $0xc8] sm:$0xf] %v1438_v32  ;;  %v1442_v34 = vld [vmem:[%s2305_s20 + $0xd0] sm:$0xf]  ;;  %v1444_v35 = vld [vmem:[%s2305_s20 + $0xd4] sm:$0xf] }
 0x171   : >> { %1441 = vst [vmem:[%s2301_s15 + $0xcc] sm:$0xf] %v1440_v33  ;;  %1443 = vst [vmem:[%s2301_s15 + $0xd0] sm:$0xf] %v1442_v34  ;;  %v1446_v36 = vld [vmem:[%s2305_s20 + $0xd8] sm:$0xf] }
 0x172   : >> { %1445 = vst [vmem:[%s2301_s15 + $0xd4] sm:$0xf] %v1444_v35  ;;  %v1448_v37 = vld [vmem:[%s2305_s20 + $0xdc] sm:$0xf]  ;;  %v1450_v41 = vld [vmem:[%s2305_s20 + $0xe0] sm:$0xf] }
 0x173   : >> { %1447 = vst [vmem:[%s2301_s15 + $0xd8] sm:$0xf] %v1446_v36  ;;  %1449 = vst [vmem:[%s2301_s15 + $0xdc] sm:$0xf] %v1448_v37  ;;  %v1452_v38 = vld [vmem:[%s2305_s20 + $0xe4] sm:$0xf] }
 0x174   : >> { %1451 = vst [vmem:[%s2301_s15 + $0xe0] sm:$0xf] %v1450_v41  ;;  %v1454_v39 = vld [vmem:[%s2305_s20 + $0xe8] sm:$0xf]  ;;  %v1456_v40 = vld [vmem:[%s2305_s20 + $0xec] sm:$0xf] }
 0x175   : >> { %1453 = vst [vmem:[%s2301_s15 + $0xe4] sm:$0xf] %v1452_v38  ;;  %1455 = vst [vmem:[%s2301_s15 + $0xe8] sm:$0xf] %v1454_v39  ;;  %v1458_v42 = vld [vmem:[%s2305_s20 + $0xf0] sm:$0xf] }
 0x176   : >> { %1457 = vst [vmem:[%s2301_s15 + $0xec] sm:$0xf] %v1456_v40  ;;  %v1460_v43 = vld [vmem:[%s2305_s20 + $0xf4] sm:$0xf]  ;;  %v1462_v44 = vld [vmem:[%s2305_s20 + $0xf8] sm:$0xf] }
 0x177   : >> { %1459 = vst [vmem:[%s2301_s15 + $0xf0] sm:$0xf] %v1458_v42  ;;  %1461 = vst [vmem:[%s2301_s15 + $0xf4] sm:$0xf] %v1460_v43  ;;  %v1464_v45 = vld [vmem:[%s2305_s20 + $0xfc] sm:$0xf] }
 0x178   : >> { %1463 = vst [vmem:[%s2301_s15 + $0xf8] sm:$0xf] %v1462_v44  ;;  %1465 = vst [vmem:[%s2301_s15 + $0xfc] sm:$0xf] %v1464_v45  ;;  %s2886_s29 = smov (%p1467_p11, %s1466_s29), 0  ;;  %s1332_s28 = sadd.s32 1, %s2313_s28  }
 0x179   : >> { %s1919_s30 = sshll.u32 %s2886_s29, 8  ;;  %p1331_p12 = scmp.ge.s32.totalorder %s1332_s28, %s2686_s26 }
 0x17a   : >> { %s1471_s20 = scalar_lea.vmem %s2487_s12, %s1919_s30 [#allocation2]   ;;  %s1472_s15 = scalar_lea.vmem %s2680_s24, %s1919_s30  }
 0x17b   : >> { %s2879_s27 = smov %s2886_s29  ;;  %1334 = sbr.rel (!%p1331_p12) target bundleno = 334 (0x14e), region = 118 }
 0x182 PF: > { %s2854_s4 = sand.u32 63, %s2884_s18   ;;  %s1994_s5 = sshll.u32 %s2686_s26, 8 }
 0x183   : > { %s1477_s6 = scalar_lea.vmem %s2487_s12, %s1994_s5 [#allocation2]   ;;  %s1479_s7 = scalar_lea.vmem %s2680_s24, %s1994_s5  }
 0x184   : > { %p1924_p13 = scmp.le.s32.totalorder %s2854_s4, 0 }
 0x185   : > { %s2315_s8 = smov (!%p1924_p13), %s1479_s7   ;;  %s2319_s9 = smov (!%p1924_p13), %s1477_s6  }
 0x186   : > { %1741 = sbr.rel (%p1924_p13) target bundleno = 407 (0x197), region = 123  ;;  %s2323_s10 = smov (!%p1924_p13), 0  }
 0x187   : > { %s2327_s11 = smov (!%p1924_p13), 0  }
 0x18d LB: >> { %v1489_v46 = vld [vmem:[%s2321_s9] sm:$0xf]  ;;  %s1491_s14 = sadd.s32 1, %s2325_s10  ;;  %s1483_s11 = sadd.s32 1, %s2329_s11   ;;  %s2329_s11 = sphi %s2327_s11, %s1483_s11   ;;  %s2325_s10 = sphi %s2323_s10, %s2324_s10   ;;  %s2321_s9 = sphi %s2319_s9, %s1496_s9   ;;  %s2317_s8 = sphi %s2315_s8, %s1497_s8  }
 0x18e   : >> { %1490 = vst [vmem:[%s2317_s8] sm:$0xf] %v1489_v46  ;;  %p1492_p0 = scmp.ge.s32.totalorder %s1491_s14, %s2854_s4  ;;  %p1482_p1 = scmp.ge.s32.totalorder %s1483_s11, %s2854_s4 }
 0x190   : >> { %s2888_s14 = smov (%p1492_p0, %s1491_s14), 0  ;;  %1485 = sbr.rel (!%p1482_p1) target bundleno = 397 (0x18d), region = 129 }
 0x191   : >> { %s1925_s17 = sshll.u32 %s2888_s14, 2  ;;  %s2324_s10 = smov %s2888_s14  }
 0x192   : >> { %s1496_s9 = scalar_lea.vmem %s1477_s6, %s1925_s17 [#allocation2]   ;;  %s1497_s8 = scalar_lea.vmem %s1479_s7, %s1925_s17  }
 0x197 PF: > { %p10_p2 = scmp.ge.s32.totalorder %s2367_s16, 12   ;;  %s2880_s12 = smov %s2293_s13 }
 0x198   : > { %s2881_s13 = smov %s2375_s19  ;;  %s2882_s14 = smov %s2367_s16 }
 0x199   :  { %12 = sbr.rel (!%p10_p2) target bundleno = 2 (0x2), region = 140 }

// kernel: pilotnet_forward.7
= control target key start
LH: loop header
LB: loop body
LE: loop exit
PB: predicated region body
PF: predicated region fallthrough
CT: control target
= control target key end

     0   :  { %s4522_s12 = smov 0   ;;  %s4524_s13 = smov 0   ;;  %s5637_s0 = inlined_call_operand.vmem [shape: bf16[1110,600], index: 0, kind: input, shape index: {}]   ;;  %s5638_s1 = inlined_call_operand.vmem [shape: bf16[600,36], index: 1, kind: input, shape index: {}]   ;;  %s5639_s2 = inlined_call_operand.vmem [shape: f32[1,36], index: 2, kind: input, shape index: {}]   ;;  %s5640_s3 = inlined_call_operand.vmem [shape: bf16[1110,36], index: 3, kind: output, shape index: {}]  }
   0x1   :  { %s4526_s14 = smov 0  }
   0x2 LB: > { %s4535_s15 = sadd.s32 4294967295, %s4467_s14   ;;  %s4537_s16 = sadd.s32 1, %s4467_s14   ;;  %s4467_s14 = sphi %s4526_s14, %s5683_s14   ;;  %s4463_s13 = sphi %s4524_s13, %s5682_s13   ;;  %s4459_s12 = sphi %s4522_s12, %s5681_s12  }
   0x3   : > { %s85_s17 = ssub.s32 %s4467_s14, %s4537_s16  ;;  %s88_s18 = sadd.s32 1, %s4463_s13 }
   0x4   : > { %p86_p0 = scmp.eq.s32.totalorder %s85_s17, 0  ;;  %p98_p1 = scmp.ne.s32.totalorder %s4463_s13, %s4459_s12 }
   0x5   : > { %p99_p2 = scmp.eq.s32.totalorder %s4535_s15, 2  ;;  %p3386_p3 = scmp.ge.s32.totalorder %s4467_s14, 1 }
   0x6   : > { %s4545_s19 = scalar_select %p86_p0, %s4463_s13, %s88_s18  }
   0x7   : > { %p4547_p4 = por %p99_p2, %p98_p1  ;;  %p149_p5 = scmp.lt.s32.totalorder %s4467_s14, 4 }
   0x9   : > { %p150_p6 = pnand %p3386_p3, %p149_p5 }
   0xb   : > { %153 = sbr.rel (%p150_p6) target bundleno = 711 (0x2c7), region = 32 }
  0x12   : > { %v4150_v0 = vld [vmem:[%s5638_s1] sm:$0xff]   ;;  %v4501_v1 = vmov 0   ;;  %s4557_s23 = sshll.u32 %s4535_s15, 6  ;;  %v4151_v2 = vld [vmem:[%s5638_s1 + $0x8] sm:$0xff]   ;;  %v4152_v3 = vld [vmem:[%s5638_s1 + $0x10] sm:$0xff]   ;;  %vm1597_vm0 = vcmask 1043456  }
  0x13   : > { %1601 = vmatprep.subr.bf16.mxu0 %v4501_v1  ;;  %3883 = vmatprep.subr.bf16.mxu1 %v4501_v1  ;;  %p184_p7 = scmp.lt.s32.totalorder %s4557_s23, 138  ;;  %v4153_v4 = vld [vmem:[%s5638_s1 + $0x18] sm:$0xff]   ;;  %v4154_v5 = vld [vmem:[%s5638_s1 + $0x20] sm:$0xff]   ;;  %v4155_v7 = vld [vmem:[%s5638_s1 + $0x28] sm:$0xff]   ;;  %vm1500_vm1 = vcmask 719872   ;;  %s175_s27 = sand.u32 1, %s4459_s12  }
  0x14   : > { %1602 = vmatpush1.bf16.msra.mxu0 %v4150_v0  ;;  %3899 = vmatpush1.bf16.msra.mxu1 %v4150_v0  ;;  %v4156_v9 = vld [vmem:[%s5638_s1 + $0x30] sm:$0xff]   ;;  %v4157_v10 = vld [vmem:[%s5638_s1 + $0x38] sm:$0xff]   ;;  %v4158_v11 = vld [vmem:[%s5638_s1 + $0x40] sm:$0xff]   ;;  %vm2852_vm2 = vcmask 289792   ;;  %s3766_s5 = sshll.u32 (%p4547_p4), %s4535_s15, 8 }
  0x15   : > { %1603 = vmatprep.subr.bf16.mxu0 %v4501_v1  ;;  %3884 = vmatprep.subr.bf16.mxu1 %v4501_v1  ;;  %s185_s28 = scalar_select %p184_p7, %s4557_s23, 138  ;;  %v4159_v12 = vld [vmem:[%s5638_s1 + $0x48] sm:$0xff]   ;;  %v4160_v13 = vld [vmem:[%s5638_s1 + $0x50] sm:$0xff]   ;;  %v4161_v14 = vld [vmem:[%s5638_s1 + $0x58] sm:$0xff]  }
  0x16   : > { %v4162_v15 = vld [vmem:[%s5638_s1 + $0x60] sm:$0xff]   ;;  %v4163_v16 = vld [vmem:[%s5638_s1 + $0x68] sm:$0xff]   ;;  %v4164_v17 = vld [vmem:[%s5638_s1 + $0x70] sm:$0xff]   ;;  %s5445_s8 = scalar_lea.vmem (%p4547_p4), %s5640_s3, %s3766_s5  }
  0x17   : > { %s4060_s4 = smul.u32 20, %s185_s28  ;;  %v4165_v18 = vld [vmem:[%s5638_s1 + $0x78] sm:$0xff]   ;;  %v4173_v19 = vld [vmem:[%s5638_s1 + $0x100] sm:$0xff]   ;;  %v4206_v25 = vld [vmem:[%s5638_s1 + $0x108] sm:$0xff]   ;;  %s3387_s28 = sshll.u32 %s175_s27, 8 }
  0x18   : > { %1604 = vmatpush1.bf16.msra.mxu0 %v4151_v2  ;;  %3900 = vmatpush1.bf16.msra.mxu1 %v4151_v2  ;;  %v4172_v22 = vld [vmem:[%s5638_s1 + $0x80] sm:$0xff]   ;;  %v4174_v26 = vld [vmem:[%s5638_s1 + $0x88] sm:$0xff]   ;;  %v4238_v27 = vld [vmem:[%s5638_s1 + $0x110] sm:$0xff]   ;;  %s5139_s12 = scalar_lea.vmem [#allocation2], %s3387_s28  }
  0x19   : > { %1605 = vmatprep.subr.bf16.mxu0 %v4501_v1  ;;  %3885 = vmatprep.subr.bf16.mxu1 %v4501_v1  ;;  %s4582_s9 = scalar_lea.vmem %s5637_s0, %s4060_s4  ;;  %v4181_v30 = vld [vmem:[%s5638_s1 + $0x90] sm:$0xff]   ;;  %v4263_v33 = vld [vmem:[%s5638_s1 + $0x118] sm:$0xff]   ;;  %v4189_v37 = vld [vmem:[%s5638_s1 + $0xa0] sm:$0xff]   ;;  %s2925_s4 = ssub.s32 (%p4547_p4), 139, %s4557_s23 }
  0x1a   : > { %v4168_v6 = vld [vmem:[%s4582_s9 + $0x4] ss:$20 sps:$4 sm:$0xff]   ;;  %v4166_v20 = vld [vmem:[%s4582_s9] ss:$20 sps:$4 sm:$0xff]   ;;  %v4179_v28 = vld [vmem:[%s4582_s9 + $0x28] ss:$20 sps:$4 sm:$0xff]  }
  0x1b   : > { %v4171_v8 = vld [vmem:[%s4582_s9 + $0x144] ss:$20 sps:$4 sm:$0xff]   ;;  %1633 = vmatprep.mubr.bf16.mxu0 %v4168_v6  ;;  %v4169_v21 = vld [vmem:[%s4582_s9 + $0x140] ss:$20 sps:$4 sm:$0xff]   ;;  %v4180_v29 = vld [vmem:[%s4582_s9 + $0x168] ss:$20 sps:$4 sm:$0xff]  }
  0x1c   : > { %1606 = vmatpush1.bf16.msra.mxu0 %v4152_v3  ;;  %3901 = vmatpush1.bf16.msra.mxu1 %v4152_v3  ;;  %v4175_v23 = vld [vmem:[%s4582_s9 + $0x2c] ss:$20 sps:$4 sm:$0xff]   ;;  %v4183_v31 = vld [vmem:[%s4582_s9 + $0x54] ss:$20 sps:$4 sm:$0xff]   ;;  %v4182_v34 = vld [vmem:[%s5638_s1 + $0x98] sm:$0xff]   ;;  %p2926_p8 = scmp.lt.s32.totalorder (%p4547_p4), %s2925_s4, 64 }
  0x1d   : > { %1607 = vmatprep.subr.bf16.mxu0 %v4501_v1  ;;  %3886 = vmatprep.subr.bf16.mxu1 %v4501_v1  ;;  %v4177_v24 = vld [vmem:[%s4582_s9 + $0x16c] ss:$20 sps:$4 sm:$0xff]   ;;  %v4185_v32 = vld [vmem:[%s4582_s9 + $0x194] ss:$20 sps:$4 sm:$0xff]   ;;  %v4187_v35 = vld [vmem:[%s4582_s9 + $0x50] ss:$20 sps:$4 sm:$0xff]  }
  0x1e   : > { %1697 = vmatprep.mubr.bf16.mxu1 %v4171_v8  ;;  %v4188_v36 = vld [vmem:[%s4582_s9 + $0x190] ss:$20 sps:$4 sm:$0xff]   ;;  %v4190_v40 = vld [vmem:[%s5638_s1 + $0xa8] sm:$0xff]   ;;  %v4198_v47 = vld [vmem:[%s5638_s1 + $0xb8] sm:$0xff]  }
  0x1f   : > { %v4191_v38 = vld [vmem:[%s4582_s9 + $0x7c] ss:$20 sps:$4 sm:$0xff]   ;;  %v4288_v41 = vld [vmem:[%s5638_s1 + $0x120] sm:$0xff]   ;;  %v4195_v42 = vld [vmem:[%s4582_s9 + $0x78] ss:$20 sps:$4 sm:$0xff]  }
  0x20   : > { %1608 = vmatpush1.bf16.msra.mxu0 %v4153_v4  ;;  %3902 = vmatpush1.bf16.msra.mxu1 %v4153_v4  ;;  %v4193_v39 = vld [vmem:[%s4582_s9 + $0x1bc] ss:$20 sps:$4 sm:$0xff]   ;;  %v4196_v43 = vld [vmem:[%s4582_s9 + $0x1b8] ss:$20 sps:$4 sm:$0xff]   ;;  %v4203_v48 = vld [vmem:[%s4582_s9 + $0xa0] ss:$20 sps:$4 sm:$0xff]  }
  0x21   : > { %1609 = vmatprep.subr.bf16.mxu0 %v4501_v1  ;;  %3887 = vmatprep.subr.bf16.mxu1 %v4501_v1  ;;  %v4197_v44 = vld [vmem:[%s5638_s1 + $0xb0] sm:$0xff]   ;;  %v4199_v45 = vld [vmem:[%s4582_s9 + $0xa4] ss:$20 sps:$4 sm:$0xff]   ;;  %v4208_v51 = vld [vmem:[%s4582_s9 + $0xcc] ss:$20 sps:$4 sm:$0xff]  }
  0x22   : > { %v4201_v46 = vld [vmem:[%s4582_s9 + $0x1e4] ss:$20 sps:$4 sm:$0xff]   ;;  %v4204_v49 = vld [vmem:[%s4582_s9 + $0x1e0] ss:$20 sps:$4 sm:$0xff]   ;;  %v4313_v53 = vld [vmem:[%s5638_s1 + $0x128] ss:$0 sps:$4 sm:$0xff]  }
  0x23   : > { %v4205_v50 = vld [vmem:[%s5638_s1 + $0xc0] sm:$0xff]   ;;  %v4207_v54 = vld [vmem:[%s5638_s1 + $0xc8] sm:$0xff]   ;;  %v1599_v57 = vsel %vm1597_vm0, %v4313_v53, 0  ;;  %v4214_v58 = vld [vmem:[%s5638_s1 + $0xd0] sm:$0xff]  }
  0x24   : > { %1610 = vmatpush1.bf16.msra.mxu0 %v4154_v5  ;;  %3903 = vmatpush1.bf16.msra.mxu1 %v4154_v5  ;;  %v4210_v52 = vld [vmem:[%s4582_s9 + $0x20c] ss:$20 sps:$4 sm:$0xff]   ;;  %v4212_v55 = vld [vmem:[%s4582_s9 + $0xc8] ss:$20 sps:$4 sm:$0xff]   ;;  %v4220_v62 = vld [vmem:[%s4582_s9 + $0xf0] ss:$20 sps:$4 sm:$0xff]  }
  0x25   : > { %1611 = vmatprep.subr.bf16.mxu0 %v4501_v1  ;;  %3888 = vmatprep.subr.bf16.mxu1 %v4501_v1  ;;  %v4213_v56 = vld [vmem:[%s4582_s9 + $0x208] ss:$20 sps:$4 sm:$0xff]   ;;  %v4221_v63 = vld [vmem:[%s4582_s9 + $0x230] ss:$20 sps:$4 sm:$0xff]   ;;  %v4228_v5 = vld [vmem:[%s4582_s9 + $0x118] ss:$20 sps:$4 sm:$0xff]  }
  0x26   : > { %v4216_v59 = vld [vmem:[%s4582_s9 + $0xf4] ss:$20 sps:$4 sm:$0xff]   ;;  %v4215_v61 = vld [vmem:[%s5638_s1 + $0xd8] sm:$0xff]   ;;  %v4222_v0 = vld [vmem:[%s5638_s1 + $0xe0] sm:$0xff]  }
  0x27   : > { %v4218_v60 = vld [vmem:[%s4582_s9 + $0x234] ss:$20 sps:$4 sm:$0xff]   ;;  %v4224_v2 = vld [vmem:[%s4582_s9 + $0x11c] ss:$20 sps:$4 sm:$0xff]   ;;  %v4229_v6 = vld [vmem:[%s4582_s9 + $0x258] ss:$20 sps:$4 sm:$0xff]  }
  0x28   : > { %1612 = vmatpush1.bf16.msra.mxu0 %v4155_v7  ;;  %3904 = vmatpush1.bf16.msra.mxu1 %v4155_v7  ;;  %v4226_v3 = vld [vmem:[%s4582_s9 + $0x25c] ss:$20 sps:$4 sm:$0xff]   ;;  %v4223_v4 = vld [vmem:[%s5638_s1 + $0xe8] sm:$0xff]   ;;  %v4232_v8 = vld [vmem:[%s4582_s9 + $0x284] ss:$20 sps:$4 sm:$0xff]  }
  0x29   : > { %1613 = vmatprep.subr.bf16.mxu0 %v4501_v1  ;;  %3889 = vmatprep.subr.bf16.mxu1 %v4501_v1  ;;  %v4230_v7 = vld [vmem:[%s5638_s1 + $0xf0] sm:$0xff]  }
  0x2c   : > { %1614 = vmatpush1.bf16.msra.mxu0 %v4156_v9  ;;  %3905 = vmatpush1.bf16.msra.mxu1 %v4156_v9  ;;  %v4236_v9 = vld [vmem:[%s4582_s9 + $0xc] ss:$20 sps:$4 sm:$0xff]  }
  0x2d   : > { %1615 = vmatprep.subr.bf16.mxu0 %v4501_v1  ;;  %3890 = vmatprep.subr.bf16.mxu1 %v4501_v1 }
  0x30   : > { %1616 = vmatpush1.bf16.msra.mxu0 %v4157_v10  ;;  %3906 = vmatpush1.bf16.msra.mxu1 %v4157_v10  ;;  %v4231_v10 = vld [vmem:[%s5638_s1 + $0xf8] sm:$0xff]  }
  0x31   : > { %1617 = vmatprep.subr.bf16.mxu0 %v4501_v1  ;;  %3891 = vmatprep.subr.bf16.mxu1 %v4501_v1 }
  0x34   : > { %1618 = vmatpush1.bf16.msra.mxu0 %v4158_v11  ;;  %3907 = vmatpush1.bf16.msra.mxu1 %v4158_v11  ;;  %v4234_v11 = vld [vmem:[%s4582_s9 + $0x8] ss:$20 sps:$4 sm:$0xff]  }
  0x35   : > { %1619 = vmatprep.subr.bf16.mxu0 %v4501_v1  ;;  %3892 = vmatprep.subr.bf16.mxu1 %v4501_v1 }
  0x38   : > { %1620 = vmatpush1.bf16.msra.mxu0 %v4159_v12  ;;  %3908 = vmatpush1.bf16.msra.mxu1 %v4159_v12  ;;  %v4237_v12 = vld [vmem:[%s4582_s9 + $0x280] ss:$20 sps:$4 sm:$0xff]  }
  0x39   : > { %1621 = vmatprep.subr.bf16.mxu0 %v4501_v1  ;;  %3893 = vmatprep.subr.bf16.mxu1 %v4501_v1 }
  0x3c   : > { %1622 = vmatpush1.bf16.msra.mxu0 %v4160_v13  ;;  %3909 = vmatpush1.bf16.msra.mxu1 %v4160_v13  ;;  %v4239_v13 = vld [vmem:[%s4582_s9 + $0x2ac] ss:$20 sps:$4 sm:$0xff]  }
  0x3d   : > { %1623 = vmatprep.subr.bf16.mxu0 %v4501_v1  ;;  %3894 = vmatprep.subr.bf16.mxu1 %v4501_v1 }
  0x40   : > { %1624 = vmatpush1.bf16.msra.mxu0 %v4161_v14  ;;  %3910 = vmatpush1.bf16.msra.mxu1 %v4161_v14  ;;  %v4241_v14 = vld [vmem:[%s4582_s9 + $0x34] ss:$20 sps:$4 sm:$0xff]  }
  0x41   : > { %1625 = vmatprep.subr.bf16.mxu0 %v4501_v1  ;;  %3895 = vmatprep.subr.bf16.mxu1 %v4501_v1 }
  0x44   : > { %1626 = vmatpush1.bf16.msra.mxu0 %v4162_v15  ;;  %3911 = vmatpush1.bf16.msra.mxu1 %v4162_v15  ;;  %v4243_v15 = vld [vmem:[%s4582_s9 + $0x2a8] ss:$20 sps:$4 sm:$0xff]  }
  0x45   : > { %1627 = vmatprep.subr.bf16.mxu0 %v4501_v1  ;;  %3896 = vmatprep.subr.bf16.mxu1 %v4501_v1 }
  0x48   : > { %1628 = vmatpush1.bf16.msra.mxu0 %v4163_v16  ;;  %3912 = vmatpush1.bf16.msra.mxu1 %v4163_v16  ;;  %v4244_v16 = vld [vmem:[%s4582_s9 + $0x30] ss:$20 sps:$4 sm:$0xff]  }
  0x49   : > { %1629 = vmatprep.subr.bf16.mxu0 %v4501_v1  ;;  %3897 = vmatprep.subr.bf16.mxu1 %v4501_v1 }
  0x4c   : > { %1630 = vmatpush1.bf16.msra.mxu0 %v4164_v17  ;;  %3913 = vmatpush1.bf16.msra.mxu1 %v4164_v17  ;;  %v4245_v17 = vld [vmem:[%s4582_s9 + $0x2d4] ss:$20 sps:$4 sm:$0xff]  }
  0x4d   : > { %1631 = vmatprep.subr.bf16.mxu0 %v4501_v1  ;;  %3898 = vmatprep.subr.bf16.mxu1 %v4501_v1 }
  0x50   : > { %1632 = vmatpush1.bf16.msra.mxu0 %v4165_v18  ;;  %3914 = vmatpush1.bf16.msra.mxu1 %v4165_v18  ;;  %v4249_v18 = vld [vmem:[%s4582_s9 + $0x2d0] ss:$20 sps:$4 sm:$0xff]  }
  0x51   : > { %1890 = vmatprep.subr.bf16.mxu0 %v4501_v1  ;;  %3807 = vmatprep.subr.bf16.mxu1 %v4173_v19 }
  0x53   : > { %1634 = vmatmul.mubr.bf16.vlgmr.msra.gmra.mrb[0].mxu0 %v4166_v20  ;;  %1698 = vmatmul.mubr.bf16.vlgmr.msra.gmra.mrb[0].mxu1 %v4169_v21  ;;  %v4251_v20 = vld [vmem:[%s4582_s9 + $0x2fc] ss:$20 sps:$4 sm:$0xff]   ;;  %v4253_v21 = vld [vmem:[%s4582_s9 + $0x84] ss:$20 sps:$4 sm:$0xff]  }
  0x54   : > { %1891 = vmatpush1.bf16.msra.mxu0 %v4172_v22  ;;  %3808 = vmatpush3.bf16.msra.mxu1 %v4173_v19  ;;  %v4250_v19 = vld [vmem:[%s4582_s9 + $0x58] ss:$20 sps:$4 sm:$0xff]  }
  0x55   : > { %1892 = vmatprep.subr.bf16.mxu0 %v4501_v1  ;;  %1641 = vmatprep.mubr.bf16.mxu0 %v4175_v23  ;;  %v4255_v22 = vld [vmem:[%s4582_s9 + $0x2f8] ss:$20 sps:$4 sm:$0xff]   ;;  %v4256_v23 = vld [vmem:[%s4582_s9 + $0x80] ss:$20 sps:$4 sm:$0xff]  }
  0x56   : > { %1705 = vmatprep.mubr.bf16.mxu1 %v4177_v24  ;;  %3809 = vmatprep.subr.bf16.mxu1 %v4206_v25  ;;  %v4257_v24 = vld [vmem:[%s4582_s9 + $0x324] ss:$20 sps:$4 sm:$0xff]  }
  0x58   : > { %1893 = vmatpush1.bf16.msra.mxu0 %v4174_v26  ;;  %3810 = vmatpush3.bf16.msra.mxu1 %v4206_v25  ;;  %v4259_v25 = vld [vmem:[%s4582_s9 + $0xac] ss:$20 sps:$4 sm:$0xff]  }
  0x59   : > { %1894 = vmatprep.subr.bf16.mxu0 %v4501_v1  ;;  %3811 = vmatprep.subr.bf16.mxu1 %v4238_v27  ;;  %v4261_v26 = vld [vmem:[%s4582_s9 + $0x320] ss:$20 sps:$4 sm:$0xff]  }
  0x5b   : > { %1642 = vmatmul.mubr.bf16.gmra.mrb[4].mxu0 %v4179_v28  ;;  %1706 = vmatmul.mubr.bf16.gmra.mrb[4].mxu1 %v4180_v29  ;;  %v4264_v28 = vld [vmem:[%s4582_s9 + $0x34c] ss:$20 sps:$4 sm:$0xff]   ;;  %v4266_v29 = vld [vmem:[%s4582_s9 + $0xd4] ss:$20 sps:$4 sm:$0xff]  }
  0x5c   : > { %1895 = vmatpush1.bf16.msra.mxu0 %v4181_v30  ;;  %1649 = vmatprep.mubr.bf16.mxu0 %v4183_v31  ;;  %v4268_v30 = vld [vmem:[%s4582_s9 + $0x348] ss:$20 sps:$4 sm:$0xff]   ;;  %v4269_v31 = vld [vmem:[%s4582_s9 + $0xd0] ss:$20 sps:$4 sm:$0xff]  }
  0x5d   : > { %1896 = vmatprep.subr.bf16.mxu0 %v4501_v1  ;;  %1713 = vmatprep.mubr.bf16.mxu1 %v4185_v32  ;;  %v4270_v32 = vld [vmem:[%s4582_s9 + $0x374] ss:$20 sps:$4 sm:$0xff]  }
  0x5e   : > { %3812 = vmatpush3.bf16.msra.mxu1 %v4238_v27  ;;  %v4262_v27 = vld [vmem:[%s4582_s9 + $0xa8] ss:$20 sps:$4 sm:$0xff]  }
  0x5f   : > { %3813 = vmatprep.subr.bf16.mxu1 %v4263_v33 }
  0x60   : > { %1897 = vmatpush1.bf16.msra.mxu0 %v4182_v34  ;;  %v4274_v34 = vld [vmem:[%s4582_s9 + $0x370] ss:$20 sps:$4 sm:$0xff]  }
  0x61   : > { %1898 = vmatprep.subr.bf16.mxu0 %v4501_v1 }
  0x62   : > { %3814 = vmatpush3.bf16.msra.mxu1 %v4263_v33  ;;  %v4272_v33 = vld [vmem:[%s4582_s9 + $0xfc] ss:$20 sps:$4 sm:$0xff]  }
  0x63   : > { %1650 = vmatmul.mubr.bf16.gmra.mrb[8].mxu0 %v4187_v35  ;;  %1714 = vmatmul.mubr.bf16.gmra.mrb[8].mxu1 %v4188_v36  ;;  %v4275_v35 = vld [vmem:[%s4582_s9 + $0xf8] ss:$20 sps:$4 sm:$0xff]   ;;  %v4276_v36 = vld [vmem:[%s4582_s9 + $0x39c] ss:$20 sps:$4 sm:$0xff]  }
  0x64   : > { %1899 = vmatpush1.bf16.msra.mxu0 %v4189_v37  ;;  %1657 = vmatprep.mubr.bf16.mxu0 %v4191_v38  ;;  %v4278_v37 = vld [vmem:[%s4582_s9 + $0x124] ss:$20 sps:$4 sm:$0xff]  }
  0x65   : > { %1900 = vmatprep.subr.bf16.mxu0 %v4501_v1  ;;  %1721 = vmatprep.mubr.bf16.mxu1 %v4193_v39  ;;  %v4280_v38 = vld [vmem:[%s4582_s9 + $0x398] ss:$20 sps:$4 sm:$0xff]   ;;  %v4281_v39 = vld [vmem:[%s4582_s9 + $0x120] ss:$20 sps:$4 sm:$0xff]  }
  0x66   : > { %3815 = vmatprep.subr.bf16.mxu1 %v4288_v41 }
  0x67   : > { %3816 = vmatpush3.bf16.msra.mxu1 %v4288_v41  ;;  %v4284_v41 = vld [vmem:[%s4582_s9 + $0x14c] ss:$20 sps:$4 sm:$0xff]  }
  0x68   : > { %1901 = vmatpush1.bf16.msra.mxu0 %v4190_v40  ;;  %4059 = vmatprep.subr.msk.bf16.mxu1 %vm1597_vm0, %v4313_v53  ;;  %v4282_v40 = vld [vmem:[%s4582_s9 + $0x3c4] ss:$20 sps:$4 sm:$0xff]  }
  0x69   : > { %1902 = vmatprep.subr.bf16.mxu0 %v4501_v1  ;;  %v4303_v53 = vld [vmem:[%s4582_s9 + $0x1c4] ss:$20 sps:$4 sm:$0xff]  }
  0x6b   : > { %1658 = vmatmul.mubr.bf16.gmra.mrb[12].mxu0 %v4195_v42  ;;  %1722 = vmatmul.mubr.bf16.gmra.mrb[12].mxu1 %v4196_v43  ;;  %v4286_v42 = vld [vmem:[%s4582_s9 + $0x3c0] ss:$20 sps:$4 sm:$0xff]   ;;  %v4287_v43 = vld [vmem:[%s4582_s9 + $0x148] ss:$20 sps:$4 sm:$0xff]  }
  0x6c   : > { %1903 = vmatpush1.bf16.msra.mxu0 %v4197_v44  ;;  %1665 = vmatprep.mubr.bf16.mxu0 %v4199_v45  ;;  %v4289_v44 = vld [vmem:[%s4582_s9 + $0x3ec] ss:$20 sps:$4 sm:$0xff]   ;;  %v4291_v45 = vld [vmem:[%s4582_s9 + $0x174] ss:$20 sps:$4 sm:$0xff]  }
  0x6d   : > { %1904 = vmatprep.subr.bf16.mxu0 %v4501_v1  ;;  %1729 = vmatprep.mubr.bf16.mxu1 %v4201_v46  ;;  %v4293_v46 = vld [vmem:[%s4582_s9 + $0x3e8] ss:$20 sps:$4 sm:$0xff]  }
  0x6e   : > { %3818 = vmatpush3.bf16.msra.mxu1 %v1599_v57  ;;  %v4309_v57 = vld [vmem:[%s4582_s9 + $0x1ec] ss:$20 sps:$4 sm:$0xff]  }
  0x70   : > { %1905 = vmatpush1.bf16.msra.mxu0 %v4198_v47  ;;  %v4294_v47 = vld [vmem:[%s4582_s9 + $0x170] ss:$20 sps:$4 sm:$0xff]  }
  0x71   : > { %1906 = vmatprep.subr.bf16.mxu0 %v4501_v1 }
  0x73   : > { %1666 = vmatmul.mubr.bf16.gmra.mrb[16].mxu0 %v4203_v48  ;;  %1730 = vmatmul.mubr.bf16.gmra.mrb[16].mxu1 %v4204_v49  ;;  %v4295_v48 = vld [vmem:[%s4582_s9 + $0x414] ss:$20 sps:$4 sm:$0xff]   ;;  %v4297_v49 = vld [vmem:[%s4582_s9 + $0x19c] ss:$20 sps:$4 sm:$0xff]  }
  0x74   : > { %1907 = vmatpush1.bf16.msra.mxu0 %v4205_v50  ;;  %1673 = vmatprep.mubr.bf16.mxu0 %v4208_v51  ;;  %v4299_v50 = vld [vmem:[%s4582_s9 + $0x410] ss:$20 sps:$4 sm:$0xff]   ;;  %v4300_v51 = vld [vmem:[%s4582_s9 + $0x198] ss:$20 sps:$4 sm:$0xff]  }
  0x75   : > { %1908 = vmatprep.subr.bf16.mxu0 %v4501_v1  ;;  %1737 = vmatprep.mubr.bf16.mxu1 %v4210_v52  ;;  %v4301_v52 = vld [vmem:[%s4582_s9 + $0x43c] ss:$20 sps:$4 sm:$0xff]  }
  0x78   : > { %1909 = vmatpush1.bf16.msra.mxu0 %v4207_v54  ;;  %v4305_v54 = vld [vmem:[%s4582_s9 + $0x438] ss:$20 sps:$4 sm:$0xff]  }
  0x79   : > { %1910 = vmatprep.subr.bf16.mxu0 %v4501_v1 }
  0x7b   : > { %1674 = vmatmul.mubr.bf16.gmra.mrb[20].mxu0 %v4212_v55  ;;  %1738 = vmatmul.mubr.bf16.gmra.mrb[20].mxu1 %v4213_v56  ;;  %v4306_v55 = vld [vmem:[%s4582_s9 + $0x1c0] ss:$20 sps:$4 sm:$0xff]   ;;  %v4307_v56 = vld [vmem:[%s4582_s9 + $0x464] ss:$20 sps:$4 sm:$0xff]  }
  0x7c   : > { %1911 = vmatpush1.bf16.msra.mxu0 %v4214_v58  ;;  %1681 = vmatprep.mubr.bf16.mxu0 %v4216_v59  ;;  %v4311_v58 = vld [vmem:[%s4582_s9 + $0x460] ss:$20 sps:$4 sm:$0xff]   ;;  %v4312_v59 = vld [vmem:[%s4582_s9 + $0x1e8] ss:$20 sps:$4 sm:$0xff]  }
  0x7d   : > { %1912 = vmatprep.subr.bf16.mxu0 %v4501_v1  ;;  %1745 = vmatprep.mubr.bf16.mxu1 %v4218_v60  ;;  %v4314_v60 = vld [vmem:[%s4582_s9 + $0x48c] ss:$20 sps:$4 sm:$0xff]  }
  0x80   : > { %1913 = vmatpush1.bf16.msra.mxu0 %v4215_v61  ;;  %v4316_v61 = vld [vmem:[%s4582_s9 + $0x214] ss:$20 sps:$4 sm:$0xff]  }
  0x81   : > { %1914 = vmatprep.subr.bf16.mxu0 %v4501_v1 }
  0x83   : > { %1682 = vmatmul.mubr.bf16.gmra.mrb[24].mxu0 %v4220_v62  ;;  %1746 = vmatmul.mubr.bf16.gmra.mrb[24].mxu1 %v4221_v63  ;;  %v4318_v62 = vld [vmem:[%s4582_s9 + $0x488] ss:$20 sps:$4 sm:$0xff]   ;;  %v4319_v63 = vld [vmem:[%s4582_s9 + $0x210] ss:$20 sps:$4 sm:$0xff]  }
  0x84   : > { %1915 = vmatpush1.bf16.msra.mxu0 %v4222_v0  ;;  %1689 = vmatprep.mubr.bf16.mxu0 %v4224_v2  ;;  %v4320_v0 = vld [vmem:[%s4582_s9 + $0x4b4] ss:$20 sps:$4 sm:$0xff]   ;;  %v4322_v2 = vld [vmem:[%s4582_s9 + $0x23c] ss:$20 sps:$4 sm:$0xff]  }
  0x85   : > { %1916 = vmatprep.subr.bf16.mxu0 %v4501_v1  ;;  %1753 = vmatprep.mubr.bf16.mxu1 %v4226_v3  ;;  %v4324_v3 = vld [vmem:[%s4582_s9 + $0x4b0] ss:$20 sps:$4 sm:$0xff]  }
  0x88   : > { %1917 = vmatpush1.bf16.msra.mxu0 %v4223_v4  ;;  %v4325_v4 = vld [vmem:[%s4582_s9 + $0x238] ss:$20 sps:$4 sm:$0xff]  }
  0x89   : > { %1918 = vmatprep.subr.bf16.mxu0 %v4501_v1 }
  0x8b   : > { %1690 = vmatmul.mubr.bf16.gmra.mrb[28].mxu0 %v4228_v5  ;;  %1754 = vmatmul.mubr.bf16.gmra.mrb[28].mxu1 %v4229_v6  ;;  %v4326_v5 = vld [vmem:[%s4582_s9 + $0x4dc] ss:$20 sps:$4 sm:$0xff]   ;;  %v4328_v6 = vld [vmem:[%s4582_s9 + $0x264] ss:$20 sps:$4 sm:$0xff]  }
  0x8c   : > { %1919 = vmatpush1.bf16.msra.mxu0 %v4230_v7  ;;  %1761 = vmatprep.mubr.bf16.mxu1 %v4232_v8  ;;  %v4330_v7 = vld [vmem:[%s4582_s9 + $0x4d8] ss:$20 sps:$4 sm:$0xff]   ;;  %v4331_v8 = vld [vmem:[%s4582_s9 + $0x260] ss:$20 sps:$4 sm:$0xff]  }
  0x8d   : > { %1920 = vmatprep.subr.bf16.mxu0 %v4501_v1  ;;  %1922 = vmatprep.mubr.bf16.mxu0 %v4236_v9  ;;  %v4247_v1 = vld [vmem:[%s4582_s9 + $0x5c] ss:$20 sps:$4 sm:$0xff]   ;;  %v4332_v9 = vld [vmem:[%s4582_s9 + $0x28c] ss:$20 sps:$4 sm:$0xff]  }
  0x90   : > { %1921 = vmatpush1.bf16.msra.mxu0 %v4231_v10  ;;  %v4334_v10 = vld [vmem:[%s4582_s9 + $0x10] ss:$20 sps:$4 sm:$0xff]  }
  0x93   : > { %1762 = vmatmul.mubr.bf16.gmra.mrb[32].mxu1 %v4237_v12  ;;  %1923 = vmatmul.mubr.bf16.vlgmr.msra.gmra.mrb[0].mxu0 %v4234_v11  ;;  %v4335_v11 = vld [vmem:[%s4582_s9 + $0x288] ss:$20 sps:$4 sm:$0xff]   ;;  %v4336_v12 = vld [vmem:[%s4582_s9 + $0x38] ss:$20 sps:$4 sm:$0xff]  }
  0x94   : > { %1769 = vmatprep.mubr.bf16.mxu1 %v4239_v13  ;;  %1930 = vmatprep.mubr.bf16.mxu0 %v4241_v14  ;;  %v4337_v13 = vld [vmem:[%s4582_s9 + $0x2b4] ss:$20 sps:$4 sm:$0xff]  }
  0x95   : > { %v4339_v14 = vld [vmem:[%s4582_s9 + $0x60] ss:$20 sps:$4 sm:$0xff]  }
  0x9b   : > { %1770 = vmatmul.mubr.bf16.gmra.mrb[36].mxu1 %v4243_v15  ;;  %1931 = vmatmul.mubr.bf16.gmra.mrb[4].mxu0 %v4244_v16  ;;  %v4340_v15 = vld [vmem:[%s4582_s9 + $0x2b0] ss:$20 sps:$4 sm:$0xff]   ;;  %v4341_v16 = vld [vmem:[%s4582_s9 + $0x88] ss:$20 sps:$4 sm:$0xff]  }
  0x9c   : > { %1777 = vmatprep.mubr.bf16.mxu1 %v4245_v17  ;;  %1938 = vmatprep.mubr.bf16.mxu0 %v4247_v1  ;;  %v4342_v17 = vld [vmem:[%s4582_s9 + $0x2dc] ss:$20 sps:$4 sm:$0xff]  }
  0x9d   : > { %v4344_v1 = vld [vmem:[%s4582_s9 + $0xb0] ss:$20 sps:$4 sm:$0xff]  }
  0xa3   : > { %1778 = vmatmul.mubr.bf16.gmra.mrb[40].mxu1 %v4249_v18  ;;  %1939 = vmatmul.mubr.bf16.gmra.mrb[8].mxu0 %v4250_v19  ;;  %v4345_v18 = vld [vmem:[%s4582_s9 + $0x2d8] ss:$20 sps:$4 sm:$0xff]  }
  0xa4   : > { %1785 = vmatprep.mubr.bf16.mxu1 %v4251_v20  ;;  %1946 = vmatprep.mubr.bf16.mxu0 %v4253_v21  ;;  %v4346_v19 = vld [vmem:[%s4582_s9 + $0xd8] ss:$20 sps:$4 sm:$0xff]   ;;  %v4349_v21 = vld [vmem:[%s4582_s9 + $0x100] ss:$20 sps:$4 sm:$0xff]  }
  0xa5   : > { %v4347_v20 = vld [vmem:[%s4582_s9 + $0x304] ss:$20 sps:$4 sm:$0xff]  }
  0xab   : > { %1786 = vmatmul.mubr.bf16.gmra.mrb[44].mxu1 %v4255_v22  ;;  %1947 = vmatmul.mubr.bf16.gmra.mrb[12].mxu0 %v4256_v23 }
  0xac   : > { %1793 = vmatprep.mubr.bf16.mxu1 %v4257_v24  ;;  %1954 = vmatprep.mubr.bf16.mxu0 %v4259_v25  ;;  %v4350_v24 = vld [vmem:[%s4582_s9 + $0x300] ss:$20 sps:$4 sm:$0xff]   ;;  %v4351_v25 = vld [vmem:[%s4582_s9 + $0x128] ss:$20 sps:$4 sm:$0xff]  }
  0xb3   : > { %1794 = vmatmul.mubr.bf16.gmra.mrb[48].mxu1 %v4261_v26  ;;  %1955 = vmatmul.mubr.bf16.gmra.mrb[16].mxu0 %v4262_v27  ;;  %v4352_v27 = vld [vmem:[%s4582_s9 + $0x32c] ss:$20 sps:$4 sm:$0xff]  }
  0xb4   : > { %1801 = vmatprep.mubr.bf16.mxu1 %v4264_v28  ;;  %1962 = vmatprep.mubr.bf16.mxu0 %v4266_v29  ;;  %v4354_v28 = vld [vmem:[%s4582_s9 + $0x150] ss:$20 sps:$4 sm:$0xff]  }
  0xbb   : > { %1802 = vmatmul.mubr.bf16.gmra.mrb[52].mxu1 %v4268_v30  ;;  %1963 = vmatmul.mubr.bf16.gmra.mrb[20].mxu0 %v4269_v31 }
  0xbc   : > { %1809 = vmatprep.mubr.bf16.mxu1 %v4270_v32  ;;  %1970 = vmatprep.mubr.bf16.mxu0 %v4272_v33  ;;  %v4355_v32 = vld [vmem:[%s4582_s9 + $0x328] ss:$20 sps:$4 sm:$0xff]   ;;  %v4356_v33 = vld [vmem:[%s4582_s9 + $0x178] ss:$20 sps:$4 sm:$0xff]  }
  0xc3   : > { %1810 = vmatmul.mubr.bf16.gmra.mrb[56].mxu1 %v4274_v34  ;;  %1971 = vmatmul.mubr.bf16.gmra.mrb[24].mxu0 %v4275_v35  ;;  %v4357_v35 = vld [vmem:[%s4582_s9 + $0x354] ss:$20 sps:$4 sm:$0xff]  }
  0xc4   : > { %1817 = vmatprep.mubr.bf16.mxu1 %v4276_v36  ;;  %1978 = vmatprep.mubr.bf16.mxu0 %v4278_v37  ;;  %v4359_v36 = vld [vmem:[%s4582_s9 + $0x1a0] ss:$20 sps:$4 sm:$0xff]  }
  0xcb   : > { %1818 = vmatmul.mubr.bf16.gmra.mrb[60].mxu1 %v4280_v38  ;;  %1979 = vmatmul.mubr.bf16.gmra.mrb[28].mxu0 %v4281_v39 }
  0xcc   : > { %1825 = vmatprep.mubr.bf16.mxu1 %v4282_v40  ;;  %1986 = vmatprep.mubr.bf16.mxu0 %v4284_v41  ;;  %v4360_v40 = vld [vmem:[%s4582_s9 + $0x350] ss:$20 sps:$4 sm:$0xff]   ;;  %v4361_v41 = vld [vmem:[%s4582_s9 + $0x1c8] ss:$20 sps:$4 sm:$0xff]  }
  0xd3   : > { %1826 = vmatmul.mubr.bf16.gmra.mrb[64].mxu1 %v4286_v42  ;;  %1987 = vmatmul.mubr.bf16.gmra.mrb[32].mxu0 %v4287_v43  ;;  %v4362_v43 = vld [vmem:[%s4582_s9 + $0x37c] ss:$20 sps:$4 sm:$0xff]  }
  0xd4   : > { %1833 = vmatprep.mubr.bf16.mxu1 %v4289_v44  ;;  %1994 = vmatprep.mubr.bf16.mxu0 %v4291_v45  ;;  %v4364_v44 = vld [vmem:[%s4582_s9 + $0x1f0] ss:$20 sps:$4 sm:$0xff]  }
  0xdb   : > { %1834 = vmatmul.mubr.bf16.gmra.mrb[68].mxu1 %v4293_v46  ;;  %1995 = vmatmul.mubr.bf16.gmra.mrb[36].mxu0 %v4294_v47 }
  0xdc   : > { %1841 = vmatprep.mubr.bf16.mxu1 %v4295_v48  ;;  %2002 = vmatprep.mubr.bf16.mxu0 %v4297_v49  ;;  %v4365_v48 = vld [vmem:[%s4582_s9 + $0x378] ss:$20 sps:$4 sm:$0xff]  }
  0xdd   : > { %v4366_v49 = vld [vmem:[%s4582_s9 + $0x218] ss:$20 sps:$4 sm:$0xff]  }
  0xe3   : > { %1842 = vmatmul.mubr.bf16.gmra.mrb[72].mxu1 %v4299_v50  ;;  %2003 = vmatmul.mubr.bf16.gmra.mrb[40].mxu0 %v4300_v51  ;;  %v4367_v51 = vld [vmem:[%s4582_s9 + $0x3a4] ss:$20 sps:$4 sm:$0xff]  }
  0xe4   : > { %1849 = vmatprep.mubr.bf16.mxu1 %v4301_v52  ;;  %2010 = vmatprep.mubr.bf16.mxu0 %v4303_v53  ;;  %v4369_v52 = vld [vmem:[%s4582_s9 + $0x240] ss:$20 sps:$4 sm:$0xff]  }
  0xeb   : > { %1850 = vmatmul.mubr.bf16.gmra.mrb[76].mxu1 %v4305_v54  ;;  %2011 = vmatmul.mubr.bf16.gmra.mrb[44].mxu0 %v4306_v55 }
  0xec   : > { %1857 = vmatprep.mubr.bf16.mxu1 %v4307_v56  ;;  %2018 = vmatprep.mubr.bf16.mxu0 %v4309_v57  ;;  %v4370_v56 = vld [vmem:[%s4582_s9 + $0x3a0] ss:$20 sps:$4 sm:$0xff]   ;;  %v4371_v57 = vld [vmem:[%s4582_s9 + $0x268] ss:$20 sps:$4 sm:$0xff]  }
  0xf3   : > { %1858 = vmatmul.mubr.bf16.gmra.mrb[80].mxu1 %v4311_v58  ;;  %2019 = vmatmul.mubr.bf16.gmra.mrb[48].mxu0 %v4312_v59  ;;  %v4372_v59 = vld [vmem:[%s4582_s9 + $0x3cc] ss:$20 sps:$4 sm:$0xff]  }
  0xf4   : > { %1865 = vmatprep.mubr.bf16.mxu1 %v4314_v60  ;;  %2026 = vmatprep.mubr.bf16.mxu0 %v4316_v61  ;;  %v4374_v60 = vld [vmem:[%s4582_s9 + $0x290] ss:$20 sps:$4 sm:$0xff]  }
  0xfb   : > { %1866 = vmatmul.mubr.bf16.gmra.mrb[84].mxu1 %v4318_v62  ;;  %2027 = vmatmul.mubr.bf16.gmra.mrb[52].mxu0 %v4319_v63 }
  0xfc   : > { %1873 = vmatprep.mubr.bf16.mxu1 %v4320_v0  ;;  %2034 = vmatprep.mubr.bf16.mxu0 %v4322_v2  ;;  %v4375_v0 = vld [vmem:[%s4582_s9 + $0x3c8] ss:$20 sps:$4 sm:$0xff]   ;;  %v4376_v2 = vld [vmem:[%s4582_s9 + $0x2b8] ss:$20 sps:$4 sm:$0xff]  }
 0x103   : > { %1874 = vmatmul.mubr.bf16.gmra.mrb[88].mxu1 %v4324_v3  ;;  %2035 = vmatmul.mubr.bf16.gmra.mrb[56].mxu0 %v4325_v4  ;;  %v4377_v4 = vld [vmem:[%s4582_s9 + $0x3f4] ss:$20 sps:$4 sm:$0xff]  }
 0x104   : > { %1881 = vmatprep.mubr.bf16.mxu1 %v4326_v5  ;;  %2042 = vmatprep.mubr.bf16.mxu0 %v4328_v6  ;;  %v4379_v5 = vld [vmem:[%s4582_s9 + $0x2e0] ss:$20 sps:$4 sm:$0xff]  }
 0x10b   : > { %1882 = vmatmul.mubr.bf16.gmra.mrb[92].mxu1 %v4330_v7  ;;  %2043 = vmatmul.mubr.bf16.gmra.mrb[60].mxu0 %v4331_v8 }
 0x10c   : > { %2050 = vmatprep.mubr.bf16.mxu0 %v4332_v9  ;;  %3819 = vmatprep.mubr.msk.bf16.mxu1 %vm1500_vm1, %v4334_v10  ;;  %v4380_v9 = vld [vmem:[%s4582_s9 + $0x3f0] ss:$20 sps:$4 sm:$0xff]   ;;  %v4381_v10 = vld [vmem:[%s4582_s9 + $0x308] ss:$20 sps:$4 sm:$0xff]  }
 0x113   : > { %2051 = vmatmul.mubr.bf16.gmra.mrb[64].mxu0 %v4335_v11  ;;  %3820 = vmatmul.mubr.msk.bf16.vlgmr.msra.gmra.mrb[96].mxu1 %vm1500_vm1, %v4336_v12  ;;  %v4382_v12 = vld [vmem:[%s4582_s9 + $0x41c] ss:$20 sps:$4 sm:$0xff]  }
 0x114   : > { %2058 = vmatprep.mubr.bf16.mxu0 %v4337_v13  ;;  %3823 = vmatprep.mubr.msk.bf16.mxu1 %vm1500_vm1, %v4339_v14  ;;  %v4384_v13 = vld [vmem:[%s4582_s9 + $0x330] ss:$20 sps:$4 sm:$0xff]  }
 0x11b   : > { %2059 = vmatmul.mubr.bf16.gmra.mrb[68].mxu0 %v4340_v15  ;;  %3824 = vmatmul.mubr.msk.bf16.gmra.mrb[100].mxu1 %vm1500_vm1, %v4341_v16 }
 0x11c   : > { %2066 = vmatprep.mubr.bf16.mxu0 %v4342_v17  ;;  %3827 = vmatprep.mubr.msk.bf16.mxu1 %vm1500_vm1, %v4344_v1  ;;  %v4385_v17 = vld [vmem:[%s4582_s9 + $0x418] ss:$20 sps:$4 sm:$0xff]  }
 0x11d   : > { %v4386_v1 = vld [vmem:[%s4582_s9 + $0x358] ss:$20 sps:$4 sm:$0xff]  }
 0x123   : > { %2067 = vmatmul.mubr.bf16.gmra.mrb[72].mxu0 %v4345_v18  ;;  %3828 = vmatmul.mubr.msk.bf16.gmra.mrb[104].mxu1 %vm1500_vm1, %v4346_v19  ;;  %v4387_v19 = vld [vmem:[%s4582_s9 + $0x444] ss:$20 sps:$4 sm:$0xff]  }
 0x124   : > { %2074 = vmatprep.mubr.bf16.mxu0 %v4347_v20  ;;  %3831 = vmatprep.mubr.msk.bf16.mxu1 %vm1500_vm1, %v4349_v21  ;;  %v4389_v20 = vld [vmem:[%s4582_s9 + $0x380] ss:$20 sps:$4 sm:$0xff]  }
 0x126   : > { %v4840_v22 = vpop.f32.mrb[0].mxu1 }
 0x127   : > { %v1701_v23 = vpop.f32.mrb[1].mxu1 }
 0x128   : > { %v4844_v26 = vpop.f32.mrb[2].mxu1 }
 0x129   : > { %v1704_v29 = vpop.f32.mrb[3].mxu1 }
 0x12a   : > { %v4391_v29 = vld [vmem:[%s4582_s9 + $0x3a8] ss:$20 sps:$4 sm:$0xff]  }
 0x12b   : > { %2075 = vmatmul.mubr.bf16.gmra.mrb[76].mxu0 %v4350_v24  ;;  %3832 = vmatmul.mubr.msk.bf16.gmra.mrb[108].mxu1 %vm1500_vm1, %v4351_v25 }
 0x12c   : > { %2082 = vmatprep.mubr.bf16.mxu0 %v4352_v27  ;;  %3835 = vmatprep.mubr.msk.bf16.mxu1 %vm1500_vm1, %v4354_v28  ;;  %v4390_v28 = vld [vmem:[%s4582_s9 + $0x440] ss:$20 sps:$4 sm:$0xff]  }
 0x12e   : > { %v4850_v30 = vpop.f32.mrb[4].mxu1 }
 0x12f   : > { %v1709_v31 = vpop.f32.mrb[5].mxu1 }
 0x130   : > { %v4854_v34 = vpop.f32.mrb[6].mxu1 }
 0x131   : > { %v1712_v37 = vpop.f32.mrb[7].mxu1 }
 0x133   : > { %2083 = vmatmul.mubr.bf16.gmra.mrb[80].mxu0 %v4355_v32  ;;  %3836 = vmatmul.mubr.msk.bf16.gmra.mrb[112].mxu1 %vm1500_vm1, %v4356_v33  ;;  %v4392_v33 = vld [vmem:[%s4582_s9 + $0x46c] ss:$20 sps:$4 sm:$0xff]  }
 0x134   : > { %2090 = vmatprep.mubr.bf16.mxu0 %v4357_v35  ;;  %3839 = vmatprep.mubr.msk.bf16.mxu1 %vm1500_vm1, %v4359_v36  ;;  %v4394_v35 = vld [vmem:[%s4582_s9 + $0x3d0] ss:$20 sps:$4 sm:$0xff]  }
 0x136   : > { %v4860_v38 = vpop.f32.mrb[8].mxu1 }
 0x137   : > { %v1717_v39 = vpop.f32.mrb[9].mxu1 }
 0x138   : > { %v4864_v42 = vpop.f32.mrb[10].mxu1 }
 0x139   : > { %v1720_v45 = vpop.f32.mrb[11].mxu1 }
 0x13a   : > { %v4396_v45 = vld [vmem:[%s4582_s9 + $0x3f8] ss:$20 sps:$4 sm:$0xff]  }
 0x13b   : > { %2091 = vmatmul.mubr.bf16.gmra.mrb[84].mxu0 %v4360_v40  ;;  %3840 = vmatmul.mubr.msk.bf16.gmra.mrb[116].mxu1 %vm1500_vm1, %v4361_v41 }
 0x13c   : > { %2098 = vmatprep.mubr.bf16.mxu0 %v4362_v43  ;;  %3843 = vmatprep.mubr.msk.bf16.mxu1 %vm1500_vm1, %v4364_v44  ;;  %v4395_v44 = vld [vmem:[%s4582_s9 + $0x468] ss:$20 sps:$4 sm:$0xff]  }
 0x13e   : > { %v4870_v46 = vpop.f32.mrb[12].mxu1 }
 0x13f   : > { %v1725_v47 = vpop.f32.mrb[13].mxu1 }
 0x140   : > { %v4874_v50 = vpop.f32.mrb[14].mxu1 }
 0x141   : > { %v1728_v53 = vpop.f32.mrb[15].mxu1 }
 0x143   : > { %2099 = vmatmul.mubr.bf16.gmra.mrb[88].mxu0 %v4365_v48  ;;  %3844 = vmatmul.mubr.msk.bf16.gmra.mrb[120].mxu1 %vm1500_vm1, %v4366_v49  ;;  %v4397_v49 = vld [vmem:[%s4582_s9 + $0x494] ss:$20 sps:$4 sm:$0xff]  }
 0x144   : > { %2106 = vmatprep.mubr.bf16.mxu0 %v4367_v51  ;;  %3847 = vmatprep.mubr.msk.bf16.mxu1 %vm1500_vm1, %v4369_v52  ;;  %v4399_v51 = vld [vmem:[%s4582_s9 + $0x420] ss:$20 sps:$4 sm:$0xff]  }
 0x146   : > { %v4880_v54 = vpop.f32.mrb[16].mxu1 }
 0x147   : > { %v1733_v55 = vpop.f32.mrb[17].mxu1 }
 0x148   : > { %v4884_v58 = vpop.f32.mrb[18].mxu1 }
 0x149   : > { %v1736_v61 = vpop.f32.mrb[19].mxu1 }
 0x14a   : > { %v4401_v61 = vld [vmem:[%s4582_s9 + $0x448] ss:$20 sps:$4 sm:$0xff]  }
 0x14b   : > { %2107 = vmatmul.mubr.bf16.gmra.mrb[92].mxu0 %v4370_v56  ;;  %3848 = vmatmul.mubr.msk.bf16.gmra.mrb[124].mxu1 %vm1500_vm1, %v4371_v57 }
 0x14c   : > { %2114 = vmatprep.mubr.bf16.mxu0 %v4372_v59  ;;  %3851 = vmatprep.mubr.msk.bf16.mxu1 %vm1500_vm1, %v4374_v60  ;;  %v4400_v60 = vld [vmem:[%s4582_s9 + $0x490] ss:$20 sps:$4 sm:$0xff]  }
 0x14e   : > { %v4890_v62 = vpop.f32.mrb[20].mxu1 }
 0x14f   : > { %v1741_v63 = vpop.f32.mrb[21].mxu1 }
 0x150   : > { %v4894_v3 = vpop.f32.mrb[22].mxu1 }
 0x151   : > { %v1744_v6 = vpop.f32.mrb[23].mxu1 }
 0x153   : > { %2115 = vmatmul.mubr.bf16.gmra.mrb[96].mxu0 %v4375_v0  ;;  %3852 = vmatmul.mubr.msk.bf16.gmra.mrb[128].mxu1 %vm1500_vm1, %v4376_v2  ;;  %v4402_v2 = vld [vmem:[%s4582_s9 + $0x4bc] ss:$20 sps:$4 sm:$0xff]  }
 0x154   : > { %2122 = vmatprep.mubr.bf16.mxu0 %v4377_v4  ;;  %3855 = vmatprep.mubr.msk.bf16.mxu1 %vm1500_vm1, %v4379_v5  ;;  %v4404_v4 = vld [vmem:[%s4582_s9 + $0x470] ss:$20 sps:$4 sm:$0xff]  }
 0x156   : > { %v4900_v7 = vpop.f32.mrb[24].mxu1 }
 0x157   : > { %v1749_v8 = vpop.f32.mrb[25].mxu1 }
 0x158   : > { %v4904_v11 = vpop.f32.mrb[26].mxu1 }
 0x159   : > { %v1752_v14 = vpop.f32.mrb[27].mxu1 }
 0x15a   : > { %v4406_v14 = vld [vmem:[%s4582_s9 + $0x498] ss:$20 sps:$4 sm:$0xff]  }
 0x15b   : > { %2123 = vmatmul.mubr.bf16.gmra.mrb[100].mxu0 %v4380_v9  ;;  %3856 = vmatmul.mubr.msk.bf16.gmra.mrb[132].mxu1 %vm1500_vm1, %v4381_v10 }
 0x15c   : > { %2130 = vmatprep.mubr.bf16.mxu0 %v4382_v12  ;;  %3859 = vmatprep.mubr.msk.bf16.mxu1 %vm1500_vm1, %v4384_v13  ;;  %v4405_v13 = vld [vmem:[%s4582_s9 + $0x4b8] ss:$20 sps:$4 sm:$0xff]  }
 0x15e   : > { %v4910_v15 = vpop.f32.mrb[28].mxu1 }
 0x15f   : > { %v1757_v16 = vpop.f32.mrb[29].mxu1 }
 0x160   : > { %v4914_v18 = vpop.f32.mrb[30].mxu1 }
 0x161   : > { %v1760_v21 = vpop.f32.mrb[31].mxu1 }
 0x163   : > { %2131 = vmatmul.mubr.bf16.gmra.mrb[104].mxu0 %v4385_v17  ;;  %3860 = vmatmul.mubr.msk.bf16.gmra.mrb[136].mxu1 %vm1500_vm1, %v4386_v1  ;;  %v4407_v1 = vld [vmem:[%s4582_s9 + $0x4e4] ss:$20 sps:$4 sm:$0xff]  }
 0x164   : > { %2138 = vmatprep.mubr.bf16.mxu0 %v4387_v19  ;;  %3863 = vmatprep.mubr.msk.bf16.mxu1 %vm1500_vm1, %v4389_v20  ;;  %v4409_v19 = vld [vmem:[%s4582_s9 + $0x4c0] ss:$20 sps:$4 sm:$0xff]  }
 0x166   : > { %v4920_v23 = vpop.f32.mrb[32].mxu1  ;;  %v4922_v24 = vpop.f32.mrb[0].mxu0 }
 0x167   : > { %v1765_v25 = vpop.f32.mrb[33].mxu1  ;;  %v1926_v27 = vpop.f32.mrb[1].mxu0 }
 0x168   : > { %v4926_v31 = vpop.f32.mrb[34].mxu1  ;;  %v4928_v32 = vpop.f32.mrb[2].mxu0 }
 0x169   : > { %v1768_v36 = vpop.f32.mrb[35].mxu1  ;;  %v1929_v37 = vpop.f32.mrb[3].mxu0 }
 0x16b   : > { %2139 = vmatmul.mubr.bf16.gmra.mrb[108].mxu0 %v4390_v28  ;;  %3864 = vmatmul.mubr.msk.bf16.gmra.mrb[140].mxu1 %vm1500_vm1, %v4391_v29 }
 0x16c   : > { %2146 = vmatprep.mubr.bf16.mxu0 %v4392_v33  ;;  %3867 = vmatprep.mubr.msk.bf16.mxu1 %vm1500_vm1, %v4394_v35  ;;  %v4410_v33 = vld [vmem:[%s4582_s9 + $0x4e0] ss:$20 sps:$4 sm:$0xff]   ;;  %v4411_v35 = vld [vmem:[%s4582_s9 + $0x4e8] ss:$20 sps:$4 sm:$0xff]  }
 0x16e   : > { %v4934_v39 = vpop.f32.mrb[36].mxu1  ;;  %v4936_v40 = vpop.f32.mrb[4].mxu0 }
 0x16f   : > { %v1773_v41 = vpop.f32.mrb[37].mxu1  ;;  %v1934_v43 = vpop.f32.mrb[5].mxu0 }
 0x170   : > { %v4940_v47 = vpop.f32.mrb[38].mxu1  ;;  %v4942_v48 = vpop.f32.mrb[6].mxu0 }
 0x171   : > { %v1776_v52 = vpop.f32.mrb[39].mxu1  ;;  %v1937_v53 = vpop.f32.mrb[7].mxu0 }
 0x173   : > { %2147 = vmatmul.mubr.bf16.gmra.mrb[112].mxu0 %v4395_v44  ;;  %3868 = vmatmul.mubr.msk.bf16.gmra.mrb[144].mxu1 %vm1500_vm1, %v4396_v45 }
 0x174   : > { %2154 = vmatprep.mubr.bf16.mxu0 %v4397_v49  ;;  %3871 = vmatprep.mubr.msk.bf16.mxu1 %vm1500_vm1, %v4399_v51 }
 0x176   : > { %v4948_v55 = vpop.f32.mrb[40].mxu1  ;;  %v4950_v56 = vpop.f32.mrb[8].mxu0 }
 0x177   : > { %v1781_v57 = vpop.f32.mrb[41].mxu1  ;;  %v1942_v59 = vpop.f32.mrb[9].mxu0 }
 0x178   : > { %v4954_v63 = vpop.f32.mrb[42].mxu1  ;;  %v4956_v0 = vpop.f32.mrb[10].mxu0 }
 0x179   : > { %v1784_v5 = vpop.f32.mrb[43].mxu1  ;;  %v1945_v6 = vpop.f32.mrb[11].mxu0 }
 0x17b   : > { %2155 = vmatmul.mubr.bf16.gmra.mrb[116].mxu0 %v4400_v60  ;;  %3872 = vmatmul.mubr.msk.bf16.gmra.mrb[148].mxu1 %vm1500_vm1, %v4401_v61 }
 0x17c   : > { %2162 = vmatprep.mubr.bf16.mxu0 %v4402_v2  ;;  %3875 = vmatprep.mubr.msk.bf16.mxu1 %vm1500_vm1, %v4404_v4 }
 0x17e   : > { %v4962_v8 = vpop.f32.mrb[44].mxu1  ;;  %v4964_v9 = vpop.f32.mrb[12].mxu0 }
 0x17f   : > { %v1789_v10 = vpop.f32.mrb[45].mxu1  ;;  %v1950_v12 = vpop.f32.mrb[13].mxu0 }
 0x180   : > { %v4968_v16 = vpop.f32.mrb[46].mxu1  ;;  %v4970_v17 = vpop.f32.mrb[14].mxu0 }
 0x181   : > { %v1792_v20 = vpop.f32.mrb[47].mxu1  ;;  %v1953_v21 = vpop.f32.mrb[15].mxu0 }
 0x183   : > { %2163 = vmatmul.mubr.bf16.gmra.mrb[120].mxu0 %v4405_v13  ;;  %3876 = vmatmul.mubr.msk.bf16.gmra.mrb[152].mxu1 %vm1500_vm1, %v4406_v14 }
 0x184   : > { %2170 = vmatprep.mubr.bf16.mxu0 %v4407_v1  ;;  %3879 = vmatprep.mubr.msk.bf16.mxu1 %vm1500_vm1, %v4409_v19 }
 0x186   : > { %v4976_v25 = vpop.f32.mrb[48].mxu1  ;;  %v4978_v27 = vpop.f32.mrb[16].mxu0 }
 0x187   : > { %v1797_v28 = vpop.f32.mrb[49].mxu1  ;;  %v1958_v29 = vpop.f32.mrb[17].mxu0 }
 0x188   : > { %v4982_v36 = vpop.f32.mrb[50].mxu1  ;;  %v4984_v37 = vpop.f32.mrb[18].mxu0 }
 0x189   : > { %v1800_v41 = vpop.f32.mrb[51].mxu1  ;;  %v1961_v43 = vpop.f32.mrb[19].mxu0 }
 0x18b   : > { %2171 = vmatmul.mubr.bf16.gmra.mrb[124].mxu0 %v4410_v33  ;;  %3880 = vmatmul.mubr.msk.bf16.gmra.mrb[156].mxu1 %vm1500_vm1, %v4411_v35  ;;  %v5014_v33 = vld [vmem:[%s5639_s2] ss:$0 sm:$0xff] }
 0x18c   : > { %v1700_v35 = vadd.f32 %v5014_v33, %v4840_v22  ;;  %v1708_v22 = vadd.f32 %v5014_v33, %v4850_v30  ;;  %v1716_v30 = vadd.f32 %v5014_v33, %v4860_v38  ;;  %v1724_v38 = vadd.f32 %v5014_v33, %v4870_v46 }
 0x18d   : > { %v1732_v46 = vadd.f32 %v5014_v33, %v4880_v54  ;;  %v1740_v54 = vadd.f32 %v5014_v33, %v4890_v62  ;;  %v1748_v62 = vadd.f32 %v5014_v33, %v4900_v7  ;;  %v1756_v7 = vadd.f32 %v5014_v33, %v4910_v15 }
 0x18e   : > { %v4987_v44 = vpop.f32.mrb[52].mxu1  ;;  %v4989_v45 = vpop.f32.mrb[20].mxu0  ;;  %v1764_v15 = vadd.f32 %v5014_v33, %v4920_v23 }
 0x18f   : > { %v1805_v49 = vpop.f32.mrb[53].mxu1  ;;  %v1966_v51 = vpop.f32.mrb[21].mxu0 }
 0x190   : > { %v4991_v52 = vpop.f32.mrb[54].mxu1  ;;  %v4993_v53 = vpop.f32.mrb[22].mxu0  ;;  %v1703_v49 = vadd.f32 %v5014_v33, %v4844_v26  ;;  %v1711_v26 = vadd.f32 %v5014_v33, %v4854_v34  ;;  %v1719_v34 = vadd.f32 %v5014_v33, %v4864_v42  ;;  %v1727_v42 = vadd.f32 %v5014_v33, %v4874_v50 }
 0x191   : > { %v1808_v57 = vpop.f32.mrb[55].mxu1  ;;  %v1969_v59 = vpop.f32.mrb[23].mxu0  ;;  %v1735_v50 = vadd.f32 %v5014_v33, %v4884_v58  ;;  %v1743_v58 = vadd.f32 %v5014_v33, %v4894_v3  ;;  %v1751_v3 = vadd.f32 %v5014_v33, %v4904_v11  ;;  %v1759_v11 = vadd.f32 %v5014_v33, %v4914_v18 }
 0x192   : > { %v3915_v18 = vadd.f32 %v5014_v33, %v4922_v24 }
 0x196   : > { %v4995_v60 = vpop.f32.mrb[56].mxu1  ;;  %v4997_v61 = vpop.f32.mrb[24].mxu0 }
 0x197   : > { %v1813_v2 = vpop.f32.mrb[57].mxu1  ;;  %v1974_v4 = vpop.f32.mrb[25].mxu0 }
 0x198   : > { %v4999_v5 = vpop.f32.mrb[58].mxu1  ;;  %v5001_v6 = vpop.f32.mrb[26].mxu0 }
 0x199   : > { %v1816_v10 = vpop.f32.mrb[59].mxu1  ;;  %v1977_v12 = vpop.f32.mrb[27].mxu0 }
 0x19e   : > { %v5003_v13 = vpop.f32.mrb[60].mxu1  ;;  %v5005_v14 = vpop.f32.mrb[28].mxu0 }
 0x19f   : > { %v1821_v1 = vpop.f32.mrb[61].mxu1  ;;  %v1982_v19 = vpop.f32.mrb[29].mxu0 }
 0x1a0   : > { %v5007_v20 = vpop.f32.mrb[62].mxu1  ;;  %v5009_v21 = vpop.f32.mrb[30].mxu0 }
 0x1a1   : > { %v1824_v28 = vpop.f32.mrb[63].mxu1  ;;  %v1985_v29 = vpop.f32.mrb[31].mxu0 }
 0x1a6   : > { %v5018_v41 = vpop.f32.mrb[64].mxu1  ;;  %v1988_v43 = vpop.f32.mrb[32].mxu0 }
 0x1a7   : > { %5642 = vst [vmem:[#allocation3_spill] sm:$0xff] %v5018_v41  ;;  %v5022_v51 = vadd.f32 %v1988_v43, %v1700_v35  ;;  %v1829_v57 = vpop.f32.mrb[65].mxu1  ;;  %v1990_v59 = vpop.f32.mrb[33].mxu0 }
 0x1a8   : > { %v5024_v2 = vpop.f32.mrb[66].mxu1  ;;  %v1991_v4 = vpop.f32.mrb[34].mxu0 }
 0x1a9   : > { %5643 = vst [vmem:[#allocation4_spill] sm:$0xff] %v5024_v2  ;;  %v5026_v10 = vadd.f32 %v1991_v4, %v1703_v49  ;;  %v1832_v12 = vpop.f32.mrb[67].mxu1  ;;  %v1993_v1 = vpop.f32.mrb[35].mxu0 }
 0x1ae   : > { %v5030_v19 = vpop.f32.mrb[68].mxu1  ;;  %v1996_v28 = vpop.f32.mrb[36].mxu0 }
 0x1af   : > { %5644 = vst [vmem:[#allocation5_spill] sm:$0xff] %v5030_v19  ;;  %v5034_v29 = vadd.f32 %v1996_v28, %v1708_v22  ;;  %v1837_v35 = vpop.f32.mrb[69].mxu1  ;;  %v1998_v43 = vpop.f32.mrb[37].mxu0 }
 0x1b0   : > { %v5036_v57 = vpop.f32.mrb[70].mxu1  ;;  %v1999_v59 = vpop.f32.mrb[38].mxu0 }
 0x1b1   : > { %5645 = vst [vmem:[#allocation6_spill] sm:$0xff] %v5036_v57  ;;  %v5038_v49 = vadd.f32 %v1999_v59, %v1711_v26  ;;  %v1840_v4 = vpop.f32.mrb[71].mxu1  ;;  %v2001_v12 = vpop.f32.mrb[39].mxu0 }
 0x1b6   : > { %v5042_v1 = vpop.f32.mrb[72].mxu1  ;;  %v2004_v19 = vpop.f32.mrb[40].mxu0 }
 0x1b7   : > { %5646 = vst [vmem:[#allocation7_spill] sm:$0xff] %v5042_v1  ;;  %v5046_v22 = vadd.f32 %v2004_v19, %v1716_v30  ;;  %v1845_v28 = vpop.f32.mrb[73].mxu1  ;;  %v2006_v35 = vpop.f32.mrb[41].mxu0 }
 0x1b8   : > { %v5048_v43 = vpop.f32.mrb[74].mxu1  ;;  %v2007_v57 = vpop.f32.mrb[42].mxu0 }
 0x1b9   : > { %5647 = vst [vmem:[#allocation8_spill] sm:$0xff] %v5048_v43  ;;  %v5050_v26 = vadd.f32 %v2007_v57, %v1719_v34  ;;  %v1848_v59 = vpop.f32.mrb[75].mxu1  ;;  %v2009_v4 = vpop.f32.mrb[43].mxu0 }
 0x1be   : > { %v5054_v12 = vpop.f32.mrb[76].mxu1  ;;  %v2012_v1 = vpop.f32.mrb[44].mxu0 }
 0x1bf   : > { %5648 = vst [vmem:[#allocation9_spill] sm:$0xff] %v5054_v12  ;;  %v5058_v19 = vadd.f32 %v2012_v1, %v1724_v38  ;;  %v1853_v30 = vpop.f32.mrb[77].mxu1  ;;  %v2014_v28 = vpop.f32.mrb[45].mxu0 }
 0x1c0   : > { %v5060_v35 = vpop.f32.mrb[78].mxu1  ;;  %v2015_v43 = vpop.f32.mrb[46].mxu0 }
 0x1c1   : > { %5649 = vst [vmem:[#allocation10_spill] sm:$0xff] %v5060_v35  ;;  %v5062_v57 = vadd.f32 %v2015_v43, %v1727_v42  ;;  %v1856_v34 = vpop.f32.mrb[79].mxu1  ;;  %v2017_v59 = vpop.f32.mrb[47].mxu0 }
 0x1c6   : > { %v5066_v4 = vpop.f32.mrb[80].mxu1  ;;  %v2020_v12 = vpop.f32.mrb[48].mxu0 }
 0x1c7   : > { %5650 = vst [vmem:[#allocation11_spill] sm:$0xff] %v5066_v4  ;;  %v5070_v1 = vadd.f32 %v2020_v12, %v1732_v46  ;;  %v1861_v38 = vpop.f32.mrb[81].mxu1  ;;  %v2022_v30 = vpop.f32.mrb[49].mxu0 }
 0x1c8   : > { %v5072_v28 = vpop.f32.mrb[82].mxu1  ;;  %v2023_v35 = vpop.f32.mrb[50].mxu0 }
 0x1c9   : > { %5651 = vst [vmem:[#allocation12_spill] sm:$0xff] %v5072_v28  ;;  %v5074_v43 = vadd.f32 %v2023_v35, %v1735_v50  ;;  %v1864_v42 = vpop.f32.mrb[83].mxu1  ;;  %v2025_v34 = vpop.f32.mrb[51].mxu0 }
 0x1ce   : > { %v5078_v59 = vpop.f32.mrb[84].mxu1  ;;  %v2028_v4 = vpop.f32.mrb[52].mxu0 }
 0x1cf   : > { %5652 = vst [vmem:[#allocation13_spill] sm:$0xff] %v5078_v59  ;;  %v5082_v12 = vadd.f32 %v2028_v4, %v1740_v54  ;;  %v1869_v46 = vpop.f32.mrb[85].mxu1  ;;  %v2030_v38 = vpop.f32.mrb[53].mxu0 }
 0x1d0   : > { %v5084_v30 = vpop.f32.mrb[86].mxu1  ;;  %v2031_v28 = vpop.f32.mrb[54].mxu0 }
 0x1d1   : > { %5653 = vst [vmem:[#allocation14_spill] sm:$0xff] %v5084_v30  ;;  %v5086_v35 = vadd.f32 %v2031_v28, %v1743_v58  ;;  %v1872_v50 = vpop.f32.mrb[87].mxu1  ;;  %v2033_v42 = vpop.f32.mrb[55].mxu0 }
 0x1d6   : > { %v5090_v34 = vpop.f32.mrb[88].mxu1  ;;  %v2036_v59 = vpop.f32.mrb[56].mxu0 }
 0x1d7   : > { %5654 = vst [vmem:[#allocation15_spill] sm:$0xff] %v5090_v34  ;;  %v5094_v4 = vadd.f32 %v2036_v59, %v1748_v62  ;;  %v1877_v54 = vpop.f32.mrb[89].mxu1  ;;  %v2038_v46 = vpop.f32.mrb[57].mxu0 }
 0x1d8   : > { %v5096_v38 = vpop.f32.mrb[90].mxu1  ;;  %v2039_v30 = vpop.f32.mrb[58].mxu0 }
 0x1d9   : > { %5655 = vst [vmem:[#allocation16_spill] sm:$0xff] %v5096_v38  ;;  %v5098_v28 = vadd.f32 %v2039_v30, %v1751_v3  ;;  %v1880_v58 = vpop.f32.mrb[91].mxu1  ;;  %v2041_v50 = vpop.f32.mrb[59].mxu0 }
 0x1db   : > { %5656 = vst [vmem:[#allocation17_spill] sm:$0xff] %v5098_v28 }
 0x1de   : > { %v5102_v42 = vpop.f32.mrb[92].mxu1  ;;  %v2044_v34 = vpop.f32.mrb[60].mxu0 }
 0x1df   : > { %5657 = vst [vmem:[#allocation18_spill] sm:$0xff] %v5102_v42  ;;  %v5106_v59 = vadd.f32 %v2044_v34, %v1756_v7  ;;  %v1885_v62 = vpop.f32.mrb[93].mxu1  ;;  %v2046_v54 = vpop.f32.mrb[61].mxu0  ;;  %v3917_v42 = vadd.f32 %v5014_v33, %v4936_v40  ;;  %v3916_v40 = vadd.f32 %v5014_v33, %v4928_v32  ;;  %v1772_v32 = vadd.f32 %v5014_v33, %v4934_v39 }
 0x1e0   : > { %v5108_v46 = vpop.f32.mrb[94].mxu1  ;;  %v2047_v30 = vpop.f32.mrb[62].mxu0  ;;  %v1767_v62 = vadd.f32 %v5014_v33, %v4926_v31 }
 0x1e1   : > { %5658 = vst [vmem:[#allocation19_spill] sm:$0xff] %v5108_v46  ;;  %v5110_v3 = vadd.f32 %v2047_v30, %v1759_v11  ;;  %v1888_v58 = vpop.f32.mrb[95].mxu1  ;;  %v2049_v50 = vpop.f32.mrb[63].mxu0  ;;  %v3918_v11 = vadd.f32 %v5014_v33, %v4942_v48 }
 0x1e3   : > { %5659 = vst [vmem:[#allocation20_spill] sm:$0xff] %v5110_v3 }
 0x1e6   : > { %v2052_v34 = vpop.f32.mrb[64].mxu0  ;;  %v3821_v7 = vpop.f32.mrb[96].mxu1 }
 0x1e7   : > { %v5123_v54 = vadd.f32 %v2052_v34, %v1764_v15  ;;  %v2222_v30 = vadd.f32 %v3917_v42, %v3821_v7  ;;  %v2054_v58 = vpop.f32.mrb[65].mxu0  ;;  %v2213_v23 = vpop.f32.mrb[97].mxu1 }
 0x1e8   : > { %v2214_v50 = vadd.f32 %v3915_v18, %v2213_v23  ;;  %v2055_v46 = vpop.f32.mrb[66].mxu0  ;;  %v3822_v24 = vpop.f32.mrb[98].mxu1  ;;  %v3921_v18 = vadd.f32 %v5014_v33, %v4964_v9 }
 0x1e9   : > { %v2470_v38 = vmul.f32 0.01, %v2222_v30  ;;  %v5127_v2 = vadd.f32 %v2055_v46, %v1767_v62  ;;  %v2225_v41 = vadd.f32 %v3918_v11, %v3822_v24  ;;  %v2057_v31 = vpop.f32.mrb[67].mxu0  ;;  %v2216_v28 = vpop.f32.mrb[99].mxu1  ;;  %v1775_v46 = vadd.f32 %v5014_v33, %v4940_v47 }
 0x1ea   : > { %v2468_v3 = vmul.f32 0.01, %v2214_v50  ;;  %v2217_v48 = vadd.f32 %v3916_v40, %v2216_v28  ;;  %v3919_v62 = vadd.f32 %v5014_v33, %v4950_v56  ;;  %v3920_v40 = vadd.f32 %v5014_v33, %v4956_v0 }
 0x1eb   : > { %v2534_v15 = vmax.f32 %v2222_v30, %v2470_v38  ;;  %v2471_v34 = vmul.f32 0.01, %v2225_v41 }
 0x1ec   : > { %v2532_v42 = vmax.f32 %v2214_v50, %v2468_v3  ;;  %v2469_v7 = vmul.f32 0.01, %v2217_v48  ;;  %v3922_v3 = vadd.f32 %v5014_v33, %v4970_v17 }
 0x1ed   : > { %v3704_v58 = vpack.c.bf16 %v2534_v15, %v2534_v15  ;;  %v2535_v23 = vmax.f32 %v2225_v41, %v2471_v34 }
 0x1ee   : > { %v3702_v28 = vpack.c.bf16 %v2532_v42, %v2532_v42  ;;  %v2533_v38 = vmax.f32 %v2217_v48, %v2469_v7  ;;  %v2060_v11 = vpop.f32.mrb[68].mxu0  ;;  %v3825_v30 = vpop.f32.mrb[100].mxu1 }
 0x1ef   : > { %2855 = vst.msk [vmem:[%s5139_s12 + $0x8] sm:$0xf] %vm2852_vm2, %v3704_v58  ;;  %v3705_v39 = vpack.c.bf16 %v2535_v23, %v2535_v23  ;;  %v5143_v9 = vadd.f32 %v2060_v11, %v1772_v32  ;;  %v2238_v47 = vadd.f32 %v3921_v18, %v3825_v30  ;;  %v2062_v56 = vpop.f32.mrb[69].mxu0  ;;  %v2229_v41 = vpop.f32.mrb[101].mxu1  ;;  %v1783_v30 = vadd.f32 %v5014_v33, %v4954_v63 }
 0x1f0   : > { %2853 = vst.msk [vmem:[%s5139_s12] sm:$0xf] %vm2852_vm2, %v3702_v28  ;;  %v3703_v17 = vpack.c.bf16 %v2533_v38, %v2533_v38  ;;  %v2230_v50 = vadd.f32 %v3919_v62, %v2229_v41  ;;  %v2063_v24 = vpop.f32.mrb[70].mxu0  ;;  %v3826_v31 = vpop.f32.mrb[102].mxu1  ;;  %v1780_v62 = vadd.f32 %v5014_v33, %v4948_v55  ;;  %v3925_v38 = vadd.f32 %v5014_v33, %v4989_v45 }
 0x1f1   : > { %2856 = vst.msk [vmem:[%s5139_s12 + $0xc] sm:$0xf] %vm2852_vm2, %v3705_v39  ;;  %v2474_v48 = vmul.f32 0.01, %v2238_v47  ;;  %v5151_v15 = vadd.f32 %v2063_v24, %v1775_v46  ;;  %v2241_v34 = vadd.f32 %v3922_v3, %v3826_v31  ;;  %v2065_v42 = vpop.f32.mrb[71].mxu0  ;;  %v2232_v7 = vpop.f32.mrb[103].mxu1  ;;  %v3923_v3 = vadd.f32 %v5014_v33, %v4978_v27 }
 0x1f2   : > { %2854 = vst.msk [vmem:[%s5139_s12 + $0x4] sm:$0xf] %vm2852_vm2, %v3703_v17  ;;  %v2472_v32 = vmul.f32 0.01, %v2230_v50  ;;  %v2233_v18 = vadd.f32 %v3920_v40, %v2232_v7  ;;  %v3926_v55 = vadd.f32 %v5014_v33, %v4993_v53  ;;  %v3924_v27 = vadd.f32 %v5014_v33, %v4984_v37 }
 0x1f3   : > { %v2538_v0 = vmax.f32 %v2238_v47, %v2474_v48  ;;  %v2475_v58 = vmul.f32 0.01, %v2241_v34 }
 0x1f4   : > { %v2536_v23 = vmax.f32 %v2230_v50, %v2472_v32  ;;  %v2473_v28 = vmul.f32 0.01, %v2233_v18 }
 0x1f5   : > { %v3708_v46 = vpack.c.bf16 %v2538_v0, %v2538_v0  ;;  %v2539_v11 = vmax.f32 %v2241_v34, %v2475_v58 }
 0x1f6   : > { %v3706_v39 = vpack.c.bf16 %v2536_v23, %v2536_v23  ;;  %v2537_v47 = vmax.f32 %v2233_v18, %v2473_v28  ;;  %v2068_v56 = vpop.f32.mrb[72].mxu0  ;;  %v3829_v41 = vpop.f32.mrb[104].mxu1 }
 0x1f7   : > { %2859 = vst.msk [vmem:[%s5139_s12 + $0x18] sm:$0xf] %vm2852_vm2, %v3708_v46  ;;  %v3709_v45 = vpack.c.bf16 %v2539_v11, %v2539_v11  ;;  %v5167_v40 = vadd.f32 %v2068_v56, %v1780_v62  ;;  %v2254_v17 = vadd.f32 %v3925_v38, %v3829_v41  ;;  %v2070_v50 = vpop.f32.mrb[73].mxu0  ;;  %v2245_v63 = vpop.f32.mrb[105].mxu1  ;;  %v1788_v38 = vadd.f32 %v5014_v33, %v4962_v8 }
 0x1f8   : > { %2857 = vst.msk [vmem:[%s5139_s12 + $0x10] sm:$0xf] %vm2852_vm2, %v3706_v39  ;;  %v3707_v24 = vpack.c.bf16 %v2537_v47, %v2537_v47  ;;  %v2246_v31 = vadd.f32 %v3923_v3, %v2245_v63  ;;  %v2071_v48 = vpop.f32.mrb[74].mxu0  ;;  %v3830_v34 = vpop.f32.mrb[106].mxu1  ;;  %v3929_v46 = vadd.f32 %v5014_v33, %v5005_v14  ;;  %v1791_v3 = vadd.f32 %v5014_v33, %v4968_v16 }
 0x1f9   : > { %2860 = vst.msk [vmem:[%s5139_s12 + $0x1c] sm:$0xf] %vm2852_vm2, %v3709_v45  ;;  %v2478_v53 = vmul.f32 0.01, %v2254_v17  ;;  %v5175_v42 = vadd.f32 %v2071_v48, %v1783_v30  ;;  %v2257_v7 = vadd.f32 %v3926_v55, %v3830_v34  ;;  %v2073_v32 = vpop.f32.mrb[75].mxu0  ;;  %v2248_v18 = vpop.f32.mrb[107].mxu1  ;;  %v3927_v39 = vadd.f32 %v5014_v33, %v4997_v61 }
 0x1fa   : > { %2858 = vst.msk [vmem:[%s5139_s12 + $0x14] sm:$0xf] %vm2852_vm2, %v3707_v24  ;;  %v2476_v0 = vmul.f32 0.01, %v2246_v31  ;;  %v2249_v58 = vadd.f32 %v3924_v27, %v2248_v18  ;;  %v3930_v8 = vadd.f32 %v5014_v33, %v5009_v21  ;;  %v3928_v61 = vadd.f32 %v5014_v33, %v5001_v6 }
 0x1fb   : > { %v2542_v37 = vmax.f32 %v2254_v17, %v2478_v53  ;;  %v2479_v23 = vmul.f32 0.01, %v2257_v7 }
 0x1fc   : > { %v2540_v28 = vmax.f32 %v2246_v31, %v2476_v0  ;;  %v2477_v62 = vmul.f32 0.01, %v2249_v58 }
 0x1fd   : > { %v3712_v11 = vpack.c.bf16 %v2542_v37, %v2542_v37  ;;  %v2543_v30 = vmax.f32 %v2257_v7, %v2479_v23  ;;  %v1796_v23 = vadd.f32 %v5014_v33, %v4976_v25 }
 0x1fe   : > { %v3710_v47 = vpack.c.bf16 %v2540_v28, %v2540_v28  ;;  %v2541_v56 = vmax.f32 %v2249_v58, %v2477_v62  ;;  %v2076_v41 = vpop.f32.mrb[76].mxu0  ;;  %v3833_v55 = vpop.f32.mrb[108].mxu1 }
 0x1ff   : > { %2863 = vst.msk [vmem:[%s5139_s12 + $0x28] sm:$0xf] %vm2852_vm2, %v3712_v11  ;;  %v3713_v14 = vpack.c.bf16 %v2543_v30, %v2543_v30  ;;  %v5191_v45 = vadd.f32 %v2076_v41, %v1788_v38  ;;  %v2270_v17 = vadd.f32 %v3929_v46, %v3833_v55  ;;  %v2078_v50 = vpop.f32.mrb[77].mxu0  ;;  %v2261_v16 = vpop.f32.mrb[109].mxu1 }
 0x200   : > { %2861 = vst.msk [vmem:[%s5139_s12 + $0x20] sm:$0xf] %vm2852_vm2, %v3710_v47  ;;  %v3711_v63 = vpack.c.bf16 %v2541_v56, %v2541_v56  ;;  %v2262_v27 = vadd.f32 %v3927_v39, %v2261_v16  ;;  %v2079_v24 = vpop.f32.mrb[78].mxu0  ;;  %v3834_v31 = vpop.f32.mrb[110].mxu1 }
 0x201   : > { %2864 = vst.msk [vmem:[%s5139_s12 + $0x2c] sm:$0xf] %vm2852_vm2, %v3713_v14  ;;  %v2482_v21 = vmul.f32 0.01, %v2270_v17  ;;  %v5199_v48 = vadd.f32 %v2079_v24, %v1791_v3  ;;  %v2273_v34 = vadd.f32 %v3930_v8, %v3834_v31  ;;  %v2081_v53 = vpop.f32.mrb[79].mxu0  ;;  %v2264_v7 = vpop.f32.mrb[111].mxu1  ;;  %v1799_v3 = vadd.f32 %v5014_v33, %v4982_v36 }
 0x202   : > { %2862 = vst.msk [vmem:[%s5139_s12 + $0x24] sm:$0xf] %vm2852_vm2, %v3711_v63  ;;  %v2480_v32 = vmul.f32 0.01, %v2262_v27  ;;  %v2265_v18 = vadd.f32 %v3928_v61, %v2264_v7 }
 0x203   : > { %v2546_v6 = vmax.f32 %v2270_v17, %v2482_v21  ;;  %v2483_v0 = vmul.f32 0.01, %v2273_v34 }
 0x204   : > { %v2544_v58 = vmax.f32 %v2262_v27, %v2480_v32  ;;  %v2481_v37 = vmul.f32 0.01, %v2265_v18 }
 0x205   : > { %v3716_v28 = vpack.c.bf16 %v2546_v6, %v2546_v6  ;;  %v2547_v62 = vmax.f32 %v2273_v34, %v2483_v0  ;;  %v1804_v34 = vadd.f32 %v5014_v33, %v4987_v44  ;;  %v1807_v0 = vadd.f32 %v5014_v33, %v4991_v52 }
 0x206   : > { %v3714_v38 = vpack.c.bf16 %v2544_v58, %v2544_v58  ;;  %v2545_v46 = vmax.f32 %v2265_v18, %v2481_v37  ;;  %v2084_v11 = vpop.f32.mrb[80].mxu0  ;;  %v3837_v30 = vpop.f32.mrb[112].mxu1 }
 0x207   : > { %2867 = vst.msk [vmem:[%s5139_s12 + $0x38] sm:$0xf] %vm2852_vm2, %v3716_v28  ;;  %v3717_v39 = vpack.c.bf16 %v2547_v62, %v2547_v62  ;;  %v5209_v47 = vadd.f32 %v2084_v11, %v1796_v23  ;;  %v2286_v56 = vadd.f32 %v3837_v30, %v5034_v29  ;;  %v2086_v41 = vpop.f32.mrb[81].mxu0  ;;  %v2277_v25 = vpop.f32.mrb[113].mxu1 }
 0x208   : > { %2865 = vst.msk [vmem:[%s5139_s12 + $0x30] sm:$0xf] %vm2852_vm2, %v3714_v38  ;;  %v3715_v55 = vpack.c.bf16 %v2545_v46, %v2545_v46  ;;  %v2278_v8 = vadd.f32 %v2277_v25, %v5022_v51  ;;  %v2087_v14 = vpop.f32.mrb[82].mxu0  ;;  %v3838_v17 = vpop.f32.mrb[114].mxu1 }
 0x209   : > { %2868 = vst.msk [vmem:[%s5139_s12 + $0x3c] sm:$0xf] %vm2852_vm2, %v3717_v39  ;;  %v2486_v36 = vmul.f32 0.01, %v2286_v56  ;;  %v5217_v50 = vadd.f32 %v2087_v14, %v1799_v3  ;;  %v2289_v16 = vadd.f32 %v3838_v17, %v5038_v49  ;;  %v2089_v61 = vpop.f32.mrb[83].mxu0  ;;  %v2280_v63 = vpop.f32.mrb[115].mxu1 }
 0x20a   : > { %2866 = vst.msk [vmem:[%s5139_s12 + $0x34] sm:$0xf] %vm2852_vm2, %v3715_v55  ;;  %v2484_v29 = vmul.f32 0.01, %v2278_v8  ;;  %v2281_v27 = vadd.f32 %v2280_v63, %v5026_v10  ;;  %v1815_v63 = vadd.f32 %v5014_v33, %v4999_v5 }
 0x20b   : > { %v2550_v24 = vmax.f32 %v2286_v56, %v2486_v36  ;;  %v2487_v31 = vmul.f32 0.01, %v2289_v16 }
 0x20c   : > { %v2548_v51 = vmax.f32 %v2278_v8, %v2484_v29  ;;  %v2485_v21 = vmul.f32 0.01, %v2281_v27  ;;  %v1812_v8 = vadd.f32 %v5014_v33, %v4995_v60 }
 0x20d   : > { %v3720_v53 = vpack.c.bf16 %v2550_v24, %v2550_v24  ;;  %v2551_v7 = vmax.f32 %v2289_v16, %v2487_v31 }
 0x20e   : > { %v3718_v32 = vpack.c.bf16 %v2548_v51, %v2548_v51  ;;  %v2549_v49 = vmax.f32 %v2281_v27, %v2485_v21  ;;  %v2092_v18 = vpop.f32.mrb[84].mxu0  ;;  %v3841_v6 = vpop.f32.mrb[116].mxu1 }
 0x20f   : > { %2871 = vst.msk [vmem:[%s5139_s12 + $0x48] sm:$0xf] %vm2852_vm2, %v3720_v53  ;;  %v3721_v10 = vpack.c.bf16 %v2551_v7, %v2551_v7  ;;  %v5229_v58 = vadd.f32 %v2092_v18, %v1804_v34  ;;  %v2302_v37 = vadd.f32 %v3841_v6, %v5058_v19  ;;  %v2094_v23 = vpop.f32.mrb[85].mxu0  ;;  %v2293_v44 = vpop.f32.mrb[117].mxu1 }
 0x210   : > { %2869 = vst.msk [vmem:[%s5139_s12 + $0x40] sm:$0xf] %vm2852_vm2, %v3718_v32  ;;  %v3719_v28 = vpack.c.bf16 %v2549_v49, %v2549_v49  ;;  %v2294_v62 = vadd.f32 %v2293_v44, %v5046_v22  ;;  %v2095_v38 = vpop.f32.mrb[86].mxu0  ;;  %v3842_v46 = vpop.f32.mrb[118].mxu1 }
 0x211   : > { %2872 = vst.msk [vmem:[%s5139_s12 + $0x4c] sm:$0xf] %vm2852_vm2, %v3721_v10  ;;  %v2490_v52 = vmul.f32 0.01, %v2302_v37  ;;  %v5237_v11 = vadd.f32 %v2095_v38, %v1807_v0  ;;  %v2305_v30 = vadd.f32 %v3842_v46, %v5062_v57  ;;  %v2097_v3 = vpop.f32.mrb[87].mxu0  ;;  %v2296_v39 = vpop.f32.mrb[119].mxu1  ;;  %v1823_v46 = vadd.f32 %v5014_v33, %v5007_v20 }
 0x212   : > { %2870 = vst.msk [vmem:[%s5139_s12 + $0x44] sm:$0xf] %vm2852_vm2, %v3719_v28  ;;  %v2488_v19 = vmul.f32 0.01, %v2294_v62  ;;  %v2297_v56 = vadd.f32 %v2296_v39, %v5050_v26 }
 0x213   : > { %v2554_v41 = vmax.f32 %v2302_v37, %v2490_v52  ;;  %v2491_v25 = vmul.f32 0.01, %v2305_v30  ;;  %v1820_v37 = vadd.f32 %v5014_v33, %v5003_v13 }
 0x214   : > { %v2552_v22 = vmax.f32 %v2294_v62, %v2488_v19  ;;  %v2489_v55 = vmul.f32 0.01, %v2297_v56 }
 0x215   : > { %v3724_v14 = vpack.c.bf16 %v2554_v41, %v2554_v41  ;;  %v2555_v17 = vmax.f32 %v2305_v30, %v2491_v25 }
 0x216   : > { %v3722_v36 = vpack.c.bf16 %v2552_v22, %v2552_v22  ;;  %v2553_v57 = vmax.f32 %v2297_v56, %v2489_v55  ;;  %v2100_v16 = vpop.f32.mrb[88].mxu0  ;;  %v3845_v61 = vpop.f32.mrb[120].mxu1  ;;  %v5660_v22 = vld [vmem:[#allocation20_spill] sm:$0xff] }
 0x217   : > { %2875 = vst.msk [vmem:[%s5139_s12 + $0x58] sm:$0xf] %vm2852_vm2, %v3724_v14  ;;  %v3725_v26 = vpack.c.bf16 %v2555_v17, %v2555_v17  ;;  %v5249_v29 = vadd.f32 %v2100_v16, %v1812_v8  ;;  %v2318_v27 = vadd.f32 %v3845_v61, %v5082_v12  ;;  %v2102_v24 = vpop.f32.mrb[89].mxu0  ;;  %v2309_v60 = vpop.f32.mrb[121].mxu1  ;;  %v5661_v17 = vld [vmem:[#allocation17_spill] sm:$0xff] }
 0x218   : > { %2873 = vst.msk [vmem:[%s5139_s12 + $0x50] sm:$0xf] %vm2852_vm2, %v3722_v36  ;;  %v3723_v31 = vpack.c.bf16 %v2553_v57, %v2553_v57  ;;  %v2310_v51 = vadd.f32 %v2309_v60, %v5070_v1  ;;  %v2103_v21 = vpop.f32.mrb[90].mxu0  ;;  %v3846_v34 = vpop.f32.mrb[122].mxu1 }
 0x219   : > { %2876 = vst.msk [vmem:[%s5139_s12 + $0x5c] sm:$0xf] %vm2852_vm2, %v3725_v26  ;;  %v2494_v5 = vmul.f32 0.01, %v2318_v27  ;;  %v5257_v53 = vadd.f32 %v2103_v21, %v1815_v63  ;;  %v2321_v7 = vadd.f32 %v3846_v34, %v5086_v35  ;;  %v2105_v32 = vpop.f32.mrb[91].mxu0  ;;  %v2312_v49 = vpop.f32.mrb[123].mxu1 }
 0x21a   : > { %2874 = vst.msk [vmem:[%s5139_s12 + $0x54] sm:$0xf] %vm2852_vm2, %v3723_v31  ;;  %v2492_v12 = vmul.f32 0.01, %v2310_v51  ;;  %v2313_v18 = vadd.f32 %v2312_v49, %v5074_v43  ;;  %v5662_v63 = vld [vmem:[#allocation3_spill] sm:$0xff]  ;;  %v5663_v34 = vld [vmem:[#allocation4_spill] sm:$0xff] }
 0x21b   : > { %v2558_v6 = vmax.f32 %v2318_v27, %v2494_v5  ;;  %v2495_v0 = vmul.f32 0.01, %v2321_v7  ;;  %v1828_v26 = vadd.f32 %v5014_v33, %v5662_v63  ;;  %v1831_v5 = vadd.f32 %v5014_v33, %v5663_v34 }
 0x21c   : > { %v2556_v1 = vmax.f32 %v2310_v51, %v2492_v12  ;;  %v2493_v10 = vmul.f32 0.01, %v2313_v18 }
 0x21d   : > { %v3728_v23 = vpack.c.bf16 %v2558_v6, %v2558_v6  ;;  %v2559_v44 = vmax.f32 %v2321_v7, %v2495_v0 }
 0x21e   : > { %v3726_v28 = vpack.c.bf16 %v2556_v1, %v2556_v1  ;;  %v2557_v35 = vmax.f32 %v2313_v18, %v2493_v10  ;;  %v2108_v62 = vpop.f32.mrb[92].mxu0  ;;  %v3849_v38 = vpop.f32.mrb[124].mxu1 }
 0x21f   : > { %2879 = vst.msk [vmem:[%s5139_s12 + $0x68] sm:$0xf] %vm2852_vm2, %v3728_v23  ;;  %v3729_v43 = vpack.c.bf16 %v2559_v44, %v2559_v44  ;;  %v5269_v52 = vadd.f32 %v2108_v62, %v1820_v37  ;;  %v2334_v30 = vadd.f32 %v3849_v38, %v5106_v59  ;;  %v2110_v3 = vpop.f32.mrb[93].mxu0  ;;  %v2325_v13 = vpop.f32.mrb[125].mxu1 }
 0x220   : > { %2877 = vst.msk [vmem:[%s5139_s12 + $0x60] sm:$0xf] %vm2852_vm2, %v3726_v28  ;;  %v3727_v39 = vpack.c.bf16 %v2557_v35, %v2557_v35  ;;  %v2326_v19 = vadd.f32 %v2325_v13, %v5094_v4  ;;  %v2111_v56 = vpop.f32.mrb[94].mxu0  ;;  %v3850_v41 = vpop.f32.mrb[126].mxu1 }
 0x221   : > { %2880 = vst.msk [vmem:[%s5139_s12 + $0x6c] sm:$0xf] %vm2852_vm2, %v3729_v43  ;;  %v2498_v20 = vmul.f32 0.01, %v2334_v30  ;;  %v5277_v25 = vadd.f32 %v2111_v56, %v1823_v46  ;;  %v2337_v55 = vadd.f32 %v3850_v41, %v5660_v22  ;;  %v2113_v8 = vpop.f32.mrb[95].mxu0  ;;  %v2328_v14 = vpop.f32.mrb[127].mxu1 }
 0x222   : > { %2878 = vst.msk [vmem:[%s5139_s12 + $0x64] sm:$0xf] %vm2852_vm2, %v3727_v39  ;;  %v2496_v59 = vmul.f32 0.01, %v2326_v19  ;;  %v2329_v36 = vadd.f32 %v2328_v14, %v5661_v17 }
 0x223   : > { %v2562_v57 = vmax.f32 %v2334_v30, %v2498_v20  ;;  %v2499_v16 = vmul.f32 0.01, %v2337_v55  ;;  %v5664_v30 = vld [vmem:[#allocation5_spill] sm:$0xff]  ;;  %v5665_v20 = vld [vmem:[#allocation6_spill] sm:$0xff] }
 0x224   : > { %v2560_v4 = vmax.f32 %v2326_v19, %v2496_v59  ;;  %v2497_v61 = vmul.f32 0.01, %v2329_v36  ;;  %v1836_v3 = vadd.f32 %v5014_v33, %v5664_v30  ;;  %v1839_v22 = vadd.f32 %v5014_v33, %v5665_v20 }
 0x225   : > { %v3732_v27 = vpack.c.bf16 %v2562_v57, %v2562_v57  ;;  %v2563_v24 = vmax.f32 %v2337_v55, %v2499_v16 }
 0x226   : > { %v3730_v60 = vpack.c.bf16 %v2560_v4, %v2560_v4  ;;  %v2561_v31 = vmax.f32 %v2329_v36, %v2497_v61  ;;  %v2116_v51 = vpop.f32.mrb[96].mxu0  ;;  %v3853_v21 = vpop.f32.mrb[128].mxu1 }
 0x227   : > { %2883 = vst.msk [vmem:[%s5139_s12 + $0x78] sm:$0xf] %vm2852_vm2, %v3732_v27  ;;  %v3733_v7 = vpack.c.bf16 %v2563_v24, %v2563_v24  ;;  %v5289_v32 = vadd.f32 %v2116_v51, %v1828_v26  ;;  %v2350_v49 = vadd.f32 %v3853_v21, %v5143_v9  ;;  %v2118_v12 = vpop.f32.mrb[97].mxu0  ;;  %v2341_v18 = vpop.f32.mrb[129].mxu1  ;;  %v5666_v21 = vld [vmem:[#allocation7_spill] sm:$0xff] }
 0x228   : > { %2881 = vst.msk [vmem:[%s5139_s12 + $0x70] sm:$0xf] %vm2852_vm2, %v3730_v60  ;;  %v3731_v6 = vpack.c.bf16 %v2561_v31, %v2561_v31  ;;  %v2342_v0 = vadd.f32 %v2341_v18, %v5123_v54  ;;  %v2119_v1 = vpop.f32.mrb[98].mxu0  ;;  %v3854_v10 = vpop.f32.mrb[130].mxu1  ;;  %v1844_v34 = vadd.f32 %v5014_v33, %v5666_v21 }
 0x229   : > { %2884 = vst.msk [vmem:[%s5139_s12 + $0x7c] sm:$0xf] %vm2852_vm2, %v3733_v7  ;;  %v2502_v37 = vmul.f32 0.01, %v2350_v49  ;;  %v5297_v23 = vadd.f32 %v2119_v1, %v1831_v5  ;;  %v2353_v44 = vadd.f32 %v3854_v10, %v5151_v15  ;;  %v2121_v28 = vpop.f32.mrb[99].mxu0  ;;  %v2344_v35 = vpop.f32.mrb[131].mxu1 }
 0x22a   : > { %2882 = vst.msk [vmem:[%s5139_s12 + $0x74] sm:$0xf] %vm2852_vm2, %v3731_v6  ;;  %v2500_v9 = vmul.f32 0.01, %v2342_v0  ;;  %v2345_v62 = vadd.f32 %v2344_v35, %v5127_v2  ;;  %v5667_v6 = vld [vmem:[#allocation8_spill] sm:$0xff] }
 0x22b   : > { %v2566_v38 = vmax.f32 %v2350_v49, %v2502_v37  ;;  %v2503_v46 = vmul.f32 0.01, %v2353_v44 }
 0x22c   : > { %v2564_v54 = vmax.f32 %v2342_v0, %v2500_v9  ;;  %v2501_v43 = vmul.f32 0.01, %v2345_v62  ;;  %v1847_v0 = vadd.f32 %v5014_v33, %v5667_v6 }
 0x22d   : > { %v3736_v13 = vpack.c.bf16 %v2566_v38, %v2566_v38  ;;  %v2567_v39 = vmax.f32 %v2353_v44, %v2503_v46 }
 0x22e   : > { %v3734_v19 = vpack.c.bf16 %v2564_v54, %v2564_v54  ;;  %v2565_v15 = vmax.f32 %v2345_v62, %v2501_v43  ;;  %v2124_v56 = vpop.f32.mrb[100].mxu0  ;;  %v3857_v41 = vpop.f32.mrb[132].mxu1 }
 0x22f   : > { %2887 = vst.msk [vmem:[%s5139_s12 + $0x88] sm:$0xf] %vm2852_vm2, %v3736_v13  ;;  %v3737_v2 = vpack.c.bf16 %v2567_v39, %v2567_v39  ;;  %v5309_v55 = vadd.f32 %v2124_v56, %v1836_v3  ;;  %v2366_v8 = vadd.f32 %v3857_v41, %v5191_v45  ;;  %v2126_v14 = vpop.f32.mrb[101].mxu0  ;;  %v2357_v59 = vpop.f32.mrb[133].mxu1 }
 0x230   : > { %2885 = vst.msk [vmem:[%s5139_s12 + $0x80] sm:$0xf] %vm2852_vm2, %v3734_v19  ;;  %v3735_v17 = vpack.c.bf16 %v2565_v15, %v2565_v15  ;;  %v2358_v36 = vadd.f32 %v2357_v59, %v5167_v40  ;;  %v2127_v57 = vpop.f32.mrb[102].mxu0  ;;  %v3858_v16 = vpop.f32.mrb[134].mxu1  ;;  %v5668_v15 = vld [vmem:[#allocation9_spill] sm:$0xff]  ;;  %v5669_v14 = vld [vmem:[#allocation10_spill] sm:$0xff] }
 0x231   : > { %2888 = vst.msk [vmem:[%s5139_s12 + $0x8c] sm:$0xf] %vm2852_vm2, %v3737_v2  ;;  %v2506_v4 = vmul.f32 0.01, %v2366_v8  ;;  %v5317_v61 = vadd.f32 %v2127_v57, %v1839_v22  ;;  %v2369_v63 = vadd.f32 %v3858_v16, %v5199_v48  ;;  %v2129_v26 = vpop.f32.mrb[103].mxu0  ;;  %v2360_v27 = vpop.f32.mrb[135].mxu1  ;;  %v1852_v56 = vadd.f32 %v5014_v33, %v5668_v15 }
 0x232   : > { %2886 = vst.msk [vmem:[%s5139_s12 + $0x84] sm:$0xf] %vm2852_vm2, %v3735_v17  ;;  %v2504_v45 = vmul.f32 0.01, %v2358_v36  ;;  %v2361_v24 = vadd.f32 %v2360_v27, %v5175_v42  ;;  %v1855_v59 = vadd.f32 %v5014_v33, %v5669_v14  ;;  %v5386_v15 = vld [vmem:[%s5639_s2] ss:$0 sm:$0xff] }
 0x233   : > { %v2570_v60 = vmax.f32 %v2366_v8, %v2506_v4  ;;  %v2507_v31 = vmul.f32 0.01, %v2369_v63 }
 0x234   : > { %v2568_v40 = vmax.f32 %v2358_v36, %v2504_v45  ;;  %v2505_v51 = vmul.f32 0.01, %v2361_v24 }
 0x235   : > { %v3740_v5 = vpack.c.bf16 %v2570_v60, %v2570_v60  ;;  %v2571_v7 = vmax.f32 %v2369_v63, %v2507_v31 }
 0x236   : > { %v3738_v49 = vpack.c.bf16 %v2568_v40, %v2568_v40  ;;  %v2569_v48 = vmax.f32 %v2361_v24, %v2505_v51  ;;  %v2132_v12 = vpop.f32.mrb[104].mxu0  ;;  %v3861_v18 = vpop.f32.mrb[136].mxu1 }
 0x237   : > { %2891 = vst.msk [vmem:[%s5139_s12 + $0x98] sm:$0xf] %vm2852_vm2, %v3740_v5  ;;  %v3741_v42 = vpack.c.bf16 %v2571_v7, %v2571_v7  ;;  %v5329_v1 = vadd.f32 %v2132_v12, %v1844_v34  ;;  %v2382_v10 = vadd.f32 %v3861_v18, %v5229_v58  ;;  %v2134_v37 = vpop.f32.mrb[105].mxu0  ;;  %v2373_v44 = vpop.f32.mrb[137].mxu1  ;;  %v5670_v7 = vld [vmem:[#allocation11_spill] sm:$0xff] }
 0x238   : > { %2889 = vst.msk [vmem:[%s5139_s12 + $0x90] sm:$0xf] %vm2852_vm2, %v3738_v49  ;;  %v3739_v28 = vpack.c.bf16 %v2569_v48, %v2569_v48  ;;  %v2374_v35 = vadd.f32 %v2373_v44, %v5209_v47  ;;  %v2135_v9 = vpop.f32.mrb[106].mxu0  ;;  %v3862_v62 = vpop.f32.mrb[138].mxu1  ;;  %v1860_v49 = vadd.f32 %v5014_v33, %v5670_v7 }
 0x239   : > { %2892 = vst.msk [vmem:[%s5139_s12 + $0x9c] sm:$0xf] %vm2852_vm2, %v3741_v42  ;;  %v2510_v38 = vmul.f32 0.01, %v2382_v10  ;;  %v5337_v46 = vadd.f32 %v2135_v9, %v1847_v0  ;;  %v2385_v54 = vadd.f32 %v3862_v62, %v5237_v11  ;;  %v2137_v43 = vpop.f32.mrb[107].mxu0  ;;  %v2376_v30 = vpop.f32.mrb[139].mxu1 }
 0x23a   : > { %2890 = vst.msk [vmem:[%s5139_s12 + $0x94] sm:$0xf] %vm2852_vm2, %v3739_v28  ;;  %v2508_v58 = vmul.f32 0.01, %v2374_v35  ;;  %v2377_v3 = vadd.f32 %v2376_v30, %v5217_v50  ;;  %v5671_v42 = vld [vmem:[#allocation12_spill] sm:$0xff] }
 0x23b   : > { %v2574_v13 = vmax.f32 %v2382_v10, %v2510_v38  ;;  %v2511_v39 = vmul.f32 0.01, %v2385_v54  ;;  %v1863_v10 = vadd.f32 %v5014_v33, %v5671_v42 }
 0x23c   : > { %v2572_v47 = vmax.f32 %v2374_v35, %v2508_v58  ;;  %v2509_v19 = vmul.f32 0.01, %v2377_v3 }
 0x23d   : > { %v3744_v41 = vpack.c.bf16 %v2574_v13, %v2574_v13  ;;  %v2575_v20 = vmax.f32 %v2385_v54, %v2511_v39 }
 0x23e   : > { %v3742_v22 = vpack.c.bf16 %v2572_v47, %v2572_v47  ;;  %v2573_v11 = vmax.f32 %v2377_v3, %v2509_v19  ;;  %v2140_v2 = vpop.f32.mrb[108].mxu0  ;;  %v3865_v8 = vpop.f32.mrb[140].mxu1 }
 0x23f   : > { %2895 = vst.msk [vmem:[%s5139_s12 + $0xa8] sm:$0xf] %vm2852_vm2, %v3744_v41  ;;  %v3745_v50 = vpack.c.bf16 %v2575_v20, %v2575_v20  ;;  %v5349_v17 = vadd.f32 %v2140_v2, %v1852_v56  ;;  %v2398_v36 = vadd.f32 %v3865_v8, %v5269_v52  ;;  %v2142_v57 = vpop.f32.mrb[109].mxu0  ;;  %v2389_v16 = vpop.f32.mrb[141].mxu1  ;;  %v5672_v56 = vld [vmem:[#allocation13_spill] sm:$0xff]  ;;  %v5673_v8 = vld [vmem:[#allocation14_spill] sm:$0xff] }
 0x240   : > { %2893 = vst.msk [vmem:[%s5139_s12 + $0xa0] sm:$0xf] %vm2852_vm2, %v3742_v22  ;;  %v3743_v4 = vpack.c.bf16 %v2573_v11, %v2573_v11  ;;  %v2390_v63 = vadd.f32 %v2389_v16, %v5249_v29  ;;  %v2143_v26 = vpop.f32.mrb[110].mxu0  ;;  %v3866_v27 = vpop.f32.mrb[142].mxu1  ;;  %v1871_v14 = vadd.f32 %v5386_v15, %v5673_v8 }
 0x241   : > { %2896 = vst.msk [vmem:[%s5139_s12 + $0xac] sm:$0xf] %vm2852_vm2, %v3745_v50  ;;  %v2514_v45 = vmul.f32 0.01, %v2398_v36  ;;  %v5357_v24 = vadd.f32 %v2143_v26, %v1855_v59  ;;  %v2401_v60 = vadd.f32 %v3866_v27, %v5277_v25  ;;  %v2145_v31 = vpop.f32.mrb[111].mxu0  ;;  %v2392_v40 = vpop.f32.mrb[143].mxu1 }
 0x242   : > { %2894 = vst.msk [vmem:[%s5139_s12 + $0xa4] sm:$0xf] %vm2852_vm2, %v3743_v4  ;;  %v2512_v52 = vmul.f32 0.01, %v2390_v63  ;;  %v2393_v51 = vadd.f32 %v2392_v40, %v5257_v53 }
 0x243   : > { %v2578_v21 = vmax.f32 %v2398_v36, %v2514_v45  ;;  %v2515_v34 = vmul.f32 0.01, %v2401_v60 }
 0x244   : > { %v2576_v29 = vmax.f32 %v2390_v63, %v2512_v52  ;;  %v2513_v5 = vmul.f32 0.01, %v2393_v51 }
 0x245   : > { %v3748_v48 = vpack.c.bf16 %v2578_v21, %v2578_v21  ;;  %v2579_v12 = vmax.f32 %v2401_v60, %v2515_v34 }
 0x246   : > { %v3746_v18 = vpack.c.bf16 %v2576_v29, %v2576_v29  ;;  %v2577_v25 = vmax.f32 %v2393_v51, %v2513_v5  ;;  %v2148_v6 = vpop.f32.mrb[112].mxu0  ;;  %v3869_v0 = vpop.f32.mrb[144].mxu1  ;;  %v5674_v5 = vld [vmem:[#allocation15_spill] sm:$0xff] }
 0x247   : > { %2899 = vst.msk [vmem:[%s5139_s12 + $0xb8] sm:$0xf] %vm2852_vm2, %v3748_v48  ;;  %v3749_v53 = vpack.c.bf16 %v2579_v12, %v2579_v12  ;;  %v5369_v37 = vadd.f32 %v2148_v6, %v1860_v49  ;;  %v2414_v44 = vadd.f32 %v3869_v0, %v5309_v55  ;;  %v2150_v28 = vpop.f32.mrb[113].mxu0  ;;  %v2405_v35 = vpop.f32.mrb[145].mxu1  ;;  %v1876_v7 = vadd.f32 %v5386_v15, %v5674_v5  ;;  %v5675_v6 = vld [vmem:[#allocation16_spill] sm:$0xff] }
 0x248   : > { %2897 = vst.msk [vmem:[%s5139_s12 + $0xb0] sm:$0xf] %vm2852_vm2, %v3746_v18  ;;  %v3747_v9 = vpack.c.bf16 %v2577_v25, %v2577_v25  ;;  %v2406_v62 = vadd.f32 %v2405_v35, %v5289_v32  ;;  %v2151_v38 = vpop.f32.mrb[114].mxu0  ;;  %v3870_v54 = vpop.f32.mrb[146].mxu1  ;;  %v1879_v0 = vadd.f32 %v5386_v15, %v5675_v6 }
 0x249   : > { %2900 = vst.msk [vmem:[%s5139_s12 + $0xbc] sm:$0xf] %vm2852_vm2, %v3749_v53  ;;  %v2518_v33 = vmul.f32 0.01, %v2414_v44  ;;  %v5377_v43 = vadd.f32 %v2151_v38, %v1863_v10  ;;  %v2417_v30 = vadd.f32 %v3870_v54, %v5317_v61  ;;  %v2153_v58 = vpop.f32.mrb[115].mxu0  ;;  %v2408_v3 = vpop.f32.mrb[147].mxu1  ;;  %v1868_v61 = vadd.f32 %v5386_v15, %v5672_v56 }
 0x24a   : > { %2898 = vst.msk [vmem:[%s5139_s12 + $0xb4] sm:$0xf] %vm2852_vm2, %v3747_v9  ;;  %v2516_v55 = vmul.f32 0.01, %v2406_v62  ;;  %v2409_v13 = vadd.f32 %v2408_v3, %v5297_v23 }
 0x24b   : > { %v2582_v39 = vmax.f32 %v2414_v44, %v2518_v33  ;;  %v2519_v47 = vmul.f32 0.01, %v2417_v30 }
 0x24c   : > { %v2580_v32 = vmax.f32 %v2406_v62, %v2516_v55  ;;  %v2517_v19 = vmul.f32 0.01, %v2409_v13 }
 0x24d   : > { %v3752_v41 = vpack.c.bf16 %v2582_v39, %v2582_v39  ;;  %v2583_v20 = vmax.f32 %v2417_v30, %v2519_v47 }
 0x24e   : > { %v3750_v22 = vpack.c.bf16 %v2580_v32, %v2580_v32  ;;  %v2581_v11 = vmax.f32 %v2409_v13, %v2517_v19  ;;  %v2156_v2 = vpop.f32.mrb[116].mxu0  ;;  %v3873_v23 = vpop.f32.mrb[148].mxu1  ;;  %v5676_v32 = vld [vmem:[#allocation18_spill] sm:$0xff] }
 0x24f   : > { %2903 = vst.msk [vmem:[%s5139_s12 + $0xc8] sm:$0xf] %vm2852_vm2, %v3752_v41  ;;  %v3753_v59 = vpack.c.bf16 %v2583_v20, %v2583_v20  ;;  %v2157_v50 = vadd.f32 %v2156_v2, %v1868_v61  ;;  %v2430_v36 = vadd.f32 %v3873_v23, %v5349_v17  ;;  %v2158_v57 = vpop.f32.mrb[117].mxu0  ;;  %v2421_v16 = vpop.f32.mrb[149].mxu1  ;;  %v1884_v19 = vadd.f32 %v5386_v15, %v5676_v32  ;;  %v5677_v2 = vld [vmem:[#allocation19_spill] sm:$0xff] }
 0x250   : > { %2901 = vst.msk [vmem:[%s5139_s12 + $0xc0] sm:$0xf] %vm2852_vm2, %v3750_v22  ;;  %v3751_v4 = vpack.c.bf16 %v2581_v11, %v2581_v11  ;;  %v2422_v63 = vadd.f32 %v2421_v16, %v5329_v1  ;;  %v2159_v26 = vpop.f32.mrb[118].mxu0  ;;  %v3874_v27 = vpop.f32.mrb[150].mxu1  ;;  %v1887_v23 = vadd.f32 %v5386_v15, %v5677_v2 }
 0x251   : > { %2904 = vst.msk [vmem:[%s5139_s12 + $0xcc] sm:$0xf] %vm2852_vm2, %v3753_v59  ;;  %v2522_v45 = vmul.f32 0.01, %v2430_v36  ;;  %v2160_v60 = vadd.f32 %v2159_v26, %v1871_v14  ;;  %v2433_v31 = vadd.f32 %v3874_v27, %v5357_v24  ;;  %v2161_v40 = vpop.f32.mrb[119].mxu0  ;;  %v2424_v52 = vpop.f32.mrb[151].mxu1 }
 0x252   : > { %2902 = vst.msk [vmem:[%s5139_s12 + $0xc4] sm:$0xf] %vm2852_vm2, %v3751_v4  ;;  %v2520_v17 = vmul.f32 0.01, %v2422_v63  ;;  %v2425_v51 = vadd.f32 %v2424_v52, %v5337_v46 }
 0x253   : > { %v2586_v21 = vmax.f32 %v2430_v36, %v2522_v45  ;;  %v2523_v34 = vmul.f32 0.01, %v2433_v31 }
 0x254   : > { %v2584_v29 = vmax.f32 %v2422_v63, %v2520_v17  ;;  %v2521_v1 = vmul.f32 0.01, %v2425_v51 }
 0x255   : > { %v3756_v49 = vpack.c.bf16 %v2586_v21, %v2586_v21  ;;  %v2587_v48 = vmax.f32 %v2433_v31, %v2523_v34 }
 0x256   : > { %v3754_v12 = vpack.c.bf16 %v2584_v29, %v2584_v29  ;;  %v2585_v24 = vmax.f32 %v2425_v51, %v2521_v1  ;;  %v2164_v18 = vpop.f32.mrb[120].mxu0  ;;  %v3877_v25 = vpop.f32.mrb[152].mxu1 }
 0x257   : > { %2907 = vst.msk [vmem:[%s5139_s12 + $0xd8] sm:$0xf] %vm2852_vm2, %v3756_v49  ;;  %v3757_v46 = vpack.c.bf16 %v2587_v48, %v2587_v48  ;;  %v2165_v42 = vadd.f32 %v2164_v18, %v1876_v7  ;;  %v2446_v10 = vadd.f32 %v3877_v25, %v2157_v50  ;;  %v2166_v53 = vpop.f32.mrb[121].mxu0  ;;  %v2437_v44 = vpop.f32.mrb[153].mxu1 }
 0x258   : > { %2905 = vst.msk [vmem:[%s5139_s12 + $0xd0] sm:$0xf] %vm2852_vm2, %v3754_v12  ;;  %v3755_v28 = vpack.c.bf16 %v2585_v24, %v2585_v24  ;;  %v2438_v35 = vadd.f32 %v2437_v44, %v5369_v37  ;;  %v2167_v9 = vpop.f32.mrb[122].mxu0  ;;  %v3878_v62 = vpop.f32.mrb[154].mxu1 }
 0x259   : > { %2908 = vst.msk [vmem:[%s5139_s12 + $0xdc] sm:$0xf] %vm2852_vm2, %v3757_v46  ;;  %v2526_v38 = vmul.f32 0.01, %v2446_v10  ;;  %v2168_v54 = vadd.f32 %v2167_v9, %v1879_v0  ;;  %v2449_v33 = vadd.f32 %v3878_v62, %v2160_v60  ;;  %v2169_v30 = vpop.f32.mrb[123].mxu0  ;;  %v2440_v58 = vpop.f32.mrb[155].mxu1 }
 0x25a   : > { %2906 = vst.msk [vmem:[%s5139_s12 + $0xd4] sm:$0xf] %vm2852_vm2, %v3755_v28  ;;  %v2524_v3 = vmul.f32 0.01, %v2438_v35  ;;  %v2441_v55 = vadd.f32 %v2440_v58, %v5377_v43 }
 0x25b   : > { %v2590_v13 = vmax.f32 %v2446_v10, %v2526_v38  ;;  %v2527_v39 = vmul.f32 0.01, %v2449_v33 }
 0x25c   : > { %v2588_v47 = vmax.f32 %v2438_v35, %v2524_v3  ;;  %v2525_v37 = vmul.f32 0.01, %v2441_v55 }
 0x25d   : > { %v3760_v56 = vpack.c.bf16 %v2590_v13, %v2590_v13  ;;  %v2591_v61 = vmax.f32 %v2449_v33, %v2527_v39 }
 0x25e   : > { %v3758_v41 = vpack.c.bf16 %v2588_v47, %v2588_v47  ;;  %v2589_v20 = vmax.f32 %v2441_v55, %v2525_v37  ;;  %v2172_v22 = vpop.f32.mrb[124].mxu0  ;;  %v3881_v11 = vpop.f32.mrb[156].mxu1 }
 0x25f   : > { %2911 = vst.msk [vmem:[%s5139_s12 + $0xe8] sm:$0xf] %vm2852_vm2, %v3760_v56  ;;  %v3761_v43 = vpack.c.bf16 %v2591_v61, %v2591_v61  ;;  %v2173_v8 = vadd.f32 %v2172_v22, %v1884_v19  ;;  %v2174_v14 = vpop.f32.mrb[125].mxu0  ;;  %v2453_v59 = vpop.f32.mrb[157].mxu1 }
 0x260   : > { %2909 = vst.msk [vmem:[%s5139_s12 + $0xe0] sm:$0xf] %vm2852_vm2, %v3758_v41  ;;  %v3759_v50 = vpack.c.bf16 %v2589_v20, %v2589_v20  ;;  %v2454_v36 = vadd.f32 %v2453_v59, %v2165_v42  ;;  %v2175_v57 = vpop.f32.mrb[126].mxu0  ;;  %v3882_v16 = vpop.f32.mrb[158].mxu1 }
 0x261   : > { %2912 = vst.msk [vmem:[%s5139_s12 + $0xec] sm:$0xf] %vm2852_vm2, %v3761_v43  ;;  %v2462_v4 = vadd.f32 %v3881_v11, %v2173_v8  ;;  %v2176_v63 = vadd.f32 %v2175_v57, %v1887_v23  ;;  %v2177_v26 = vpop.f32.mrb[127].mxu0  ;;  %v2456_v15 = vpop.f32.mrb[159].mxu1 }
 0x262   : > { %2910 = vst.msk [vmem:[%s5139_s12 + $0xe4] sm:$0xf] %vm2852_vm2, %v3759_v50  ;;  %v2528_v27 = vmul.f32 0.01, %v2454_v36  ;;  %v2457_v45 = vadd.f32 %v2456_v15, %v2168_v54 }
 0x263   : > { %v2530_v60 = vmul.f32 0.01, %v2462_v4  ;;  %v2465_v31 = vadd.f32 %v3882_v16, %v2176_v63 }
 0x264   : > { %v2592_v40 = vmax.f32 %v2454_v36, %v2528_v27  ;;  %v2529_v52 = vmul.f32 0.01, %v2457_v45 }
 0x265   : > { %v2594_v17 = vmax.f32 %v2462_v4, %v2530_v60  ;;  %v2531_v51 = vmul.f32 0.01, %v2465_v31  ;;  %2923 = sbr.rel (!%p4547_p4) target bundleno = 711 (0x2c7), region = 36 }
 0x266   : > { %v3762_v21 = vpack.c.bf16 %v2592_v40, %v2592_v40  ;;  %v2593_v34 = vmax.f32 %v2457_v45, %v2529_v52 }
 0x267   : > { %v3764_v29 = vpack.c.bf16 %v2594_v17, %v2594_v17  ;;  %v2595_v1 = vmax.f32 %v2465_v31, %v2531_v51 }
 0x268   : > { %2913 = vst.msk [vmem:[%s5139_s12 + $0xf0] sm:$0xf] %vm2852_vm2, %v3762_v21  ;;  %v3763_v5 = vpack.c.bf16 %v2593_v34, %v2593_v34 }
 0x269   : > { %2915 = vst.msk [vmem:[%s5139_s12 + $0xf8] sm:$0xf] %vm2852_vm2, %v3764_v29  ;;  %v3765_v7 = vpack.c.bf16 %v2595_v1, %v2595_v1 }
 0x26a   : > { %2914 = vst.msk [vmem:[%s5139_s12 + $0xf4] sm:$0xf] %vm2852_vm2, %v3763_v5 }
 0x26b   : > { %2916 = vst.msk [vmem:[%s5139_s12 + $0xfc] sm:$0xf] %vm2852_vm2, %v3765_v7 }
 0x26c   : > { %s5685_s4 = smov (!%p2926_p8, %s2925_s4), 64 }
 0x26d   : > { %s3687_s10 = sshll.u32 %s5685_s4, 6 }
 0x26e   : > { %p3690_p9 = scmp.eq.s32.totalorder %s3687_s10, 0 }
 0x26f   : > { %s5451_s11 = sshrl.u32 (!%p3690_p9), %s5685_s4, 6 }
 0x270   : > { %2934 = sbr.rel (%p3690_p9) target bundleno = 711 (0x2c7), region = 40  ;;  %p3691_p10 = scmp.le.s32.totalorder (!%p3690_p9), %s5451_s11, 0 }
 0x277   : > { %3339 = sbr.rel (%p3691_p10) target bundleno = 690 (0x2b2), region = 112  ;;  %s5678_s15 = smov (!%p3691_p10), %s5445_s8 }
 0x278   : > { %s5679_s20 = smov (!%p3691_p10), %s5139_s12  ;;  %s5460_s23 = smov (!%p3691_p10), 0  }
 0x279   : > { %s5462_s14 = smov (!%p3691_p10), 0  }
 0x27e LB: >> { %v2950_v49 = vld [vmem:[%s4475_s20] sm:$0xf]  ;;  %v2952_v48 = vld [vmem:[%s4475_s20 + $0x4] sm:$0xf]  ;;  %v2954_v12 = vld [vmem:[%s4475_s20 + $0x8] sm:$0xf]  ;;  %s4483_s14 = sphi %s5462_s14, %s2944_s14   ;;  %s4479_s23 = sphi %s5460_s23, %s5680_s23   ;;  %s4475_s20 = sphi %s5679_s20, %s3083_s20   ;;  %s4471_s15 = sphi %s5678_s15, %s3084_s15  }
 0x27f   : >> { %2951 = vst [vmem:[%s4471_s15] sm:$0xf] %v2950_v49  ;;  %2953 = vst [vmem:[%s4471_s15 + $0x4] sm:$0xf] %v2952_v48  ;;  %v2956_v24 = vld [vmem:[%s4475_s20 + $0xc] sm:$0xf]  ;;  %s3078_s17 = sadd.s32 1, %s4479_s23 }
 0x280   : >> { %2955 = vst [vmem:[%s4471_s15 + $0x8] sm:$0xf] %v2954_v12  ;;  %v2958_v18 = vld [vmem:[%s4475_s20 + $0x10] sm:$0xf]  ;;  %v2960_v25 = vld [vmem:[%s4475_s20 + $0x14] sm:$0xf]  ;;  %p3079_p11 = scmp.ge.s32.totalorder %s3078_s17, %s5451_s11 }
 0x281   : >> { %2957 = vst [vmem:[%s4471_s15 + $0xc] sm:$0xf] %v2956_v24  ;;  %2959 = vst [vmem:[%s4471_s15 + $0x10] sm:$0xf] %v2958_v18  ;;  %v2962_v6 = vld [vmem:[%s4475_s20 + $0x18] sm:$0xf] }
 0x282   : >> { %2961 = vst [vmem:[%s4471_s15 + $0x14] sm:$0xf] %v2960_v25  ;;  %v2964_v0 = vld [vmem:[%s4475_s20 + $0x1c] sm:$0xf]  ;;  %v2966_v46 = vld [vmem:[%s4475_s20 + $0x20] sm:$0xf] }
 0x283   : >> { %2963 = vst [vmem:[%s4471_s15 + $0x18] sm:$0xf] %v2962_v6  ;;  %2965 = vst [vmem:[%s4471_s15 + $0x1c] sm:$0xf] %v2964_v0  ;;  %v2968_v42 = vld [vmem:[%s4475_s20 + $0x24] sm:$0xf] }
 0x284   : >> { %2967 = vst [vmem:[%s4471_s15 + $0x20] sm:$0xf] %v2966_v46  ;;  %v2970_v10 = vld [vmem:[%s4475_s20 + $0x28] sm:$0xf]  ;;  %v2972_v53 = vld [vmem:[%s4475_s20 + $0x2c] sm:$0xf] }
 0x285   : >> { %2969 = vst [vmem:[%s4471_s15 + $0x24] sm:$0xf] %v2968_v42  ;;  %2971 = vst [vmem:[%s4471_s15 + $0x28] sm:$0xf] %v2970_v10  ;;  %v2974_v44 = vld [vmem:[%s4475_s20 + $0x30] sm:$0xf] }
 0x286   : >> { %2973 = vst [vmem:[%s4471_s15 + $0x2c] sm:$0xf] %v2972_v53  ;;  %v2976_v28 = vld [vmem:[%s4475_s20 + $0x34] sm:$0xf]  ;;  %v2978_v35 = vld [vmem:[%s4475_s20 + $0x38] sm:$0xf] }
 0x287   : >> { %2975 = vst [vmem:[%s4471_s15 + $0x30] sm:$0xf] %v2974_v44  ;;  %2977 = vst [vmem:[%s4471_s15 + $0x34] sm:$0xf] %v2976_v28  ;;  %v2980_v9 = vld [vmem:[%s4475_s20 + $0x3c] sm:$0xf] }
 0x288   : >> { %2979 = vst [vmem:[%s4471_s15 + $0x38] sm:$0xf] %v2978_v35  ;;  %v2982_v62 = vld [vmem:[%s4475_s20 + $0x40] sm:$0xf]  ;;  %v2984_v38 = vld [vmem:[%s4475_s20 + $0x44] sm:$0xf] }
 0x289   : >> { %2981 = vst [vmem:[%s4471_s15 + $0x3c] sm:$0xf] %v2980_v9  ;;  %2983 = vst [vmem:[%s4471_s15 + $0x40] sm:$0xf] %v2982_v62  ;;  %v2986_v54 = vld [vmem:[%s4475_s20 + $0x48] sm:$0xf] }
 0x28a   : >> { %2985 = vst [vmem:[%s4471_s15 + $0x44] sm:$0xf] %v2984_v38  ;;  %v2988_v33 = vld [vmem:[%s4475_s20 + $0x4c] sm:$0xf]  ;;  %v2990_v30 = vld [vmem:[%s4475_s20 + $0x50] sm:$0xf] }
 0x28b   : >> { %2987 = vst [vmem:[%s4471_s15 + $0x48] sm:$0xf] %v2986_v54  ;;  %2989 = vst [vmem:[%s4471_s15 + $0x4c] sm:$0xf] %v2988_v33  ;;  %v2992_v58 = vld [vmem:[%s4475_s20 + $0x54] sm:$0xf] }
 0x28c   : >> { %2991 = vst [vmem:[%s4471_s15 + $0x50] sm:$0xf] %v2990_v30  ;;  %v2994_v3 = vld [vmem:[%s4475_s20 + $0x58] sm:$0xf]  ;;  %v2996_v55 = vld [vmem:[%s4475_s20 + $0x5c] sm:$0xf] }
 0x28d   : >> { %2993 = vst [vmem:[%s4471_s15 + $0x54] sm:$0xf] %v2992_v58  ;;  %2995 = vst [vmem:[%s4471_s15 + $0x58] sm:$0xf] %v2994_v3  ;;  %v2998_v13 = vld [vmem:[%s4475_s20 + $0x60] sm:$0xf] }
 0x28e   : >> { %2997 = vst [vmem:[%s4471_s15 + $0x5c] sm:$0xf] %v2996_v55  ;;  %v3000_v39 = vld [vmem:[%s4475_s20 + $0x64] sm:$0xf]  ;;  %v3002_v47 = vld [vmem:[%s4475_s20 + $0x68] sm:$0xf] }
 0x28f   : >> { %2999 = vst [vmem:[%s4471_s15 + $0x60] sm:$0xf] %v2998_v13  ;;  %3001 = vst [vmem:[%s4471_s15 + $0x64] sm:$0xf] %v3000_v39  ;;  %v3004_v37 = vld [vmem:[%s4475_s20 + $0x6c] sm:$0xf] }
 0x290   : >> { %3003 = vst [vmem:[%s4471_s15 + $0x68] sm:$0xf] %v3002_v47  ;;  %v3006_v32 = vld [vmem:[%s4475_s20 + $0x70] sm:$0xf]  ;;  %v3008_v19 = vld [vmem:[%s4475_s20 + $0x74] sm:$0xf] }
 0x291   : >> { %3005 = vst [vmem:[%s4471_s15 + $0x6c] sm:$0xf] %v3004_v37  ;;  %3007 = vst [vmem:[%s4471_s15 + $0x70] sm:$0xf] %v3006_v32  ;;  %v3010_v56 = vld [vmem:[%s4475_s20 + $0x78] sm:$0xf] }
 0x292   : >> { %3009 = vst [vmem:[%s4471_s15 + $0x74] sm:$0xf] %v3008_v19  ;;  %v3012_v61 = vld [vmem:[%s4475_s20 + $0x7c] sm:$0xf]  ;;  %v3014_v41 = vld [vmem:[%s4475_s20 + $0x80] sm:$0xf] }
 0x293   : >> { %3011 = vst [vmem:[%s4471_s15 + $0x78] sm:$0xf] %v3010_v56  ;;  %3013 = vst [vmem:[%s4471_s15 + $0x7c] sm:$0xf] %v3012_v61  ;;  %v3016_v20 = vld [vmem:[%s4475_s20 + $0x84] sm:$0xf] }
 0x294   : >> { %3015 = vst [vmem:[%s4471_s15 + $0x80] sm:$0xf] %v3014_v41  ;;  %v3018_v22 = vld [vmem:[%s4475_s20 + $0x88] sm:$0xf]  ;;  %v3020_v11 = vld [vmem:[%s4475_s20 + $0x8c] sm:$0xf] }
 0x295   : >> { %3017 = vst [vmem:[%s4471_s15 + $0x84] sm:$0xf] %v3016_v20  ;;  %3019 = vst [vmem:[%s4471_s15 + $0x88] sm:$0xf] %v3018_v22  ;;  %v3022_v2 = vld [vmem:[%s4475_s20 + $0x90] sm:$0xf] }
 0x296   : >> { %3021 = vst [vmem:[%s4471_s15 + $0x8c] sm:$0xf] %v3020_v11  ;;  %v3024_v23 = vld [vmem:[%s4475_s20 + $0x94] sm:$0xf]  ;;  %v3026_v43 = vld [vmem:[%s4475_s20 + $0x98] sm:$0xf] }
 0x297   : >> { %3023 = vst [vmem:[%s4471_s15 + $0x90] sm:$0xf] %v3022_v2  ;;  %3025 = vst [vmem:[%s4471_s15 + $0x94] sm:$0xf] %v3024_v23  ;;  %v3028_v8 = vld [vmem:[%s4475_s20 + $0x9c] sm:$0xf] }
 0x298   : >> { %3027 = vst [vmem:[%s4471_s15 + $0x98] sm:$0xf] %v3026_v43  ;;  %v3030_v14 = vld [vmem:[%s4475_s20 + $0xa0] sm:$0xf]  ;;  %v3032_v59 = vld [vmem:[%s4475_s20 + $0xa4] sm:$0xf] }
 0x299   : >> { %3029 = vst [vmem:[%s4471_s15 + $0x9c] sm:$0xf] %v3028_v8  ;;  %3031 = vst [vmem:[%s4471_s15 + $0xa0] sm:$0xf] %v3030_v14  ;;  %v3034_v50 = vld [vmem:[%s4475_s20 + $0xa8] sm:$0xf] }
 0x29a   : >> { %3033 = vst [vmem:[%s4471_s15 + $0xa4] sm:$0xf] %v3032_v59  ;;  %v3036_v36 = vld [vmem:[%s4475_s20 + $0xac] sm:$0xf]  ;;  %v3038_v57 = vld [vmem:[%s4475_s20 + $0xb0] sm:$0xf] }
 0x29b   : >> { %3035 = vst [vmem:[%s4471_s15 + $0xa8] sm:$0xf] %v3034_v50  ;;  %3037 = vst [vmem:[%s4471_s15 + $0xac] sm:$0xf] %v3036_v36  ;;  %v3040_v16 = vld [vmem:[%s4475_s20 + $0xb4] sm:$0xf] }
 0x29c   : >> { %3039 = vst [vmem:[%s4471_s15 + $0xb0] sm:$0xf] %v3038_v57  ;;  %v3042_v4 = vld [vmem:[%s4475_s20 + $0xb8] sm:$0xf]  ;;  %v3044_v63 = vld [vmem:[%s4475_s20 + $0xbc] sm:$0xf] }
 0x29d   : >> { %3041 = vst [vmem:[%s4471_s15 + $0xb4] sm:$0xf] %v3040_v16  ;;  %3043 = vst [vmem:[%s4471_s15 + $0xb8] sm:$0xf] %v3042_v4  ;;  %v3046_v26 = vld [vmem:[%s4475_s20 + $0xc0] sm:$0xf] }
 0x29e   : >> { %3045 = vst [vmem:[%s4471_s15 + $0xbc] sm:$0xf] %v3044_v63  ;;  %v3048_v15 = vld [vmem:[%s4475_s20 + $0xc4] sm:$0xf]  ;;  %v3050_v27 = vld [vmem:[%s4475_s20 + $0xc8] sm:$0xf] }
 0x29f   : >> { %3047 = vst [vmem:[%s4471_s15 + $0xc0] sm:$0xf] %v3046_v26  ;;  %3049 = vst [vmem:[%s4471_s15 + $0xc4] sm:$0xf] %v3048_v15  ;;  %v3052_v45 = vld [vmem:[%s4475_s20 + $0xcc] sm:$0xf] }
 0x2a0   : >> { %3051 = vst [vmem:[%s4471_s15 + $0xc8] sm:$0xf] %v3050_v27  ;;  %v3054_v60 = vld [vmem:[%s4475_s20 + $0xd0] sm:$0xf]  ;;  %v3056_v31 = vld [vmem:[%s4475_s20 + $0xd4] sm:$0xf] }
 0x2a1   : >> { %3053 = vst [vmem:[%s4471_s15 + $0xcc] sm:$0xf] %v3052_v45  ;;  %3055 = vst [vmem:[%s4471_s15 + $0xd0] sm:$0xf] %v3054_v60  ;;  %v3058_v40 = vld [vmem:[%s4475_s20 + $0xd8] sm:$0xf] }
 0x2a2   : >> { %3057 = vst [vmem:[%s4471_s15 + $0xd4] sm:$0xf] %v3056_v31  ;;  %v3060_v52 = vld [vmem:[%s4475_s20 + $0xdc] sm:$0xf]  ;;  %v3062_v17 = vld [vmem:[%s4475_s20 + $0xe0] sm:$0xf] }
 0x2a3   : >> { %3059 = vst [vmem:[%s4471_s15 + $0xd8] sm:$0xf] %v3058_v40  ;;  %3061 = vst [vmem:[%s4471_s15 + $0xdc] sm:$0xf] %v3060_v52  ;;  %v3064_v51 = vld [vmem:[%s4475_s20 + $0xe4] sm:$0xf] }
 0x2a4   : >> { %3063 = vst [vmem:[%s4471_s15 + $0xe0] sm:$0xf] %v3062_v17  ;;  %v3066_v21 = vld [vmem:[%s4475_s20 + $0xe8] sm:$0xf]  ;;  %v3068_v34 = vld [vmem:[%s4475_s20 + $0xec] sm:$0xf] }
 0x2a5   : >> { %3065 = vst [vmem:[%s4471_s15 + $0xe4] sm:$0xf] %v3064_v51  ;;  %3067 = vst [vmem:[%s4471_s15 + $0xe8] sm:$0xf] %v3066_v21  ;;  %v3070_v29 = vld [vmem:[%s4475_s20 + $0xf0] sm:$0xf] }
 0x2a6   : >> { %3069 = vst [vmem:[%s4471_s15 + $0xec] sm:$0xf] %v3068_v34  ;;  %v3072_v1 = vld [vmem:[%s4475_s20 + $0xf4] sm:$0xf]  ;;  %v3074_v5 = vld [vmem:[%s4475_s20 + $0xf8] sm:$0xf] }
 0x2a7   : >> { %3071 = vst [vmem:[%s4471_s15 + $0xf0] sm:$0xf] %v3070_v29  ;;  %3073 = vst [vmem:[%s4471_s15 + $0xf4] sm:$0xf] %v3072_v1  ;;  %v3076_v7 = vld [vmem:[%s4475_s20 + $0xfc] sm:$0xf] }
 0x2a8   : >> { %3075 = vst [vmem:[%s4471_s15 + $0xf8] sm:$0xf] %v3074_v5  ;;  %3077 = vst [vmem:[%s4471_s15 + $0xfc] sm:$0xf] %v3076_v7  ;;  %s5687_s17 = smov (%p3079_p11, %s3078_s17), 0  ;;  %s2944_s14 = sadd.s32 1, %s4483_s14  }
 0x2a9   : >> { %s3692_s18 = sshll.u32 %s5687_s17, 8  ;;  %p2943_p12 = scmp.ge.s32.totalorder %s2944_s14, %s5451_s11 }
 0x2aa   : >> { %s3083_s20 = scalar_lea.vmem %s5139_s12, %s3692_s18 [#allocation2]   ;;  %s3084_s15 = scalar_lea.vmem %s5445_s8, %s3692_s18  }
 0x2ab   : >> { %s5680_s23 = smov %s5687_s17  ;;  %2946 = sbr.rel (!%p2943_p12) target bundleno = 638 (0x27e), region = 118 }
 0x2b2 PF: > { %s5619_s21 = sand.u32 63, %s5685_s4   ;;  %s3767_s22 = sshll.u32 %s5451_s11, 8 }
 0x2b3   : > { %s3089_s24 = scalar_lea.vmem %s5139_s12, %s3767_s22 [#allocation2]   ;;  %s3091_s25 = scalar_lea.vmem %s5445_s8, %s3767_s22  }
 0x2b4   : > { %p3697_p13 = scmp.le.s32.totalorder %s5619_s21, 0 }
 0x2b5   : > { %s4485_s9 = smov (!%p3697_p13), %s3091_s25   ;;  %s4489_s26 = smov (!%p3697_p13), %s3089_s24  }
 0x2b6   : > { %3353 = sbr.rel (%p3697_p13) target bundleno = 711 (0x2c7), region = 123  ;;  %s4493_s27 = smov (!%p3697_p13), 0  }
 0x2b7   : > { %s4497_s28 = smov (!%p3697_p13), 0  }
 0x2bd LB: >> { %v3101_v49 = vld [vmem:[%s4491_s26] sm:$0xf]  ;;  %s3103_s29 = sadd.s32 1, %s4495_s27  ;;  %s3095_s28 = sadd.s32 1, %s4499_s28   ;;  %s4499_s28 = sphi %s4497_s28, %s3095_s28   ;;  %s4495_s27 = sphi %s4493_s27, %s4494_s27   ;;  %s4491_s26 = sphi %s4489_s26, %s3108_s26   ;;  %s4487_s9 = sphi %s4485_s9, %s3109_s9  }
 0x2be   : >> { %3102 = vst [vmem:[%s4487_s9] sm:$0xf] %v3101_v49  ;;  %p3104_p0 = scmp.ge.s32.totalorder %s3103_s29, %s5619_s21  ;;  %p3094_p1 = scmp.ge.s32.totalorder %s3095_s28, %s5619_s21 }
 0x2c0   : >> { %s5689_s29 = smov (%p3104_p0, %s3103_s29), 0  ;;  %3097 = sbr.rel (!%p3094_p1) target bundleno = 701 (0x2bd), region = 129 }
 0x2c1   : >> { %s3698_s12 = sshll.u32 %s5689_s29, 2  ;;  %s4494_s27 = smov %s5689_s29  }
 0x2c2   : >> { %s3108_s26 = scalar_lea.vmem %s3089_s24, %s3698_s12 [#allocation2]   ;;  %s3109_s9 = scalar_lea.vmem %s3091_s25, %s3698_s12  }
 0x2c7 PF: > { %p10_p2 = scmp.ge.s32.totalorder %s4537_s16, 5   ;;  %s5681_s12 = smov %s4463_s13 }
 0x2c8   : > { %s5682_s13 = smov %s4545_s19  ;;  %s5683_s14 = smov %s4537_s16 }
 0x2c9   :  { %12 = sbr.rel (!%p10_p2) target bundleno = 2 (0x2), region = 140 }

// kernel: pilotnet_forward.8
= control target key start
LH: loop header
LB: loop body
LE: loop exit
PB: predicated region body
PF: predicated region fallthrough
CT: control target
= control target key end

     0   :  { %v2432_v42 = vmov 0   ;;  %vm1125_vm0 = vcmask 1041408   ;;  %vm1085_vm1 = vcmask 31744   ;;  %vm1833_vm2 = vcmask 388096   ;;  %s3170_s1 = inlined_call_operand.vmem [shape: bf16[900,48], index: 1, kind: input, shape index: {}]   ;;  %s3171_s0 = inlined_call_operand.vmem [shape: bf16[204,900], index: 0, kind: input, shape index: {}]   ;;  %s3172_s2 = inlined_call_operand.vmem [shape: f32[1,48], index: 2, kind: input, shape index: {}]   ;;  %s3173_s3 = inlined_call_operand.vmem [shape: bf16[204,48], index: 3, kind: output, shape index: {}]  }
   0x1   :  { %v2375_v0 = vld [vmem:[%s3170_s1 + $0x40] sm:$0xff]   ;;  %v2379_v4 = vld [vmem:[%s3170_s1 + $0x48] sm:$0xff]   ;;  %v2383_v8 = vld [vmem:[%s3170_s1 + $0x50] sm:$0xff]   ;;  %vm1859_vm3 = vcmask 386048  }
   0x2   :  { %v2376_v1 = vld [vmem:[%s3170_s1] sm:$0xff]   ;;  %2092 = vmatprep.subr.bf16.mxu0 %v2375_v0  ;;  %v2380_v5 = vld [vmem:[%s3170_s1 + $0x8] sm:$0xff]   ;;  %v2384_v9 = vld [vmem:[%s3170_s1 + $0x10] sm:$0xff]  }
   0x3   :  { %v2377_v2 = vld [vmem:[%s3170_s1 + $0xc0] sm:$0xff]   ;;  %2093 = vmatpush3.bf16.msra.mxu0 %v2376_v1  ;;  %v2381_v6 = vld [vmem:[%s3170_s1 + $0xc8] sm:$0xff]   ;;  %v2385_v10 = vld [vmem:[%s3170_s1 + $0xd0] sm:$0xff]  }
   0x4   :  { %v2378_v3 = vld [vmem:[%s3170_s1 + $0x80] sm:$0xff]   ;;  %2186 = vmatprep.subr.bf16.mxu1 %v2377_v2  ;;  %2094 = vmatprep.subr.bf16.mxu0 %v2379_v4  ;;  %v2382_v7 = vld [vmem:[%s3170_s1 + $0x88] sm:$0xff]   ;;  %v2386_v11 = vld [vmem:[%s3170_s1 + $0x90] sm:$0xff]  }
   0x5   :  { %2187 = vmatpush3.bf16.msra.mxu1 %v2378_v3  ;;  %v2387_v12 = vld [vmem:[%s3170_s1 + $0x58] sm:$0xff]   ;;  %v2391_v16 = vld [vmem:[%s3170_s1 + $0x60] sm:$0xff]   ;;  %v2395_v20 = vld [vmem:[%s3170_s1 + $0x68] sm:$0xff]  }
   0x6   :  { %2188 = vmatprep.subr.bf16.mxu1 %v2381_v6  ;;  %v2388_v13 = vld [vmem:[%s3170_s1 + $0x18] sm:$0xff]   ;;  %v2392_v17 = vld [vmem:[%s3170_s1 + $0x20] sm:$0xff]   ;;  %v2396_v21 = vld [vmem:[%s3170_s1 + $0x28] sm:$0xff]  }
   0x7   :  { %2095 = vmatpush3.bf16.msra.mxu0 %v2380_v5  ;;  %v2389_v14 = vld [vmem:[%s3170_s1 + $0xd8] sm:$0xff]   ;;  %v2393_v18 = vld [vmem:[%s3170_s1 + $0xe0] sm:$0xff]   ;;  %v2397_v22 = vld [vmem:[%s3170_s1 + $0xe8] sm:$0xff]  }
   0x8   :  { %2096 = vmatprep.subr.bf16.mxu0 %v2383_v8  ;;  %v2390_v15 = vld [vmem:[%s3170_s1 + $0x98] sm:$0xff]   ;;  %v2394_v19 = vld [vmem:[%s3170_s1 + $0xa0] sm:$0xff]   ;;  %v2398_v23 = vld [vmem:[%s3170_s1 + $0xa8] sm:$0xff]  }
   0x9   :  { %2189 = vmatpush3.bf16.msra.mxu1 %v2382_v7  ;;  %v2399_v24 = vld [vmem:[%s3170_s1 + $0x70] sm:$0xff]   ;;  %v2403_v28 = vld [vmem:[%s3170_s1 + $0x78] sm:$0xff]   ;;  %v15_v31 = vld [vmem:[%s3171_s0] sm:$0xff] }
   0xa   :  { %2190 = vmatprep.subr.bf16.mxu1 %v2385_v10  ;;  %v2400_v25 = vld [vmem:[%s3170_s1 + $0x30] sm:$0xff]   ;;  %v2404_v29 = vld [vmem:[%s3170_s1 + $0x38] sm:$0xff]   ;;  %v19_v32 = vld [vmem:[%s3171_s0 + $0x20] sm:$0xff] }
   0xb   :  { %2097 = vmatpush3.bf16.msra.mxu0 %v2384_v9  ;;  %v2401_v26 = vld [vmem:[%s3170_s1 + $0xf0] sm:$0xff]   ;;  %v2405_v30 = vld [vmem:[%s3170_s1 + $0xf8] sm:$0xff]   ;;  %v1866_v33 = vcombine.low %v15_v31, %v19_v32  ;;  %v1867_v34 = vcombine.high %v15_v31, %v19_v32  ;;  %v2407_v36 = vld [vmem:[%s3170_s1 + $0x140] sm:$0xff]  }
   0xc   :  { %2098 = vmatprep.subr.bf16.mxu0 %v2387_v12  ;;  %v2402_v27 = vld [vmem:[%s3170_s1 + $0xb0] sm:$0xff]   ;;  %v2406_v35 = vld [vmem:[%s3170_s1 + $0xb8] sm:$0xff]   ;;  %v16_v37 = vld [vmem:[%s3171_s0 + $0x8] sm:$0xff] }
   0xd   :  { %2191 = vmatpush3.bf16.msra.mxu1 %v2386_v11  ;;  %1161 = vmatprep.mubr.bf16.mxu0 %v1867_v34  ;;  %v20_v38 = vld [vmem:[%s3171_s0 + $0x28] sm:$0xff]  ;;  %v2408_v41 = vld [vmem:[%s3170_s1 + $0x100] sm:$0xff]   ;;  %v2413_v63 = vld [vmem:[%s3170_s1 + $0x150] sm:$0xff]  }
   0xe   :  { %2192 = vmatprep.subr.bf16.mxu1 %v2389_v14  ;;  %v1868_v39 = vcombine.low %v16_v37, %v20_v38  ;;  %v1869_v40 = vcombine.high %v16_v37, %v20_v38  ;;  %v2409_v43 = vld [vmem:[%s3170_s1 + $0x180] sm:$0xff]   ;;  %v24_v47 = vld [vmem:[%s3171_s0 + $0x48] sm:$0xff]  ;;  %v2414_v0 = vld [vmem:[%s3170_s1 + $0x110] sm:$0xff]  }
   0xf   :  { %2099 = vmatpush3.bf16.msra.mxu0 %v2388_v13  ;;  %v23_v44 = vld [vmem:[%s3171_s0 + $0x40] sm:$0xff]  ;;  %v28_v48 = vld [vmem:[%s3171_s0 + $0x68] sm:$0xff]  ;;  %v2415_v1 = vld [vmem:[%s3170_s1 + $0x190] sm:$0xff]  }
  0x10   :  { %2100 = vmatprep.subr.bf16.mxu0 %v2391_v16  ;;  %v27_v45 = vld [vmem:[%s3171_s0 + $0x60] sm:$0xff]  ;;  %1298 = vmatprep.mubr.bf16.mxu1 %v1869_v40  ;;  %v1877_v49 = vcombine.high %v24_v47, %v28_v48  ;;  %v2410_v50 = vld [vmem:[%s3170_s1 + $0x148] sm:$0xff]   ;;  %v1876_v59 = vcombine.low %v24_v47, %v28_v48  ;;  %v2416_v6 = vld [vmem:[%s3170_s1 + $0x158] sm:$0xff]  }
  0x11   :  { %2193 = vmatpush3.bf16.msra.mxu1 %v2390_v15  ;;  %v1875_v46 = vcombine.high %v23_v44, %v27_v45  ;;  %v1874_v51 = vcombine.low %v23_v44, %v27_v45  ;;  %v2411_v52 = vld [vmem:[%s3170_s1 + $0x108] sm:$0xff]   ;;  %v31_v53 = vld [vmem:[%s3171_s0 + $0x80] sm:$0xff]  ;;  %v2417_v8 = vld [vmem:[%s3170_s1 + $0x118] sm:$0xff]  }
  0x12   :  { %2194 = vmatprep.subr.bf16.mxu1 %v2393_v18  ;;  %v35_v54 = vld [vmem:[%s3171_s0 + $0xa0] sm:$0xff]  ;;  %v32_v55 = vld [vmem:[%s3171_s0 + $0x88] sm:$0xff]  ;;  %v2418_v10 = vld [vmem:[%s3170_s1 + $0x198] sm:$0xff]  }
  0x13   :  { %2101 = vmatpush3.bf16.msra.mxu0 %v2392_v17  ;;  %v36_v56 = vld [vmem:[%s3171_s0 + $0xa8] sm:$0xff]  ;;  %v1883_v57 = vcombine.high %v31_v53, %v35_v54  ;;  %v39_v61 = vld [vmem:[%s3171_s0 + $0xc0] sm:$0xff]  ;;  %v1882_v2 = vcombine.low %v31_v53, %v35_v54  ;;  %v2425_v31 = vld [vmem:[%s3170_s1 + $0x1b0] sm:$0xff]  }
  0x14   :  { %2102 = vmatprep.subr.bf16.mxu0 %v2395_v20  ;;  %v2412_v58 = vld [vmem:[%s3170_s1 + $0x188] sm:$0xff]   ;;  %v1885_v60 = vcombine.high %v32_v55, %v36_v56  ;;  %v43_v62 = vld [vmem:[%s3171_s0 + $0xe0] sm:$0xff]  ;;  %v1884_v7 = vcombine.low %v32_v55, %v36_v56  ;;  %v2426_v32 = vld [vmem:[%s3170_s1 + $0x170] sm:$0xff]  }
  0x15   :  { %2195 = vmatpush3.bf16.msra.mxu1 %v2394_v19  ;;  %v40_v3 = vld [vmem:[%s3171_s0 + $0xc8] sm:$0xff]  ;;  %v1891_v4 = vcombine.high %v39_v61, %v43_v62  ;;  %v47_v11 = vld [vmem:[%s3171_s0 + $0x100] sm:$0xff]  ;;  %v1890_v14 = vcombine.low %v39_v61, %v43_v62  ;;  %v2427_v34 = vld [vmem:[%s3170_s1 + $0x130] sm:$0xff]  }
  0x16   :  { %2196 = vmatprep.subr.bf16.mxu1 %v2397_v22  ;;  %v44_v5 = vld [vmem:[%s3171_s0 + $0xe8] sm:$0xff]  ;;  %v51_v12 = vld [vmem:[%s3171_s0 + $0x120] sm:$0xff]  ;;  %v2428_v38 = vld [vmem:[%s3170_s1 + $0x1b8] sm:$0xff]  }
  0x17   :  { %2103 = vmatpush3.bf16.msra.mxu0 %v2396_v21  ;;  %v1893_v9 = vcombine.high %v40_v3, %v44_v5  ;;  %v2419_v13 = vld [vmem:[%s3170_s1 + $0x160] sm:$0xff]   ;;  %v1899_v16 = vcombine.high %v47_v11, %v51_v12  ;;  %v48_v17 = vld [vmem:[%s3171_s0 + $0x108] sm:$0xff]  ;;  %v1892_v20 = vcombine.low %v40_v3, %v44_v5 }
  0x18   :  { %2104 = vmatprep.subr.bf16.mxu0 %v2399_v24  ;;  %v2420_v15 = vld [vmem:[%s3170_s1 + $0x120] sm:$0xff]   ;;  %v52_v18 = vld [vmem:[%s3171_s0 + $0x128] sm:$0xff] }
  0x19   :  { %2197 = vmatpush3.bf16.msra.mxu1 %v2398_v23  ;;  %v2421_v19 = vld [vmem:[%s3170_s1 + $0x1a0] sm:$0xff]   ;;  %v1901_v21 = vcombine.high %v48_v17, %v52_v18  ;;  %v2422_v24 = vld [vmem:[%s3170_s1 + $0x1a8] sm:$0xff]  }
  0x1a   :  { %2198 = vmatprep.subr.bf16.mxu1 %v2401_v26  ;;  %v55_v22 = vld [vmem:[%s3171_s0 + $0x140] sm:$0xff]  ;;  %v2424_v26 = vld [vmem:[%s3170_s1 + $0x128] sm:$0xff]  }
  0x1b   :  { %2105 = vmatpush3.bf16.msra.mxu0 %v2400_v25  ;;  %v59_v23 = vld [vmem:[%s3171_s0 + $0x160] sm:$0xff]  ;;  %v2423_v25 = vld [vmem:[%s3170_s1 + $0x168] sm:$0xff]  }
  0x1c   :  { %2106 = vmatprep.subr.bf16.mxu0 %v2403_v28  ;;  %v1898_v28 = vcombine.low %v47_v11, %v51_v12  ;;  %v67_v37 = vld [vmem:[%s3171_s0 + $0x1a0] sm:$0xff]  ;;  %v1906_v40 = vcombine.low %v55_v22, %v59_v23  ;;  %v64_v44 = vld [vmem:[%s3171_s0 + $0x188] sm:$0xff] }
  0x1d   :  { %2199 = vmatpush3.bf16.msra.mxu1 %v2402_v27  ;;  %v56_v27 = vld [vmem:[%s3171_s0 + $0x148] sm:$0xff]  ;;  %v2431_v47 = vld [vmem:[%s3170_s1 + $0x1c0] ss:$0 sps:$4 sm:$0x33]  }
  0x1e   :  { %2200 = vmatprep.subr.bf16.mxu1 %v2405_v30  ;;  %v1907_v30 = vcombine.high %v55_v22, %v59_v23  ;;  %v68_v45 = vld [vmem:[%s3171_s0 + $0x1a8] sm:$0xff] }
  0x1f   :  { %2107 = vmatpush3.bf16.msra.mxu0 %v2404_v29  ;;  %v60_v29 = vld [vmem:[%s3171_s0 + $0x168] sm:$0xff]  ;;  %v1917_v48 = vcombine.high %v64_v44, %v68_v45  ;;  %v1916_v55 = vcombine.low %v64_v44, %v68_v45 }
  0x20   :  { %2280 = vmatprep.subr.bf16.mxu0 %v2407_v36  ;;  %v63_v36 = vld [vmem:[%s3171_s0 + $0x180] sm:$0xff]  ;;  %v72_v53 = vld [vmem:[%s3171_s0 + $0x1c8] sm:$0xff] }
  0x21   :  { %2201 = vmatpush3.bf16.msra.mxu1 %v2406_v35  ;;  %v1909_v35 = vcombine.high %v56_v27, %v60_v29  ;;  %v76_v54 = vld [vmem:[%s3171_s0 + $0x1e8] sm:$0xff] }
  0x22   :  { %1162 = vmatmul.mubr.bf16.vlgmr.msra.gmra.mrb[0].mxu0 %v1866_v33  ;;  %1540 = vmatprep.subr.bf16.mxu1 %v2432_v42  ;;  %v1900_v33 = vcombine.low %v48_v17, %v52_v18  ;;  %v1925_v56 = vcombine.high %v72_v53, %v76_v54  ;;  %v80_v61 = vld [vmem:[%s3171_s0 + $0x208] sm:$0xff]  ;;  %v103_v17 = vld [vmem:[%s3171_s0 + $0x2c0] sm:$0xff] }
  0x23   :  { %2281 = vmatpush3.bf16.msra.mxu0 %v2408_v41  ;;  %1169 = vmatprep.mubr.bf16.mxu0 %v1875_v46  ;;  %v2430_v41 = vld [vmem:[%s3170_s1 + $0x138] sm:$0xff]   ;;  %v1908_v46 = vcombine.low %v56_v27, %v60_v29  ;;  %v84_v62 = vld [vmem:[%s3171_s0 + $0x228] sm:$0xff]  ;;  %v107_v18 = vld [vmem:[%s3171_s0 + $0x2e0] sm:$0xff] }
  0x24   :  { %1299 = vmatmul.mubr.bf16.vlgmr.msra.gmra.mrb[0].mxu1 %v1868_v39  ;;  %2282 = vmatprep.subr.bf16.mxu0 %v2410_v50  ;;  %v2429_v39 = vld [vmem:[%s3170_s1 + $0x178] sm:$0xff]   ;;  %v71_v50 = vld [vmem:[%s3171_s0 + $0x1c0] sm:$0xff]  ;;  %v88_v5 = vld [vmem:[%s3171_s0 + $0x248] sm:$0xff]  ;;  %v1954_v27 = vcombine.low %v103_v17, %v107_v18 }
  0x25   :  { %1541 = vmatpush1.bf16.msra.mxu1 %v2409_v43  ;;  %1306 = vmatprep.mubr.bf16.mxu1 %v1877_v49  ;;  %v1915_v43 = vcombine.high %v63_v36, %v67_v37  ;;  %v1127_v49 = vsel %vm1125_vm0, %v2431_v47, 0  ;;  %v108_v22 = vld [vmem:[%s3171_s0 + $0x2e8] sm:$0xff]  ;;  %v30_v47 = vld [vmem:[%s3171_s0 + $0x78] sm:$0xff] }
  0x26   :  { %1542 = vmatprep.subr.bf16.mxu1 %v2432_v42  ;;  %v112_v29 = vld [vmem:[%s3171_s0 + $0x308] sm:$0xff] }
  0x27   :  { %2283 = vmatpush3.bf16.msra.mxu0 %v2411_v52 }
  0x28   :  { %2284 = vmatprep.subr.bf16.mxu0 %v2413_v63  ;;  %v1924_v63 = vcombine.low %v72_v53, %v76_v54  ;;  %v34_v53 = vld [vmem:[%s3171_s0 + $0x98] sm:$0xff] }
  0x29   :  { %1543 = vmatpush1.bf16.msra.mxu1 %v2412_v58  ;;  %v83_v58 = vld [vmem:[%s3171_s0 + $0x220] sm:$0xff]  ;;  %v38_v54 = vld [vmem:[%s3171_s0 + $0xb8] sm:$0xff] }
  0x2a   :  { %1170 = vmatmul.mubr.bf16.gmra.mrb[4].mxu0 %v1874_v51  ;;  %1544 = vmatprep.subr.bf16.mxu1 %v2432_v42  ;;  %v75_v51 = vld [vmem:[%s3171_s0 + $0x1e0] sm:$0xff] }
  0x2b   :  { %1177 = vmatprep.mubr.bf16.mxu0 %v1883_v57  ;;  %2285 = vmatpush3.bf16.msra.mxu0 %v2414_v0  ;;  %v1923_v52 = vcombine.high %v71_v50, %v75_v51  ;;  %v79_v57 = vld [vmem:[%s3171_s0 + $0x200] sm:$0xff]  ;;  %v1933_v0 = vcombine.high %v80_v61, %v84_v62 }
  0x2c   :  { %1307 = vmatmul.mubr.bf16.gmra.mrb[4].mxu1 %v1876_v59  ;;  %2286 = vmatprep.subr.bf16.mxu0 %v2416_v6  ;;  %v1922_v59 = vcombine.low %v71_v50, %v75_v51  ;;  %v1930_v3 = vcombine.low %v79_v57, %v83_v58  ;;  %v92_v6 = vld [vmem:[%s3171_s0 + $0x268] sm:$0xff]  ;;  %v33_v50 = vld [vmem:[%s3171_s0 + $0x90] sm:$0xff] }
  0x2d   :  { %1314 = vmatprep.mubr.bf16.mxu1 %v1885_v60  ;;  %1545 = vmatpush1.bf16.msra.mxu1 %v2415_v1  ;;  %v1931_v60 = vcombine.high %v79_v57, %v83_v58  ;;  %v87_v1 = vld [vmem:[%s3171_s0 + $0x240] sm:$0xff]  ;;  %v37_v51 = vld [vmem:[%s3171_s0 + $0xb0] sm:$0xff] }
  0x2e   :  { %1546 = vmatprep.subr.bf16.mxu1 %v2432_v42  ;;  %v41_v57 = vld [vmem:[%s3171_s0 + $0xd0] sm:$0xff] }
  0x2f   :  { %2287 = vmatpush3.bf16.msra.mxu0 %v2417_v8  ;;  %v1941_v8 = vcombine.high %v88_v5, %v92_v6  ;;  %v45_v58 = vld [vmem:[%s3171_s0 + $0xf0] sm:$0xff] }
  0x30   :  { %2288 = vmatprep.subr.bf16.mxu0 %v2419_v13  ;;  %v96_v13 = vld [vmem:[%s3171_s0 + $0x288] sm:$0xff] }
  0x31   :  { %1547 = vmatpush1.bf16.msra.mxu1 %v2418_v10  ;;  %v99_v10 = vld [vmem:[%s3171_s0 + $0x2a0] sm:$0xff] }
  0x32   :  { %1178 = vmatmul.mubr.bf16.gmra.mrb[8].mxu0 %v1882_v2  ;;  %1548 = vmatprep.subr.bf16.mxu1 %v2432_v42  ;;  %v91_v2 = vld [vmem:[%s3171_s0 + $0x260] sm:$0xff] }
  0x33   :  { %1185 = vmatprep.mubr.bf16.mxu0 %v1891_v4  ;;  %2289 = vmatpush3.bf16.msra.mxu0 %v2420_v15  ;;  %v1939_v4 = vcombine.high %v87_v1, %v91_v2  ;;  %v1938_v11 = vcombine.low %v87_v1, %v91_v2  ;;  %v1940_v15 = vcombine.low %v88_v5, %v92_v6  ;;  %v49_v1 = vld [vmem:[%s3171_s0 + $0x110] sm:$0xff]  ;;  %v50_v5 = vld [vmem:[%s3171_s0 + $0x118] sm:$0xff] }
  0x34   :  { %1315 = vmatmul.mubr.bf16.gmra.mrb[8].mxu1 %v1884_v7  ;;  %2290 = vmatprep.subr.bf16.mxu0 %v2423_v25  ;;  %v1932_v7 = vcombine.low %v80_v61, %v84_v62  ;;  %v111_v25 = vld [vmem:[%s3171_s0 + $0x300] sm:$0xff]  ;;  %v42_v61 = vld [vmem:[%s3171_s0 + $0xd8] sm:$0xff]  ;;  %v53_v2 = vld [vmem:[%s3171_s0 + $0x130] sm:$0xff] }
  0x35   :  { %1322 = vmatprep.mubr.bf16.mxu1 %v1893_v9  ;;  %1549 = vmatpush1.bf16.msra.mxu1 %v2421_v19  ;;  %v95_v9 = vld [vmem:[%s3171_s0 + $0x280] sm:$0xff]  ;;  %v46_v62 = vld [vmem:[%s3171_s0 + $0xf8] sm:$0xff] }
  0x36   :  { %1550 = vmatprep.subr.bf16.mxu1 %v2432_v42  ;;  %v1947_v12 = vcombine.high %v95_v9, %v99_v10  ;;  %v1946_v19 = vcombine.low %v95_v9, %v99_v10  ;;  %v54_v6 = vld [vmem:[%s3171_s0 + $0x138] sm:$0xff]  ;;  %v57_v9 = vld [vmem:[%s3171_s0 + $0x150] sm:$0xff] }
  0x37   :  { %2291 = vmatpush3.bf16.msra.mxu0 %v2424_v26  ;;  %v115_v26 = vld [vmem:[%s3171_s0 + $0x320] sm:$0x33]  ;;  %v61_v10 = vld [vmem:[%s3171_s0 + $0x170] sm:$0xff] }
  0x38   :  { %2292 = vmatprep.subr.bf16.mxu0 %v2426_v32 }
  0x39   :  { %1551 = vmatpush1.bf16.msra.mxu1 %v2422_v24 }
  0x3a   :  { %1186 = vmatmul.mubr.bf16.gmra.mrb[12].mxu0 %v1890_v14  ;;  %1552 = vmatprep.subr.bf16.mxu1 %v2432_v42  ;;  %v100_v14 = vld [vmem:[%s3171_s0 + $0x2a8] sm:$0xff] }
  0x3b   :  { %1193 = vmatprep.mubr.bf16.mxu0 %v1899_v16  ;;  %2293 = vmatpush3.bf16.msra.mxu0 %v2427_v34  ;;  %v1949_v16 = vcombine.high %v96_v13, %v100_v14  ;;  %v1948_v23 = vcombine.low %v96_v13, %v100_v14  ;;  %v21_v34 = vld [vmem:[%s3171_s0 + $0x30] sm:$0xff]  ;;  %v58_v13 = vld [vmem:[%s3171_s0 + $0x158] sm:$0xff] }
  0x3c   :  { %1323 = vmatmul.mubr.bf16.gmra.mrb[12].mxu1 %v1892_v20  ;;  %2294 = vmatprep.subr.bf16.mxu0 %v2429_v39  ;;  %v1955_v20 = vcombine.high %v103_v17, %v107_v18  ;;  %v62_v14 = vld [vmem:[%s3171_s0 + $0x178] sm:$0xff]  ;;  %v65_v17 = vld [vmem:[%s3171_s0 + $0x190] sm:$0xff] }
  0x3d   :  { %1330 = vmatprep.mubr.bf16.mxu1 %v1901_v21  ;;  %1553 = vmatpush1.bf16.msra.mxu1 %v2425_v31  ;;  %v104_v21 = vld [vmem:[%s3171_s0 + $0x2c8] sm:$0xff]  ;;  %v69_v18 = vld [vmem:[%s3171_s0 + $0x1b0] sm:$0xff] }
  0x3e   :  { %1554 = vmatprep.subr.bf16.mxu1 %v2432_v42  ;;  %v1957_v24 = vcombine.high %v104_v21, %v108_v22  ;;  %v1956_v31 = vcombine.low %v104_v21, %v108_v22  ;;  %v66_v21 = vld [vmem:[%s3171_s0 + $0x198] sm:$0xff] }
  0x3f   :  { %2295 = vmatpush3.bf16.msra.mxu0 %v2430_v41  ;;  %v25_v41 = vld [vmem:[%s3171_s0 + $0x50] sm:$0xff]  ;;  %v70_v22 = vld [vmem:[%s3171_s0 + $0x1b8] sm:$0xff] }
  0x41   :  { %1555 = vmatpush1.bf16.msra.mxu1 %v2428_v38  ;;  %v22_v38 = vld [vmem:[%s3171_s0 + $0x38] sm:$0xff] }
  0x42   :  { %1194 = vmatmul.mubr.bf16.gmra.mrb[16].mxu0 %v1898_v28  ;;  %1556 = vmatprep.subr.bf16.mxu1 %v2432_v42  ;;  %v1914_v42 = vcombine.low %v63_v36, %v67_v37  ;;  %v1963_v28 = vcombine.high %v111_v25, %v115_v26  ;;  %v18_v37 = vld [vmem:[%s3171_s0 + $0x18] sm:$0xff] }
  0x43   :  { %1201 = vmatprep.mubr.bf16.mxu0 %v1907_v30  ;;  %v116_v30 = vld [vmem:[%s3171_s0 + $0x328] sm:$0x33] }
  0x44   :  { %1331 = vmatmul.mubr.bf16.gmra.mrb[16].mxu1 %v1900_v33  ;;  %v1965_v32 = vcombine.high %v112_v29, %v116_v30  ;;  %v17_v33 = vld [vmem:[%s3171_s0 + $0x10] sm:$0xff]  ;;  %v1964_v39 = vcombine.low %v112_v29, %v116_v30  ;;  %v74_v29 = vld [vmem:[%s3171_s0 + $0x1d8] sm:$0xff] }
  0x45   :  { %1338 = vmatprep.mubr.bf16.mxu1 %v1909_v35  ;;  %1557 = vmatpush1.bf16.msra.mxu1 %v1127_v49  ;;  %v1962_v35 = vcombine.low %v111_v25, %v115_v26  ;;  %v1871_v36 = vcombine.high %v17_v33, %v21_v34  ;;  %v1870_v44 = vcombine.low %v17_v33, %v21_v34  ;;  %v73_v25 = vld [vmem:[%s3171_s0 + $0x1d0] sm:$0xff]  ;;  %v78_v30 = vld [vmem:[%s3171_s0 + $0x1f8] sm:$0xff] }
  0x46   :  { %v77_v26 = vld [vmem:[%s3171_s0 + $0x1f0] sm:$0xff] }
  0x47   :  { %v81_v33 = vld [vmem:[%s3171_s0 + $0x210] sm:$0xff] }
  0x48   :  { %v85_v34 = vld [vmem:[%s3171_s0 + $0x230] sm:$0xff] }
  0x4a   :  { %1202 = vmatmul.mubr.bf16.gmra.mrb[20].mxu0 %v1906_v40  ;;  %v1873_v40 = vcombine.high %v18_v37, %v22_v38 }
  0x4b   :  { %1209 = vmatprep.mubr.bf16.mxu0 %v1915_v43  ;;  %v29_v43 = vld [vmem:[%s3171_s0 + $0x70] sm:$0xff] }
  0x4c   :  { %1339 = vmatmul.mubr.bf16.gmra.mrb[20].mxu1 %v1908_v46  ;;  %v1879_v45 = vcombine.high %v25_v41, %v29_v43  ;;  %v26_v46 = vld [vmem:[%s3171_s0 + $0x58] sm:$0xff] }
  0x4d   :  { %1346 = vmatprep.mubr.bf16.mxu1 %v1917_v48  ;;  %v1872_v48 = vcombine.low %v18_v37, %v22_v38  ;;  %v1881_v49 = vcombine.high %v26_v46, %v30_v47  ;;  %v82_v37 = vld [vmem:[%s3171_s0 + $0x218] sm:$0xff] }
  0x4e   :  { %v86_v38 = vld [vmem:[%s3171_s0 + $0x238] sm:$0xff] }
  0x52   :  { %1210 = vmatmul.mubr.bf16.gmra.mrb[24].mxu0 %v1914_v42  ;;  %v1878_v42 = vcombine.low %v25_v41, %v29_v43  ;;  %v89_v41 = vld [vmem:[%s3171_s0 + $0x250] sm:$0xff] }
  0x53   :  { %1217 = vmatprep.mubr.bf16.mxu0 %v1923_v52  ;;  %v1887_v52 = vcombine.high %v33_v50, %v37_v51  ;;  %v93_v43 = vld [vmem:[%s3171_s0 + $0x270] sm:$0xff] }
  0x54   :  { %1347 = vmatmul.mubr.bf16.gmra.mrb[24].mxu1 %v1916_v55  ;;  %v1880_v55 = vcombine.low %v26_v46, %v30_v47  ;;  %v90_v46 = vld [vmem:[%s3171_s0 + $0x258] sm:$0xff] }
  0x55   :  { %1354 = vmatprep.mubr.bf16.mxu1 %v1925_v56  ;;  %v1889_v56 = vcombine.high %v34_v53, %v38_v54  ;;  %v94_v47 = vld [vmem:[%s3171_s0 + $0x278] sm:$0xff] }
  0x5a   :  { %1218 = vmatmul.mubr.bf16.gmra.mrb[28].mxu0 %v1922_v59  ;;  %v1886_v59 = vcombine.low %v33_v50, %v37_v51  ;;  %v97_v50 = vld [vmem:[%s3171_s0 + $0x290] sm:$0xff] }
  0x5b   :  { %1225 = vmatprep.mubr.bf16.mxu0 %v1931_v60  ;;  %v1895_v60 = vcombine.high %v41_v57, %v45_v58  ;;  %v101_v51 = vld [vmem:[%s3171_s0 + $0x2b0] sm:$0xff] }
  0x5c   :  { %1355 = vmatmul.mubr.bf16.gmra.mrb[28].mxu1 %v1924_v63  ;;  %v1888_v63 = vcombine.low %v34_v53, %v38_v54  ;;  %v98_v53 = vld [vmem:[%s3171_s0 + $0x298] sm:$0xff] }
  0x5d   :  { %1362 = vmatprep.mubr.bf16.mxu1 %v1933_v0  ;;  %v1897_v0 = vcombine.high %v42_v61, %v46_v62  ;;  %v102_v54 = vld [vmem:[%s3171_s0 + $0x2b8] sm:$0xff] }
  0x62   :  { %1226 = vmatmul.mubr.bf16.gmra.mrb[32].mxu0 %v1930_v3  ;;  %v1894_v3 = vcombine.low %v41_v57, %v45_v58  ;;  %v105_v57 = vld [vmem:[%s3171_s0 + $0x2d0] sm:$0xff] }
  0x63   :  { %1233 = vmatprep.mubr.bf16.mxu0 %v1939_v4  ;;  %v1903_v4 = vcombine.high %v49_v1, %v53_v2  ;;  %v109_v58 = vld [vmem:[%s3171_s0 + $0x2f0] sm:$0xff] }
  0x64   :  { %1363 = vmatmul.mubr.bf16.gmra.mrb[32].mxu1 %v1932_v7  ;;  %v1896_v7 = vcombine.low %v42_v61, %v46_v62  ;;  %v106_v61 = vld [vmem:[%s3171_s0 + $0x2d8] sm:$0xff] }
  0x65   :  { %1370 = vmatprep.mubr.bf16.mxu1 %v1941_v8  ;;  %v1905_v8 = vcombine.high %v50_v5, %v54_v6  ;;  %v110_v62 = vld [vmem:[%s3171_s0 + $0x2f8] sm:$0xff] }
  0x6a   :  { %1234 = vmatmul.mubr.bf16.gmra.mrb[36].mxu0 %v1938_v11  ;;  %v1902_v11 = vcombine.low %v49_v1, %v53_v2  ;;  %v113_v1 = vld [vmem:[%s3171_s0 + $0x310] sm:$0xff] }
  0x6b   :  { %1241 = vmatprep.mubr.bf16.mxu0 %v1947_v12  ;;  %v1911_v12 = vcombine.high %v57_v9, %v61_v10  ;;  %v117_v2 = vld [vmem:[%s3171_s0 + $0x330] sm:$0x33] }
  0x6c   :  { %1371 = vmatmul.mubr.bf16.gmra.mrb[36].mxu1 %v1940_v15  ;;  %v1904_v15 = vcombine.low %v50_v5, %v54_v6  ;;  %v114_v5 = vld [vmem:[%s3171_s0 + $0x318] sm:$0xff] }
  0x6d   :  { %1378 = vmatprep.mubr.bf16.mxu1 %v1949_v16  ;;  %v1913_v16 = vcombine.high %v58_v13, %v62_v14  ;;  %v118_v6 = vld [vmem:[%s3171_s0 + $0x338] sm:$0x33] }
  0x72   :  { %1242 = vmatmul.mubr.bf16.gmra.mrb[40].mxu0 %v1946_v19  ;;  %v1910_v19 = vcombine.low %v57_v9, %v61_v10  ;;  %v1966_v9 = vcombine.low %v113_v1, %v117_v2  ;;  %v1968_v10 = vcombine.low %v114_v5, %v118_v6 }
  0x73   :  { %1249 = vmatprep.mubr.bf16.mxu0 %v1955_v20  ;;  %v1919_v20 = vcombine.high %v65_v17, %v69_v18 }
  0x74   :  { %1379 = vmatmul.mubr.bf16.gmra.mrb[40].mxu1 %v1948_v23  ;;  %v1912_v23 = vcombine.low %v58_v13, %v62_v14 }
  0x75   :  { %1386 = vmatprep.mubr.bf16.mxu1 %v1957_v24  ;;  %v1921_v24 = vcombine.high %v66_v21, %v70_v22 }
  0x7a   :  { %1250 = vmatmul.mubr.bf16.gmra.mrb[44].mxu0 %v1954_v27  ;;  %v1918_v27 = vcombine.low %v65_v17, %v69_v18 }
  0x7b   :  { %1257 = vmatprep.mubr.bf16.mxu0 %v1963_v28  ;;  %v1927_v28 = vcombine.high %v73_v25, %v77_v26 }
  0x7c   :  { %1387 = vmatmul.mubr.bf16.gmra.mrb[44].mxu1 %v1956_v31  ;;  %v1920_v31 = vcombine.low %v66_v21, %v70_v22 }
  0x7d   :  { %1394 = vmatprep.mubr.bf16.mxu1 %v1965_v32  ;;  %v1929_v32 = vcombine.high %v74_v29, %v78_v30 }
  0x82   :  { %1258 = vmatmul.mubr.bf16.gmra.mrb[48].mxu0 %v1962_v35  ;;  %v1926_v35 = vcombine.low %v73_v25, %v77_v26 }
  0x83   :  { %1435 = vmatprep.mubr.bf16.mxu0 %v1871_v36  ;;  %v1935_v36 = vcombine.high %v81_v33, %v85_v34 }
  0x84   :  { %1395 = vmatmul.mubr.bf16.gmra.mrb[48].mxu1 %v1964_v39  ;;  %v1928_v39 = vcombine.low %v74_v29, %v78_v30 }
  0x85   :  { %2027 = vmatprep.mubr.msk.bf16.mxu1 %vm1085_vm1, %v1873_v40  ;;  %v1937_v40 = vcombine.high %v82_v37, %v86_v38 }
  0x8a   :  { %1436 = vmatmul.mubr.bf16.vlgmr.msra.gmra.mrb[52].mxu0 %v1870_v44  ;;  %v1934_v44 = vcombine.low %v81_v33, %v85_v34 }
  0x8b   :  { %1443 = vmatprep.mubr.bf16.mxu0 %v1879_v45  ;;  %v1943_v45 = vcombine.high %v89_v41, %v93_v43 }
  0x8c   :  { %1573 = vmatmul.mubr.bf16.vlgmr.msra.gmra.mrb[52].mxu1 %v1872_v48  ;;  %v1936_v48 = vcombine.low %v82_v37, %v86_v38 }
  0x8d   :  { %2028 = vmatprep.mubr.msk.bf16.mxu1 %vm1085_vm1, %v1881_v49  ;;  %v1945_v49 = vcombine.high %v90_v46, %v94_v47 }
  0x92   :  { %1444 = vmatmul.mubr.bf16.gmra.mrb[56].mxu0 %v1878_v42  ;;  %v1942_v42 = vcombine.low %v89_v41, %v93_v43 }
  0x93   :  { %1451 = vmatprep.mubr.bf16.mxu0 %v1887_v52  ;;  %v1951_v52 = vcombine.high %v97_v50, %v101_v51 }
  0x94   :  { %1581 = vmatmul.mubr.bf16.gmra.mrb[56].mxu1 %v1880_v55  ;;  %v1944_v55 = vcombine.low %v90_v46, %v94_v47 }
  0x95   :  { %2029 = vmatprep.mubr.msk.bf16.mxu1 %vm1085_vm1, %v1889_v56  ;;  %v1953_v56 = vcombine.high %v98_v53, %v102_v54 }
  0x9a   :  { %1452 = vmatmul.mubr.bf16.gmra.mrb[60].mxu0 %v1886_v59  ;;  %v1950_v59 = vcombine.low %v97_v50, %v101_v51 }
  0x9b   :  { %1459 = vmatprep.mubr.bf16.mxu0 %v1895_v60  ;;  %v1959_v60 = vcombine.high %v105_v57, %v109_v58 }
  0x9c   :  { %1589 = vmatmul.mubr.bf16.gmra.mrb[60].mxu1 %v1888_v63  ;;  %v1952_v63 = vcombine.low %v98_v53, %v102_v54 }
  0x9d   :  { %2030 = vmatprep.mubr.msk.bf16.mxu1 %vm1085_vm1, %v1897_v0  ;;  %v1961_v0 = vcombine.high %v106_v61, %v110_v62 }
  0xa2   :  { %1460 = vmatmul.mubr.bf16.gmra.mrb[64].mxu0 %v1894_v3  ;;  %v1958_v3 = vcombine.low %v105_v57, %v109_v58 }
  0xa3   :  { %1467 = vmatprep.mubr.bf16.mxu0 %v1903_v4  ;;  %v1967_v4 = vcombine.high %v113_v1, %v117_v2 }
  0xa4   :  { %1597 = vmatmul.mubr.bf16.gmra.mrb[64].mxu1 %v1896_v7  ;;  %v1960_v7 = vcombine.low %v106_v61, %v110_v62 }
  0xa5   :  { %2031 = vmatprep.mubr.msk.bf16.mxu1 %vm1085_vm1, %v1905_v8  ;;  %v1969_v8 = vcombine.high %v114_v5, %v118_v6 }
  0xaa   :  { %1468 = vmatmul.mubr.bf16.gmra.mrb[68].mxu0 %v1902_v11 }
  0xab   :  { %1475 = vmatprep.mubr.bf16.mxu0 %v1911_v12  ;;  %v2961_v12 = vld [vmem:[%s3172_s2] ss:$0 sm:$0xff] }
  0xac   :  { %1605 = vmatmul.mubr.bf16.gmra.mrb[68].mxu1 %v1904_v15 }
  0xad   :  { %2032 = vmatprep.mubr.msk.bf16.mxu1 %vm1085_vm1, %v1913_v16 }
  0xb2   :  { %1476 = vmatmul.mubr.bf16.gmra.mrb[72].mxu0 %v1910_v19 }
  0xb3   :  { %1483 = vmatprep.mubr.bf16.mxu0 %v1919_v20 }
  0xb4   :  { %1613 = vmatmul.mubr.bf16.gmra.mrb[72].mxu1 %v1912_v23 }
  0xb5   :  { %2033 = vmatprep.mubr.msk.bf16.mxu1 %vm1085_vm1, %v1921_v24 }
  0xba   :  { %1484 = vmatmul.mubr.bf16.gmra.mrb[76].mxu0 %v1918_v27 }
  0xbb   :  { %1491 = vmatprep.mubr.bf16.mxu0 %v1927_v28 }
  0xbc   :  { %1621 = vmatmul.mubr.bf16.gmra.mrb[76].mxu1 %v1920_v31 }
  0xbd   :  { %2034 = vmatprep.mubr.msk.bf16.mxu1 %vm1085_vm1, %v1929_v32 }
  0xc2   :  { %1492 = vmatmul.mubr.bf16.gmra.mrb[80].mxu0 %v1926_v35 }
  0xc3   :  { %1499 = vmatprep.mubr.bf16.mxu0 %v1935_v36 }
  0xc4   :  { %1629 = vmatmul.mubr.bf16.gmra.mrb[80].mxu1 %v1928_v39 }
  0xc5   :  { %2035 = vmatprep.mubr.msk.bf16.mxu1 %vm1085_vm1, %v1937_v40 }
  0xca   :  { %1500 = vmatmul.mubr.bf16.gmra.mrb[84].mxu0 %v1934_v44 }
  0xcb   :  { %1507 = vmatprep.mubr.bf16.mxu0 %v1943_v45 }
  0xcc   :  { %1637 = vmatmul.mubr.bf16.gmra.mrb[84].mxu1 %v1936_v48 }
  0xcd   :  { %2036 = vmatprep.mubr.msk.bf16.mxu1 %vm1085_vm1, %v1945_v49 }
  0xd2   :  { %1508 = vmatmul.mubr.bf16.gmra.mrb[88].mxu0 %v1942_v42 }
  0xd3   :  { %1515 = vmatprep.mubr.bf16.mxu0 %v1951_v52 }
  0xd4   :  { %1645 = vmatmul.mubr.bf16.gmra.mrb[88].mxu1 %v1944_v55 }
  0xd5   :  { %2037 = vmatprep.mubr.msk.bf16.mxu1 %vm1085_vm1, %v1953_v56 }
  0xda   :  { %1516 = vmatmul.mubr.bf16.gmra.mrb[92].mxu0 %v1950_v59 }
  0xdb   :  { %1523 = vmatprep.mubr.bf16.mxu0 %v1959_v60 }
  0xdc   :  { %1653 = vmatmul.mubr.bf16.gmra.mrb[92].mxu1 %v1952_v63 }
  0xdd   :  { %2038 = vmatprep.mubr.msk.bf16.mxu1 %vm1085_vm1, %v1961_v0 }
  0xe2   :  { %1524 = vmatmul.mubr.bf16.gmra.mrb[96].mxu0 %v1958_v3 }
  0xe3   :  { %1531 = vmatprep.mubr.bf16.mxu0 %v1967_v4 }
  0xe4   :  { %1661 = vmatmul.mubr.bf16.gmra.mrb[96].mxu1 %v1960_v7 }
  0xe5   :  { %2039 = vmatprep.mubr.msk.bf16.mxu1 %vm1085_vm1, %v1969_v8 }
  0xea   :  { %1532 = vmatmul.mubr.bf16.gmra.mrb[100].mxu0 %v1966_v9 }
  0xec   :  { %1669 = vmatmul.mubr.bf16.gmra.mrb[100].mxu1 %v1968_v10 }
  0xf5   :  { %v2108_v11 = vpop.f32.mrb[0].mxu0 }
  0xf6   :  { %v2109_v13 = vpop.f32.mrb[1].mxu0 }
  0xf7   :  { %v2110_v14 = vadd.f32 %v2109_v13, %v2108_v11  ;;  %v2111_v15 = vpop.f32.mrb[2].mxu0  ;;  %v2202_v16 = vpop.f32.mrb[0].mxu1 }
  0xf8   :  { %v2112_v17 = vpop.f32.mrb[3].mxu0  ;;  %v2203_v20 = vpop.f32.mrb[1].mxu1 }
  0xf9   :  { %v1164_v18 = vadd.f32 %v2110_v14, %v2961_v12  ;;  %v2113_v19 = vadd.f32 %v2112_v17, %v2111_v15  ;;  %v2204_v21 = vadd.f32 %v2203_v20, %v2202_v16  ;;  %v2205_v22 = vpop.f32.mrb[2].mxu1 }
  0xfa   :  { %v2206_v24 = vpop.f32.mrb[3].mxu1 }
  0xfb   :  { %v1167_v23 = vadd.f32 %v2113_v19, %v2961_v12  ;;  %v2965_v25 = vadd.f32 %v2204_v21, %v1164_v18  ;;  %v2207_v26 = vadd.f32 %v2206_v24, %v2205_v22 }
  0xfd   :  { %v2114_v27 = vpop.f32.mrb[4].mxu0  ;;  %v2967_v28 = vadd.f32 %v2207_v26, %v1167_v23 }
  0xfe   :  { %v2115_v29 = vpop.f32.mrb[5].mxu0 }
  0xff   :  { %v2116_v30 = vadd.f32 %v2115_v29, %v2114_v27  ;;  %v2117_v31 = vpop.f32.mrb[6].mxu0  ;;  %v2208_v32 = vpop.f32.mrb[4].mxu1 }
 0x100   :  { %v2118_v33 = vpop.f32.mrb[7].mxu0  ;;  %v2209_v36 = vpop.f32.mrb[5].mxu1 }
 0x101   :  { %v1172_v34 = vadd.f32 %v2116_v30, %v2961_v12  ;;  %v2119_v35 = vadd.f32 %v2118_v33, %v2117_v31  ;;  %v2210_v37 = vadd.f32 %v2209_v36, %v2208_v32  ;;  %v2211_v38 = vpop.f32.mrb[6].mxu1 }
 0x102   :  { %v2212_v40 = vpop.f32.mrb[7].mxu1 }
 0x103   :  { %v1175_v39 = vadd.f32 %v2119_v35, %v2961_v12  ;;  %v2971_v41 = vadd.f32 %v2210_v37, %v1172_v34  ;;  %v2213_v43 = vadd.f32 %v2212_v40, %v2211_v38 }
 0x105   :  { %v2120_v44 = vpop.f32.mrb[8].mxu0  ;;  %v2973_v45 = vadd.f32 %v2213_v43, %v1175_v39 }
 0x106   :  { %v2121_v46 = vpop.f32.mrb[9].mxu0 }
 0x107   :  { %v2122_v47 = vadd.f32 %v2121_v46, %v2120_v44  ;;  %v2123_v48 = vpop.f32.mrb[10].mxu0  ;;  %v2214_v49 = vpop.f32.mrb[8].mxu1 }
 0x108   :  { %v2124_v50 = vpop.f32.mrb[11].mxu0  ;;  %v2215_v52 = vpop.f32.mrb[9].mxu1 }
 0x109   :  { %v1180_v51 = vadd.f32 %v2122_v47, %v2961_v12  ;;  %v2125_v42 = vadd.f32 %v2124_v50, %v2123_v48  ;;  %v2216_v53 = vadd.f32 %v2215_v52, %v2214_v49  ;;  %v2217_v54 = vpop.f32.mrb[10].mxu1 }
 0x10a   :  { %v2218_v56 = vpop.f32.mrb[11].mxu1 }
 0x10b   :  { %v1183_v55 = vadd.f32 %v2125_v42, %v2961_v12  ;;  %v2977_v57 = vadd.f32 %v2216_v53, %v1180_v51  ;;  %v2219_v58 = vadd.f32 %v2218_v56, %v2217_v54 }
 0x10d   :  { %v2126_v59 = vpop.f32.mrb[12].mxu0  ;;  %v2979_v60 = vadd.f32 %v2219_v58, %v1183_v55 }
 0x10e   :  { %v2127_v61 = vpop.f32.mrb[13].mxu0 }
 0x10f   :  { %v2128_v62 = vadd.f32 %v2127_v61, %v2126_v59  ;;  %v2129_v63 = vpop.f32.mrb[14].mxu0  ;;  %v2220_v0 = vpop.f32.mrb[12].mxu1 }
 0x110   :  { %v2130_v1 = vpop.f32.mrb[15].mxu0  ;;  %v2221_v4 = vpop.f32.mrb[13].mxu1 }
 0x111   :  { %v1188_v2 = vadd.f32 %v2128_v62, %v2961_v12  ;;  %v2131_v3 = vadd.f32 %v2130_v1, %v2129_v63  ;;  %v2222_v5 = vadd.f32 %v2221_v4, %v2220_v0  ;;  %v2223_v6 = vpop.f32.mrb[14].mxu1 }
 0x112   :  { %v2224_v8 = vpop.f32.mrb[15].mxu1 }
 0x113   :  { %v1191_v7 = vadd.f32 %v2131_v3, %v2961_v12  ;;  %v2983_v9 = vadd.f32 %v2222_v5, %v1188_v2  ;;  %v2225_v10 = vadd.f32 %v2224_v8, %v2223_v6 }
 0x115   :  { %v2132_v11 = vpop.f32.mrb[16].mxu0  ;;  %v2985_v13 = vadd.f32 %v2225_v10, %v1191_v7 }
 0x116   :  { %v2133_v14 = vpop.f32.mrb[17].mxu0 }
 0x117   :  { %v2134_v15 = vadd.f32 %v2133_v14, %v2132_v11  ;;  %v2135_v16 = vpop.f32.mrb[18].mxu0  ;;  %v2226_v17 = vpop.f32.mrb[16].mxu1 }
 0x118   :  { %v2136_v18 = vpop.f32.mrb[19].mxu0  ;;  %v2227_v21 = vpop.f32.mrb[17].mxu1 }
 0x119   :  { %v1196_v19 = vadd.f32 %v2134_v15, %v2961_v12  ;;  %v2137_v20 = vadd.f32 %v2136_v18, %v2135_v16  ;;  %v2228_v22 = vadd.f32 %v2227_v21, %v2226_v17  ;;  %v2229_v23 = vpop.f32.mrb[18].mxu1 }
 0x11a   :  { %v2230_v26 = vpop.f32.mrb[19].mxu1 }
 0x11b   :  { %v1199_v24 = vadd.f32 %v2137_v20, %v2961_v12  ;;  %v2989_v27 = vadd.f32 %v2228_v22, %v1196_v19  ;;  %v2231_v29 = vadd.f32 %v2230_v26, %v2229_v23 }
 0x11d   :  { %v2138_v30 = vpop.f32.mrb[20].mxu0  ;;  %v2991_v31 = vadd.f32 %v2231_v29, %v1199_v24 }
 0x11e   :  { %v2139_v32 = vpop.f32.mrb[21].mxu0 }
 0x11f   :  { %v2140_v33 = vadd.f32 %v2139_v32, %v2138_v30  ;;  %v2141_v34 = vpop.f32.mrb[22].mxu0  ;;  %v2232_v35 = vpop.f32.mrb[20].mxu1 }
 0x120   :  { %v2142_v36 = vpop.f32.mrb[23].mxu0  ;;  %v2233_v39 = vpop.f32.mrb[21].mxu1 }
 0x121   :  { %v1204_v37 = vadd.f32 %v2140_v33, %v2961_v12  ;;  %v2143_v38 = vadd.f32 %v2142_v36, %v2141_v34  ;;  %v2234_v40 = vadd.f32 %v2233_v39, %v2232_v35  ;;  %v2235_v43 = vpop.f32.mrb[22].mxu1 }
 0x122   :  { %v2236_v46 = vpop.f32.mrb[23].mxu1 }
 0x123   :  { %v1207_v44 = vadd.f32 %v2143_v38, %v2961_v12  ;;  %v2995_v47 = vadd.f32 %v2234_v40, %v1204_v37  ;;  %v2237_v48 = vadd.f32 %v2236_v46, %v2235_v43 }
 0x125   :  { %v2144_v49 = vpop.f32.mrb[24].mxu0  ;;  %v2997_v50 = vadd.f32 %v2237_v48, %v1207_v44 }
 0x126   :  { %v2145_v51 = vpop.f32.mrb[25].mxu0 }
 0x127   :  { %v2146_v42 = vadd.f32 %v2145_v51, %v2144_v49  ;;  %v2147_v52 = vpop.f32.mrb[26].mxu0  ;;  %v2238_v53 = vpop.f32.mrb[24].mxu1 }
 0x128   :  { %v2148_v54 = vpop.f32.mrb[27].mxu0  ;;  %v2239_v58 = vpop.f32.mrb[25].mxu1 }
 0x129   :  { %v1212_v55 = vadd.f32 %v2146_v42, %v2961_v12  ;;  %v2149_v56 = vadd.f32 %v2148_v54, %v2147_v52  ;;  %v2240_v59 = vadd.f32 %v2239_v58, %v2238_v53  ;;  %v2241_v61 = vpop.f32.mrb[26].mxu1 }
 0x12a   :  { %v2242_v63 = vpop.f32.mrb[27].mxu1 }
 0x12b   :  { %v1215_v62 = vadd.f32 %v2149_v56, %v2961_v12  ;;  %v3001_v0 = vadd.f32 %v2240_v59, %v1212_v55  ;;  %v2243_v1 = vadd.f32 %v2242_v63, %v2241_v61 }
 0x12d   :  { %v2150_v2 = vpop.f32.mrb[28].mxu0  ;;  %v3003_v3 = vadd.f32 %v2243_v1, %v1215_v62 }
 0x12e   :  { %v2151_v4 = vpop.f32.mrb[29].mxu0 }
 0x12f   :  { %v2152_v5 = vadd.f32 %v2151_v4, %v2150_v2  ;;  %v2153_v6 = vpop.f32.mrb[30].mxu0  ;;  %v2244_v7 = vpop.f32.mrb[28].mxu1 }
 0x130   :  { %v2154_v8 = vpop.f32.mrb[31].mxu0  ;;  %v2245_v14 = vpop.f32.mrb[29].mxu1 }
 0x131   :  { %v1220_v10 = vadd.f32 %v2152_v5, %v2961_v12  ;;  %v2155_v11 = vadd.f32 %v2154_v8, %v2153_v6  ;;  %v2246_v15 = vadd.f32 %v2245_v14, %v2244_v7  ;;  %v2247_v16 = vpop.f32.mrb[30].mxu1 }
 0x132   :  { %v2248_v18 = vpop.f32.mrb[31].mxu1 }
 0x133   :  { %v1223_v17 = vadd.f32 %v2155_v11, %v2961_v12  ;;  %v3007_v19 = vadd.f32 %v2246_v15, %v1220_v10  ;;  %v2249_v20 = vadd.f32 %v2248_v18, %v2247_v16 }
 0x135   :  { %v2156_v21 = vpop.f32.mrb[32].mxu0  ;;  %v3009_v22 = vadd.f32 %v2249_v20, %v1223_v17 }
 0x136   :  { %v2157_v23 = vpop.f32.mrb[33].mxu0 }
 0x137   :  { %v2158_v24 = vadd.f32 %v2157_v23, %v2156_v21  ;;  %v2159_v26 = vpop.f32.mrb[34].mxu0  ;;  %v2250_v29 = vpop.f32.mrb[32].mxu1 }
 0x138   :  { %v2160_v30 = vpop.f32.mrb[35].mxu0  ;;  %v2251_v34 = vpop.f32.mrb[33].mxu1 }
 0x139   :  { %v1228_v32 = vadd.f32 %v2158_v24, %v2961_v12  ;;  %v2161_v33 = vadd.f32 %v2160_v30, %v2159_v26  ;;  %v2252_v35 = vadd.f32 %v2251_v34, %v2250_v29  ;;  %v2253_v36 = vpop.f32.mrb[34].mxu1 }
 0x13a   :  { %v2254_v38 = vpop.f32.mrb[35].mxu1 }
 0x13b   :  { %v1231_v37 = vadd.f32 %v2161_v33, %v2961_v12  ;;  %v3013_v39 = vadd.f32 %v2252_v35, %v1228_v32  ;;  %v2255_v40 = vadd.f32 %v2254_v38, %v2253_v36 }
 0x13d   :  { %v2162_v43 = vpop.f32.mrb[36].mxu0  ;;  %v3015_v44 = vadd.f32 %v2255_v40, %v1231_v37 }
 0x13e   :  { %v2163_v46 = vpop.f32.mrb[37].mxu0 }
 0x13f   :  { %v2164_v48 = vadd.f32 %v2163_v46, %v2162_v43  ;;  %v2165_v49 = vpop.f32.mrb[38].mxu0  ;;  %v2256_v51 = vpop.f32.mrb[36].mxu1 }
 0x140   :  { %v2166_v42 = vpop.f32.mrb[39].mxu0  ;;  %v2257_v54 = vpop.f32.mrb[37].mxu1 }
 0x141   :  { %v1236_v52 = vadd.f32 %v2164_v48, %v2961_v12  ;;  %v2167_v53 = vadd.f32 %v2166_v42, %v2165_v49  ;;  %v2258_v55 = vadd.f32 %v2257_v54, %v2256_v51  ;;  %v2259_v56 = vpop.f32.mrb[38].mxu1 }
 0x142   :  { %v2260_v59 = vpop.f32.mrb[39].mxu1 }
 0x143   :  { %v1239_v58 = vadd.f32 %v2167_v53, %v2961_v12  ;;  %v3019_v61 = vadd.f32 %v2258_v55, %v1236_v52  ;;  %v2261_v62 = vadd.f32 %v2260_v59, %v2259_v56 }
 0x145   :  { %v2168_v63 = vpop.f32.mrb[40].mxu0  ;;  %v3021_v1 = vadd.f32 %v2261_v62, %v1239_v58 }
 0x146   :  { %v2169_v2 = vpop.f32.mrb[41].mxu0 }
 0x147   :  { %v2170_v4 = vadd.f32 %v2169_v2, %v2168_v63  ;;  %v2171_v5 = vpop.f32.mrb[42].mxu0  ;;  %v2262_v6 = vpop.f32.mrb[40].mxu1 }
 0x148   :  { %v2172_v7 = vpop.f32.mrb[43].mxu0  ;;  %v2263_v11 = vpop.f32.mrb[41].mxu1 }
 0x149   :  { %v1244_v8 = vadd.f32 %v2170_v4, %v2961_v12  ;;  %v2173_v10 = vadd.f32 %v2172_v7, %v2171_v5  ;;  %v2264_v14 = vadd.f32 %v2263_v11, %v2262_v6  ;;  %v2265_v15 = vpop.f32.mrb[42].mxu1 }
 0x14a   :  { %v2266_v17 = vpop.f32.mrb[43].mxu1 }
 0x14b   :  { %v1247_v16 = vadd.f32 %v2173_v10, %v2961_v12  ;;  %v3025_v18 = vadd.f32 %v2264_v14, %v1244_v8  ;;  %v2267_v20 = vadd.f32 %v2266_v17, %v2265_v15 }
 0x14d   :  { %v2174_v21 = vpop.f32.mrb[44].mxu0  ;;  %v3027_v23 = vadd.f32 %v2267_v20, %v1247_v16 }
 0x14e   :  { %v2175_v24 = vpop.f32.mrb[45].mxu0 }
 0x14f   :  { %v2176_v26 = vadd.f32 %v2175_v24, %v2174_v21  ;;  %v2177_v29 = vpop.f32.mrb[46].mxu0  ;;  %v2268_v30 = vpop.f32.mrb[44].mxu1 }
 0x150   :  { %v2178_v32 = vpop.f32.mrb[47].mxu0  ;;  %v2269_v35 = vpop.f32.mrb[45].mxu1 }
 0x151   :  { %v1252_v33 = vadd.f32 %v2176_v26, %v2961_v12  ;;  %v2179_v34 = vadd.f32 %v2178_v32, %v2177_v29  ;;  %v2270_v36 = vadd.f32 %v2269_v35, %v2268_v30  ;;  %v2271_v37 = vpop.f32.mrb[46].mxu1 }
 0x152   :  { %v2272_v40 = vpop.f32.mrb[47].mxu1 }
 0x153   :  { %v1255_v38 = vadd.f32 %v2179_v34, %v2961_v12  ;;  %v3031_v43 = vadd.f32 %v2270_v36, %v1252_v33  ;;  %v2273_v46 = vadd.f32 %v2272_v40, %v2271_v37 }
 0x155   :  { %v2180_v48 = vpop.f32.mrb[48].mxu0  ;;  %v3033_v49 = vadd.f32 %v2273_v46, %v1255_v38 }
 0x156   :  { %v2181_v51 = vpop.f32.mrb[49].mxu0 }
 0x157   :  { %v2182_v42 = vadd.f32 %v2181_v51, %v2180_v48  ;;  %v2183_v52 = vpop.f32.mrb[50].mxu0  ;;  %v2274_v53 = vpop.f32.mrb[48].mxu1 }
 0x158   :  { %v2184_v54 = vpop.f32.mrb[51].mxu0  ;;  %v2275_v58 = vpop.f32.mrb[49].mxu1 }
 0x159   :  { %v1260_v55 = vadd.f32 %v2182_v42, %v2961_v12  ;;  %v2185_v56 = vadd.f32 %v2184_v54, %v2183_v52  ;;  %v2276_v59 = vadd.f32 %v2275_v58, %v2274_v53  ;;  %v2277_v62 = vpop.f32.mrb[50].mxu1 }
 0x15a   :  { %v2278_v2 = vpop.f32.mrb[51].mxu1 }
 0x15b   :  { %v1263_v63 = vadd.f32 %v2185_v56, %v2961_v12  ;;  %v3037_v4 = vadd.f32 %v2276_v59, %v1260_v55  ;;  %v2279_v5 = vadd.f32 %v2278_v2, %v2277_v62 }
 0x15d   :  { %v2296_v6 = vpop.f32.mrb[52].mxu0  ;;  %v3039_v7 = vadd.f32 %v2279_v5, %v1263_v63 }
 0x15e   :  { %v2297_v8 = vpop.f32.mrb[53].mxu0 }
 0x15f   :  { %v2298_v10 = vadd.f32 %v2297_v8, %v2296_v6  ;;  %v2299_v11 = vpop.f32.mrb[54].mxu0  ;;  %v1574_v15 = vpop.f32.mrb[52].mxu1 }
 0x160   :  { %v2300_v14 = vpop.f32.mrb[55].mxu0  ;;  %v1576_v20 = vpop.f32.mrb[53].mxu1 }
 0x161   :  { %v2301_v16 = vadd.f32 %v2300_v14, %v2299_v11  ;;  %v1438_v17 = vadd.f32 %v2298_v10, %v2965_v25  ;;  %v1577_v21 = vpop.f32.mrb[54].mxu1 }
 0x162   :  { %v1579_v26 = vpop.f32.mrb[55].mxu1 }
 0x163   :  { %v1575_v24 = vadd.f32 %v1574_v15, %v1438_v17  ;;  %v1441_v12 = vadd.f32 %v2301_v16, %v2967_v28 }
 0x165   :  { %v1677_v29 = vmul.f32 0.01, %v1575_v24  ;;  %v1578_v30 = vadd.f32 %v1577_v21, %v1441_v12  ;;  %v2302_v32 = vpop.f32.mrb[56].mxu0 }
 0x166   :  { %v2303_v33 = vpop.f32.mrb[57].mxu0 }
 0x167   :  { %v1703_v34 = vmax.f32 %v1575_v24, %v1677_v29  ;;  %v1678_v35 = vmul.f32 0.01, %v1578_v30  ;;  %v2304_v36 = vadd.f32 %v2303_v33, %v2302_v32  ;;  %v2305_v37 = vpop.f32.mrb[58].mxu0  ;;  %v1582_v40 = vpop.f32.mrb[56].mxu1 }
 0x168   :  { %v2306_v38 = vpop.f32.mrb[59].mxu0  ;;  %v1584_v42 = vpop.f32.mrb[57].mxu1 }
 0x169   :  { %v2066_v46 = vpack.c.bf16 %v1703_v34, %v1703_v34  ;;  %v1704_v48 = vmax.f32 %v1578_v30, %v1678_v35  ;;  %v2307_v25 = vadd.f32 %v2306_v38, %v2305_v37  ;;  %v1446_v51 = vadd.f32 %v2304_v36, %v2971_v41  ;;  %v1585_v52 = vpop.f32.mrb[58].mxu1 }
 0x16a   :  { %v1587_v55 = vpop.f32.mrb[59].mxu1 }
 0x16b   :  { %1834 = vst.msk [vmem:[%s3173_s3] sm:$0xf] %vm1833_vm2, %v2066_v46  ;;  %v2067_v28 = vpack.c.bf16 %v1704_v48, %v1704_v48  ;;  %v1583_v53 = vadd.f32 %v1582_v40, %v1446_v51  ;;  %v1449_v54 = vadd.f32 %v2307_v25, %v2973_v45 }
 0x16d   :  { %1835 = vst.msk [vmem:[%s3173_s3 + $0x4] sm:$0xf] %vm1833_vm2, %v2067_v28  ;;  %v1679_v56 = vmul.f32 0.01, %v1583_v53  ;;  %v1586_v58 = vadd.f32 %v1585_v52, %v1449_v54  ;;  %v2308_v41 = vpop.f32.mrb[60].mxu0 }
 0x16e   :  { %v2309_v59 = vpop.f32.mrb[61].mxu0 }
 0x16f   :  { %v1705_v62 = vmax.f32 %v1583_v53, %v1679_v56  ;;  %v1680_v63 = vmul.f32 0.01, %v1586_v58  ;;  %v2310_v2 = vadd.f32 %v2309_v59, %v2308_v41  ;;  %v2311_v5 = vpop.f32.mrb[62].mxu0  ;;  %v1590_v8 = vpop.f32.mrb[60].mxu1 }
 0x170   :  { %v2312_v6 = vpop.f32.mrb[63].mxu0  ;;  %v1592_v15 = vpop.f32.mrb[61].mxu1 }
 0x171   :  { %v2068_v10 = vpack.c.bf16 %v1705_v62, %v1705_v62  ;;  %v1706_v11 = vmax.f32 %v1586_v58, %v1680_v63  ;;  %v2313_v14 = vadd.f32 %v2312_v6, %v2311_v5  ;;  %v1454_v45 = vadd.f32 %v2310_v2, %v2977_v57  ;;  %v1593_v16 = vpop.f32.mrb[62].mxu1 }
 0x172   :  { %v1595_v24 = vpop.f32.mrb[63].mxu1 }
 0x173   :  { %1836 = vst.msk [vmem:[%s3173_s3 + $0x8] sm:$0xf] %vm1833_vm2, %v2068_v10  ;;  %v2069_v17 = vpack.c.bf16 %v1706_v11, %v1706_v11  ;;  %v1591_v20 = vadd.f32 %v1590_v8, %v1454_v45  ;;  %v1457_v21 = vadd.f32 %v2313_v14, %v2979_v60 }
 0x175   :  { %1837 = vst.msk [vmem:[%s3173_s3 + $0xc] sm:$0xf] %vm1833_vm2, %v2069_v17  ;;  %v1681_v12 = vmul.f32 0.01, %v1591_v20  ;;  %v1594_v26 = vadd.f32 %v1593_v16, %v1457_v21  ;;  %v2314_v57 = vpop.f32.mrb[64].mxu0 }
 0x176   :  { %v2315_v29 = vpop.f32.mrb[65].mxu0 }
 0x177   :  { %v1707_v30 = vmax.f32 %v1591_v20, %v1681_v12  ;;  %v1682_v32 = vmul.f32 0.01, %v1594_v26  ;;  %v2316_v33 = vadd.f32 %v2315_v29, %v2314_v57  ;;  %v2317_v34 = vpop.f32.mrb[66].mxu0  ;;  %v1598_v36 = vpop.f32.mrb[64].mxu1 }
 0x178   :  { %v2318_v35 = vpop.f32.mrb[67].mxu0  ;;  %v1600_v46 = vpop.f32.mrb[65].mxu1 }
 0x179   :  { %v2070_v37 = vpack.c.bf16 %v1707_v30, %v1707_v30  ;;  %v1708_v38 = vmax.f32 %v1594_v26, %v1682_v32  ;;  %v2319_v40 = vadd.f32 %v2318_v35, %v2317_v34  ;;  %v1462_v60 = vadd.f32 %v2316_v33, %v2983_v9  ;;  %v1601_v48 = vpop.f32.mrb[66].mxu1 }
 0x17a   :  { %v1603_v52 = vpop.f32.mrb[67].mxu1 }
 0x17b   :  { %1838 = vst.msk [vmem:[%s3173_s3 + $0x10] sm:$0xf] %vm1833_vm2, %v2070_v37  ;;  %v2071_v25 = vpack.c.bf16 %v1708_v38, %v1708_v38  ;;  %v1599_v51 = vadd.f32 %v1598_v36, %v1462_v60  ;;  %v1465_v42 = vadd.f32 %v2319_v40, %v2985_v13 }
 0x17d   :  { %1839 = vst.msk [vmem:[%s3173_s3 + $0x14] sm:$0xf] %vm1833_vm2, %v2071_v25  ;;  %v1683_v28 = vmul.f32 0.01, %v1599_v51  ;;  %v1602_v53 = vadd.f32 %v1601_v48, %v1465_v42  ;;  %v2320_v9 = vpop.f32.mrb[68].mxu0 }
 0x17e   :  { %v2321_v54 = vpop.f32.mrb[69].mxu0 }
 0x17f   :  { %v1709_v55 = vmax.f32 %v1599_v51, %v1683_v28  ;;  %v1684_v56 = vmul.f32 0.01, %v1602_v53  ;;  %v2322_v58 = vadd.f32 %v2321_v54, %v2320_v9  ;;  %v2323_v41 = vpop.f32.mrb[70].mxu0  ;;  %v1606_v62 = vpop.f32.mrb[68].mxu1 }
 0x180   :  { %v2324_v59 = vpop.f32.mrb[71].mxu0  ;;  %v1608_v6 = vpop.f32.mrb[69].mxu1 }
 0x181   :  { %v2072_v63 = vpack.c.bf16 %v1709_v55, %v1709_v55  ;;  %v1710_v2 = vmax.f32 %v1602_v53, %v1684_v56  ;;  %v2325_v5 = vadd.f32 %v2324_v59, %v2323_v41  ;;  %v1470_v13 = vadd.f32 %v2322_v58, %v2989_v27  ;;  %v1609_v8 = vpop.f32.mrb[70].mxu1 }
 0x182   :  { %v1611_v45 = vpop.f32.mrb[71].mxu1 }
 0x183   :  { %1840 = vst.msk [vmem:[%s3173_s3 + $0x18] sm:$0xf] %vm1833_vm2, %v2072_v63  ;;  %v2073_v10 = vpack.c.bf16 %v1710_v2, %v1710_v2  ;;  %v1607_v11 = vadd.f32 %v1606_v62, %v1470_v13  ;;  %v1473_v14 = vadd.f32 %v2325_v5, %v2991_v31 }
 0x185   :  { %1841 = vst.msk [vmem:[%s3173_s3 + $0x1c] sm:$0xf] %vm1833_vm2, %v2073_v10  ;;  %v1685_v15 = vmul.f32 0.01, %v1607_v11  ;;  %v1610_v16 = vadd.f32 %v1609_v8, %v1473_v14  ;;  %v2326_v27 = vpop.f32.mrb[72].mxu0 }
 0x186   :  { %v2327_v17 = vpop.f32.mrb[73].mxu0 }
 0x187   :  { %v1711_v20 = vmax.f32 %v1607_v11, %v1685_v15  ;;  %v1686_v21 = vmul.f32 0.01, %v1610_v16  ;;  %v2328_v24 = vadd.f32 %v2327_v17, %v2326_v27  ;;  %v2329_v12 = vpop.f32.mrb[74].mxu0  ;;  %v1614_v57 = vpop.f32.mrb[72].mxu1 }
 0x188   :  { %v2330_v26 = vpop.f32.mrb[75].mxu0  ;;  %v1616_v33 = vpop.f32.mrb[73].mxu1 }
 0x189   :  { %v2074_v29 = vpack.c.bf16 %v1711_v20, %v1711_v20  ;;  %v1712_v30 = vmax.f32 %v1610_v16, %v1686_v21  ;;  %v2331_v32 = vadd.f32 %v2330_v26, %v2329_v12  ;;  %v1478_v31 = vadd.f32 %v2328_v24, %v2995_v47  ;;  %v1617_v34 = vpop.f32.mrb[74].mxu1 }
 0x18a   :  { %v1619_v38 = vpop.f32.mrb[75].mxu1 }
 0x18b   :  { %1842 = vst.msk [vmem:[%s3173_s3 + $0x20] sm:$0xf] %vm1833_vm2, %v2074_v29  ;;  %v2075_v35 = vpack.c.bf16 %v1712_v30, %v1712_v30  ;;  %v1615_v36 = vadd.f32 %v1614_v57, %v1478_v31  ;;  %v1481_v37 = vadd.f32 %v2331_v32, %v2997_v50 }
 0x18d   :  { %1843 = vst.msk [vmem:[%s3173_s3 + $0x24] sm:$0xf] %vm1833_vm2, %v2075_v35  ;;  %v1687_v40 = vmul.f32 0.01, %v1615_v36  ;;  %v1618_v60 = vadd.f32 %v1617_v34, %v1481_v37  ;;  %v2332_v47 = vpop.f32.mrb[76].mxu0 }
 0x18e   :  { %v2333_v46 = vpop.f32.mrb[77].mxu0 }
 0x18f   :  { %v1713_v48 = vmax.f32 %v1615_v36, %v1687_v40  ;;  %v1688_v25 = vmul.f32 0.01, %v1618_v60  ;;  %v2334_v51 = vadd.f32 %v2333_v46, %v2332_v47  ;;  %v2335_v42 = vpop.f32.mrb[78].mxu0  ;;  %v1622_v28 = vpop.f32.mrb[76].mxu1 }
 0x190   :  { %v2336_v52 = vpop.f32.mrb[79].mxu0  ;;  %v1624_v55 = vpop.f32.mrb[77].mxu1 }
 0x191   :  { %v2076_v53 = vpack.c.bf16 %v1713_v48, %v1713_v48  ;;  %v1714_v9 = vmax.f32 %v1618_v60, %v1688_v25  ;;  %v2337_v54 = vadd.f32 %v2336_v52, %v2335_v42  ;;  %v1486_v50 = vadd.f32 %v2334_v51, %v3001_v0  ;;  %v1625_v56 = vpop.f32.mrb[78].mxu1 }
 0x192   :  { %v1627_v62 = vpop.f32.mrb[79].mxu1 }
 0x193   :  { %1844 = vst.msk [vmem:[%s3173_s3 + $0x28] sm:$0xf] %vm1833_vm2, %v2076_v53  ;;  %v2077_v58 = vpack.c.bf16 %v1714_v9, %v1714_v9  ;;  %v1623_v41 = vadd.f32 %v1622_v28, %v1486_v50  ;;  %v1489_v59 = vadd.f32 %v2337_v54, %v3003_v3 }
 0x195   :  { %1845 = vst.msk [vmem:[%s3173_s3 + $0x2c] sm:$0xf] %vm1833_vm2, %v2077_v58  ;;  %v1689_v63 = vmul.f32 0.01, %v1623_v41  ;;  %v1626_v2 = vadd.f32 %v1625_v56, %v1489_v59  ;;  %v2338_v0 = vpop.f32.mrb[80].mxu0 }
 0x196   :  { %v2339_v5 = vpop.f32.mrb[81].mxu0 }
 0x197   :  { %v1715_v13 = vmax.f32 %v1623_v41, %v1689_v63  ;;  %v1690_v6 = vmul.f32 0.01, %v1626_v2  ;;  %v2340_v8 = vadd.f32 %v2339_v5, %v2338_v0  ;;  %v2341_v10 = vpop.f32.mrb[82].mxu0  ;;  %v1630_v14 = vpop.f32.mrb[80].mxu1 }
 0x198   :  { %v2342_v11 = vpop.f32.mrb[83].mxu0  ;;  %v1632_v27 = vpop.f32.mrb[81].mxu1 }
 0x199   :  { %v2078_v45 = vpack.c.bf16 %v1715_v13, %v1715_v13  ;;  %v1716_v15 = vmax.f32 %v1626_v2, %v1690_v6  ;;  %v2343_v16 = vadd.f32 %v2342_v11, %v2341_v10  ;;  %v1494_v3 = vadd.f32 %v2340_v8, %v3007_v19  ;;  %v1633_v17 = vpop.f32.mrb[82].mxu1 }
 0x19a   :  { %v1635_v12 = vpop.f32.mrb[83].mxu1 }
 0x19b   :  { %1846 = vst.msk [vmem:[%s3173_s3 + $0x30] sm:$0xf] %vm1833_vm2, %v2078_v45  ;;  %v2079_v20 = vpack.c.bf16 %v1716_v15, %v1716_v15  ;;  %v1631_v21 = vadd.f32 %v1630_v14, %v1494_v3  ;;  %v1497_v24 = vadd.f32 %v2343_v16, %v3009_v22 }
 0x19d   :  { %1847 = vst.msk [vmem:[%s3173_s3 + $0x34] sm:$0xf] %vm1833_vm2, %v2079_v20  ;;  %v1691_v26 = vmul.f32 0.01, %v1631_v21  ;;  %v1634_v57 = vadd.f32 %v1633_v17, %v1497_v24  ;;  %v2344_v19 = vpop.f32.mrb[84].mxu0 }
 0x19e   :  { %v2345_v29 = vpop.f32.mrb[85].mxu0 }
 0x19f   :  { %v1717_v30 = vmax.f32 %v1631_v21, %v1691_v26  ;;  %v1692_v32 = vmul.f32 0.01, %v1634_v57  ;;  %v2346_v31 = vadd.f32 %v2345_v29, %v2344_v19  ;;  %v2347_v33 = vpop.f32.mrb[86].mxu0  ;;  %v1638_v35 = vpop.f32.mrb[84].mxu1 }
 0x1a0   :  { %v2348_v34 = vpop.f32.mrb[87].mxu0  ;;  %v1640_v40 = vpop.f32.mrb[85].mxu1 }
 0x1a1   :  { %v2080_v36 = vpack.c.bf16 %v1717_v30, %v1717_v30  ;;  %v1718_v37 = vmax.f32 %v1634_v57, %v1692_v32  ;;  %v2349_v38 = vadd.f32 %v2348_v34, %v2347_v33  ;;  %v1502_v22 = vadd.f32 %v2346_v31, %v3013_v39  ;;  %v1641_v60 = vpop.f32.mrb[86].mxu1 }
 0x1a2   :  { %v1643_v25 = vpop.f32.mrb[87].mxu1 }
 0x1a3   :  { %1848 = vst.msk [vmem:[%s3173_s3 + $0x38] sm:$0xf] %vm1833_vm2, %v2080_v36  ;;  %v2081_v47 = vpack.c.bf16 %v1718_v37, %v1718_v37  ;;  %v1639_v46 = vadd.f32 %v1638_v35, %v1502_v22  ;;  %v1505_v48 = vadd.f32 %v2349_v38, %v3015_v44 }
 0x1a5   :  { %1849 = vst.msk [vmem:[%s3173_s3 + $0x3c] sm:$0xf] %vm1833_vm2, %v2081_v47  ;;  %v1693_v51 = vmul.f32 0.01, %v1639_v46  ;;  %v1642_v42 = vadd.f32 %v1641_v60, %v1505_v48  ;;  %v2350_v39 = vpop.f32.mrb[88].mxu0 }
 0x1a6   :  { %v2351_v52 = vpop.f32.mrb[89].mxu0 }
 0x1a7   :  { %v1719_v28 = vmax.f32 %v1639_v46, %v1693_v51  ;;  %v1694_v53 = vmul.f32 0.01, %v1642_v42  ;;  %v2352_v9 = vadd.f32 %v2351_v52, %v2350_v39  ;;  %v2353_v54 = vpop.f32.mrb[90].mxu0  ;;  %v1646_v55 = vpop.f32.mrb[88].mxu1 }
 0x1a8   :  { %v2354_v50 = vpop.f32.mrb[91].mxu0  ;;  %v1648_v59 = vpop.f32.mrb[89].mxu1 }
 0x1a9   :  { %v2082_v56 = vpack.c.bf16 %v1719_v28, %v1719_v28  ;;  %v1720_v58 = vmax.f32 %v1642_v42, %v1694_v53  ;;  %v2355_v41 = vadd.f32 %v2354_v50, %v2353_v54  ;;  %v1510_v44 = vadd.f32 %v2352_v9, %v3019_v61  ;;  %v1649_v62 = vpop.f32.mrb[90].mxu1 }
 0x1aa   :  { %v1651_v5 = vpop.f32.mrb[91].mxu1 }
 0x1ab   :  { %1850 = vst.msk [vmem:[%s3173_s3 + $0x40] sm:$0xf] %vm1833_vm2, %v2082_v56  ;;  %v2083_v63 = vpack.c.bf16 %v1720_v58, %v1720_v58  ;;  %v1647_v2 = vadd.f32 %v1646_v55, %v1510_v44  ;;  %v1513_v0 = vadd.f32 %v2355_v41, %v3021_v1 }
 0x1ad   :  { %1851 = vst.msk [vmem:[%s3173_s3 + $0x44] sm:$0xf] %vm1833_vm2, %v2083_v63  ;;  %v1695_v13 = vmul.f32 0.01, %v1647_v2  ;;  %v1650_v6 = vadd.f32 %v1649_v62, %v1513_v0  ;;  %v2356_v61 = vpop.f32.mrb[92].mxu0 }
 0x1ae   :  { %v2357_v8 = vpop.f32.mrb[93].mxu0 }
 0x1af   :  { %v1721_v10 = vmax.f32 %v1647_v2, %v1695_v13  ;;  %v1696_v11 = vmul.f32 0.01, %v1650_v6  ;;  %v2358_v14 = vadd.f32 %v2357_v8, %v2356_v61  ;;  %v2359_v45 = vpop.f32.mrb[94].mxu0  ;;  %v1654_v16 = vpop.f32.mrb[92].mxu1 }
 0x1b0   :  { %v2360_v15 = vpop.f32.mrb[95].mxu0  ;;  %v1656_v20 = vpop.f32.mrb[93].mxu1 }
 0x1b1   :  { %v2084_v3 = vpack.c.bf16 %v1721_v10, %v1721_v10  ;;  %v1722_v27 = vmax.f32 %v1650_v6, %v1696_v11  ;;  %v2361_v17 = vadd.f32 %v2360_v15, %v2359_v45  ;;  %v1518_v1 = vadd.f32 %v2358_v14, %v3025_v18  ;;  %v1657_v21 = vpop.f32.mrb[94].mxu1 }
 0x1b2   :  { %v1659_v57 = vpop.f32.mrb[95].mxu1 }
 0x1b3   :  { %1852 = vst.msk [vmem:[%s3173_s3 + $0x48] sm:$0xf] %vm1833_vm2, %v2084_v3  ;;  %v2085_v24 = vpack.c.bf16 %v1722_v27, %v1722_v27  ;;  %v1655_v12 = vadd.f32 %v1654_v16, %v1518_v1  ;;  %v1521_v26 = vadd.f32 %v2361_v17, %v3027_v23 }
 0x1b5   :  { %1853 = vst.msk [vmem:[%s3173_s3 + $0x4c] sm:$0xf] %vm1833_vm2, %v2085_v24  ;;  %v1697_v19 = vmul.f32 0.01, %v1655_v12  ;;  %v1658_v29 = vadd.f32 %v1657_v21, %v1521_v26  ;;  %v2362_v18 = vpop.f32.mrb[96].mxu0 }
 0x1b6   :  { %v2363_v30 = vpop.f32.mrb[97].mxu0 }
 0x1b7   :  { %v1723_v32 = vmax.f32 %v1655_v12, %v1697_v19  ;;  %v1698_v31 = vmul.f32 0.01, %v1658_v29  ;;  %v2364_v33 = vadd.f32 %v2363_v30, %v2362_v18  ;;  %v2365_v34 = vpop.f32.mrb[98].mxu0  ;;  %v1662_v36 = vpop.f32.mrb[96].mxu1 }
 0x1b8   :  { %v2366_v35 = vpop.f32.mrb[99].mxu0  ;;  %v1664_v40 = vpop.f32.mrb[97].mxu1 }
 0x1b9   :  { %v2086_v37 = vpack.c.bf16 %v1723_v32, %v1723_v32  ;;  %v1724_v38 = vmax.f32 %v1658_v29, %v1698_v31  ;;  %v2367_v22 = vadd.f32 %v2366_v35, %v2365_v34  ;;  %v1526_v23 = vadd.f32 %v2364_v33, %v3031_v43  ;;  %v1665_v60 = vpop.f32.mrb[98].mxu1 }
 0x1ba   :  { %v1667_v25 = vpop.f32.mrb[99].mxu1 }
 0x1bb   :  { %1854 = vst.msk [vmem:[%s3173_s3 + $0x50] sm:$0xf] %vm1833_vm2, %v2086_v37  ;;  %v2087_v47 = vpack.c.bf16 %v1724_v38, %v1724_v38  ;;  %v1663_v46 = vadd.f32 %v1662_v36, %v1526_v23  ;;  %v1529_v48 = vadd.f32 %v2367_v22, %v3033_v49 }
 0x1bd   :  { %1855 = vst.msk [vmem:[%s3173_s3 + $0x54] sm:$0xf] %vm1833_vm2, %v2087_v47  ;;  %v1699_v51 = vmul.f32 0.01, %v1663_v46  ;;  %v1666_v42 = vadd.f32 %v1665_v60, %v1529_v48  ;;  %v2368_v43 = vpop.f32.mrb[100].mxu0 }
 0x1be   :  { %v2369_v39 = vpop.f32.mrb[101].mxu0 }
 0x1bf   :  { %v1725_v52 = vmax.f32 %v1663_v46, %v1699_v51  ;;  %v1700_v28 = vmul.f32 0.01, %v1666_v42  ;;  %v2370_v53 = vadd.f32 %v2369_v39, %v2368_v43  ;;  %v2371_v9 = vpop.f32.mrb[102].mxu0  ;;  %v1670_v50 = vpop.f32.mrb[100].mxu1 }
 0x1c0   :  { %v2372_v54 = vpop.f32.mrb[103].mxu0  ;;  %v1672_v41 = vpop.f32.mrb[101].mxu1 }
 0x1c1   :  { %v2088_v55 = vpack.c.bf16 %v1725_v52, %v1725_v52  ;;  %v1726_v56 = vmax.f32 %v1666_v42, %v1700_v28  ;;  %v2373_v58 = vadd.f32 %v2372_v54, %v2371_v9  ;;  %v1534_v49 = vadd.f32 %v2370_v53, %v3037_v4  ;;  %v1673_v44 = vpop.f32.mrb[102].mxu1 }
 0x1c2   :  { %v1675_v2 = vpop.f32.mrb[103].mxu1 }
 0x1c3   :  { %1856 = vst.msk [vmem:[%s3173_s3 + $0x58] sm:$0xf] %vm1833_vm2, %v2088_v55  ;;  %v2089_v59 = vpack.c.bf16 %v1726_v56, %v1726_v56  ;;  %v1671_v62 = vadd.f32 %v1670_v50, %v1534_v49  ;;  %v1537_v63 = vadd.f32 %v2373_v58, %v3039_v7 }
 0x1c5   :  { %1857 = vst.msk [vmem:[%s3173_s3 + $0x5c] sm:$0xf] %vm1833_vm2, %v2089_v59  ;;  %v1701_v0 = vmul.f32 0.01, %v1671_v62  ;;  %v1674_v5 = vadd.f32 %v1673_v44, %v1537_v63 }
 0x1c7   :  { %v1727_v4 = vmax.f32 %v1671_v62, %v1701_v0  ;;  %v1702_v13 = vmul.f32 0.01, %v1674_v5 }
 0x1c9   :  { %v2090_v6 = vpack.c.bf16 %v1727_v4, %v1727_v4  ;;  %v1728_v61 = vmax.f32 %v1674_v5, %v1702_v13 }
 0x1cb   :  { %1858 = vst.msk [vmem:[%s3173_s3 + $0x60] sm:$0xf] %vm1833_vm2, %v2090_v6  ;;  %v2091_v8 = vpack.c.bf16 %v1728_v61, %v1728_v61 }
 0x1cd   :  { %1860 = vst.msk [vmem:[%s3173_s3 + $0x64] sm:$0x3] %vm1859_vm3, %v2091_v8 }

// kernel: pilotnet_forward.9
= control target key start
LH: loop header
LB: loop body
LE: loop exit
PB: predicated region body
PF: predicated region fallthrough
CT: control target
= control target key end

     0   :  { %v978_v0 = vmov 0   ;;  %vm414_vm0 = vcmask 392192   ;;  %vm722_vm1 = vcmask 519168   ;;  %s1269_s1 = inlined_call_operand.vmem [shape: bf16[432,64], index: 1, kind: input, shape index: {}]   ;;  %s1270_s0 = inlined_call_operand.vmem [shape: bf16[120,432], index: 0, kind: input, shape index: {}]   ;;  %s1271_s2 = inlined_call_operand.vmem [shape: f32[1,64], index: 2, kind: input, shape index: {}]   ;;  %s1272_s3 = inlined_call_operand.vmem [shape: bf16[120,64], index: 3, kind: output, shape index: {}]  }
   0x1   :  { %535 = vmatprep.subr.bf16.mxu1 %v978_v0  ;;  %v905_v1 = vld [vmem:[%s1269_s1 + $0x80] sm:$0xff]   ;;  %v908_v4 = vld [vmem:[%s1269_s1 + $0x88] sm:$0xff]   ;;  %v911_v7 = vld [vmem:[%s1269_s1 + $0x90] sm:$0xff]  }
   0x2   :  { %v906_v2 = vld [vmem:[%s1269_s1 + $0x40] sm:$0xff]   ;;  %536 = vmatpush1.bf16.msra.mxu1 %v905_v1  ;;  %v909_v5 = vld [vmem:[%s1269_s1 + $0x48] sm:$0xff]   ;;  %v912_v8 = vld [vmem:[%s1269_s1 + $0x50] sm:$0xff]  }
   0x3   :  { %v907_v3 = vld [vmem:[%s1269_s1] sm:$0xff]   ;;  %840 = vmatprep.subr.bf16.mxu0 %v906_v2  ;;  %537 = vmatprep.subr.bf16.mxu1 %v978_v0  ;;  %v910_v6 = vld [vmem:[%s1269_s1 + $0x8] sm:$0xff]   ;;  %v913_v9 = vld [vmem:[%s1269_s1 + $0x10] sm:$0xff]  }
   0x4   :  { %841 = vmatpush3.bf16.msra.mxu0 %v907_v3  ;;  %v914_v10 = vld [vmem:[%s1269_s1 + $0x98] sm:$0xff]   ;;  %v918_v13 = vld [vmem:[%s1269_s1 + $0x60] sm:$0xff]   ;;  %v921_v16 = vld [vmem:[%s1269_s1 + $0x68] sm:$0xff]  }
   0x5   :  { %842 = vmatprep.subr.bf16.mxu0 %v909_v5  ;;  %v915_v11 = vld [vmem:[%s1269_s1 + $0x58] sm:$0xff]   ;;  %v917_v14 = vld [vmem:[%s1269_s1 + $0xa0] sm:$0xff]   ;;  %v920_v17 = vld [vmem:[%s1269_s1 + $0xa8] sm:$0xff]  }
   0x6   :  { %538 = vmatpush1.bf16.msra.mxu1 %v908_v4  ;;  %v916_v12 = vld [vmem:[%s1269_s1 + $0x18] sm:$0xff]   ;;  %v919_v15 = vld [vmem:[%s1269_s1 + $0x20] sm:$0xff]   ;;  %v922_v18 = vld [vmem:[%s1269_s1 + $0x28] sm:$0xff]  }
   0x7   :  { %539 = vmatprep.subr.bf16.mxu1 %v978_v0  ;;  %v924_v19 = vld [vmem:[%s1269_s1 + $0x70] sm:$0xff]   ;;  %v926_v22 = vld [vmem:[%s1269_s1 + $0xb8] sm:$0xff]   ;;  %v929_v26 = vld [vmem:[%s1269_s1 + $0xc0] sm:$0xff]  }
   0x8   :  { %843 = vmatpush3.bf16.msra.mxu0 %v910_v6  ;;  %v923_v20 = vld [vmem:[%s1269_s1 + $0xb0] sm:$0xff]   ;;  %v927_v23 = vld [vmem:[%s1269_s1 + $0x78] sm:$0xff]   ;;  %v933_v30 = vld [vmem:[%s1269_s1 + $0xc8] sm:$0xff]  }
   0x9   :  { %844 = vmatprep.subr.bf16.mxu0 %v912_v8  ;;  %v925_v21 = vld [vmem:[%s1269_s1 + $0x30] sm:$0xff]   ;;  %v928_v25 = vld [vmem:[%s1269_s1 + $0x38] sm:$0xff]   ;;  %v43_v52 = vld [vmem:[%s1270_s0 + $0xe0] sm:$0xff] }
   0xa   :  { %540 = vmatpush1.bf16.msra.mxu1 %v911_v7  ;;  %v932_v24 = vld [vmem:[%s1270_s0 + $0x4] ss:$16 sps:$4 sm:$0xff]   ;;  %v939_v27 = vld [vmem:[%s1270_s0 + $0xc] ss:$16 sps:$4 sm:$0xff]   ;;  %v930_v28 = vld [vmem:[%s1270_s0] ss:$16 sps:$4 sm:$0xff]   ;;  %v772_v54 = vcombine.high %v43_v52, %v43_v52  ;;  %v771_v57 = vcombine.low %v43_v52, %v43_v52 }
   0xb   :  { %541 = vmatprep.subr.bf16.mxu1 %v978_v0  ;;  %471 = vmatprep.mubr.bf16.mxu0 %v932_v24  ;;  %v935_v29 = vld [vmem:[%s1270_s0 + $0x24] ss:$16 sps:$4 sm:$0xff]   ;;  %v940_v32 = vld [vmem:[%s1270_s0 + $0x20] ss:$16 sps:$4 sm:$0xff]   ;;  %v937_v34 = vld [vmem:[%s1270_s0 + $0x8] ss:$16 sps:$4 sm:$0xff]  }
   0xc   :  { %845 = vmatpush3.bf16.msra.mxu0 %v913_v9  ;;  %802 = vmatprep.mubr.msk.bf16.mxu1 %vm414_vm0, %v939_v27  ;;  %v934_v31 = vld [vmem:[%s1269_s1 + $0xd0] sm:$0xff]   ;;  %v943_v35 = vld [vmem:[%s1270_s0 + $0x2c] ss:$16 sps:$4 sm:$0xff]   ;;  %v946_v38 = vld [vmem:[%s1270_s0 + $0x28] ss:$16 sps:$4 sm:$0xff]  }
   0xd   :  { %846 = vmatprep.subr.bf16.mxu0 %v915_v11  ;;  %v941_v33 = vld [vmem:[%s1270_s0 + $0x44] ss:$16 sps:$4 sm:$0xff]   ;;  %v945_v36 = vld [vmem:[%s1270_s0 + $0x40] ss:$16 sps:$4 sm:$0xff]   ;;  %v949_v39 = vld [vmem:[%s1270_s0 + $0x4c] ss:$16 sps:$4 sm:$0xff]  }
   0xe   :  { %542 = vmatpush1.bf16.msra.mxu1 %v914_v10  ;;  %v947_v37 = vld [vmem:[%s1270_s0 + $0x64] ss:$16 sps:$4 sm:$0xff]   ;;  %v951_v40 = vld [vmem:[%s1270_s0 + $0x60] ss:$16 sps:$4 sm:$0xff]   ;;  %v952_v42 = vld [vmem:[%s1270_s0 + $0x48] ss:$16 sps:$4 sm:$0xff]  }
   0xf   :  { %543 = vmatprep.subr.bf16.mxu1 %v978_v0  ;;  %v953_v41 = vld [vmem:[%s1270_s0 + $0x84] ss:$16 sps:$4 sm:$0xff]   ;;  %v955_v43 = vld [vmem:[%s1270_s0 + $0x6c] ss:$16 sps:$4 sm:$0xff]   ;;  %v957_v44 = vld [vmem:[%s1270_s0 + $0x80] ss:$16 sps:$4 sm:$0xff]  }
  0x10   :  { %847 = vmatpush3.bf16.msra.mxu0 %v916_v12  ;;  %v959_v45 = vld [vmem:[%s1270_s0 + $0xa4] ss:$16 sps:$4 sm:$0xff]   ;;  %v958_v46 = vld [vmem:[%s1270_s0 + $0x68] ss:$16 sps:$4 sm:$0xff]   ;;  %v961_v47 = vld [vmem:[%s1270_s0 + $0x8c] ss:$16 sps:$4 sm:$0xff]  }
  0x11   :  { %848 = vmatprep.subr.bf16.mxu0 %v918_v13  ;;  %v963_v48 = vld [vmem:[%s1270_s0 + $0xa0] ss:$16 sps:$4 sm:$0xff]   ;;  %v965_v49 = vld [vmem:[%s1270_s0 + $0xc4] ss:$16 sps:$4 sm:$0xff]   ;;  %v964_v50 = vld [vmem:[%s1270_s0 + $0x88] ss:$16 sps:$4 sm:$0xff]  }
  0x12   :  { %544 = vmatpush1.bf16.msra.mxu1 %v917_v14  ;;  %v967_v51 = vld [vmem:[%s1270_s0 + $0xac] ss:$16 sps:$4 sm:$0xff]   ;;  %v969_v53 = vld [vmem:[%s1270_s0 + $0xc0] ss:$16 sps:$4 sm:$0xff]   ;;  %v970_v55 = vld [vmem:[%s1270_s0 + $0xa8] ss:$16 sps:$4 sm:$0xff]  }
  0x13   :  { %545 = vmatprep.subr.bf16.mxu1 %v978_v0  ;;  %v972_v56 = vld [vmem:[%s1270_s0 + $0xcc] ss:$16 sps:$4 sm:$0xff]   ;;  %v975_v59 = vld [vmem:[%s1270_s0 + $0xc8] ss:$16 sps:$4 sm:$0xff]   ;;  %v1192_v4 = vld [vmem:[%s1271_s2] ss:$0 sm:$0xff] }
  0x14   :  { %849 = vmatpush3.bf16.msra.mxu0 %v919_v15  ;;  %v44_v58 = vld [vmem:[%s1270_s0 + $0xe8] sm:$0xff] }
  0x15   :  { %850 = vmatprep.subr.bf16.mxu0 %v921_v16  ;;  %v774_v60 = vcombine.high %v44_v58, %v44_v58  ;;  %v773_v61 = vcombine.low %v44_v58, %v44_v58 }
  0x16   :  { %546 = vmatpush1.bf16.msra.mxu1 %v920_v17 }
  0x17   :  { %547 = vmatprep.subr.bf16.mxu1 %v978_v0 }
  0x18   :  { %851 = vmatpush3.bf16.msra.mxu0 %v922_v18 }
  0x19   :  { %852 = vmatprep.subr.bf16.mxu0 %v924_v19 }
  0x1a   :  { %548 = vmatpush1.bf16.msra.mxu1 %v923_v20 }
  0x1b   :  { %549 = vmatprep.subr.bf16.mxu1 %v978_v0 }
  0x1c   :  { %853 = vmatpush3.bf16.msra.mxu0 %v925_v21 }
  0x1d   :  { %854 = vmatprep.subr.bf16.mxu0 %v927_v23 }
  0x1e   :  { %550 = vmatpush1.bf16.msra.mxu1 %v926_v22 }
  0x1f   :  { %551 = vmatprep.subr.bf16.mxu1 %v978_v0 }
  0x20   :  { %855 = vmatpush3.bf16.msra.mxu0 %v928_v25 }
  0x22   :  { %552 = vmatpush1.bf16.msra.mxu1 %v929_v26 }
  0x23   :  { %472 = vmatmul.mubr.bf16.vlgmr.msra.gmra.mrb[0].mxu0 %v930_v28  ;;  %553 = vmatprep.subr.bf16.mxu1 %v978_v0 }
  0x24   :  { %479 = vmatprep.mubr.bf16.mxu0 %v935_v29 }
  0x26   :  { %554 = vmatpush1.bf16.msra.mxu1 %v933_v30 }
  0x27   :  { %555 = vmatprep.subr.bf16.mxu1 %v978_v0 }
  0x2a   :  { %556 = vmatpush1.bf16.msra.mxu1 %v934_v31 }
  0x2b   :  { %480 = vmatmul.mubr.bf16.gmra.mrb[4].mxu0 %v940_v32 }
  0x2c   :  { %487 = vmatprep.mubr.bf16.mxu0 %v941_v33 }
  0x2d   :  { %568 = vmatmul.mubr.bf16.vlgmr.msra.gmra.mrb[0].mxu1 %v937_v34 }
  0x2e   :  { %803 = vmatprep.mubr.msk.bf16.mxu1 %vm414_vm0, %v943_v35 }
  0x33   :  { %488 = vmatmul.mubr.bf16.gmra.mrb[8].mxu0 %v945_v36 }
  0x34   :  { %495 = vmatprep.mubr.bf16.mxu0 %v947_v37 }
  0x35   :  { %576 = vmatmul.mubr.bf16.gmra.mrb[4].mxu1 %v946_v38 }
  0x36   :  { %804 = vmatprep.mubr.msk.bf16.mxu1 %vm414_vm0, %v949_v39 }
  0x3b   :  { %496 = vmatmul.mubr.bf16.gmra.mrb[12].mxu0 %v951_v40 }
  0x3c   :  { %503 = vmatprep.mubr.bf16.mxu0 %v953_v41 }
  0x3d   :  { %584 = vmatmul.mubr.bf16.gmra.mrb[8].mxu1 %v952_v42 }
  0x3e   :  { %805 = vmatprep.mubr.msk.bf16.mxu1 %vm414_vm0, %v955_v43 }
  0x43   :  { %504 = vmatmul.mubr.bf16.gmra.mrb[16].mxu0 %v957_v44 }
  0x44   :  { %511 = vmatprep.mubr.bf16.mxu0 %v959_v45 }
  0x45   :  { %592 = vmatmul.mubr.bf16.gmra.mrb[12].mxu1 %v958_v46 }
  0x46   :  { %806 = vmatprep.mubr.msk.bf16.mxu1 %vm414_vm0, %v961_v47 }
  0x4b   :  { %512 = vmatmul.mubr.bf16.gmra.mrb[20].mxu0 %v963_v48 }
  0x4c   :  { %519 = vmatprep.mubr.bf16.mxu0 %v965_v49 }
  0x4d   :  { %600 = vmatmul.mubr.bf16.gmra.mrb[16].mxu1 %v964_v50 }
  0x4e   :  { %807 = vmatprep.mubr.msk.bf16.mxu1 %vm414_vm0, %v967_v51 }
  0x53   :  { %520 = vmatmul.mubr.bf16.gmra.mrb[24].mxu0 %v969_v53 }
  0x54   :  { %527 = vmatprep.mubr.bf16.mxu0 %v772_v54 }
  0x55   :  { %608 = vmatmul.mubr.bf16.gmra.mrb[20].mxu1 %v970_v55 }
  0x56   :  { %808 = vmatprep.mubr.msk.bf16.mxu1 %vm414_vm0, %v972_v56 }
  0x5b   :  { %528 = vmatmul.mubr.bf16.gmra.mrb[28].mxu0 %v771_v57 }
  0x5d   :  { %616 = vmatmul.mubr.bf16.gmra.mrb[24].mxu1 %v975_v59 }
  0x5e   :  { %809 = vmatprep.mubr.msk.bf16.mxu1 %vm414_vm0, %v774_v60 }
  0x65   :  { %624 = vmatmul.mubr.bf16.gmra.mrb[28].mxu1 %v773_v61 }
  0xf6   :  { %v856_v62 = vpop.f32.mrb[0].mxu0 }
  0xf7   :  { %v857_v63 = vpop.f32.mrb[1].mxu0 }
  0xf8   :  { %v858_v0 = vadd.f32 %v857_v63, %v856_v62  ;;  %v859_v1 = vpop.f32.mrb[2].mxu0 }
  0xf9   :  { %v860_v2 = vpop.f32.mrb[3].mxu0 }
  0xfa   :  { %v861_v3 = vadd.f32 %v860_v2, %v859_v1  ;;  %v474_v5 = vadd.f32 %v858_v0, %v1192_v4 }
  0xfc   :  { %v477_v13 = vadd.f32 %v861_v3, %v1192_v4 }
  0xfe   :  { %v862_v6 = vpop.f32.mrb[4].mxu0 }
  0xff   :  { %v863_v7 = vpop.f32.mrb[5].mxu0 }
 0x100   :  { %v569_v8 = vpop.f32.mrb[0].mxu1  ;;  %v864_v9 = vadd.f32 %v863_v7, %v862_v6  ;;  %v865_v10 = vpop.f32.mrb[6].mxu0 }
 0x101   :  { %v570_v11 = vadd.f32 %v569_v8, %v474_v5  ;;  %v571_v12 = vpop.f32.mrb[1].mxu1  ;;  %v866_v14 = vpop.f32.mrb[7].mxu0 }
 0x102   :  { %v572_v15 = vpop.f32.mrb[2].mxu1  ;;  %v867_v16 = vadd.f32 %v866_v14, %v865_v10  ;;  %v482_v22 = vadd.f32 %v864_v9, %v1192_v4 }
 0x103   :  { %v631_v17 = vmul.f32 0.01, %v570_v11  ;;  %v573_v18 = vadd.f32 %v572_v15, %v477_v13  ;;  %v574_v19 = vpop.f32.mrb[3].mxu1 }
 0x104   :  { %v485_v33 = vadd.f32 %v867_v16, %v1192_v4 }
 0x105   :  { %v646_v20 = vmax.f32 %v570_v11, %v631_v17  ;;  %v632_v21 = vmul.f32 0.01, %v573_v18 }
 0x106   :  { %v868_v23 = vpop.f32.mrb[8].mxu0 }
 0x107   :  { %v825_v24 = vpack.c.bf16 %v646_v20, %v646_v20  ;;  %v647_v25 = vmax.f32 %v573_v18, %v632_v21  ;;  %v869_v26 = vpop.f32.mrb[9].mxu0 }
 0x108   :  { %v577_v27 = vpop.f32.mrb[4].mxu1  ;;  %v870_v28 = vadd.f32 %v869_v26, %v868_v23  ;;  %v871_v29 = vpop.f32.mrb[10].mxu0 }
 0x109   :  { %723 = vst.msk [vmem:[%s1272_s3] sm:$0xf] %vm722_vm1, %v825_v24  ;;  %v826_v30 = vpack.c.bf16 %v647_v25, %v647_v25  ;;  %v578_v31 = vadd.f32 %v577_v27, %v482_v22  ;;  %v579_v32 = vpop.f32.mrb[5].mxu1  ;;  %v872_v34 = vpop.f32.mrb[11].mxu0 }
 0x10a   :  { %v580_v35 = vpop.f32.mrb[6].mxu1  ;;  %v873_v36 = vadd.f32 %v872_v34, %v871_v29  ;;  %v490_v42 = vadd.f32 %v870_v28, %v1192_v4 }
 0x10b   :  { %724 = vst.msk [vmem:[%s1272_s3 + $0x4] sm:$0xf] %vm722_vm1, %v826_v30  ;;  %v633_v37 = vmul.f32 0.01, %v578_v31  ;;  %v581_v38 = vadd.f32 %v580_v35, %v485_v33  ;;  %v582_v39 = vpop.f32.mrb[7].mxu1 }
 0x10c   :  { %v493_v53 = vadd.f32 %v873_v36, %v1192_v4 }
 0x10d   :  { %v648_v40 = vmax.f32 %v578_v31, %v633_v37  ;;  %v634_v41 = vmul.f32 0.01, %v581_v38 }
 0x10e   :  { %v874_v43 = vpop.f32.mrb[12].mxu0 }
 0x10f   :  { %v827_v44 = vpack.c.bf16 %v648_v40, %v648_v40  ;;  %v649_v45 = vmax.f32 %v581_v38, %v634_v41  ;;  %v875_v46 = vpop.f32.mrb[13].mxu0 }
 0x110   :  { %v585_v47 = vpop.f32.mrb[8].mxu1  ;;  %v876_v48 = vadd.f32 %v875_v46, %v874_v43  ;;  %v877_v49 = vpop.f32.mrb[14].mxu0 }
 0x111   :  { %725 = vst.msk [vmem:[%s1272_s3 + $0x8] sm:$0xf] %vm722_vm1, %v827_v44  ;;  %v828_v50 = vpack.c.bf16 %v649_v45, %v649_v45  ;;  %v586_v51 = vadd.f32 %v585_v47, %v490_v42  ;;  %v587_v52 = vpop.f32.mrb[9].mxu1  ;;  %v878_v54 = vpop.f32.mrb[15].mxu0 }
 0x112   :  { %v588_v55 = vpop.f32.mrb[10].mxu1  ;;  %v879_v56 = vadd.f32 %v878_v54, %v877_v49  ;;  %v498_v62 = vadd.f32 %v876_v48, %v1192_v4 }
 0x113   :  { %726 = vst.msk [vmem:[%s1272_s3 + $0xc] sm:$0xf] %vm722_vm1, %v828_v50  ;;  %v635_v57 = vmul.f32 0.01, %v586_v51  ;;  %v589_v58 = vadd.f32 %v588_v55, %v493_v53  ;;  %v590_v59 = vpop.f32.mrb[11].mxu1 }
 0x114   :  { %v501_v10 = vadd.f32 %v879_v56, %v1192_v4 }
 0x115   :  { %v650_v60 = vmax.f32 %v586_v51, %v635_v57  ;;  %v636_v61 = vmul.f32 0.01, %v589_v58 }
 0x116   :  { %v880_v63 = vpop.f32.mrb[16].mxu0 }
 0x117   :  { %v829_v0 = vpack.c.bf16 %v650_v60, %v650_v60  ;;  %v651_v1 = vmax.f32 %v589_v58, %v636_v61  ;;  %v881_v2 = vpop.f32.mrb[17].mxu0 }
 0x118   :  { %v593_v3 = vpop.f32.mrb[12].mxu1  ;;  %v882_v5 = vadd.f32 %v881_v2, %v880_v63  ;;  %v883_v6 = vpop.f32.mrb[18].mxu0 }
 0x119   :  { %727 = vst.msk [vmem:[%s1272_s3 + $0x10] sm:$0xf] %vm722_vm1, %v829_v0  ;;  %v830_v7 = vpack.c.bf16 %v651_v1, %v651_v1  ;;  %v594_v8 = vadd.f32 %v593_v3, %v498_v62  ;;  %v595_v9 = vpop.f32.mrb[13].mxu1  ;;  %v884_v11 = vpop.f32.mrb[19].mxu0 }
 0x11a   :  { %v596_v12 = vpop.f32.mrb[14].mxu1  ;;  %v885_v13 = vadd.f32 %v884_v11, %v883_v6  ;;  %v506_v19 = vadd.f32 %v882_v5, %v1192_v4 }
 0x11b   :  { %728 = vst.msk [vmem:[%s1272_s3 + $0x14] sm:$0xf] %vm722_vm1, %v830_v7  ;;  %v637_v14 = vmul.f32 0.01, %v594_v8  ;;  %v597_v15 = vadd.f32 %v596_v12, %v501_v10  ;;  %v598_v16 = vpop.f32.mrb[15].mxu1 }
 0x11c   :  { %v509_v30 = vadd.f32 %v885_v13, %v1192_v4 }
 0x11d   :  { %v652_v17 = vmax.f32 %v594_v8, %v637_v14  ;;  %v638_v18 = vmul.f32 0.01, %v597_v15 }
 0x11e   :  { %v886_v20 = vpop.f32.mrb[20].mxu0 }
 0x11f   :  { %v831_v21 = vpack.c.bf16 %v652_v17, %v652_v17  ;;  %v653_v22 = vmax.f32 %v597_v15, %v638_v18  ;;  %v887_v23 = vpop.f32.mrb[21].mxu0 }
 0x120   :  { %v601_v24 = vpop.f32.mrb[16].mxu1  ;;  %v888_v25 = vadd.f32 %v887_v23, %v886_v20  ;;  %v889_v26 = vpop.f32.mrb[22].mxu0 }
 0x121   :  { %729 = vst.msk [vmem:[%s1272_s3 + $0x18] sm:$0xf] %vm722_vm1, %v831_v21  ;;  %v832_v27 = vpack.c.bf16 %v653_v22, %v653_v22  ;;  %v602_v28 = vadd.f32 %v601_v24, %v506_v19  ;;  %v603_v29 = vpop.f32.mrb[17].mxu1  ;;  %v890_v31 = vpop.f32.mrb[23].mxu0 }
 0x122   :  { %v604_v32 = vpop.f32.mrb[18].mxu1  ;;  %v891_v33 = vadd.f32 %v890_v31, %v889_v26  ;;  %v514_v39 = vadd.f32 %v888_v25, %v1192_v4 }
 0x123   :  { %730 = vst.msk [vmem:[%s1272_s3 + $0x1c] sm:$0xf] %vm722_vm1, %v832_v27  ;;  %v639_v34 = vmul.f32 0.01, %v602_v28  ;;  %v605_v35 = vadd.f32 %v604_v32, %v509_v30  ;;  %v606_v36 = vpop.f32.mrb[19].mxu1 }
 0x124   :  { %v517_v50 = vadd.f32 %v891_v33, %v1192_v4 }
 0x125   :  { %v654_v37 = vmax.f32 %v602_v28, %v639_v34  ;;  %v640_v38 = vmul.f32 0.01, %v605_v35 }
 0x126   :  { %v892_v40 = vpop.f32.mrb[24].mxu0 }
 0x127   :  { %v833_v41 = vpack.c.bf16 %v654_v37, %v654_v37  ;;  %v655_v42 = vmax.f32 %v605_v35, %v640_v38  ;;  %v893_v43 = vpop.f32.mrb[25].mxu0 }
 0x128   :  { %v609_v44 = vpop.f32.mrb[20].mxu1  ;;  %v894_v45 = vadd.f32 %v893_v43, %v892_v40  ;;  %v895_v46 = vpop.f32.mrb[26].mxu0 }
 0x129   :  { %731 = vst.msk [vmem:[%s1272_s3 + $0x20] sm:$0xf] %vm722_vm1, %v833_v41  ;;  %v834_v47 = vpack.c.bf16 %v655_v42, %v655_v42  ;;  %v610_v48 = vadd.f32 %v609_v44, %v514_v39  ;;  %v611_v49 = vpop.f32.mrb[21].mxu1  ;;  %v896_v51 = vpop.f32.mrb[27].mxu0 }
 0x12a   :  { %v612_v52 = vpop.f32.mrb[22].mxu1  ;;  %v897_v53 = vadd.f32 %v896_v51, %v895_v46  ;;  %v522_v59 = vadd.f32 %v894_v45, %v1192_v4 }
 0x12b   :  { %732 = vst.msk [vmem:[%s1272_s3 + $0x24] sm:$0xf] %vm722_vm1, %v834_v47  ;;  %v641_v54 = vmul.f32 0.01, %v610_v48  ;;  %v613_v55 = vadd.f32 %v612_v52, %v517_v50  ;;  %v614_v56 = vpop.f32.mrb[23].mxu1 }
 0x12c   :  { %v525_v7 = vadd.f32 %v897_v53, %v1192_v4 }
 0x12d   :  { %v656_v57 = vmax.f32 %v610_v48, %v641_v54  ;;  %v642_v58 = vmul.f32 0.01, %v613_v55 }
 0x12e   :  { %v898_v60 = vpop.f32.mrb[28].mxu0 }
 0x12f   :  { %v835_v61 = vpack.c.bf16 %v656_v57, %v656_v57  ;;  %v657_v62 = vmax.f32 %v613_v55, %v642_v58  ;;  %v899_v63 = vpop.f32.mrb[29].mxu0 }
 0x130   :  { %v617_v0 = vpop.f32.mrb[24].mxu1  ;;  %v900_v1 = vadd.f32 %v899_v63, %v898_v60  ;;  %v901_v2 = vpop.f32.mrb[30].mxu0 }
 0x131   :  { %733 = vst.msk [vmem:[%s1272_s3 + $0x28] sm:$0xf] %vm722_vm1, %v835_v61  ;;  %v836_v3 = vpack.c.bf16 %v657_v62, %v657_v62  ;;  %v618_v5 = vadd.f32 %v617_v0, %v522_v59  ;;  %v619_v6 = vpop.f32.mrb[25].mxu1  ;;  %v902_v8 = vpop.f32.mrb[31].mxu0 }
 0x132   :  { %v620_v9 = vpop.f32.mrb[26].mxu1  ;;  %v530_v15 = vadd.f32 %v900_v1, %v1192_v4 }
 0x133   :  { %734 = vst.msk [vmem:[%s1272_s3 + $0x2c] sm:$0xf] %vm722_vm1, %v836_v3  ;;  %v643_v10 = vmul.f32 0.01, %v618_v5  ;;  %v621_v11 = vadd.f32 %v620_v9, %v525_v7  ;;  %v622_v12 = vpop.f32.mrb[27].mxu1 }
 0x135   :  { %v658_v13 = vmax.f32 %v618_v5, %v643_v10  ;;  %v644_v14 = vmul.f32 0.01, %v621_v11 }
 0x137   :  { %v837_v16 = vpack.c.bf16 %v658_v13, %v658_v13  ;;  %v659_v17 = vmax.f32 %v621_v11, %v644_v14 }
 0x138   :  { %v625_v18 = vpop.f32.mrb[28].mxu1 }
 0x139   :  { %735 = vst.msk [vmem:[%s1272_s3 + $0x30] sm:$0xf] %vm722_vm1, %v837_v16  ;;  %v838_v19 = vpack.c.bf16 %v659_v17, %v659_v17  ;;  %v626_v20 = vadd.f32 %v625_v18, %v530_v15  ;;  %v627_v21 = vpop.f32.mrb[29].mxu1 }
 0x13a   :  { %v628_v22 = vpop.f32.mrb[30].mxu1 }
 0x13b   :  { %736 = vst.msk [vmem:[%s1272_s3 + $0x34] sm:$0xf] %vm722_vm1, %v838_v19  ;;  %v645_v23 = vmul.f32 0.01, %v626_v20  ;;  %v629_v24 = vpop.f32.mrb[31].mxu1 }
 0x13d   :  { %v660_v4 = vmax.f32 %v626_v20, %v645_v23 }
 0x13f   :  { %v839_v25 = vpack.c.bf16 %v660_v4, %v660_v4 }
 0x141   :  { %737 = vst.msk [vmem:[%s1272_s3 + $0x38] sm:$0xf] %vm722_vm1, %v839_v25 }

// kernel: pilotnet_forward.10
= control target key start
LH: loop header
LB: loop body
LE: loop exit
PB: predicated region body
PF: predicated region fallthrough
CT: control target
= control target key end

     0   :  { %vm423_vm0 = vcmask 523264   ;;  %vm671_vm1 = vcmask 519168   ;;  %vm678_vm2 = vcmask 517120   ;;  %s1145_s1 = inlined_call_operand.vmem [shape: bf16[576,64], index: 1, kind: input, shape index: {}]   ;;  %s1146_s0 = inlined_call_operand.vmem [shape: bf16[52,576], index: 0, kind: input, shape index: {}]   ;;  %s1147_s2 = inlined_call_operand.vmem [shape: f32[1,64], index: 2, kind: input, shape index: {}]   ;;  %s1148_s3 = inlined_call_operand.vmem [shape: bf16[52,64], index: 3, kind: output, shape index: {}]  }
   0x1   :  { %v871_v0 = vld [vmem:[%s1145_s1 + $0x40] sm:$0xff]   ;;  %v875_v4 = vld [vmem:[%s1145_s1 + $0x48] sm:$0xff]   ;;  %v879_v8 = vld [vmem:[%s1145_s1 + $0x50] sm:$0xff]  }
   0x2   :  { %v872_v1 = vld [vmem:[%s1145_s1 + $0xc0] sm:$0xff]   ;;  %759 = vmatprep.subr.bf16.mxu0 %v871_v0  ;;  %v876_v5 = vld [vmem:[%s1145_s1 + $0xc8] sm:$0xff]   ;;  %v880_v9 = vld [vmem:[%s1145_s1 + $0xd0] sm:$0xff]  }
   0x3   :  { %v873_v2 = vld [vmem:[%s1145_s1] sm:$0xff]   ;;  %799 = vmatprep.subr.bf16.mxu1 %v872_v1  ;;  %v877_v6 = vld [vmem:[%s1145_s1 + $0x8] sm:$0xff]   ;;  %v881_v10 = vld [vmem:[%s1145_s1 + $0x10] sm:$0xff]  }
   0x4   :  { %v874_v3 = vld [vmem:[%s1145_s1 + $0x80] sm:$0xff]   ;;  %760 = vmatpush3.bf16.msra.mxu0 %v873_v2  ;;  %v878_v7 = vld [vmem:[%s1145_s1 + $0x88] sm:$0xff]   ;;  %v882_v11 = vld [vmem:[%s1145_s1 + $0x90] sm:$0xff]  }
   0x5   :  { %800 = vmatpush3.bf16.msra.mxu1 %v874_v3  ;;  %761 = vmatprep.subr.bf16.mxu0 %v875_v4  ;;  %v883_v12 = vld [vmem:[%s1145_s1 + $0x58] sm:$0xff]   ;;  %v887_v16 = vld [vmem:[%s1145_s1 + $0x60] sm:$0xff]   ;;  %v891_v20 = vld [vmem:[%s1145_s1 + $0x68] sm:$0xff]  }
   0x6   :  { %801 = vmatprep.subr.bf16.mxu1 %v876_v5  ;;  %v884_v13 = vld [vmem:[%s1145_s1 + $0xd8] sm:$0xff]   ;;  %v888_v17 = vld [vmem:[%s1145_s1 + $0xe0] sm:$0xff]   ;;  %v892_v21 = vld [vmem:[%s1145_s1 + $0xe8] sm:$0xff]  }
   0x7   :  { %v885_v14 = vld [vmem:[%s1145_s1 + $0x18] sm:$0xff]   ;;  %v889_v18 = vld [vmem:[%s1145_s1 + $0x20] sm:$0xff]   ;;  %v893_v22 = vld [vmem:[%s1145_s1 + $0x28] sm:$0xff]  }
   0x8   :  { %762 = vmatpush3.bf16.msra.mxu0 %v877_v6  ;;  %v886_v15 = vld [vmem:[%s1145_s1 + $0x98] sm:$0xff]   ;;  %v890_v19 = vld [vmem:[%s1145_s1 + $0xa0] sm:$0xff]   ;;  %v894_v23 = vld [vmem:[%s1145_s1 + $0xa8] sm:$0xff]  }
   0x9   :  { %802 = vmatpush3.bf16.msra.mxu1 %v878_v7  ;;  %763 = vmatprep.subr.bf16.mxu0 %v879_v8  ;;  %v895_v24 = vld [vmem:[%s1145_s1 + $0x70] sm:$0xff]   ;;  %v899_v28 = vld [vmem:[%s1145_s1 + $0x78] sm:$0xff]   ;;  %v908_v35 = vld [vmem:[%s1146_s0 + $0xc] ss:$20 sps:$4 sm:$0xff]  }
   0xa   :  { %803 = vmatprep.subr.bf16.mxu1 %v880_v9  ;;  %v896_v25 = vld [vmem:[%s1145_s1 + $0xf0] sm:$0xff]   ;;  %v900_v29 = vld [vmem:[%s1145_s1 + $0xf8] sm:$0xff]   ;;  %v909_v36 = vld [vmem:[%s1145_s1 + $0x100] sm:$0xff]   ;;  %532 = vmatprep.mubr.bf16.mxu1 %v908_v35 }
   0xb   :  { %v897_v26 = vld [vmem:[%s1145_s1 + $0x30] sm:$0xff]   ;;  %v901_v30 = vld [vmem:[%s1145_s1 + $0x38] sm:$0xff]   ;;  %v910_v37 = vld [vmem:[%s1146_s0 + $0x2c] ss:$20 sps:$4 sm:$0xff]  }
   0xc   :  { %764 = vmatpush3.bf16.msra.mxu0 %v881_v10  ;;  %v898_v27 = vld [vmem:[%s1145_s1 + $0xb0] sm:$0xff]   ;;  %v902_v31 = vld [vmem:[%s1145_s1 + $0xb8] sm:$0xff]   ;;  %v916_v39 = vld [vmem:[%s1145_s1 + $0x108] sm:$0xff]  }
   0xd   :  { %804 = vmatpush3.bf16.msra.mxu1 %v882_v11  ;;  %765 = vmatprep.subr.bf16.mxu0 %v883_v12  ;;  %v903_v32 = vld [vmem:[%s1146_s0] ss:$20 sps:$4 sm:$0xff]   ;;  %v905_v33 = vld [vmem:[%s1146_s0 + $0x4] ss:$20 sps:$4 sm:$0xff]   ;;  %v906_v34 = vld [vmem:[%s1146_s0 + $0x8] ss:$20 sps:$4 sm:$0xff]  }
   0xe   :  { %805 = vmatprep.subr.bf16.mxu1 %v884_v13  ;;  %468 = vmatprep.mubr.bf16.mxu0 %v905_v33  ;;  %v912_v38 = vld [vmem:[%s1146_s0 + $0x34] ss:$20 sps:$4 sm:$0xff]   ;;  %v915_v41 = vld [vmem:[%s1146_s0 + $0x30] ss:$20 sps:$4 sm:$0xff]   ;;  %v928_v45 = vld [vmem:[%s1145_s1 + $0x118] sm:$0xff]  }
   0xf   :  { %v914_v40 = vld [vmem:[%s1146_s0 + $0x28] ss:$20 sps:$4 sm:$0xff]   ;;  %v923_v44 = vld [vmem:[%s1145_s1 + $0x110] sm:$0xff]   ;;  %v34_v47 = vld [vmem:[%s1146_s0 + $0x80] sm:$0x33] }
  0x10   :  { %766 = vmatpush3.bf16.msra.mxu0 %v885_v14  ;;  %v917_v42 = vld [vmem:[%s1146_s0 + $0x54] ss:$20 sps:$4 sm:$0xff]   ;;  %v919_v43 = vld [vmem:[%s1146_s0 + $0x5c] ss:$20 sps:$4 sm:$0xff]   ;;  %v922_v49 = vld [vmem:[%s1146_s0 + $0x58] ss:$20 sps:$4 sm:$0xff]   ;;  %v703_v51 = vcombine.high %v34_v47, %v34_v47  ;;  %v702_v53 = vcombine.low %v34_v47, %v34_v47 }
  0x11   :  { %806 = vmatpush3.bf16.msra.mxu1 %v886_v15  ;;  %767 = vmatprep.subr.bf16.mxu0 %v887_v16  ;;  %v33_v46 = vld [vmem:[%s1146_s0 + $0x78] sm:$0x33]  ;;  %v921_v48 = vld [vmem:[%s1146_s0 + $0x50] ss:$20 sps:$4 sm:$0xff]   ;;  %v930_v55 = vld [vmem:[%s1146_s0 + $0x60] ss:$20 sps:$4 sm:$0xff]  }
  0x12   :  { %807 = vmatprep.subr.bf16.mxu1 %v888_v17  ;;  %v701_v50 = vcombine.high %v33_v46, %v33_v46  ;;  %v700_v52 = vcombine.low %v33_v46, %v33_v46  ;;  %v929_v54 = vld [vmem:[%s1146_s0 + $0x10] ss:$20 sps:$4 sm:$0xff]   ;;  %v931_v56 = vld [vmem:[%s1146_s0 + $0x38] ss:$20 sps:$4 sm:$0xff]   ;;  %v684_v60 = vld [vmem:[%s1147_s2] ss:$0 sm:$0xff] }
  0x13   :  { %v932_v57 = vld [vmem:[%s1146_s0 + $0x88] ss:$0 sps:$4 sm:$0x33]  }
  0x14   :  { %768 = vmatpush3.bf16.msra.mxu0 %v889_v18 }
  0x15   :  { %808 = vmatpush3.bf16.msra.mxu1 %v890_v19  ;;  %769 = vmatprep.subr.bf16.mxu0 %v891_v20 }
  0x16   :  { %809 = vmatprep.subr.bf16.mxu1 %v892_v21 }
  0x18   :  { %770 = vmatpush3.bf16.msra.mxu0 %v893_v22 }
  0x19   :  { %810 = vmatpush3.bf16.msra.mxu1 %v894_v23  ;;  %771 = vmatprep.subr.bf16.mxu0 %v895_v24 }
  0x1a   :  { %811 = vmatprep.subr.bf16.mxu1 %v896_v25 }
  0x1c   :  { %772 = vmatpush3.bf16.msra.mxu0 %v897_v26 }
  0x1d   :  { %812 = vmatpush3.bf16.msra.mxu1 %v898_v27  ;;  %773 = vmatprep.subr.bf16.mxu0 %v899_v28 }
  0x1e   :  { %813 = vmatprep.subr.bf16.mxu1 %v900_v29 }
  0x20   :  { %774 = vmatpush3.bf16.msra.mxu0 %v901_v30 }
  0x21   :  { %814 = vmatpush3.bf16.msra.mxu1 %v902_v31  ;;  %847 = vmatprep.subr.bf16.mxu0 %v909_v36 }
  0x22   :  { %863 = vmatprep.subr.bf16.mxu1 %v909_v36 }
  0x23   :  { %469 = vmatmul.mubr.bf16.vlgmr.msra.gmra.mrb[0].mxu0 %v903_v32 }
  0x24   :  { %533 = vmatmul.mubr.bf16.vlgmr.msra.gmra.mrb[0].mxu1 %v906_v34  ;;  %848 = vmatpush3.bf16.msra.mxu0 %v909_v36 }
  0x25   :  { %867 = vmatpush3.bf16.msra.mxu1 %v909_v36  ;;  %476 = vmatprep.mubr.bf16.mxu0 %v910_v37 }
  0x26   :  { %540 = vmatprep.mubr.bf16.mxu1 %v912_v38  ;;  %849 = vmatprep.subr.bf16.mxu0 %v916_v39 }
  0x27   :  { %864 = vmatprep.subr.bf16.mxu1 %v916_v39 }
  0x28   :  { %850 = vmatpush3.bf16.msra.mxu0 %v916_v39 }
  0x29   :  { %868 = vmatpush3.bf16.msra.mxu1 %v916_v39  ;;  %851 = vmatprep.subr.bf16.mxu0 %v923_v44 }
  0x2a   :  { %865 = vmatprep.subr.bf16.mxu1 %v923_v44 }
  0x2b   :  { %477 = vmatmul.mubr.bf16.gmra.mrb[4].mxu0 %v914_v40 }
  0x2c   :  { %541 = vmatmul.mubr.bf16.gmra.mrb[4].mxu1 %v915_v41  ;;  %484 = vmatprep.mubr.bf16.mxu0 %v917_v42 }
  0x2d   :  { %548 = vmatprep.mubr.bf16.mxu1 %v919_v43  ;;  %852 = vmatpush3.bf16.msra.mxu0 %v923_v44 }
  0x2e   :  { %869 = vmatpush3.bf16.msra.mxu1 %v923_v44  ;;  %853 = vmatprep.subr.bf16.mxu0 %v928_v45 }
  0x2f   :  { %866 = vmatprep.subr.bf16.mxu1 %v928_v45 }
  0x31   :  { %854 = vmatpush3.bf16.msra.mxu0 %v928_v45 }
  0x32   :  { %870 = vmatpush3.bf16.msra.mxu1 %v928_v45 }
  0x33   :  { %485 = vmatmul.mubr.bf16.gmra.mrb[8].mxu0 %v921_v48 }
  0x34   :  { %549 = vmatmul.mubr.bf16.gmra.mrb[8].mxu1 %v922_v49  ;;  %492 = vmatprep.mubr.bf16.mxu0 %v701_v50 }
  0x35   :  { %556 = vmatprep.mubr.bf16.mxu1 %v703_v51 }
  0x3b   :  { %493 = vmatmul.mubr.bf16.gmra.mrb[12].mxu0 %v700_v52 }
  0x3c   :  { %557 = vmatmul.mubr.bf16.gmra.mrb[12].mxu1 %v702_v53  ;;  %855 = vmatprep.mubr.msk.bf16.mxu0 %vm423_vm0, %v929_v54 }
  0x3d   :  { %859 = vmatprep.mubr.msk.bf16.mxu1 %vm423_vm0, %v930_v55 }
  0x43   :  { %856 = vmatmul.mubr.msk.bf16.vlgmr.msra.gmra.mrb[16].mxu0 %vm423_vm0, %v931_v56 }
  0x44   :  { %860 = vmatmul.mubr.msk.bf16.vlgmr.msra.gmra.mrb[16].mxu1 %vm423_vm0, %v932_v57 }
  0xf6   :  { %v775_v58 = vpop.f32.mrb[0].mxu0 }
  0xf7   :  { %v815_v59 = vpop.f32.mrb[0].mxu1  ;;  %v776_v61 = vpop.f32.mrb[1].mxu0 }
  0xf8   :  { %v777_v62 = vadd.f32 %v776_v61, %v775_v58  ;;  %v816_v63 = vpop.f32.mrb[1].mxu1  ;;  %v778_v0 = vpop.f32.mrb[2].mxu0 }
  0xf9   :  { %v817_v1 = vadd.f32 %v816_v63, %v815_v59  ;;  %v818_v2 = vpop.f32.mrb[2].mxu1  ;;  %v779_v3 = vpop.f32.mrb[3].mxu0 }
  0xfa   :  { %v471_v4 = vadd.f32 %v777_v62, %v684_v60  ;;  %v780_v5 = vadd.f32 %v779_v3, %v778_v0  ;;  %v819_v6 = vpop.f32.mrb[3].mxu1 }
  0xfb   :  { %v820_v7 = vadd.f32 %v819_v6, %v818_v2 }
  0xfc   :  { %v474_v8 = vadd.f32 %v780_v5, %v684_v60  ;;  %v535_v9 = vadd.f32 %v817_v1, %v471_v4 }
  0xfe   :  { %v781_v10 = vpop.f32.mrb[4].mxu0  ;;  %v538_v11 = vadd.f32 %v820_v7, %v474_v8 }
  0xff   :  { %v821_v12 = vpop.f32.mrb[4].mxu1  ;;  %v782_v13 = vpop.f32.mrb[5].mxu0 }
 0x100   :  { %v783_v14 = vadd.f32 %v782_v13, %v781_v10  ;;  %v822_v15 = vpop.f32.mrb[5].mxu1  ;;  %v784_v16 = vpop.f32.mrb[6].mxu0 }
 0x101   :  { %v823_v17 = vadd.f32 %v822_v15, %v821_v12  ;;  %v824_v18 = vpop.f32.mrb[6].mxu1  ;;  %v785_v19 = vpop.f32.mrb[7].mxu0 }
 0x102   :  { %v479_v20 = vadd.f32 %v783_v14, %v684_v60  ;;  %v786_v21 = vadd.f32 %v785_v19, %v784_v16  ;;  %v825_v22 = vpop.f32.mrb[7].mxu1 }
 0x103   :  { %v826_v23 = vadd.f32 %v825_v22, %v824_v18 }
 0x104   :  { %v482_v24 = vadd.f32 %v786_v21, %v684_v60  ;;  %v543_v25 = vadd.f32 %v823_v17, %v479_v20 }
 0x106   :  { %v787_v26 = vpop.f32.mrb[8].mxu0  ;;  %v546_v27 = vadd.f32 %v826_v23, %v482_v24 }
 0x107   :  { %v827_v28 = vpop.f32.mrb[8].mxu1  ;;  %v788_v29 = vpop.f32.mrb[9].mxu0 }
 0x108   :  { %v789_v30 = vadd.f32 %v788_v29, %v787_v26  ;;  %v828_v31 = vpop.f32.mrb[9].mxu1  ;;  %v790_v32 = vpop.f32.mrb[10].mxu0 }
 0x109   :  { %v829_v33 = vadd.f32 %v828_v31, %v827_v28  ;;  %v830_v34 = vpop.f32.mrb[10].mxu1  ;;  %v791_v35 = vpop.f32.mrb[11].mxu0 }
 0x10a   :  { %v487_v36 = vadd.f32 %v789_v30, %v684_v60  ;;  %v792_v37 = vadd.f32 %v791_v35, %v790_v32  ;;  %v831_v38 = vpop.f32.mrb[11].mxu1 }
 0x10b   :  { %v832_v39 = vadd.f32 %v831_v38, %v830_v34 }
 0x10c   :  { %v490_v40 = vadd.f32 %v792_v37, %v684_v60  ;;  %v551_v41 = vadd.f32 %v829_v33, %v487_v36 }
 0x10e   :  { %v793_v42 = vpop.f32.mrb[12].mxu0  ;;  %v554_v43 = vadd.f32 %v832_v39, %v490_v40 }
 0x10f   :  { %v833_v44 = vpop.f32.mrb[12].mxu1  ;;  %v794_v45 = vpop.f32.mrb[13].mxu0 }
 0x110   :  { %v795_v46 = vadd.f32 %v794_v45, %v793_v42  ;;  %v834_v47 = vpop.f32.mrb[13].mxu1  ;;  %v796_v48 = vpop.f32.mrb[14].mxu0 }
 0x111   :  { %v835_v49 = vadd.f32 %v834_v47, %v833_v44  ;;  %v836_v50 = vpop.f32.mrb[14].mxu1  ;;  %v797_v51 = vpop.f32.mrb[15].mxu0 }
 0x112   :  { %v495_v52 = vadd.f32 %v795_v46, %v684_v60  ;;  %v837_v53 = vpop.f32.mrb[15].mxu1 }
 0x114   :  { %v559_v54 = vadd.f32 %v835_v49, %v495_v52 }
 0x116   :  { %v857_v55 = vpop.f32.mrb[16].mxu0 }
 0x117   :  { %v607_v56 = vadd.f32 %v857_v55, %v543_v25  ;;  %v861_v57 = vpop.f32.mrb[16].mxu1  ;;  %v598_v58 = vpop.f32.mrb[17].mxu0 }
 0x118   :  { %v623_v59 = vadd.f32 %v861_v57, %v559_v54  ;;  %v599_v61 = vadd.f32 %v598_v58, %v535_v9  ;;  %v614_v62 = vpop.f32.mrb[17].mxu1  ;;  %v858_v63 = vpop.f32.mrb[18].mxu0 }
 0x119   :  { %v630_v0 = vmul.f32 0.01, %v607_v56  ;;  %v615_v1 = vadd.f32 %v614_v62, %v551_v41  ;;  %v610_v2 = vadd.f32 %v858_v63, %v546_v27  ;;  %v862_v3 = vpop.f32.mrb[18].mxu1  ;;  %v601_v4 = vpop.f32.mrb[19].mxu0 }
 0x11a   :  { %v634_v5 = vmul.f32 0.01, %v623_v59  ;;  %v628_v6 = vmul.f32 0.01, %v599_v61  ;;  %v602_v7 = vadd.f32 %v601_v4, %v538_v11  ;;  %v617_v60 = vpop.f32.mrb[19].mxu1 }
 0x11b   :  { %v637_v8 = vmax.f32 %v607_v56, %v630_v0  ;;  %v632_v10 = vmul.f32 0.01, %v615_v1  ;;  %v631_v12 = vmul.f32 0.01, %v610_v2  ;;  %v618_v13 = vadd.f32 %v617_v60, %v554_v43 }
 0x11c   :  { %v641_v14 = vmax.f32 %v623_v59, %v634_v5  ;;  %v635_v15 = vmax.f32 %v599_v61, %v628_v6  ;;  %v629_v9 = vmul.f32 0.01, %v602_v7 }
 0x11d   :  { %v754_v16 = vpack.c.bf16 %v637_v8, %v637_v8  ;;  %v639_v17 = vmax.f32 %v615_v1, %v632_v10  ;;  %v638_v18 = vmax.f32 %v610_v2, %v631_v12  ;;  %v633_v19 = vmul.f32 0.01, %v618_v13 }
 0x11e   :  { %v758_v20 = vpack.c.bf16 %v641_v14, %v641_v14  ;;  %v752_v21 = vpack.c.bf16 %v635_v15, %v635_v15  ;;  %v636_v22 = vmax.f32 %v602_v7, %v629_v9 }
 0x11f   :  { %674 = vst.msk [vmem:[%s1148_s3 + $0x8] sm:$0xf] %vm671_vm1, %v754_v16  ;;  %v756_v11 = vpack.c.bf16 %v639_v17, %v639_v17  ;;  %v755_v23 = vpack.c.bf16 %v638_v18, %v638_v18  ;;  %v640_v24 = vmax.f32 %v618_v13, %v633_v19 }
 0x120   :  { %679 = vst.msk [vmem:[%s1148_s3 + $0x18] sm:$0x3] %vm678_vm2, %v758_v20  ;;  %v753_v25 = vpack.c.bf16 %v636_v22, %v636_v22 }
 0x121   :  { %672 = vst.msk [vmem:[%s1148_s3] sm:$0xf] %vm671_vm1, %v752_v21  ;;  %676 = vst.msk [vmem:[%s1148_s3 + $0x10] sm:$0xf] %vm671_vm1, %v756_v11  ;;  %v757_v26 = vpack.c.bf16 %v640_v24, %v640_v24 }
 0x122   :  { %675 = vst.msk [vmem:[%s1148_s3 + $0xc] sm:$0xf] %vm671_vm1, %v755_v23  ;;  %673 = vst.msk [vmem:[%s1148_s3 + $0x4] sm:$0xf] %vm671_vm1, %v753_v25 }
 0x123   :  { %677 = vst.msk [vmem:[%s1148_s3 + $0x14] sm:$0xf] %vm671_vm1, %v757_v26 }

// kernel: pilotnet_forward.11
= control target key start
LH: loop header
LB: loop body
LE: loop exit
PB: predicated region body
PF: predicated region fallthrough
CT: control target
= control target key end

     0   :  { %v2029_v21 = vmov 1966171168   ;;  %v258_v23 = vlaneseq  ;;  %vm2031_vm0 = vmmov 0   ;;  %vm1325_vm1 = vcmask 1041408   ;;  %s2520_s1 = inlined_call_operand.vmem [shape: bf16[1664,100], index: 1, kind: input, shape index: {}]   ;;  %s2521_s0 = inlined_call_operand.vmem [shape: bf16[2,1664], index: 0, kind: input, shape index: {}]   ;;  %s2522_s3 = inlined_call_operand.vmem [shape: bf16[100,50], index: 3, kind: input, shape index: {}]   ;;  %s2523_s2 = inlined_call_operand.vmem [shape: f32[1,100], index: 2, kind: input, shape index: {}]   ;;  %s2524_s5 = inlined_call_operand.vmem [shape: f32[50,10], index: 5, kind: input, shape index: {}]   ;;  %s2525_s7 = inlined_call_operand.vmem [shape: f32[10,1], index: 7, kind: input, shape index: {}]   ;;  %s2526_s4 = inlined_call_operand.vmem [shape: f32[1,50], index: 4, kind: input, shape index: {}]   ;;  %s2527_s8 = inlined_call_operand.<no memory space> [shape: f32[1,1], index: 8, kind: input, shape index: {}]   ;;  %s2528_s6 = inlined_call_operand.vmem [shape: f32[1,10], index: 6, kind: input, shape index: {}]   ;;  %s2529_s9 = inlined_call_operand.vmem [shape: f32[2,1], index: 9, kind: output, shape index: {}]  }
   0x1   :  { %v1916_v0 = vld [vmem:[%s2520_s1 + $0x40] sm:$0xff]   ;;  %v1920_v4 = vld [vmem:[%s2520_s1 + $0x48] sm:$0xff]   ;;  %v1924_v8 = vld [vmem:[%s2520_s1 + $0x50] sm:$0xff]   ;;  %v256_v22 = vunpack.c.l.s4 %v2029_v21  ;;  %vm1321_vm2 = vcmask 818176   ;;  %vm2033_vm3 = vmmov 1   ;;  %vm1385_vm5 = vcmask 408576  }
   0x2   :  { %v1917_v1 = vld [vmem:[%s2520_s1] sm:$0xff]   ;;  %1676 = vmatprep.subr.bf16.mxu0 %v1916_v0  ;;  %v1921_v5 = vld [vmem:[%s2520_s1 + $0x8] sm:$0xff]   ;;  %v1925_v9 = vld [vmem:[%s2520_s1 + $0x10] sm:$0xff]   ;;  %v259_v29 = vshrl.u32 %v258_v23, 7  ;;  %vm1473_vm6 = vcmask 80896   ;;  %vm1550_vm7 = vcmask 1024  }
   0x3   :  { %v1918_v2 = vld [vmem:[%s2520_s1 + $0xc0] sm:$0xff]   ;;  %1677 = vmatpush3.bf16.msra.mxu0 %v1917_v1  ;;  %v1922_v6 = vld [vmem:[%s2520_s1 + $0xc8] sm:$0xff]   ;;  %v1926_v10 = vld [vmem:[%s2520_s1 + $0xd0] sm:$0xff]   ;;  %v257_v28 = vunpack.c.0.s8 %v256_v22 }
   0x4   :  { %v1919_v3 = vld [vmem:[%s2520_s1 + $0x80] sm:$0xff]   ;;  %1698 = vmatprep.subr.bf16.mxu1 %v1918_v2  ;;  %1678 = vmatprep.subr.bf16.mxu0 %v1920_v4  ;;  %v1923_v7 = vld [vmem:[%s2520_s1 + $0x88] sm:$0xff]   ;;  %v1927_v11 = vld [vmem:[%s2520_s1 + $0x90] sm:$0xff]  }
   0x5   :  { %1699 = vmatpush3.bf16.msra.mxu1 %v1919_v3  ;;  %v1928_v12 = vld [vmem:[%s2520_s1 + $0x58] sm:$0xff]   ;;  %v1932_v16 = vld [vmem:[%s2520_s1 + $0x60] sm:$0xff]   ;;  %v1936_v20 = vld [vmem:[%s2520_s1 + $0x68] sm:$0xff]   ;;  %v2171_v34 = vsub.s32 %v257_v28, %v259_v29 }
   0x6   :  { %1700 = vmatprep.subr.bf16.mxu1 %v1922_v6  ;;  %v1929_v13 = vld [vmem:[%s2520_s1 + $0x18] sm:$0xff]   ;;  %v1933_v17 = vld [vmem:[%s2520_s1 + $0x20] sm:$0xff]   ;;  %v1937_v24 = vld [vmem:[%s2520_s1 + $0x28] sm:$0xff]  }
   0x7   :  { %1679 = vmatpush3.bf16.msra.mxu0 %v1921_v5  ;;  %v1930_v14 = vld [vmem:[%s2520_s1 + $0xd8] sm:$0xff]   ;;  %v1934_v18 = vld [vmem:[%s2520_s1 + $0xe0] sm:$0xff]   ;;  %v1938_v25 = vld [vmem:[%s2520_s1 + $0xe8] sm:$0xff]  }
   0x8   :  { %1680 = vmatprep.subr.bf16.mxu0 %v1924_v8  ;;  %v1931_v15 = vld [vmem:[%s2520_s1 + $0x98] sm:$0xff]   ;;  %v1935_v19 = vld [vmem:[%s2520_s1 + $0xa0] sm:$0xff]   ;;  %v1939_v26 = vld [vmem:[%s2520_s1 + $0xa8] sm:$0xff]  }
   0x9   :  { %1701 = vmatpush3.bf16.msra.mxu1 %v1923_v7  ;;  %v1940_v27 = vld [vmem:[%s2520_s1 + $0x70] sm:$0xff]   ;;  %v1944_v33 = vld [vmem:[%s2520_s1 + $0x78] sm:$0xff]   ;;  %v35_v37 = vld [vmem:[%s2521_s0] sm:$0xff] }
   0xa   :  { %1702 = vmatprep.subr.bf16.mxu1 %v1926_v10  ;;  %v1941_v30 = vld [vmem:[%s2520_s1 + $0x30] sm:$0xff]   ;;  %v1945_v35 = vld [vmem:[%s2520_s1 + $0x38] sm:$0xff]   ;;  %v254_v38 = vcombine.high %v35_v37, %v35_v37  ;;  %v261_v39 = vrot.slane %v35_v37, %v2171_v34  ;;  %v1950_v41 = vld [vmem:[%s2520_s1 + $0x140] sm:$0xff]  }
   0xb   :  { %1681 = vmatpush3.bf16.msra.mxu0 %v1925_v9  ;;  %v1942_v31 = vld [vmem:[%s2520_s1 + $0xf0] sm:$0xff]   ;;  %v1946_v36 = vld [vmem:[%s2520_s1 + $0xf8] sm:$0xff]   ;;  %v1952_v45 = vld [vmem:[%s2520_s1 + $0x1c0] sm:$0xff]  }
   0xc   :  { %1682 = vmatprep.subr.bf16.mxu0 %v1928_v12  ;;  %v1943_v32 = vld [vmem:[%s2520_s1 + $0xb0] sm:$0xff]   ;;  %v1949_v40 = vld [vmem:[%s2520_s1 + $0xb8] sm:$0xff]   ;;  %v269_v42 = vcombine.high %v261_v39, %v261_v39  ;;  %v277_v43 = vrot.slane %v261_v39, %v2171_v34  ;;  %v2191_v44 = vrot.slane %v254_v38, %v2171_v34  ;;  %v1951_v47 = vld [vmem:[%s2520_s1 + $0x100] sm:$0xff]  }
   0xd   :  { %1703 = vmatpush3.bf16.msra.mxu1 %v1927_v11  ;;  %v1954_v50 = vld [vmem:[%s2520_s1 + $0x148] sm:$0xff]   ;;  %v1953_v52 = vld [vmem:[%s2520_s1 + $0x180] sm:$0xff]   ;;  %v1958_v57 = vld [vmem:[%s2520_s1 + $0x150] sm:$0xff]  }
   0xe   :  { %1704 = vmatprep.subr.bf16.mxu1 %v1930_v14  ;;  %v291_v46 = vrot.slane %v269_v42, %v2171_v34  ;;  %v270_v48 = vcombine.high %v2191_v44, %v2191_v44  ;;  %v299_v49 = vcombine.high %v277_v43, %v277_v43  ;;  %v1956_v54 = vld [vmem:[%s2520_s1 + $0x1c8] sm:$0xff]   ;;  %v1960_v59 = vld [vmem:[%s2520_s1 + $0x1d0] sm:$0xff]   ;;  %v1962_v61 = vld [vmem:[%s2520_s1 + $0x158] sm:$0xff]  }
   0xf   :  { %1683 = vmatpush3.bf16.msra.mxu0 %v1929_v13  ;;  %v1955_v55 = vld [vmem:[%s2520_s1 + $0x108] sm:$0xff]   ;;  %v1959_v60 = vld [vmem:[%s2520_s1 + $0x110] sm:$0xff]   ;;  %v1964_v63 = vld [vmem:[%s2520_s1 + $0x1d8] sm:$0xff]  }
  0x10   :  { %1684 = vmatprep.subr.bf16.mxu0 %v1932_v16  ;;  %1011 = vmatprep.mubr.bf16.mxu0 %v291_v46  ;;  %v301_v51 = vcombine.high %v291_v46, %v291_v46  ;;  %v298_v53 = vrot.slane %v270_v48, %v2171_v34  ;;  %v1957_v58 = vld [vmem:[%s2520_s1 + $0x188] sm:$0xff]   ;;  %v1961_v62 = vld [vmem:[%s2520_s1 + $0x190] sm:$0xff]   ;;  %v1963_v0 = vld [vmem:[%s2520_s1 + $0x118] sm:$0xff]  }
  0x11   :  { %1705 = vmatpush3.bf16.msra.mxu1 %v1931_v15  ;;  %v1966_v1 = vld [vmem:[%s2520_s1 + $0x160] sm:$0xff]   ;;  %v1965_v2 = vld [vmem:[%s2520_s1 + $0x198] sm:$0xff]   ;;  %v2254_v5 = vld [vmem:[%s2521_s0 + $0x8] sm:$0x1f] }
  0x12   :  { %1706 = vmatprep.subr.bf16.mxu1 %v1934_v18  ;;  %1051 = vmatprep.mubr.bf16.mxu1 %v301_v51  ;;  %v302_v56 = vcombine.high %v298_v53, %v298_v53  ;;  %v1968_v3 = vld [vmem:[%s2520_s1 + $0x1e0] sm:$0xff]   ;;  %v1970_v6 = vld [vmem:[%s2520_s1 + $0x168] sm:$0xff]   ;;  %v1974_v10 = vld [vmem:[%s2520_s1 + $0x170] sm:$0xff]   ;;  %v2276_v12 = vrot.slane %v2254_v5, %v2171_v34 }
  0x13   :  { %1685 = vmatpush3.bf16.msra.mxu0 %v1933_v17  ;;  %v1967_v4 = vld [vmem:[%s2520_s1 + $0x120] sm:$0xff]   ;;  %v1972_v8 = vld [vmem:[%s2520_s1 + $0x1e8] sm:$0xff]   ;;  %v1976_v13 = vld [vmem:[%s2520_s1 + $0x1f0] sm:$0xff]  }
  0x14   :  { %1686 = vmatprep.subr.bf16.mxu0 %v1936_v20  ;;  %v1969_v7 = vld [vmem:[%s2520_s1 + $0x1a0] sm:$0xff]   ;;  %v1971_v9 = vld [vmem:[%s2520_s1 + $0x128] sm:$0xff]   ;;  %v1975_v14 = vld [vmem:[%s2520_s1 + $0x130] sm:$0xff]   ;;  %v318_v17 = vcombine.high %v2276_v12, %v2276_v12  ;;  %v284_v20 = vrot.slane %v2191_v44, %v2171_v34 }
  0x15   :  { %1707 = vmatpush3.bf16.msra.mxu1 %v1935_v19  ;;  %v1973_v11 = vld [vmem:[%s2520_s1 + $0x1a8] sm:$0xff]   ;;  %v1978_v15 = vld [vmem:[%s2520_s1 + $0x178] sm:$0xff]   ;;  %v1977_v16 = vld [vmem:[%s2520_s1 + $0x1b0] sm:$0xff]  }
  0x16   :  { %1708 = vmatprep.subr.bf16.mxu1 %v1938_v25  ;;  %v1980_v18 = vld [vmem:[%s2520_s1 + $0x1f8] sm:$0xff]   ;;  %v1982_v21 = vld [vmem:[%s2520_s1 + $0x240] sm:$0xff]   ;;  %v339_v23 = vrot.slane %v318_v17, %v2171_v34  ;;  %v1993_v38 = vld [vmem:[%s2520_s1 + $0x290] sm:$0xff]  }
  0x17   :  { %1687 = vmatpush3.bf16.msra.mxu0 %v1937_v24  ;;  %v1979_v19 = vld [vmem:[%s2520_s1 + $0x138] sm:$0xff]   ;;  %v1984_v24 = vld [vmem:[%s2520_s1 + $0x2c0] sm:$0xff]   ;;  %v2003_v48 = vld [vmem:[%s2520_s1 + $0x228] sm:$0xff]  }
  0x18   :  { %1688 = vmatprep.subr.bf16.mxu0 %v1940_v27  ;;  %v1981_v22 = vld [vmem:[%s2520_s1 + $0x1b8] sm:$0xff]   ;;  %v1983_v25 = vld [vmem:[%s2520_s1 + $0x200] sm:$0xff]   ;;  %v1986_v27 = vld [vmem:[%s2520_s1 + $0x248] sm:$0xff]   ;;  %v341_v29 = vcombine.high %v339_v23, %v339_v23 }
  0x19   :  { %1709 = vmatpush3.bf16.msra.mxu1 %v1939_v26  ;;  %v300_v26 = vcombine.high %v284_v20, %v284_v20  ;;  %v1985_v28 = vld [vmem:[%s2520_s1 + $0x280] sm:$0xff]   ;;  %v1994_v37 = vld [vmem:[%s2520_s1 + $0x258] sm:$0xff]   ;;  %v2008_v51 = vld [vmem:[%s2520_s1 + $0x2f0] sm:$0xff]  }
  0x1a   :  { %1710 = vmatprep.subr.bf16.mxu1 %v1942_v31  ;;  %v1987_v31 = vld [vmem:[%s2520_s1 + $0x208] sm:$0xff]   ;;  %v1996_v39 = vld [vmem:[%s2520_s1 + $0x2d8] sm:$0xff]   ;;  %v1999_v44 = vld [vmem:[%s2520_s1 + $0x220] sm:$0xff]  }
  0x1b   :  { %1689 = vmatpush3.bf16.msra.mxu0 %v1941_v30  ;;  %v1988_v30 = vld [vmem:[%s2520_s1 + $0x2c8] sm:$0xff]   ;;  %v1997_v42 = vld [vmem:[%s2520_s1 + $0x298] sm:$0xff]   ;;  %v2001_v46 = vld [vmem:[%s2520_s1 + $0x2a0] sm:$0xff]  }
  0x1c   :  { %1690 = vmatprep.subr.bf16.mxu0 %v1944_v33  ;;  %v1989_v33 = vld [vmem:[%s2520_s1 + $0x288] sm:$0xff]   ;;  %v1556_v17 = vld [vmem:[%s2523_s2] ss:$0 sm:$0xff]  ;;  %vm1909_vm4 = vmpackc.low %vm1325_vm1, %vm2033_vm3 }
  0x1d   :  { %1711 = vmatpush3.bf16.msra.mxu1 %v1943_v32  ;;  %v1990_v32 = vld [vmem:[%s2520_s1 + $0x250] sm:$0xff]  }
  0x1e   :  { %1712 = vmatprep.subr.bf16.mxu1 %v1946_v36  ;;  %v1991_v36 = vld [vmem:[%s2520_s1 + $0x210] sm:$0xff]  }
  0x1f   :  { %1691 = vmatpush3.bf16.msra.mxu0 %v1945_v35  ;;  %v1992_v35 = vld [vmem:[%s2520_s1 + $0x2d0] sm:$0xff]  }
  0x20   :  { %1720 = vmatprep.subr.bf16.mxu0 %v1950_v41  ;;  %v1998_v41 = vld [vmem:[%s2520_s1 + $0x260] sm:$0xff]  }
  0x21   :  { %1713 = vmatpush3.bf16.msra.mxu1 %v1949_v40  ;;  %v1995_v40 = vld [vmem:[%s2520_s1 + $0x218] sm:$0xff]  }
  0x22   :  { %1742 = vmatprep.subr.bf16.mxu1 %v1952_v45  ;;  %1012 = vmatmul.mubr.bf16.vlgmr.msra.gmra.mrb[0].mxu0 %v277_v43  ;;  %v2000_v43 = vld [vmem:[%s2520_s1 + $0x2e0] sm:$0xff]   ;;  %v2002_v45 = vld [vmem:[%s2520_s1 + $0x268] sm:$0xff]  }
  0x23   :  { %1721 = vmatpush3.bf16.msra.mxu0 %v1951_v47  ;;  %1091 = vmatprep.mubr.bf16.mxu0 %v298_v53  ;;  %v2004_v47 = vld [vmem:[%s2520_s1 + $0x2e8] sm:$0xff]   ;;  %v2010_v53 = vld [vmem:[%s2520_s1 + $0x278] sm:$0xff]  }
  0x24   :  { %1052 = vmatmul.mubr.bf16.vlgmr.msra.gmra.mrb[0].mxu1 %v299_v49  ;;  %1722 = vmatprep.subr.bf16.mxu0 %v1954_v50  ;;  %v2006_v49 = vld [vmem:[%s2520_s1 + $0x270] sm:$0xff]   ;;  %v2005_v50 = vld [vmem:[%s2520_s1 + $0x2a8] sm:$0xff]  }
  0x25   :  { %1743 = vmatpush3.bf16.msra.mxu1 %v1953_v52  ;;  %1131 = vmatprep.mubr.bf16.mxu1 %v302_v56  ;;  %v2007_v52 = vld [vmem:[%s2520_s1 + $0x230] sm:$0xff]   ;;  %v2011_v56 = vld [vmem:[%s2520_s1 + $0x238] sm:$0xff]  }
  0x26   :  { %1744 = vmatprep.subr.bf16.mxu1 %v1956_v54  ;;  %v2009_v54 = vld [vmem:[%s2520_s1 + $0x2b0] sm:$0xff]  }
  0x27   :  { %1723 = vmatpush3.bf16.msra.mxu0 %v1955_v55  ;;  %v2012_v55 = vld [vmem:[%s2520_s1 + $0x2f8] sm:$0xff]  }
  0x28   :  { %1724 = vmatprep.subr.bf16.mxu0 %v1958_v57  ;;  %v325_v57 = vrot.slane %v2276_v12, %v2171_v34  ;;  %v2027_v12 = vld [vmem:[%s2522_s3 + $0x28] sm:$0xff]  }
  0x29   :  { %1745 = vmatpush3.bf16.msra.mxu1 %v1957_v58  ;;  %v2013_v58 = vld [vmem:[%s2520_s1 + $0x2b8] sm:$0xff]  }
  0x2a   :  { %1746 = vmatprep.subr.bf16.mxu1 %v1960_v59  ;;  %v2014_v59 = vld [vmem:[%s2520_s1 + $0x300] sm:$0xff]  }
  0x2b   :  { %1725 = vmatpush3.bf16.msra.mxu0 %v1959_v60  ;;  %v2030_v60 = vmov 0.0  }
  0x2c   :  { %1726 = vmatprep.subr.bf16.mxu0 %v1962_v61  ;;  %v340_v61 = vcombine.high %v325_v57, %v325_v57 }
  0x2d   :  { %1747 = vmatpush3.bf16.msra.mxu1 %v1961_v62  ;;  %v2015_v62 = vld [vmem:[%s2520_s1 + $0x308] sm:$0xff]  }
  0x2e   :  { %1748 = vmatprep.subr.bf16.mxu1 %v1964_v63  ;;  %v2016_v63 = vld [vmem:[%s2520_s1 + $0x310] sm:$0xff]  }
  0x2f   :  { %1727 = vmatpush3.bf16.msra.mxu0 %v1963_v0  ;;  %v2017_v0 = vld [vmem:[%s2520_s1 + $0x318] sm:$0xff]  }
  0x30   :  { %1728 = vmatprep.subr.bf16.mxu0 %v1966_v1  ;;  %v2018_v1 = vld [vmem:[%s2520_s1 + $0x320] sm:$0xff]  }
  0x31   :  { %1749 = vmatpush3.bf16.msra.mxu1 %v1965_v2  ;;  %v2019_v2 = vld [vmem:[%s2520_s1 + $0x328] sm:$0xff]  }
  0x32   :  { %1750 = vmatprep.subr.bf16.mxu1 %v1968_v3  ;;  %v303_v3 = vcombine.high %v2254_v5, %v2254_v5  ;;  %v2022_v5 = vld [vmem:[%s2522_s3] sm:$0xff]  }
  0x33   :  { %1729 = vmatpush3.bf16.msra.mxu0 %v1967_v4  ;;  %v2020_v4 = vld [vmem:[%s2520_s1 + $0x330] sm:$0xff]  }
  0x34   :  { %1730 = vmatprep.subr.bf16.mxu0 %v1970_v6  ;;  %v317_v6 = vrot.slane %v303_v3, %v2171_v34  ;;  %v1374_v3 = vld [vmem:[%s2524_s5 + $0x18] sm:$0xff] }
  0x35   :  { %1751 = vmatpush3.bf16.msra.mxu1 %v1969_v7  ;;  %v2021_v7 = vld [vmem:[%s2520_s1 + $0x338] sm:$0xff]  }
  0x36   :  { %1752 = vmatprep.subr.bf16.mxu1 %v1972_v8  ;;  %v332_v8 = vrot.slane %v317_v6, %v2171_v34  ;;  %v2024_v34 = vld [vmem:[%s2522_s3 + $0x10] sm:$0xff]   ;;  %v1375_v6 = vld [vmem:[%s2524_s5 + $0x20] sm:$0xff] }
  0x37   :  { %1731 = vmatpush3.bf16.msra.mxu0 %v1971_v9  ;;  %v2023_v9 = vld [vmem:[%s2522_s3 + $0x8] sm:$0xff]  }
  0x38   :  { %1732 = vmatprep.subr.bf16.mxu0 %v1974_v10  ;;  %v2025_v10 = vld [vmem:[%s2522_s3 + $0x18] sm:$0xff]  }
  0x39   :  { %1753 = vmatpush3.bf16.msra.mxu1 %v1973_v11  ;;  %v2026_v11 = vld [vmem:[%s2522_s3 + $0x20] sm:$0xff]  }
  0x3a   :  { %1754 = vmatprep.subr.bf16.mxu1 %v1976_v13  ;;  %v2028_v13 = vld [vmem:[%s2522_s3 + $0x30] ss:$0 sps:$4 sm:$0x33]  }
  0x3b   :  { %1733 = vmatpush3.bf16.msra.mxu0 %v1975_v14  ;;  %v1327_v14 = vsel %vm1325_vm1, %v2028_v13, 0 }
  0x3c   :  { %1734 = vmatprep.subr.bf16.mxu0 %v1978_v15  ;;  %v2032_v15 = vmov 0.0|0.0  }
  0x3d   :  { %1755 = vmatpush3.bf16.msra.mxu1 %v1977_v16 }
  0x3e   :  { %1756 = vmatprep.subr.bf16.mxu1 %v1980_v18 }
  0x3f   :  { %1735 = vmatpush3.bf16.msra.mxu0 %v1979_v19 }
  0x40   :  { %1764 = vmatprep.subr.bf16.mxu0 %v1982_v21 }
  0x41   :  { %1757 = vmatpush3.bf16.msra.mxu1 %v1981_v22 }
  0x42   :  { %1092 = vmatmul.mubr.bf16.vlgmr.msra.gmra.mrb[4].mxu0 %v284_v20  ;;  %1786 = vmatprep.subr.bf16.mxu1 %v1984_v24 }
  0x43   :  { %1765 = vmatpush3.bf16.msra.mxu0 %v1983_v25  ;;  %1171 = vmatprep.mubr.bf16.mxu0 %v339_v23 }
  0x44   :  { %1132 = vmatmul.mubr.bf16.vlgmr.msra.gmra.mrb[4].mxu1 %v300_v26  ;;  %1766 = vmatprep.subr.bf16.mxu0 %v1986_v27 }
  0x45   :  { %1787 = vmatpush3.bf16.msra.mxu1 %v1985_v28  ;;  %1211 = vmatprep.mubr.bf16.mxu1 %v341_v29 }
  0x46   :  { %1788 = vmatprep.subr.bf16.mxu1 %v1988_v30 }
  0x47   :  { %1767 = vmatpush3.bf16.msra.mxu0 %v1987_v31 }
  0x48   :  { %1768 = vmatprep.subr.bf16.mxu0 %v1990_v32 }
  0x49   :  { %1789 = vmatpush3.bf16.msra.mxu1 %v1989_v33 }
  0x4a   :  { %1790 = vmatprep.subr.bf16.mxu1 %v1992_v35 }
  0x4b   :  { %1769 = vmatpush3.bf16.msra.mxu0 %v1991_v36 }
  0x4c   :  { %1770 = vmatprep.subr.bf16.mxu0 %v1994_v37 }
  0x4d   :  { %1791 = vmatpush3.bf16.msra.mxu1 %v1993_v38 }
  0x4e   :  { %1792 = vmatprep.subr.bf16.mxu1 %v1996_v39 }
  0x4f   :  { %1771 = vmatpush3.bf16.msra.mxu0 %v1995_v40 }
  0x50   :  { %1772 = vmatprep.subr.bf16.mxu0 %v1998_v41 }
  0x51   :  { %1793 = vmatpush3.bf16.msra.mxu1 %v1997_v42 }
  0x52   :  { %1794 = vmatprep.subr.bf16.mxu1 %v2000_v43 }
  0x53   :  { %1773 = vmatpush3.bf16.msra.mxu0 %v1999_v44 }
  0x54   :  { %1774 = vmatprep.subr.bf16.mxu0 %v2002_v45 }
  0x55   :  { %1795 = vmatpush3.bf16.msra.mxu1 %v2001_v46 }
  0x56   :  { %1796 = vmatprep.subr.bf16.mxu1 %v2004_v47 }
  0x57   :  { %1775 = vmatpush3.bf16.msra.mxu0 %v2003_v48 }
  0x58   :  { %1776 = vmatprep.subr.bf16.mxu0 %v2006_v49 }
  0x59   :  { %1797 = vmatpush3.bf16.msra.mxu1 %v2005_v50 }
  0x5a   :  { %1798 = vmatprep.subr.bf16.mxu1 %v2008_v51 }
  0x5b   :  { %1777 = vmatpush3.bf16.msra.mxu0 %v2007_v52 }
  0x5c   :  { %1778 = vmatprep.subr.bf16.mxu0 %v2010_v53 }
  0x5d   :  { %1799 = vmatpush3.bf16.msra.mxu1 %v2009_v54 }
  0x5e   :  { %1800 = vmatprep.subr.bf16.mxu1 %v2012_v55 }
  0x5f   :  { %1779 = vmatpush3.bf16.msra.mxu0 %v2011_v56 }
  0x60   :  { %1836 = vmatprep.subr.bf16.mxu0 %v2030_v60 }
  0x61   :  { %1801 = vmatpush3.bf16.msra.mxu1 %v2013_v58 }
  0x62   :  { %1172 = vmatmul.mubr.bf16.vlgmr.msra.gmra.mrb[8].mxu0 %v325_v57  ;;  %1856 = vmatprep.subr.bf16.mxu1 %v2030_v60 }
  0x63   :  { %1837 = vmatpush3.bf16.msra.mxu0 %v2014_v59  ;;  %1852 = vmatprep.mubr.msk.bf16.mxu0 %vm2031_vm0, %v2030_v60 }
  0x64   :  { %1212 = vmatmul.mubr.bf16.vlgmr.msra.gmra.mrb[8].mxu1 %v340_v61  ;;  %1838 = vmatprep.subr.bf16.mxu0 %v2030_v60  ;;  %v1371_v61 = vld [vmem:[%s2524_s5] sm:$0xff] }
  0x65   :  { %1870 = vmatprep.mubr.msk.bf16.mxu1 %vm2031_vm0, %v2030_v60  ;;  %1857 = vmatpush3.bf16.msra.mxu1 %v2022_v5  ;;  %v1377_v5 = vld [vmem:[%s2524_s5 + $0x30] sm:$0x3] }
  0x66   :  { %1858 = vmatprep.subr.bf16.mxu1 %v2030_v60 }
  0x67   :  { %1839 = vmatpush3.bf16.msra.mxu0 %v2015_v62  ;;  %v1372_v62 = vld [vmem:[%s2524_s5 + $0x8] sm:$0xff] }
  0x68   :  { %1840 = vmatprep.subr.bf16.mxu0 %v2030_v60 }
  0x69   :  { %1859 = vmatpush3.bf16.msra.mxu1 %v2023_v9  ;;  %v1464_v9 = vld [vmem:[%s2525_s7] sm:$0xff] }
  0x6a   :  { %1860 = vmatprep.subr.bf16.mxu1 %v2030_v60 }
  0x6b   :  { %1841 = vmatpush3.bf16.msra.mxu0 %v2016_v63 }
  0x6c   :  { %1842 = vmatprep.subr.bf16.mxu0 %v2030_v60 }
  0x6d   :  { %1861 = vmatpush3.bf16.msra.mxu1 %v2024_v34  ;;  %v1465_v34 = vld [vmem:[%s2525_s7 + $0x8] sm:$0x3] }
  0x6e   :  { %1862 = vmatprep.subr.bf16.mxu1 %v2030_v60 }
  0x6f   :  { %1843 = vmatpush3.bf16.msra.mxu0 %v2017_v0  ;;  %v1899_v0 = vpack.c.bf16 %v1372_v62, %v1371_v61 }
  0x70   :  { %1844 = vmatprep.subr.bf16.mxu0 %v2030_v60 }
  0x71   :  { %1863 = vmatpush3.bf16.msra.mxu1 %v2025_v10  ;;  %v1908_v10 = vpack.c.bf16 %v1465_v34, %v1464_v9 }
  0x72   :  { %1864 = vmatprep.subr.bf16.mxu1 %v2030_v60 }
  0x73   :  { %1845 = vmatpush3.bf16.msra.mxu0 %v2018_v1 }
  0x74   :  { %1846 = vmatprep.subr.bf16.mxu0 %v2030_v60 }
  0x75   :  { %1865 = vmatpush3.bf16.msra.mxu1 %v2026_v11 }
  0x76   :  { %1866 = vmatprep.subr.bf16.mxu1 %v2030_v60 }
  0x77   :  { %1847 = vmatpush3.bf16.msra.mxu0 %v2019_v2  ;;  %v1373_v2 = vld [vmem:[%s2524_s5 + $0x10] sm:$0xff] }
  0x78   :  { %1848 = vmatprep.subr.bf16.mxu0 %v2030_v60 }
  0x79   :  { %1867 = vmatpush3.bf16.msra.mxu1 %v2027_v12 }
  0x7a   :  { %1868 = vmatprep.subr.bf16.mxu1 %v2030_v60 }
  0x7b   :  { %1849 = vmatpush3.bf16.msra.mxu0 %v2020_v4  ;;  %v1902_v4 = vpack.c.bf16 %v1374_v3, %v1373_v2 }
  0x7c   :  { %1850 = vmatprep.subr.bf16.mxu0 %v2030_v60 }
  0x7d   :  { %1869 = vmatpush3.bf16.msra.mxu1 %v1327_v14 }
  0x7e   :  { %1898 = vmatprep.subr.bf16.mxu1 %v2032_v15 }
  0x7f   :  { %1851 = vmatpush3.bf16.msra.mxu0 %v2021_v7  ;;  %v1376_v7 = vld [vmem:[%s2524_s5 + $0x28] sm:$0xff] }
  0x80   :  { %1907 = vmatprep.subr.bf16.mxu0 %v2032_v15 }
  0x82   :  { %1853 = vmatmul.mubr.bf16.vlgmr.msra.gmra.mrb[12].mxu0 %v332_v8  ;;  %v1905_v8 = vpack.c.bf16 %v1376_v7, %v1375_v6 }
  0x83   :  { %1895 = vmatprep.mubr.msk.f32.mxu0 %vm2031_vm0, %v2030_v60  ;;  %1910 = vmatpush3.bf16.msk.msra.mxu0 %vm1909_vm4, %v1908_v10 }
  0xf5   :  { %v1692_v16 = vpop.f32.mrb[0].mxu0 }
  0xf6   :  { %v1693_v18 = vpop.f32.mrb[1].mxu0 }
  0xf7   :  { %v1694_v19 = vadd.f32 %v1693_v18, %v1692_v16  ;;  %v1695_v20 = vpop.f32.mrb[2].mxu0  ;;  %v1714_v21 = vpop.f32.mrb[0].mxu1  ;;  %v14_v18 = vstv %s2527_s8 }
  0xf8   :  { %v1696_v22 = vpop.f32.mrb[3].mxu0  ;;  %v1715_v23 = vpop.f32.mrb[1].mxu1  ;;  %15 = vst [vmem:[#allocation2] sm:$0x1] %v14_v18 }
  0xf9   :  { %v1014_v24 = vadd.f32 %v1694_v19, %v1556_v17  ;;  %v1716_v25 = vadd.f32 %v1715_v23, %v1714_v21  ;;  %v1717_v26 = vpop.f32.mrb[2].mxu1  ;;  %v1670_v19 = vld [vmem:[%s2528_s6] ss:$0 sm:$0xff] }
  0xfa   :  { %v1718_v27 = vpop.f32.mrb[3].mxu1 }
  0xfb   :  { %v1054_v28 = vadd.f32 %v1716_v25, %v1014_v24 }
  0xff   :  { %v1673_v25 = vld [vmem:[#allocation2] ss:$0 sm:$0xff] }
 0x115   :  { %v1736_v29 = vpop.f32.mrb[4].mxu0 }
 0x116   :  { %v1737_v30 = vpop.f32.mrb[5].mxu0 }
 0x117   :  { %v1738_v31 = vadd.f32 %v1737_v30, %v1736_v29  ;;  %v1739_v32 = vpop.f32.mrb[6].mxu0  ;;  %v1758_v33 = vpop.f32.mrb[4].mxu1 }
 0x118   :  { %v1740_v35 = vpop.f32.mrb[7].mxu0  ;;  %v1759_v36 = vpop.f32.mrb[5].mxu1 }
 0x119   :  { %v1094_v37 = vadd.f32 %v1738_v31, %v1054_v28  ;;  %v1760_v38 = vadd.f32 %v1759_v36, %v1758_v33  ;;  %v1761_v39 = vpop.f32.mrb[6].mxu1 }
 0x11a   :  { %v1762_v40 = vpop.f32.mrb[7].mxu1 }
 0x11b   :  { %v1134_v41 = vadd.f32 %v1760_v38, %v1094_v37 }
 0x135   :  { %v1780_v42 = vpop.f32.mrb[8].mxu0 }
 0x136   :  { %v1781_v43 = vpop.f32.mrb[9].mxu0 }
 0x137   :  { %v1782_v44 = vadd.f32 %v1781_v43, %v1780_v42  ;;  %v1783_v45 = vpop.f32.mrb[10].mxu0  ;;  %v1802_v46 = vpop.f32.mrb[8].mxu1 }
 0x138   :  { %v1784_v47 = vpop.f32.mrb[11].mxu0  ;;  %v1803_v48 = vpop.f32.mrb[9].mxu1 }
 0x139   :  { %v1174_v49 = vadd.f32 %v1782_v44, %v1134_v41  ;;  %v1804_v50 = vadd.f32 %v1803_v48, %v1802_v46  ;;  %v1805_v51 = vpop.f32.mrb[10].mxu1 }
 0x13a   :  { %v1806_v52 = vpop.f32.mrb[11].mxu1 }
 0x13b   :  { %v1214_v53 = vadd.f32 %v1804_v50, %v1174_v49 }
 0x155   :  { %v1253_v54 = vpop.f32.mrb[12].mxu0 }
 0x156   :  { %v1254_v55 = vadd.f32 %v1253_v54, %v1214_v53  ;;  %v1854_v56 = vpop.f32.mrb[13].mxu0 }
 0x157   :  { %v1256_v57 = vpop.f32.mrb[14].mxu0 }
 0x158   :  { %v1259_v58 = vmul.f32 0.01, %v1254_v55  ;;  %v1855_v59 = vpop.f32.mrb[15].mxu0 }
 0x15a   :  { %v1260_v63 = vmax.f32 %v1254_v55, %v1259_v58 }
 0x15c   :  { %v1261_v1 = vpack.c.bf16 %v1260_v63, %v1260_v63 }
 0x15e   :  { %1871 = vmatmul.mubr.msk.bf16.vlgmr.msra.gmra.mrb[12].mxu1 %vm1321_vm2, %v1261_v1 }
 0x15f   :  { %1900 = vmatpush3.bf16.msra.mxu1 %v1899_v0  ;;  %1888 = vmatprep.mubr.msk.f32.mxu1 %vm2031_vm0, %v2030_v60 }
 0x160   :  { %1901 = vmatprep.subr.bf16.mxu1 %v2032_v15 }
 0x163   :  { %1903 = vmatpush3.bf16.msra.mxu1 %v1902_v4 }
 0x164   :  { %1904 = vmatprep.subr.bf16.mxu1 %v2032_v15 }
 0x167   :  { %1906 = vmatpush3.bf16.msra.mxu1 %v1905_v8 }
 0x168   :  { %1886 = vmatprep.subr.mxu1 %v2030_v60  ;;  %v1661_v60 = vld [vmem:[%s2526_s4] ss:$0 sm:$0xff] }
 0x16b   :  { %1887 = vmatpush3.msk.msra.mxu1 %vm1325_vm1, %v1377_v5 }
 0x231   :  { %v1363_v11 = vpop.f32.mrb[12].mxu1 }
 0x232   :  { %v1364_v12 = vadd.f32 %v1661_v60, %v1363_v11  ;;  %v1872_v13 = vpop.f32.mrb[13].mxu1 }
 0x233   :  { %v1366_v14 = vpop.f32.mrb[14].mxu1 }
 0x234   :  { %v1369_v15 = vmul.f32 0.01, %v1364_v12  ;;  %v1873_v16 = vpop.f32.mrb[15].mxu1 }
 0x236   :  { %v1370_v17 = vmax.f32 %v1364_v12, %v1369_v15 }
 0x238   :  { %1889 = vmatmul.mubr.msk.f32.vlgmr.msra.gmra.mrb[16].mxu1 %vm1385_vm5, %v1370_v17 }
 0x30b   :  { %v1458_v20 = vpop.f32.mrb[16].mxu1 }
 0x30c   :  { %v1459_v21 = vadd.f32 %v1670_v19, %v1458_v20  ;;  %v1890_v22 = vpop.f32.mrb[17].mxu1 }
 0x30e   :  { %v1462_v23 = vmul.f32 0.01, %v1459_v21 }
 0x310   :  { %v1463_v24 = vmax.f32 %v1459_v21, %v1462_v23 }
 0x312   :  { %1896 = vmatmul.mubr.msk.f32.vlgmr.msra.gmra.mrb[16].mxu0 %vm1473_vm6, %v1463_v24 }
 0x3e5   :  { %v1546_v26 = vpop.f32.mrb[16].mxu0 }
 0x3e6   :  { %v1547_v27 = vadd.f32 %v1673_v25, %v1546_v26  ;;  %v1897_v28 = vpop.f32.mrb[17].mxu0 }
 0x3e8   :  { %1551 = vst.msk [vmem:[%s2529_s9] sm:$0x3] %vm1550_vm7, %v1547_v27 }

</bundles_post_ra>
